<compile_context>
chip_gen: v5e
topology: v5e:2x2
jax: 0.10.0
libtpu: 0.0.40
codegen_flags: <defaults>
</compile_context>

<pallas_src>
import functools

import numpy as np

import jax
import jax.numpy as jnp
from jax import lax
from jax.experimental import pallas as pl
from jax.experimental.pallas import tpu as pltpu

HEAD = 8
_INV_SQRT2 = 0.7071067811865476


def _erf_poly(z):
    # Abramowitz & Stegun 7.1.26 (max abs error ~1.5e-7). Only abs/mul/add/div/exp/where,
    # all of which lower cleanly in Mosaic; exp lands on the (otherwise idle) EUP slot.
    a1, a2, a3, a4, a5 = 0.254829592, -0.284496736, 1.421413741, -1.453152027, 1.061405429
    pc = 0.3275911
    az = jnp.abs(z)
    t = 1.0 / (1.0 + pc * az)
    poly = ((((a5 * t + a4) * t + a3) * t + a2) * t + a1) * t
    val = 1.0 - poly * jnp.exp(-(az * az))
    return jnp.where(z < 0.0, -val, val)


def _gelu_kernel(x):
    # PyTorch nn.GELU() default = exact (erf-based) GELU.
    return 0.5 * x * (1.0 + _erf_poly(x * _INV_SQRT2))


def _gelu_exact(x):
    return 0.5 * x * (1.0 + lax.erf(x * _INV_SQRT2))


# ---------------------------------------------------------------------------
# Fused kernel: qkv 1x1 convs + per-head channel attention + 7x7 depthwise conv
#               + GELU + residual + 1x1 out conv + residual.
# Layout: channels in sublanes, pixels (both batches) in lanes -> (C, B*N) = (32, 128).
# ---------------------------------------------------------------------------
def _msa_kernel(x_ref, wqkv_ref, bqkv_ref, ker_ref, cmask_ref, dwb_ref, wo_ref, bo_ref,
                blk_ref, out_ref, as_ref, *, B, H, W, C, KS):
    N = H * W
    cp = C // HEAD
    pad = (KS - 1) // 2
    scale = float(cp) ** 0.5                 # python float -> jaxpr literal

    x = x_ref[...]                           # (C, B*N)
    blk = blk_ref[...]                       # (C, C): 1.0 inside a head's diag block

    # ---- fused q/k/v 1x1 convs: one (3C, C) x (C, B*N) MXU pass -----------------
    qkv = jnp.dot(wqkv_ref[...], x, preferred_element_type=jnp.float32) + bqkv_ref[...]

    # ---- per-batch channel attention (B is tiny & static) -----------------------
    da_parts = []
    as_parts = []
    for b in range(B):
        lo, hi = b * N, (b + 1) * N
        qb = qkv[0 * C:1 * C, lo:hi]         # (C, N)
        kb = qkv[1 * C:2 * C, lo:hi]
        vb = qkv[2 * C:3 * C, lo:hi]

        # AS[c, k'] = sum_n q[c, n] * k[k', n] (full C x C; diag blocks == torch AS)
        AS = lax.dot_general(qb, kb, (((1,), (1,)), ((), ())),
                             preferred_element_type=jnp.float32)       # (C, C)

        # as1: pack the 8 diagonal (cp, cp) blocks into (C, cp) (only 1 block per
        # row is nonzero after masking, so a sum over head-column-groups extracts it).
        asz = AS * blk
        packed = asz[:, 0:cp]
        for h in range(1, HEAD):
            packed = packed + asz[:, h * cp:(h + 1) * cp]
        as_parts.append(packed)                                        # (C, cp)

        # block-diagonal softmax over heads; exp is taken on pre-masked logits so
        # no inf is ever produced (off-block -> exp(-1e30 - m) == 0).
        ASm = jnp.where(blk > 0.5, AS, -1e30)
        m = jnp.max(ASm, axis=-1, keepdims=True)
        e = jnp.exp(ASm - m)
        s = jnp.sum(e, axis=-1, keepdims=True)
        A = e * (scale / s)                                            # (C, C)

        # DA[c, n] = sum_k A[c, k] * v[k, n] -> already lane-dense for the conv.
        da_parts.append(jnp.dot(A, vb, preferred_element_type=jnp.float32))

    da = jnp.concatenate(da_parts, axis=1)                             # (C, B*N)
    as_ref[...] = jnp.concatenate(as_parts, axis=0)                    # (B*C, cp)

    # ---- 7x7 depthwise conv: 49 lane-shifted FMAs on the lane-dense slab --------
    ker = ker_ref[...]                                                 # (C, KS*KS)
    cmask = cmask_ref[...]                                             # (KS*KS, B*N)
    acc = None
    for i in range(KS):
        for j in range(KS):
            t = i * KS + j
            shift = (i - pad) * W + (j - pad)                          # lane shift
            if shift > 0:
                shifted = jnp.concatenate(
                    [da[:, shift:], da[:, :shift] * 0.0], axis=1)
            elif shift < 0:
                shifted = jnp.concatenate(
                    [da[:, shift:] * 0.0, da[:, :shift]], axis=1)
            else:
                shifted = da
            term = shifted * ker[:, t:t + 1] * cmask[t:t + 1, :]
            acc = term if acc is None else acc + term
    conv = acc + dwb_ref[...]                                          # (C, B*N)

    leak = _gelu_kernel(conv) + da                                     # GELU + residual

    # ---- 1x1 out conv + residual --------------------------------------------------
    out = jnp.dot(wo_ref[...], leak, preferred_element_type=jnp.float32) + bo_ref[...] + x
    out_ref[...] = out                                                 # (C, B*N), lane-dense


# ---------------------------------------------------------------------------
# Wrapper: NCHW <-> (C, B*N) plumbing, weight fusion, mask-table precompute.
# ---------------------------------------------------------------------------
def _full_block(shape):
    return pl.BlockSpec(shape, lambda i: (0,) * len(shape))


def msa_pallas(style_nchw, params):
    B, C, H, W = style_nchw.shape
    N = H * W
    cp = C // HEAD
    KS = params["dw_w"].shape[-1]                                      # 7
    pad = (KS - 1) // 2                                                # 3

    # channels in sublanes, pixels-of-both-batches in lanes.
    xT = jnp.transpose(style_nchw, (1, 0, 2, 3)).reshape(C, B * N)     # (C, B*N)

    wqkv = jnp.concatenate([params["wq"], params["wk"], params["wv"]], axis=0)  # (3C, C)
    bqkv = jnp.concatenate([params["bq"], params["bk"], params["bv"]]).reshape(3 * C, 1)
    ker_tab = params["dw_w"][:, 0].reshape(C, KS * KS)                 # (C, 49)
    dwb = params["dw_b"].reshape(C, 1)
    wo = params["wo"]                                                  # (C, C)
    bo = params["bo"].reshape(C, 1)

    # Per-tap validity masks (H/W boundary + cross-batch fold), precomputed lane-dense.
    lane = np.arange(B * N)
    hh = (lane % N) // W
    ww = lane % W
    masks = []
    for i in range(KS):
        for j in range(KS):
            dh, dw = i - pad, j - pad
            masks.append((hh + dh >= 0) & (hh + dh < H) & (ww + dw >= 0) & (ww + dw < W))
    cmask_tab = jnp.asarray(np.stack(masks).astype(np.float32))        # (49, B*N)

    # Block-diagonal (per-head) mask for the channel-attention softmax.
    ch = np.arange(C)
    blk = jnp.asarray(((ch[:, None] // cp) == (ch[None, :] // cp)).astype(np.float32))

    kernel = functools.partial(_msa_kernel, B=B, H=H, W=W, C=C, KS=KS)

    inputs = (xT, wqkv, bqkv, ker_tab, cmask_tab, dwb, wo, bo, blk)

    outT, as_packed = pl.pallas_call(
        kernel,
        out_shape=(jax.ShapeDtypeStruct((C, B * N), jnp.float32),
                   jax.ShapeDtypeStruct((B * C, cp), jnp.float32)),
        grid=(1,),
        in_specs=[_full_block(a.shape) for a in inputs],
        out_specs=(_full_block((C, B * N)), _full_block((B * C, cp))),
        compiler_params=pltpu.CompilerParams(dimension_semantics=("arbitrary",)),
        cost_estimate=pl.CostEstimate(flops=2_400_000, transcendentals=8_192,
                                      bytes_accessed=90_000),
    )(*inputs)

    out = jnp.transpose(outT.reshape(C, B, H, W), (1, 0, 2, 3))        # NCHW
    as1 = as_packed.reshape(B, HEAD, cp, cp)                           # pure reshape
    return out, as1


# ---------------------------------------------------------------------------
# Pure-JAX reference (mirrors the PyTorch forward in NCHW) for validation.
# ---------------------------------------------------------------------------
def msa_ref(x, params):
    B, C, H, W = x.shape
    cp = C // HEAD

    def conv1x1(inp, w, b):
        return jnp.einsum("bchw,oc->bohw", inp, w) + b[None, :, None, None]

    q = conv1x1(x, params["wq"], params["bq"]).reshape(B, HEAD, cp, H * W)
    k = conv1x1(x, params["wk"], params["bk"]).reshape(B, HEAD, cp, H * W)
    v = conv1x1(x, params["wv"], params["bv"]).reshape(B, HEAD, cp, H * W)

    AS = jnp.einsum("bhcn,bhkn->bhck", q, k)
    as1 = AS
    A = jax.nn.softmax(AS, axis=-1) * (cp ** 0.5)
    astyle = jnp.einsum("bhck,bhkn->bhcn", A, v)
    DA = astyle.reshape(B, C, H, W)

    dw = lax.conv_general_dilated(
        DA, params["dw_w"], window_strides=(1, 1), padding=((3, 3), (3, 3)),
        feature_group_count=C, dimension_numbers=("NCHW", "OIHW", "NCHW"),
    ) + params["dw_b"][None, :, None, None]
    leak = _gelu_exact(dw) + DA
    DA_local = conv1x1(leak, params["wo"], params["bo"])
    return DA_local + x, as1


if __name__ == "__main__":
    B, C, H, W = 2, 32, 8, 8                                           # in_planes=32, 8 heads -> 4 ch/head
    key = jax.random.PRNGKey(0)
    ks = jax.random.split(key, 11)

    params = {
        "wq": 0.1 * jax.random.normal(ks[0], (C, C), jnp.float32),
        "bq": 0.05 * jax.random.normal(ks[1], (C,), jnp.float32),
        "wk": 0.1 * jax.random.normal(ks[2], (C, C), jnp.float32),
        "bk": 0.05 * jax.random.normal(ks[3], (C,), jnp.float32),
        "wv": 0.1 * jax.random.normal(ks[4], (C, C), jnp.float32),
        "bv": 0.05 * jax.random.normal(ks[5], (C,), jnp.float32),
        "wo": 0.1 * jax.random.normal(ks[6], (C, C), jnp.float32),
        "bo": 0.05 * jax.random.normal(ks[7], (C,), jnp.float32),
        "dw_w": 0.1 * jax.random.normal(ks[8], (C, 1, 7, 7), jnp.float32),
        "dw_b": 0.05 * jax.random.normal(ks[9], (C,), jnp.float32),
    }
    style = jax.random.normal(ks[10], (B, C, H, W), jnp.float32)

    out, as1 = msa_pallas(style, params)
    out = jax.block_until_ready(out)
    as1 = jax.block_until_ready(as1)

    out_ref, as1_ref_v = msa_ref(style, params)
    assert out.shape == (B, C, H, W) and as1.shape == (B, HEAD, C // HEAD, C // HEAD)
    assert bool(jnp.allclose(out, out_ref, rtol=2e-3, atol=2e-3)), "DA mismatch vs reference"
    assert bool(jnp.allclose(as1, as1_ref_v, rtol=2e-3, atol=2e-3)), "as1 mismatch vs reference"

    print("KERNEL_OK")
</pallas_src>

<mosaic_0001>
module attributes {stable_mosaic.version = 11 : i64} {
  func.func @_msa_kernel(%arg0: i32, %arg1: memref<32x128xf32, #tpu.memory_space<vmem>>, %arg2: memref<96x32xf32, #tpu.memory_space<vmem>>, %arg3: memref<96x1xf32, #tpu.memory_space<vmem>>, %arg4: memref<32x49xf32, #tpu.memory_space<vmem>>, %arg5: memref<49x128xf32, #tpu.memory_space<vmem>>, %arg6: memref<32x1xf32, #tpu.memory_space<vmem>>, %arg7: memref<32x32xf32, #tpu.memory_space<vmem>>, %arg8: memref<32x1xf32, #tpu.memory_space<vmem>>, %arg9: memref<32x32xf32, #tpu.memory_space<vmem>>, %arg10: memref<32x128xf32, #tpu.memory_space<vmem>>, %arg11: memref<64x4xf32, #tpu.memory_space<vmem>>) attributes {dimension_semantics = [#tpu.dimension_semantics<arbitrary>], iteration_bounds = array<i64: 1>, scalar_prefetch = 0 : i64, scratch_operands = 0 : i64, tpu.core_type = #tpu.core_type<tc>, window_params = [{pipeline_mode = #tpu.pipeline_mode<synchronous>, transform_indices = @transform_0, window_bounds = array<i64: 32, 128>}, {pipeline_mode = #tpu.pipeline_mode<synchronous>, transform_indices = @transform_1, window_bounds = array<i64: 96, 32>}, {pipeline_mode = #tpu.pipeline_mode<synchronous>, transform_indices = @transform_2, window_bounds = array<i64: 96, 1>}, {pipeline_mode = #tpu.pipeline_mode<synchronous>, transform_indices = @transform_3, window_bounds = array<i64: 32, 49>}, {pipeline_mode = #tpu.pipeline_mode<synchronous>, transform_indices = @transform_4, window_bounds = array<i64: 49, 128>}, {pipeline_mode = #tpu.pipeline_mode<synchronous>, transform_indices = @transform_5, window_bounds = array<i64: 32, 1>}, {pipeline_mode = #tpu.pipeline_mode<synchronous>, transform_indices = @transform_6, window_bounds = array<i64: 32, 32>}, {pipeline_mode = #tpu.pipeline_mode<synchronous>, transform_indices = @transform_7, window_bounds = array<i64: 32, 1>}, {pipeline_mode = #tpu.pipeline_mode<synchronous>, transform_indices = @transform_8, window_bounds = array<i64: 32, 32>}, {pipeline_mode = #tpu.pipeline_mode<synchronous>, transform_indices = @transform_9, window_bounds = array<i64: 32, 128>}, {pipeline_mode = #tpu.pipeline_mode<synchronous>, transform_indices = @transform_10, window_bounds = array<i64: 64, 4>}]} {
    %c0 = arith.constant 0 : index
    %c0_0 = arith.constant 0 : index
    %0 = vector.load %arg1[%c0, %c0_0] : memref<32x128xf32, #tpu.memory_space<vmem>>, vector<32x128xf32>
    %c0_1 = arith.constant 0 : index
    %c0_2 = arith.constant 0 : index
    %1 = vector.load %arg9[%c0_1, %c0_2] : memref<32x32xf32, #tpu.memory_space<vmem>>, vector<32x32xf32>
    %c0_3 = arith.constant 0 : index
    %c0_4 = arith.constant 0 : index
    %2 = vector.load %arg2[%c0_3, %c0_4] : memref<96x32xf32, #tpu.memory_space<vmem>>, vector<96x32xf32>
    %cst = arith.constant dense<0.000000e+00> : vector<96x128xf32>
    %3 = tpu.matmul %2, %0, %cst {dimension_numbers = #tpu.dot_dimension_numbers<[1], [0], [0], [1], [0, 0, 1, 1], [], []>} : vector<96x32xf32>, vector<32x128xf32>, vector<96x128xf32> -> vector<96x128xf32>
    %c0_5 = arith.constant 0 : index
    %c0_6 = arith.constant 0 : index
    %4 = vector.load %arg3[%c0_5, %c0_6] : memref<96x1xf32, #tpu.memory_space<vmem>>, vector<96x1xf32>
    %5 = vector.broadcast %4 : vector<96x1xf32> to vector<96x128xf32>
    %6 = arith.addf %3, %5 : vector<96x128xf32>
    %7 = vector.extract_strided_slice %6 {offsets = [0, 0], sizes = [32, 64], strides = [1, 1]} : vector<96x128xf32> to vector<32x64xf32>
    %8 = vector.extract_strided_slice %6 {offsets = [32, 0], sizes = [32, 64], strides = [1, 1]} : vector<96x128xf32> to vector<32x64xf32>
    %9 = vector.extract_strided_slice %6 {offsets = [64, 0], sizes = [32, 64], strides = [1, 1]} : vector<96x128xf32> to vector<32x64xf32>
    %cst_7 = arith.constant dense<0.000000e+00> : vector<32x32xf32>
    %10 = tpu.matmul %7, %8, %cst_7 {dimension_numbers = #tpu.dot_dimension_numbers<[1], [1], [0], [0], [0, 0, 1, 0], [], []>} : vector<32x64xf32>, vector<32x64xf32>, vector<32x32xf32> -> vector<32x32xf32>
    %11 = arith.mulf %10, %1 : vector<32x32xf32>
    %12 = vector.extract_strided_slice %11 {offsets = [0, 0], sizes = [32, 4], strides = [1, 1]} : vector<32x32xf32> to vector<32x4xf32>
    %13 = vector.extract_strided_slice %11 {offsets = [0, 4], sizes = [32, 4], strides = [1, 1]} : vector<32x32xf32> to vector<32x4xf32>
    %14 = arith.addf %12, %13 : vector<32x4xf32>
    %15 = vector.extract_strided_slice %11 {offsets = [0, 8], sizes = [32, 4], strides = [1, 1]} : vector<32x32xf32> to vector<32x4xf32>
    %16 = arith.addf %14, %15 : vector<32x4xf32>
    %17 = vector.extract_strided_slice %11 {offsets = [0, 12], sizes = [32, 4], strides = [1, 1]} : vector<32x32xf32> to vector<32x4xf32>
    %18 = arith.addf %16, %17 : vector<32x4xf32>
    %19 = vector.extract_strided_slice %11 {offsets = [0, 16], sizes = [32, 4], strides = [1, 1]} : vector<32x32xf32> to vector<32x4xf32>
    %20 = arith.addf %18, %19 : vector<32x4xf32>
    %21 = vector.extract_strided_slice %11 {offsets = [0, 20], sizes = [32, 4], strides = [1, 1]} : vector<32x32xf32> to vector<32x4xf32>
    %22 = arith.addf %20, %21 : vector<32x4xf32>
    %23 = vector.extract_strided_slice %11 {offsets = [0, 24], sizes = [32, 4], strides = [1, 1]} : vector<32x32xf32> to vector<32x4xf32>
    %24 = arith.addf %22, %23 : vector<32x4xf32>
    %25 = vector.extract_strided_slice %11 {offsets = [0, 28], sizes = [32, 4], strides = [1, 1]} : vector<32x32xf32> to vector<32x4xf32>
    %26 = arith.addf %24, %25 : vector<32x4xf32>
    %cst_8 = arith.constant 5.000000e-01 : f32
    %27 = vector.broadcast %cst_8 : f32 to vector<32x32xf32>
    %28 = arith.cmpf ogt, %1, %27 : vector<32x32xf32>
    %cst_9 = arith.constant -1.000000e+30 : f32
    %29 = vector.broadcast %cst_9 : f32 to vector<32x32xf32>
    %30 = arith.select %28, %10, %29 : vector<32x32xi1>, vector<32x32xf32>
    %cst_10 = arith.constant dense<0xFF800000> : vector<32xf32>
    %31 = vector.multi_reduction <maximumf>, %30, %cst_10 [1] : vector<32x32xf32> to vector<32xf32>
    %32 = vector.shape_cast %31 : vector<32xf32> to vector<32x1xf32>
    %33 = vector.broadcast %32 : vector<32x1xf32> to vector<32x32xf32>
    %34 = arith.subf %30, %33 : vector<32x32xf32>
    %35 = math.exp %34 : vector<32x32xf32>
    %cst_11 = arith.constant dense<0.000000e+00> : vector<32xf32>
    %36 = vector.multi_reduction <add>, %35, %cst_11 [1] : vector<32x32xf32> to vector<32xf32>
    %37 = vector.shape_cast %36 : vector<32xf32> to vector<32x1xf32>
    %cst_12 = arith.constant 2.000000e+00 : f32
    %38 = vector.broadcast %cst_12 : f32 to vector<32x1xf32>
    %39 = arith.divf %38, %37 : vector<32x1xf32>
    %40 = vector.broadcast %39 : vector<32x1xf32> to vector<32x32xf32>
    %41 = arith.mulf %35, %40 : vector<32x32xf32>
    %cst_13 = arith.constant dense<0.000000e+00> : vector<32x64xf32>
    %42 = tpu.matmul %41, %9, %cst_13 {dimension_numbers = #tpu.dot_dimension_numbers<[1], [0], [0], [1], [0, 0, 1, 1], [], []>} : vector<32x32xf32>, vector<32x64xf32>, vector<32x64xf32> -> vector<32x64xf32>
    %43 = vector.extract_strided_slice %6 {offsets = [0, 64], sizes = [32, 64], strides = [1, 1]} : vector<96x128xf32> to vector<32x64xf32>
    %44 = vector.extract_strided_slice %6 {offsets = [32, 64], sizes = [32, 64], strides = [1, 1]} : vector<96x128xf32> to vector<32x64xf32>
    %45 = vector.extract_strided_slice %6 {offsets = [64, 64], sizes = [32, 64], strides = [1, 1]} : vector<96x128xf32> to vector<32x64xf32>
    %cst_14 = arith.constant dense<0.000000e+00> : vector<32x32xf32>
    %46 = tpu.matmul %43, %44, %cst_14 {dimension_numbers = #tpu.dot_dimension_numbers<[1], [1], [0], [0], [0, 0, 1, 0], [], []>} : vector<32x64xf32>, vector<32x64xf32>, vector<32x32xf32> -> vector<32x32xf32>
    %47 = arith.mulf %46, %1 : vector<32x32xf32>
    %48 = vector.extract_strided_slice %47 {offsets = [0, 0], sizes = [32, 4], strides = [1, 1]} : vector<32x32xf32> to vector<32x4xf32>
    %49 = vector.extract_strided_slice %47 {offsets = [0, 4], sizes = [32, 4], strides = [1, 1]} : vector<32x32xf32> to vector<32x4xf32>
    %50 = arith.addf %48, %49 : vector<32x4xf32>
    %51 = vector.extract_strided_slice %47 {offsets = [0, 8], sizes = [32, 4], strides = [1, 1]} : vector<32x32xf32> to vector<32x4xf32>
    %52 = arith.addf %50, %51 : vector<32x4xf32>
    %53 = vector.extract_strided_slice %47 {offsets = [0, 12], sizes = [32, 4], strides = [1, 1]} : vector<32x32xf32> to vector<32x4xf32>
    %54 = arith.addf %52, %53 : vector<32x4xf32>
    %55 = vector.extract_strided_slice %47 {offsets = [0, 16], sizes = [32, 4], strides = [1, 1]} : vector<32x32xf32> to vector<32x4xf32>
    %56 = arith.addf %54, %55 : vector<32x4xf32>
    %57 = vector.extract_strided_slice %47 {offsets = [0, 20], sizes = [32, 4], strides = [1, 1]} : vector<32x32xf32> to vector<32x4xf32>
    %58 = arith.addf %56, %57 : vector<32x4xf32>
    %59 = vector.extract_strided_slice %47 {offsets = [0, 24], sizes = [32, 4], strides = [1, 1]} : vector<32x32xf32> to vector<32x4xf32>
    %60 = arith.addf %58, %59 : vector<32x4xf32>
    %61 = vector.extract_strided_slice %47 {offsets = [0, 28], sizes = [32, 4], strides = [1, 1]} : vector<32x32xf32> to vector<32x4xf32>
    %62 = arith.addf %60, %61 : vector<32x4xf32>
    %cst_15 = arith.constant 5.000000e-01 : f32
    %63 = vector.broadcast %cst_15 : f32 to vector<32x32xf32>
    %64 = arith.cmpf ogt, %1, %63 : vector<32x32xf32>
    %cst_16 = arith.constant -1.000000e+30 : f32
    %65 = vector.broadcast %cst_16 : f32 to vector<32x32xf32>
    %66 = arith.select %64, %46, %65 : vector<32x32xi1>, vector<32x32xf32>
    %cst_17 = arith.constant dense<0xFF800000> : vector<32xf32>
    %67 = vector.multi_reduction <maximumf>, %66, %cst_17 [1] : vector<32x32xf32> to vector<32xf32>
    %68 = vector.shape_cast %67 : vector<32xf32> to vector<32x1xf32>
    %69 = vector.broadcast %68 : vector<32x1xf32> to vector<32x32xf32>
    %70 = arith.subf %66, %69 : vector<32x32xf32>
    %71 = math.exp %70 : vector<32x32xf32>
    %cst_18 = arith.constant dense<0.000000e+00> : vector<32xf32>
    %72 = vector.multi_reduction <add>, %71, %cst_18 [1] : vector<32x32xf32> to vector<32xf32>
    %73 = vector.shape_cast %72 : vector<32xf32> to vector<32x1xf32>
    %cst_19 = arith.constant 2.000000e+00 : f32
    %74 = vector.broadcast %cst_19 : f32 to vector<32x1xf32>
    %75 = arith.divf %74, %73 : vector<32x1xf32>
    %76 = vector.broadcast %75 : vector<32x1xf32> to vector<32x32xf32>
    %77 = arith.mulf %71, %76 : vector<32x32xf32>
    %cst_20 = arith.constant dense<0.000000e+00> : vector<32x64xf32>
    %78 = tpu.matmul %77, %45, %cst_20 {dimension_numbers = #tpu.dot_dimension_numbers<[1], [0], [0], [1], [0, 0, 1, 1], [], []>} : vector<32x32xf32>, vector<32x64xf32>, vector<32x64xf32> -> vector<32x64xf32>
    %79 = tpu.concatenate %42, %78 in 1 : vector<32x64xf32>, vector<32x64xf32> -> vector<32x128xf32>
    %80 = tpu.concatenate %26, %62 in 0 : vector<32x4xf32>, vector<32x4xf32> -> vector<64x4xf32>
    %c0_21 = arith.constant 0 : index
    %c0_22 = arith.constant 0 : index
    %81 = vector.load %arg11[%c0_21, %c0_22] : memref<64x4xf32, #tpu.memory_space<vmem>>, vector<64x4xf32>
    tpu.vector_store %arg11[%c0_21, %c0_22], %80 {strides = array<i32>} : memref<64x4xf32, #tpu.memory_space<vmem>>, vector<64x4xf32>,
    %c0_23 = arith.constant 0 : index
    %c0_24 = arith.constant 0 : index
    %82 = vector.load %arg4[%c0_23, %c0_24] : memref<32x49xf32, #tpu.memory_space<vmem>>, vector<32x49xf32>
    %c0_25 = arith.constant 0 : index
    %c0_26 = arith.constant 0 : index
    %83 = vector.load %arg5[%c0_25, %c0_26] : memref<49x128xf32, #tpu.memory_space<vmem>>, vector<49x128xf32>
    %84 = vector.extract_strided_slice %79 {offsets = [0, 101], sizes = [32, 27], strides = [1, 1]} : vector<32x128xf32> to vector<32x27xf32>
    %cst_27 = arith.constant 0.000000e+00 : f32
    %85 = vector.broadcast %cst_27 : f32 to vector<32x27xf32>
    %86 = arith.mulf %84, %85 : vector<32x27xf32>
    %87 = vector.extract_strided_slice %79 {offsets = [0, 0], sizes = [32, 101], strides = [1, 1]} : vector<32x128xf32> to vector<32x101xf32>
    %88 = tpu.concatenate %86, %87 in 1 : vector<32x27xf32>, vector<32x101xf32> -> vector<32x128xf32>
    %89 = vector.extract_strided_slice %82 {offsets = [0, 0], sizes = [32, 1], strides = [1, 1]} : vector<32x49xf32> to vector<32x1xf32>
    %90 = vector.broadcast %89 : vector<32x1xf32> to vector<32x128xf32>
    %91 = arith.mulf %88, %90 : vector<32x128xf32>
    %92 = vector.extract_strided_slice %83 {offsets = [0, 0], sizes = [1, 128], strides = [1, 1]} : vector<49x128xf32> to vector<1x128xf32>
    %93 = vector.broadcast %92 : vector<1x128xf32> to vector<32x128xf32>
    %94 = arith.mulf %91, %93 : vector<32x128xf32>
    %95 = vector.extract_strided_slice %79 {offsets = [0, 102], sizes = [32, 26], strides = [1, 1]} : vector<32x128xf32> to vector<32x26xf32>
    %cst_28 = arith.constant 0.000000e+00 : f32
    %96 = vector.broadcast %cst_28 : f32 to vector<32x26xf32>
    %97 = arith.mulf %95, %96 : vector<32x26xf32>
    %98 = vector.extract_strided_slice %79 {offsets = [0, 0], sizes = [32, 102], strides = [1, 1]} : vector<32x128xf32> to vector<32x102xf32>
    %99 = tpu.concatenate %97, %98 in 1 : vector<32x26xf32>, vector<32x102xf32> -> vector<32x128xf32>
    %100 = vector.extract_strided_slice %82 {offsets = [0, 1], sizes = [32, 1], strides = [1, 1]} : vector<32x49xf32> to vector<32x1xf32>
    %101 = vector.broadcast %100 : vector<32x1xf32> to vector<32x128xf32>
    %102 = arith.mulf %99, %101 : vector<32x128xf32>
    %103 = vector.extract_strided_slice %83 {offsets = [1, 0], sizes = [1, 128], strides = [1, 1]} : vector<49x128xf32> to vector<1x128xf32>
    %104 = vector.broadcast %103 : vector<1x128xf32> to vector<32x128xf32>
    %105 = arith.mulf %102, %104 : vector<32x128xf32>
    %106 = arith.addf %94, %105 : vector<32x128xf32>
    %107 = vector.extract_strided_slice %79 {offsets = [0, 103], sizes = [32, 25], strides = [1, 1]} : vector<32x128xf32> to vector<32x25xf32>
    %cst_29 = arith.constant 0.000000e+00 : f32
    %108 = vector.broadcast %cst_29 : f32 to vector<32x25xf32>
    %109 = arith.mulf %107, %108 : vector<32x25xf32>
    %110 = vector.extract_strided_slice %79 {offsets = [0, 0], sizes = [32, 103], strides = [1, 1]} : vector<32x128xf32> to vector<32x103xf32>
    %111 = tpu.concatenate %109, %110 in 1 : vector<32x25xf32>, vector<32x103xf32> -> vector<32x128xf32>
    %112 = vector.extract_strided_slice %82 {offsets = [0, 2], sizes = [32, 1], strides = [1, 1]} : vector<32x49xf32> to vector<32x1xf32>
    %113 = vector.broadcast %112 : vector<32x1xf32> to vector<32x128xf32>
    %114 = arith.mulf %111, %113 : vector<32x128xf32>
    %115 = vector.extract_strided_slice %83 {offsets = [2, 0], sizes = [1, 128], strides = [1, 1]} : vector<49x128xf32> to vector<1x128xf32>
    %116 = vector.broadcast %115 : vector<1x128xf32> to vector<32x128xf32>
    %117 = arith.mulf %114, %116 : vector<32x128xf32>
    %118 = arith.addf %106, %117 : vector<32x128xf32>
    %119 = vector.extract_strided_slice %79 {offsets = [0, 104], sizes = [32, 24], strides = [1, 1]} : vector<32x128xf32> to vector<32x24xf32>
    %cst_30 = arith.constant 0.000000e+00 : f32
    %120 = vector.broadcast %cst_30 : f32 to vector<32x24xf32>
    %121 = arith.mulf %119, %120 : vector<32x24xf32>
    %122 = vector.extract_strided_slice %79 {offsets = [0, 0], sizes = [32, 104], strides = [1, 1]} : vector<32x128xf32> to vector<32x104xf32>
    %123 = tpu.concatenate %121, %122 in 1 : vector<32x24xf32>, vector<32x104xf32> -> vector<32x128xf32>
    %124 = vector.extract_strided_slice %82 {offsets = [0, 3], sizes = [32, 1], strides = [1, 1]} : vector<32x49xf32> to vector<32x1xf32>
    %125 = vector.broadcast %124 : vector<32x1xf32> to vector<32x128xf32>
    %126 = arith.mulf %123, %125 : vector<32x128xf32>
    %127 = vector.extract_strided_slice %83 {offsets = [3, 0], sizes = [1, 128], strides = [1, 1]} : vector<49x128xf32> to vector<1x128xf32>
    %128 = vector.broadcast %127 : vector<1x128xf32> to vector<32x128xf32>
    %129 = arith.mulf %126, %128 : vector<32x128xf32>
    %130 = arith.addf %118, %129 : vector<32x128xf32>
    %131 = vector.extract_strided_slice %79 {offsets = [0, 105], sizes = [32, 23], strides = [1, 1]} : vector<32x128xf32> to vector<32x23xf32>
    %cst_31 = arith.constant 0.000000e+00 : f32
    %132 = vector.broadcast %cst_31 : f32 to vector<32x23xf32>
    %133 = arith.mulf %131, %132 : vector<32x23xf32>
    %134 = vector.extract_strided_slice %79 {offsets = [0, 0], sizes = [32, 105], strides = [1, 1]} : vector<32x128xf32> to vector<32x105xf32>
    %135 = tpu.concatenate %133, %134 in 1 : vector<32x23xf32>, vector<32x105xf32> -> vector<32x128xf32>
    %136 = vector.extract_strided_slice %82 {offsets = [0, 4], sizes = [32, 1], strides = [1, 1]} : vector<32x49xf32> to vector<32x1xf32>
    %137 = vector.broadcast %136 : vector<32x1xf32> to vector<32x128xf32>
    %138 = arith.mulf %135, %137 : vector<32x128xf32>
    %139 = vector.extract_strided_slice %83 {offsets = [4, 0], sizes = [1, 128], strides = [1, 1]} : vector<49x128xf32> to vector<1x128xf32>
    %140 = vector.broadcast %139 : vector<1x128xf32> to vector<32x128xf32>
    %141 = arith.mulf %138, %140 : vector<32x128xf32>
    %142 = arith.addf %130, %141 : vector<32x128xf32>
    %143 = vector.extract_strided_slice %79 {offsets = [0, 106], sizes = [32, 22], strides = [1, 1]} : vector<32x128xf32> to vector<32x22xf32>
    %cst_32 = arith.constant 0.000000e+00 : f32
    %144 = vector.broadcast %cst_32 : f32 to vector<32x22xf32>
    %145 = arith.mulf %143, %144 : vector<32x22xf32>
    %146 = vector.extract_strided_slice %79 {offsets = [0, 0], sizes = [32, 106], strides = [1, 1]} : vector<32x128xf32> to vector<32x106xf32>
    %147 = tpu.concatenate %145, %146 in 1 : vector<32x22xf32>, vector<32x106xf32> -> vector<32x128xf32>
    %148 = vector.extract_strided_slice %82 {offsets = [0, 5], sizes = [32, 1], strides = [1, 1]} : vector<32x49xf32> to vector<32x1xf32>
    %149 = vector.broadcast %148 : vector<32x1xf32> to vector<32x128xf32>
    %150 = arith.mulf %147, %149 : vector<32x128xf32>
    %151 = vector.extract_strided_slice %83 {offsets = [5, 0], sizes = [1, 128], strides = [1, 1]} : vector<49x128xf32> to vector<1x128xf32>
    %152 = vector.broadcast %151 : vector<1x128xf32> to vector<32x128xf32>
    %153 = arith.mulf %150, %152 : vector<32x128xf32>
    %154 = arith.addf %142, %153 : vector<32x128xf32>
    %155 = vector.extract_strided_slice %79 {offsets = [0, 107], sizes = [32, 21], strides = [1, 1]} : vector<32x128xf32> to vector<32x21xf32>
    %cst_33 = arith.constant 0.000000e+00 : f32
    %156 = vector.broadcast %cst_33 : f32 to vector<32x21xf32>
    %157 = arith.mulf %155, %156 : vector<32x21xf32>
    %158 = vector.extract_strided_slice %79 {offsets = [0, 0], sizes = [32, 107], strides = [1, 1]} : vector<32x128xf32> to vector<32x107xf32>
    %159 = tpu.concatenate %157, %158 in 1 : vector<32x21xf32>, vector<32x107xf32> -> vector<32x128xf32>
    %160 = vector.extract_strided_slice %82 {offsets = [0, 6], sizes = [32, 1], strides = [1, 1]} : vector<32x49xf32> to vector<32x1xf32>
    %161 = vector.broadcast %160 : vector<32x1xf32> to vector<32x128xf32>
    %162 = arith.mulf %159, %161 : vector<32x128xf32>
    %163 = vector.extract_strided_slice %83 {offsets = [6, 0], sizes = [1, 128], strides = [1, 1]} : vector<49x128xf32> to vector<1x128xf32>
    %164 = vector.broadcast %163 : vector<1x128xf32> to vector<32x128xf32>
    %165 = arith.mulf %162, %164 : vector<32x128xf32>
    %166 = arith.addf %154, %165 : vector<32x128xf32>
    %167 = vector.extract_strided_slice %79 {offsets = [0, 109], sizes = [32, 19], strides = [1, 1]} : vector<32x128xf32> to vector<32x19xf32>
    %cst_34 = arith.constant 0.000000e+00 : f32
    %168 = vector.broadcast %cst_34 : f32 to vector<32x19xf32>
    %169 = arith.mulf %167, %168 : vector<32x19xf32>
    %170 = vector.extract_strided_slice %79 {offsets = [0, 0], sizes = [32, 109], strides = [1, 1]} : vector<32x128xf32> to vector<32x109xf32>
    %171 = tpu.concatenate %169, %170 in 1 : vector<32x19xf32>, vector<32x109xf32> -> vector<32x128xf32>
    %172 = vector.extract_strided_slice %82 {offsets = [0, 7], sizes = [32, 1], strides = [1, 1]} : vector<32x49xf32> to vector<32x1xf32>
    %173 = vector.broadcast %172 : vector<32x1xf32> to vector<32x128xf32>
    %174 = arith.mulf %171, %173 : vector<32x128xf32>
    %175 = vector.extract_strided_slice %83 {offsets = [7, 0], sizes = [1, 128], strides = [1, 1]} : vector<49x128xf32> to vector<1x128xf32>
    %176 = vector.broadcast %175 : vector<1x128xf32> to vector<32x128xf32>
    %177 = arith.mulf %174, %176 : vector<32x128xf32>
    %178 = arith.addf %166, %177 : vector<32x128xf32>
    %179 = vector.extract_strided_slice %79 {offsets = [0, 110], sizes = [32, 18], strides = [1, 1]} : vector<32x128xf32> to vector<32x18xf32>
    %cst_35 = arith.constant 0.000000e+00 : f32
    %180 = vector.broadcast %cst_35 : f32 to vector<32x18xf32>
    %181 = arith.mulf %179, %180 : vector<32x18xf32>
    %182 = vector.extract_strided_slice %79 {offsets = [0, 0], sizes = [32, 110], strides = [1, 1]} : vector<32x128xf32> to vector<32x110xf32>
    %183 = tpu.concatenate %181, %182 in 1 : vector<32x18xf32>, vector<32x110xf32> -> vector<32x128xf32>
    %184 = vector.extract_strided_slice %82 {offsets = [0, 8], sizes = [32, 1], strides = [1, 1]} : vector<32x49xf32> to vector<32x1xf32>
    %185 = vector.broadcast %184 : vector<32x1xf32> to vector<32x128xf32>
    %186 = arith.mulf %183, %185 : vector<32x128xf32>
    %187 = vector.extract_strided_slice %83 {offsets = [8, 0], sizes = [1, 128], strides = [1, 1]} : vector<49x128xf32> to vector<1x128xf32>
    %188 = vector.broadcast %187 : vector<1x128xf32> to vector<32x128xf32>
    %189 = arith.mulf %186, %188 : vector<32x128xf32>
    %190 = arith.addf %178, %189 : vector<32x128xf32>
    %191 = vector.extract_strided_slice %79 {offsets = [0, 111], sizes = [32, 17], strides = [1, 1]} : vector<32x128xf32> to vector<32x17xf32>
    %cst_36 = arith.constant 0.000000e+00 : f32
    %192 = vector.broadcast %cst_36 : f32 to vector<32x17xf32>
    %193 = arith.mulf %191, %192 : vector<32x17xf32>
    %194 = vector.extract_strided_slice %79 {offsets = [0, 0], sizes = [32, 111], strides = [1, 1]} : vector<32x128xf32> to vector<32x111xf32>
    %195 = tpu.concatenate %193, %194 in 1 : vector<32x17xf32>, vector<32x111xf32> -> vector<32x128xf32>
    %196 = vector.extract_strided_slice %82 {offsets = [0, 9], sizes = [32, 1], strides = [1, 1]} : vector<32x49xf32> to vector<32x1xf32>
    %197 = vector.broadcast %196 : vector<32x1xf32> to vector<32x128xf32>
    %198 = arith.mulf %195, %197 : vector<32x128xf32>
    %199 = vector.extract_strided_slice %83 {offsets = [9, 0], sizes = [1, 128], strides = [1, 1]} : vector<49x128xf32> to vector<1x128xf32>
    %200 = vector.broadcast %199 : vector<1x128xf32> to vector<32x128xf32>
    %201 = arith.mulf %198, %200 : vector<32x128xf32>
    %202 = arith.addf %190, %201 : vector<32x128xf32>
    %203 = vector.extract_strided_slice %79 {offsets = [0, 112], sizes = [32, 16], strides = [1, 1]} : vector<32x128xf32> to vector<32x16xf32>
    %cst_37 = arith.constant 0.000000e+00 : f32
    %204 = vector.broadcast %cst_37 : f32 to vector<32x16xf32>
    %205 = arith.mulf %203, %204 : vector<32x16xf32>
    %206 = vector.extract_strided_slice %79 {offsets = [0, 0], sizes = [32, 112], strides = [1, 1]} : vector<32x128xf32> to vector<32x112xf32>
    %207 = tpu.concatenate %205, %206 in 1 : vector<32x16xf32>, vector<32x112xf32> -> vector<32x128xf32>
    %208 = vector.extract_strided_slice %82 {offsets = [0, 10], sizes = [32, 1], strides = [1, 1]} : vector<32x49xf32> to vector<32x1xf32>
    %209 = vector.broadcast %208 : vector<32x1xf32> to vector<32x128xf32>
    %210 = arith.mulf %207, %209 : vector<32x128xf32>
    %211 = vector.extract_strided_slice %83 {offsets = [10, 0], sizes = [1, 128], strides = [1, 1]} : vector<49x128xf32> to vector<1x128xf32>
    %212 = vector.broadcast %211 : vector<1x128xf32> to vector<32x128xf32>
    %213 = arith.mulf %210, %212 : vector<32x128xf32>
    %214 = arith.addf %202, %213 : vector<32x128xf32>
    %215 = vector.extract_strided_slice %79 {offsets = [0, 113], sizes = [32, 15], strides = [1, 1]} : vector<32x128xf32> to vector<32x15xf32>
    %cst_38 = arith.constant 0.000000e+00 : f32
    %216 = vector.broadcast %cst_38 : f32 to vector<32x15xf32>
    %217 = arith.mulf %215, %216 : vector<32x15xf32>
    %218 = vector.extract_strided_slice %79 {offsets = [0, 0], sizes = [32, 113], strides = [1, 1]} : vector<32x128xf32> to vector<32x113xf32>
    %219 = tpu.concatenate %217, %218 in 1 : vector<32x15xf32>, vector<32x113xf32> -> vector<32x128xf32>
    %220 = vector.extract_strided_slice %82 {offsets = [0, 11], sizes = [32, 1], strides = [1, 1]} : vector<32x49xf32> to vector<32x1xf32>
    %221 = vector.broadcast %220 : vector<32x1xf32> to vector<32x128xf32>
    %222 = arith.mulf %219, %221 : vector<32x128xf32>
    %223 = vector.extract_strided_slice %83 {offsets = [11, 0], sizes = [1, 128], strides = [1, 1]} : vector<49x128xf32> to vector<1x128xf32>
    %224 = vector.broadcast %223 : vector<1x128xf32> to vector<32x128xf32>
    %225 = arith.mulf %222, %224 : vector<32x128xf32>
    %226 = arith.addf %214, %225 : vector<32x128xf32>
    %227 = vector.extract_strided_slice %79 {offsets = [0, 114], sizes = [32, 14], strides = [1, 1]} : vector<32x128xf32> to vector<32x14xf32>
    %cst_39 = arith.constant 0.000000e+00 : f32
    %228 = vector.broadcast %cst_39 : f32 to vector<32x14xf32>
    %229 = arith.mulf %227, %228 : vector<32x14xf32>
    %230 = vector.extract_strided_slice %79 {offsets = [0, 0], sizes = [32, 114], strides = [1, 1]} : vector<32x128xf32> to vector<32x114xf32>
    %231 = tpu.concatenate %229, %230 in 1 : vector<32x14xf32>, vector<32x114xf32> -> vector<32x128xf32>
    %232 = vector.extract_strided_slice %82 {offsets = [0, 12], sizes = [32, 1], strides = [1, 1]} : vector<32x49xf32> to vector<32x1xf32>
    %233 = vector.broadcast %232 : vector<32x1xf32> to vector<32x128xf32>
    %234 = arith.mulf %231, %233 : vector<32x128xf32>
    %235 = vector.extract_strided_slice %83 {offsets = [12, 0], sizes = [1, 128], strides = [1, 1]} : vector<49x128xf32> to vector<1x128xf32>
    %236 = vector.broadcast %235 : vector<1x128xf32> to vector<32x128xf32>
    %237 = arith.mulf %234, %236 : vector<32x128xf32>
    %238 = arith.addf %226, %237 : vector<32x128xf32>
    %239 = vector.extract_strided_slice %79 {offsets = [0, 115], sizes = [32, 13], strides = [1, 1]} : vector<32x128xf32> to vector<32x13xf32>
    %cst_40 = arith.constant 0.000000e+00 : f32
    %240 = vector.broadcast %cst_40 : f32 to vector<32x13xf32>
    %241 = arith.mulf %239, %240 : vector<32x13xf32>
    %242 = vector.extract_strided_slice %79 {offsets = [0, 0], sizes = [32, 115], strides = [1, 1]} : vector<32x128xf32> to vector<32x115xf32>
    %243 = tpu.concatenate %241, %242 in 1 : vector<32x13xf32>, vector<32x115xf32> -> vector<32x128xf32>
    %244 = vector.extract_strided_slice %82 {offsets = [0, 13], sizes = [32, 1], strides = [1, 1]} : vector<32x49xf32> to vector<32x1xf32>
    %245 = vector.broadcast %244 : vector<32x1xf32> to vector<32x128xf32>
    %246 = arith.mulf %243, %245 : vector<32x128xf32>
    %247 = vector.extract_strided_slice %83 {offsets = [13, 0], sizes = [1, 128], strides = [1, 1]} : vector<49x128xf32> to vector<1x128xf32>
    %248 = vector.broadcast %247 : vector<1x128xf32> to vector<32x128xf32>
    %249 = arith.mulf %246, %248 : vector<32x128xf32>
    %250 = arith.addf %238, %249 : vector<32x128xf32>
    %251 = vector.extract_strided_slice %79 {offsets = [0, 117], sizes = [32, 11], strides = [1, 1]} : vector<32x128xf32> to vector<32x11xf32>
    %cst_41 = arith.constant 0.000000e+00 : f32
    %252 = vector.broadcast %cst_41 : f32 to vector<32x11xf32>
    %253 = arith.mulf %251, %252 : vector<32x11xf32>
    %254 = vector.extract_strided_slice %79 {offsets = [0, 0], sizes = [32, 117], strides = [1, 1]} : vector<32x128xf32> to vector<32x117xf32>
    %255 = tpu.concatenate %253, %254 in 1 : vector<32x11xf32>, vector<32x117xf32> -> vector<32x128xf32>
    %256 = vector.extract_strided_slice %82 {offsets = [0, 14], sizes = [32, 1], strides = [1, 1]} : vector<32x49xf32> to vector<32x1xf32>
    %257 = vector.broadcast %256 : vector<32x1xf32> to vector<32x128xf32>
    %258 = arith.mulf %255, %257 : vector<32x128xf32>
    %259 = vector.extract_strided_slice %83 {offsets = [14, 0], sizes = [1, 128], strides = [1, 1]} : vector<49x128xf32> to vector<1x128xf32>
    %260 = vector.broadcast %259 : vector<1x128xf32> to vector<32x128xf32>
    %261 = arith.mulf %258, %260 : vector<32x128xf32>
    %262 = arith.addf %250, %261 : vector<32x128xf32>
    %263 = vector.extract_strided_slice %79 {offsets = [0, 118], sizes = [32, 10], strides = [1, 1]} : vector<32x128xf32> to vector<32x10xf32>
    %cst_42 = arith.constant 0.000000e+00 : f32
    %264 = vector.broadcast %cst_42 : f32 to vector<32x10xf32>
    %265 = arith.mulf %263, %264 : vector<32x10xf32>
    %266 = vector.extract_strided_slice %79 {offsets = [0, 0], sizes = [32, 118], strides = [1, 1]} : vector<32x128xf32> to vector<32x118xf32>
    %267 = tpu.concatenate %265, %266 in 1 : vector<32x10xf32>, vector<32x118xf32> -> vector<32x128xf32>
    %268 = vector.extract_strided_slice %82 {offsets = [0, 15], sizes = [32, 1], strides = [1, 1]} : vector<32x49xf32> to vector<32x1xf32>
    %269 = vector.broadcast %268 : vector<32x1xf32> to vector<32x128xf32>
    %270 = arith.mulf %267, %269 : vector<32x128xf32>
    %271 = vector.extract_strided_slice %83 {offsets = [15, 0], sizes = [1, 128], strides = [1, 1]} : vector<49x128xf32> to vector<1x128xf32>
    %272 = vector.broadcast %271 : vector<1x128xf32> to vector<32x128xf32>
    %273 = arith.mulf %270, %272 : vector<32x128xf32>
    %274 = arith.addf %262, %273 : vector<32x128xf32>
    %275 = vector.extract_strided_slice %79 {offsets = [0, 119], sizes = [32, 9], strides = [1, 1]} : vector<32x128xf32> to vector<32x9xf32>
    %cst_43 = arith.constant 0.000000e+00 : f32
    %276 = vector.broadcast %cst_43 : f32 to vector<32x9xf32>
    %277 = arith.mulf %275, %276 : vector<32x9xf32>
    %278 = vector.extract_strided_slice %79 {offsets = [0, 0], sizes = [32, 119], strides = [1, 1]} : vector<32x128xf32> to vector<32x119xf32>
    %279 = tpu.concatenate %277, %278 in 1 : vector<32x9xf32>, vector<32x119xf32> -> vector<32x128xf32>
    %280 = vector.extract_strided_slice %82 {offsets = [0, 16], sizes = [32, 1], strides = [1, 1]} : vector<32x49xf32> to vector<32x1xf32>
    %281 = vector.broadcast %280 : vector<32x1xf32> to vector<32x128xf32>
    %282 = arith.mulf %279, %281 : vector<32x128xf32>
    %283 = vector.extract_strided_slice %83 {offsets = [16, 0], sizes = [1, 128], strides = [1, 1]} : vector<49x128xf32> to vector<1x128xf32>
    %284 = vector.broadcast %283 : vector<1x128xf32> to vector<32x128xf32>
    %285 = arith.mulf %282, %284 : vector<32x128xf32>
    %286 = arith.addf %274, %285 : vector<32x128xf32>
    %287 = vector.extract_strided_slice %79 {offsets = [0, 120], sizes = [32, 8], strides = [1, 1]} : vector<32x128xf32> to vector<32x8xf32>
    %cst_44 = arith.constant 0.000000e+00 : f32
    %288 = vector.broadcast %cst_44 : f32 to vector<32x8xf32>
    %289 = arith.mulf %287, %288 : vector<32x8xf32>
    %290 = vector.extract_strided_slice %79 {offsets = [0, 0], sizes = [32, 120], strides = [1, 1]} : vector<32x128xf32> to vector<32x120xf32>
    %291 = tpu.concatenate %289, %290 in 1 : vector<32x8xf32>, vector<32x120xf32> -> vector<32x128xf32>
    %292 = vector.extract_strided_slice %82 {offsets = [0, 17], sizes = [32, 1], strides = [1, 1]} : vector<32x49xf32> to vector<32x1xf32>
    %293 = vector.broadcast %292 : vector<32x1xf32> to vector<32x128xf32>
    %294 = arith.mulf %291, %293 : vector<32x128xf32>
    %295 = vector.extract_strided_slice %83 {offsets = [17, 0], sizes = [1, 128], strides = [1, 1]} : vector<49x128xf32> to vector<1x128xf32>
    %296 = vector.broadcast %295 : vector<1x128xf32> to vector<32x128xf32>
    %297 = arith.mulf %294, %296 : vector<32x128xf32>
    %298 = arith.addf %286, %297 : vector<32x128xf32>
    %299 = vector.extract_strided_slice %79 {offsets = [0, 121], sizes = [32, 7], strides = [1, 1]} : vector<32x128xf32> to vector<32x7xf32>
    %cst_45 = arith.constant 0.000000e+00 : f32
    %300 = vector.broadcast %cst_45 : f32 to vector<32x7xf32>
    %301 = arith.mulf %299, %300 : vector<32x7xf32>
    %302 = vector.extract_strided_slice %79 {offsets = [0, 0], sizes = [32, 121], strides = [1, 1]} : vector<32x128xf32> to vector<32x121xf32>
    %303 = tpu.concatenate %301, %302 in 1 : vector<32x7xf32>, vector<32x121xf32> -> vector<32x128xf32>
    %304 = vector.extract_strided_slice %82 {offsets = [0, 18], sizes = [32, 1], strides = [1, 1]} : vector<32x49xf32> to vector<32x1xf32>
    %305 = vector.broadcast %304 : vector<32x1xf32> to vector<32x128xf32>
    %306 = arith.mulf %303, %305 : vector<32x128xf32>
    %307 = vector.extract_strided_slice %83 {offsets = [18, 0], sizes = [1, 128], strides = [1, 1]} : vector<49x128xf32> to vector<1x128xf32>
    %308 = vector.broadcast %307 : vector<1x128xf32> to vector<32x128xf32>
    %309 = arith.mulf %306, %308 : vector<32x128xf32>
    %310 = arith.addf %298, %309 : vector<32x128xf32>
    %311 = vector.extract_strided_slice %79 {offsets = [0, 122], sizes = [32, 6], strides = [1, 1]} : vector<32x128xf32> to vector<32x6xf32>
    %cst_46 = arith.constant 0.000000e+00 : f32
    %312 = vector.broadcast %cst_46 : f32 to vector<32x6xf32>
    %313 = arith.mulf %311, %312 : vector<32x6xf32>
    %314 = vector.extract_strided_slice %79 {offsets = [0, 0], sizes = [32, 122], strides = [1, 1]} : vector<32x128xf32> to vector<32x122xf32>
    %315 = tpu.concatenate %313, %314 in 1 : vector<32x6xf32>, vector<32x122xf32> -> vector<32x128xf32>
    %316 = vector.extract_strided_slice %82 {offsets = [0, 19], sizes = [32, 1], strides = [1, 1]} : vector<32x49xf32> to vector<32x1xf32>
    %317 = vector.broadcast %316 : vector<32x1xf32> to vector<32x128xf32>
    %318 = arith.mulf %315, %317 : vector<32x128xf32>
    %319 = vector.extract_strided_slice %83 {offsets = [19, 0], sizes = [1, 128], strides = [1, 1]} : vector<49x128xf32> to vector<1x128xf32>
    %320 = vector.broadcast %319 : vector<1x128xf32> to vector<32x128xf32>
    %321 = arith.mulf %318, %320 : vector<32x128xf32>
    %322 = arith.addf %310, %321 : vector<32x128xf32>
    %323 = vector.extract_strided_slice %79 {offsets = [0, 123], sizes = [32, 5], strides = [1, 1]} : vector<32x128xf32> to vector<32x5xf32>
    %cst_47 = arith.constant 0.000000e+00 : f32
    %324 = vector.broadcast %cst_47 : f32 to vector<32x5xf32>
    %325 = arith.mulf %323, %324 : vector<32x5xf32>
    %326 = vector.extract_strided_slice %79 {offsets = [0, 0], sizes = [32, 123], strides = [1, 1]} : vector<32x128xf32> to vector<32x123xf32>
    %327 = tpu.concatenate %325, %326 in 1 : vector<32x5xf32>, vector<32x123xf32> -> vector<32x128xf32>
    %328 = vector.extract_strided_slice %82 {offsets = [0, 20], sizes = [32, 1], strides = [1, 1]} : vector<32x49xf32> to vector<32x1xf32>
    %329 = vector.broadcast %328 : vector<32x1xf32> to vector<32x128xf32>
    %330 = arith.mulf %327, %329 : vector<32x128xf32>
    %331 = vector.extract_strided_slice %83 {offsets = [20, 0], sizes = [1, 128], strides = [1, 1]} : vector<49x128xf32> to vector<1x128xf32>
    %332 = vector.broadcast %331 : vector<1x128xf32> to vector<32x128xf32>
    %333 = arith.mulf %330, %332 : vector<32x128xf32>
    %334 = arith.addf %322, %333 : vector<32x128xf32>
    %335 = vector.extract_strided_slice %79 {offsets = [0, 125], sizes = [32, 3], strides = [1, 1]} : vector<32x128xf32> to vector<32x3xf32>
    %cst_48 = arith.constant 0.000000e+00 : f32
    %336 = vector.broadcast %cst_48 : f32 to vector<32x3xf32>
    %337 = arith.mulf %335, %336 : vector<32x3xf32>
    %338 = vector.extract_strided_slice %79 {offsets = [0, 0], sizes = [32, 125], strides = [1, 1]} : vector<32x128xf32> to vector<32x125xf32>
    %339 = tpu.concatenate %337, %338 in 1 : vector<32x3xf32>, vector<32x125xf32> -> vector<32x128xf32>
    %340 = vector.extract_strided_slice %82 {offsets = [0, 21], sizes = [32, 1], strides = [1, 1]} : vector<32x49xf32> to vector<32x1xf32>
    %341 = vector.broadcast %340 : vector<32x1xf32> to vector<32x128xf32>
    %342 = arith.mulf %339, %341 : vector<32x128xf32>
    %343 = vector.extract_strided_slice %83 {offsets = [21, 0], sizes = [1, 128], strides = [1, 1]} : vector<49x128xf32> to vector<1x128xf32>
    %344 = vector.broadcast %343 : vector<1x128xf32> to vector<32x128xf32>
    %345 = arith.mulf %342, %344 : vector<32x128xf32>
    %346 = arith.addf %334, %345 : vector<32x128xf32>
    %347 = vector.extract_strided_slice %79 {offsets = [0, 126], sizes = [32, 2], strides = [1, 1]} : vector<32x128xf32> to vector<32x2xf32>
    %cst_49 = arith.constant 0.000000e+00 : f32
    %348 = vector.broadcast %cst_49 : f32 to vector<32x2xf32>
    %349 = arith.mulf %347, %348 : vector<32x2xf32>
    %350 = vector.extract_strided_slice %79 {offsets = [0, 0], sizes = [32, 126], strides = [1, 1]} : vector<32x128xf32> to vector<32x126xf32>
    %351 = tpu.concatenate %349, %350 in 1 : vector<32x2xf32>, vector<32x126xf32> -> vector<32x128xf32>
    %352 = vector.extract_strided_slice %82 {offsets = [0, 22], sizes = [32, 1], strides = [1, 1]} : vector<32x49xf32> to vector<32x1xf32>
    %353 = vector.broadcast %352 : vector<32x1xf32> to vector<32x128xf32>
    %354 = arith.mulf %351, %353 : vector<32x128xf32>
    %355 = vector.extract_strided_slice %83 {offsets = [22, 0], sizes = [1, 128], strides = [1, 1]} : vector<49x128xf32> to vector<1x128xf32>
    %356 = vector.broadcast %355 : vector<1x128xf32> to vector<32x128xf32>
    %357 = arith.mulf %354, %356 : vector<32x128xf32>
    %358 = arith.addf %346, %357 : vector<32x128xf32>
    %359 = vector.extract_strided_slice %79 {offsets = [0, 127], sizes = [32, 1], strides = [1, 1]} : vector<32x128xf32> to vector<32x1xf32>
    %cst_50 = arith.constant 0.000000e+00 : f32
    %360 = vector.broadcast %cst_50 : f32 to vector<32x1xf32>
    %361 = arith.mulf %359, %360 : vector<32x1xf32>
    %362 = vector.extract_strided_slice %79 {offsets = [0, 0], sizes = [32, 127], strides = [1, 1]} : vector<32x128xf32> to vector<32x127xf32>
    %363 = tpu.concatenate %361, %362 in 1 : vector<32x1xf32>, vector<32x127xf32> -> vector<32x128xf32>
    %364 = vector.extract_strided_slice %82 {offsets = [0, 23], sizes = [32, 1], strides = [1, 1]} : vector<32x49xf32> to vector<32x1xf32>
    %365 = vector.broadcast %364 : vector<32x1xf32> to vector<32x128xf32>
    %366 = arith.mulf %363, %365 : vector<32x128xf32>
    %367 = vector.extract_strided_slice %83 {offsets = [23, 0], sizes = [1, 128], strides = [1, 1]} : vector<49x128xf32> to vector<1x128xf32>
    %368 = vector.broadcast %367 : vector<1x128xf32> to vector<32x128xf32>
    %369 = arith.mulf %366, %368 : vector<32x128xf32>
    %370 = arith.addf %358, %369 : vector<32x128xf32>
    %371 = vector.extract_strided_slice %82 {offsets = [0, 24], sizes = [32, 1], strides = [1, 1]} : vector<32x49xf32> to vector<32x1xf32>
    %372 = vector.broadcast %371 : vector<32x1xf32> to vector<32x128xf32>
    %373 = arith.mulf %79, %372 : vector<32x128xf32>
    %374 = vector.extract_strided_slice %83 {offsets = [24, 0], sizes = [1, 128], strides = [1, 1]} : vector<49x128xf32> to vector<1x128xf32>
    %375 = vector.broadcast %374 : vector<1x128xf32> to vector<32x128xf32>
    %376 = arith.mulf %373, %375 : vector<32x128xf32>
    %377 = arith.addf %370, %376 : vector<32x128xf32>
    %378 = vector.extract_strided_slice %79 {offsets = [0, 1], sizes = [32, 127], strides = [1, 1]} : vector<32x128xf32> to vector<32x127xf32>
    %379 = vector.extract_strided_slice %79 {offsets = [0, 0], sizes = [32, 1], strides = [1, 1]} : vector<32x128xf32> to vector<32x1xf32>
    %cst_51 = arith.constant 0.000000e+00 : f32
    %380 = vector.broadcast %cst_51 : f32 to vector<32x1xf32>
    %381 = arith.mulf %379, %380 : vector<32x1xf32>
    %382 = tpu.concatenate %378, %381 in 1 : vector<32x127xf32>, vector<32x1xf32> -> vector<32x128xf32>
    %383 = vector.extract_strided_slice %82 {offsets = [0, 25], sizes = [32, 1], strides = [1, 1]} : vector<32x49xf32> to vector<32x1xf32>
    %384 = vector.broadcast %383 : vector<32x1xf32> to vector<32x128xf32>
    %385 = arith.mulf %382, %384 : vector<32x128xf32>
    %386 = vector.extract_strided_slice %83 {offsets = [25, 0], sizes = [1, 128], strides = [1, 1]} : vector<49x128xf32> to vector<1x128xf32>
    %387 = vector.broadcast %386 : vector<1x128xf32> to vector<32x128xf32>
    %388 = arith.mulf %385, %387 : vector<32x128xf32>
    %389 = arith.addf %377, %388 : vector<32x128xf32>
    %390 = vector.extract_strided_slice %79 {offsets = [0, 2], sizes = [32, 126], strides = [1, 1]} : vector<32x128xf32> to vector<32x126xf32>
    %391 = vector.extract_strided_slice %79 {offsets = [0, 0], sizes = [32, 2], strides = [1, 1]} : vector<32x128xf32> to vector<32x2xf32>
    %cst_52 = arith.constant 0.000000e+00 : f32
    %392 = vector.broadcast %cst_52 : f32 to vector<32x2xf32>
    %393 = arith.mulf %391, %392 : vector<32x2xf32>
    %394 = tpu.concatenate %390, %393 in 1 : vector<32x126xf32>, vector<32x2xf32> -> vector<32x128xf32>
    %395 = vector.extract_strided_slice %82 {offsets = [0, 26], sizes = [32, 1], strides = [1, 1]} : vector<32x49xf32> to vector<32x1xf32>
    %396 = vector.broadcast %395 : vector<32x1xf32> to vector<32x128xf32>
    %397 = arith.mulf %394, %396 : vector<32x128xf32>
    %398 = vector.extract_strided_slice %83 {offsets = [26, 0], sizes = [1, 128], strides = [1, 1]} : vector<49x128xf32> to vector<1x128xf32>
    %399 = vector.broadcast %398 : vector<1x128xf32> to vector<32x128xf32>
    %400 = arith.mulf %397, %399 : vector<32x128xf32>
    %401 = arith.addf %389, %400 : vector<32x128xf32>
    %402 = vector.extract_strided_slice %79 {offsets = [0, 3], sizes = [32, 125], strides = [1, 1]} : vector<32x128xf32> to vector<32x125xf32>
    %403 = vector.extract_strided_slice %79 {offsets = [0, 0], sizes = [32, 3], strides = [1, 1]} : vector<32x128xf32> to vector<32x3xf32>
    %cst_53 = arith.constant 0.000000e+00 : f32
    %404 = vector.broadcast %cst_53 : f32 to vector<32x3xf32>
    %405 = arith.mulf %403, %404 : vector<32x3xf32>
    %406 = tpu.concatenate %402, %405 in 1 : vector<32x125xf32>, vector<32x3xf32> -> vector<32x128xf32>
    %407 = vector.extract_strided_slice %82 {offsets = [0, 27], sizes = [32, 1], strides = [1, 1]} : vector<32x49xf32> to vector<32x1xf32>
    %408 = vector.broadcast %407 : vector<32x1xf32> to vector<32x128xf32>
    %409 = arith.mulf %406, %408 : vector<32x128xf32>
    %410 = vector.extract_strided_slice %83 {offsets = [27, 0], sizes = [1, 128], strides = [1, 1]} : vector<49x128xf32> to vector<1x128xf32>
    %411 = vector.broadcast %410 : vector<1x128xf32> to vector<32x128xf32>
    %412 = arith.mulf %409, %411 : vector<32x128xf32>
    %413 = arith.addf %401, %412 : vector<32x128xf32>
    %414 = vector.extract_strided_slice %79 {offsets = [0, 5], sizes = [32, 123], strides = [1, 1]} : vector<32x128xf32> to vector<32x123xf32>
    %415 = vector.extract_strided_slice %79 {offsets = [0, 0], sizes = [32, 5], strides = [1, 1]} : vector<32x128xf32> to vector<32x5xf32>
    %cst_54 = arith.constant 0.000000e+00 : f32
    %416 = vector.broadcast %cst_54 : f32 to vector<32x5xf32>
    %417 = arith.mulf %415, %416 : vector<32x5xf32>
    %418 = tpu.concatenate %414, %417 in 1 : vector<32x123xf32>, vector<32x5xf32> -> vector<32x128xf32>
    %419 = vector.extract_strided_slice %82 {offsets = [0, 28], sizes = [32, 1], strides = [1, 1]} : vector<32x49xf32> to vector<32x1xf32>
    %420 = vector.broadcast %419 : vector<32x1xf32> to vector<32x128xf32>
    %421 = arith.mulf %418, %420 : vector<32x128xf32>
    %422 = vector.extract_strided_slice %83 {offsets = [28, 0], sizes = [1, 128], strides = [1, 1]} : vector<49x128xf32> to vector<1x128xf32>
    %423 = vector.broadcast %422 : vector<1x128xf32> to vector<32x128xf32>
    %424 = arith.mulf %421, %423 : vector<32x128xf32>
    %425 = arith.addf %413, %424 : vector<32x128xf32>
    %426 = vector.extract_strided_slice %79 {offsets = [0, 6], sizes = [32, 122], strides = [1, 1]} : vector<32x128xf32> to vector<32x122xf32>
    %427 = vector.extract_strided_slice %79 {offsets = [0, 0], sizes = [32, 6], strides = [1, 1]} : vector<32x128xf32> to vector<32x6xf32>
    %cst_55 = arith.constant 0.000000e+00 : f32
    %428 = vector.broadcast %cst_55 : f32 to vector<32x6xf32>
    %429 = arith.mulf %427, %428 : vector<32x6xf32>
    %430 = tpu.concatenate %426, %429 in 1 : vector<32x122xf32>, vector<32x6xf32> -> vector<32x128xf32>
    %431 = vector.extract_strided_slice %82 {offsets = [0, 29], sizes = [32, 1], strides = [1, 1]} : vector<32x49xf32> to vector<32x1xf32>
    %432 = vector.broadcast %431 : vector<32x1xf32> to vector<32x128xf32>
    %433 = arith.mulf %430, %432 : vector<32x128xf32>
    %434 = vector.extract_strided_slice %83 {offsets = [29, 0], sizes = [1, 128], strides = [1, 1]} : vector<49x128xf32> to vector<1x128xf32>
    %435 = vector.broadcast %434 : vector<1x128xf32> to vector<32x128xf32>
    %436 = arith.mulf %433, %435 : vector<32x128xf32>
    %437 = arith.addf %425, %436 : vector<32x128xf32>
    %438 = vector.extract_strided_slice %79 {offsets = [0, 7], sizes = [32, 121], strides = [1, 1]} : vector<32x128xf32> to vector<32x121xf32>
    %439 = vector.extract_strided_slice %79 {offsets = [0, 0], sizes = [32, 7], strides = [1, 1]} : vector<32x128xf32> to vector<32x7xf32>
    %cst_56 = arith.constant 0.000000e+00 : f32
    %440 = vector.broadcast %cst_56 : f32 to vector<32x7xf32>
    %441 = arith.mulf %439, %440 : vector<32x7xf32>
    %442 = tpu.concatenate %438, %441 in 1 : vector<32x121xf32>, vector<32x7xf32> -> vector<32x128xf32>
    %443 = vector.extract_strided_slice %82 {offsets = [0, 30], sizes = [32, 1], strides = [1, 1]} : vector<32x49xf32> to vector<32x1xf32>
    %444 = vector.broadcast %443 : vector<32x1xf32> to vector<32x128xf32>
    %445 = arith.mulf %442, %444 : vector<32x128xf32>
    %446 = vector.extract_strided_slice %83 {offsets = [30, 0], sizes = [1, 128], strides = [1, 1]} : vector<49x128xf32> to vector<1x128xf32>
    %447 = vector.broadcast %446 : vector<1x128xf32> to vector<32x128xf32>
    %448 = arith.mulf %445, %447 : vector<32x128xf32>
    %449 = arith.addf %437, %448 : vector<32x128xf32>
    %450 = vector.extract_strided_slice %79 {offsets = [0, 8], sizes = [32, 120], strides = [1, 1]} : vector<32x128xf32> to vector<32x120xf32>
    %451 = vector.extract_strided_slice %79 {offsets = [0, 0], sizes = [32, 8], strides = [1, 1]} : vector<32x128xf32> to vector<32x8xf32>
    %cst_57 = arith.constant 0.000000e+00 : f32
    %452 = vector.broadcast %cst_57 : f32 to vector<32x8xf32>
    %453 = arith.mulf %451, %452 : vector<32x8xf32>
    %454 = tpu.concatenate %450, %453 in 1 : vector<32x120xf32>, vector<32x8xf32> -> vector<32x128xf32>
    %455 = vector.extract_strided_slice %82 {offsets = [0, 31], sizes = [32, 1], strides = [1, 1]} : vector<32x49xf32> to vector<32x1xf32>
    %456 = vector.broadcast %455 : vector<32x1xf32> to vector<32x128xf32>
    %457 = arith.mulf %454, %456 : vector<32x128xf32>
    %458 = vector.extract_strided_slice %83 {offsets = [31, 0], sizes = [1, 128], strides = [1, 1]} : vector<49x128xf32> to vector<1x128xf32>
    %459 = vector.broadcast %458 : vector<1x128xf32> to vector<32x128xf32>
    %460 = arith.mulf %457, %459 : vector<32x128xf32>
    %461 = arith.addf %449, %460 : vector<32x128xf32>
    %462 = vector.extract_strided_slice %79 {offsets = [0, 9], sizes = [32, 119], strides = [1, 1]} : vector<32x128xf32> to vector<32x119xf32>
    %463 = vector.extract_strided_slice %79 {offsets = [0, 0], sizes = [32, 9], strides = [1, 1]} : vector<32x128xf32> to vector<32x9xf32>
    %cst_58 = arith.constant 0.000000e+00 : f32
    %464 = vector.broadcast %cst_58 : f32 to vector<32x9xf32>
    %465 = arith.mulf %463, %464 : vector<32x9xf32>
    %466 = tpu.concatenate %462, %465 in 1 : vector<32x119xf32>, vector<32x9xf32> -> vector<32x128xf32>
    %467 = vector.extract_strided_slice %82 {offsets = [0, 32], sizes = [32, 1], strides = [1, 1]} : vector<32x49xf32> to vector<32x1xf32>
    %468 = vector.broadcast %467 : vector<32x1xf32> to vector<32x128xf32>
    %469 = arith.mulf %466, %468 : vector<32x128xf32>
    %470 = vector.extract_strided_slice %83 {offsets = [32, 0], sizes = [1, 128], strides = [1, 1]} : vector<49x128xf32> to vector<1x128xf32>
    %471 = vector.broadcast %470 : vector<1x128xf32> to vector<32x128xf32>
    %472 = arith.mulf %469, %471 : vector<32x128xf32>
    %473 = arith.addf %461, %472 : vector<32x128xf32>
    %474 = vector.extract_strided_slice %79 {offsets = [0, 10], sizes = [32, 118], strides = [1, 1]} : vector<32x128xf32> to vector<32x118xf32>
    %475 = vector.extract_strided_slice %79 {offsets = [0, 0], sizes = [32, 10], strides = [1, 1]} : vector<32x128xf32> to vector<32x10xf32>
    %cst_59 = arith.constant 0.000000e+00 : f32
    %476 = vector.broadcast %cst_59 : f32 to vector<32x10xf32>
    %477 = arith.mulf %475, %476 : vector<32x10xf32>
    %478 = tpu.concatenate %474, %477 in 1 : vector<32x118xf32>, vector<32x10xf32> -> vector<32x128xf32>
    %479 = vector.extract_strided_slice %82 {offsets = [0, 33], sizes = [32, 1], strides = [1, 1]} : vector<32x49xf32> to vector<32x1xf32>
    %480 = vector.broadcast %479 : vector<32x1xf32> to vector<32x128xf32>
    %481 = arith.mulf %478, %480 : vector<32x128xf32>
    %482 = vector.extract_strided_slice %83 {offsets = [33, 0], sizes = [1, 128], strides = [1, 1]} : vector<49x128xf32> to vector<1x128xf32>
    %483 = vector.broadcast %482 : vector<1x128xf32> to vector<32x128xf32>
    %484 = arith.mulf %481, %483 : vector<32x128xf32>
    %485 = arith.addf %473, %484 : vector<32x128xf32>
    %486 = vector.extract_strided_slice %79 {offsets = [0, 11], sizes = [32, 117], strides = [1, 1]} : vector<32x128xf32> to vector<32x117xf32>
    %487 = vector.extract_strided_slice %79 {offsets = [0, 0], sizes = [32, 11], strides = [1, 1]} : vector<32x128xf32> to vector<32x11xf32>
    %cst_60 = arith.constant 0.000000e+00 : f32
    %488 = vector.broadcast %cst_60 : f32 to vector<32x11xf32>
    %489 = arith.mulf %487, %488 : vector<32x11xf32>
    %490 = tpu.concatenate %486, %489 in 1 : vector<32x117xf32>, vector<32x11xf32> -> vector<32x128xf32>
    %491 = vector.extract_strided_slice %82 {offsets = [0, 34], sizes = [32, 1], strides = [1, 1]} : vector<32x49xf32> to vector<32x1xf32>
    %492 = vector.broadcast %491 : vector<32x1xf32> to vector<32x128xf32>
    %493 = arith.mulf %490, %492 : vector<32x128xf32>
    %494 = vector.extract_strided_slice %83 {offsets = [34, 0], sizes = [1, 128], strides = [1, 1]} : vector<49x128xf32> to vector<1x128xf32>
    %495 = vector.broadcast %494 : vector<1x128xf32> to vector<32x128xf32>
    %496 = arith.mulf %493, %495 : vector<32x128xf32>
    %497 = arith.addf %485, %496 : vector<32x128xf32>
    %498 = vector.extract_strided_slice %79 {offsets = [0, 13], sizes = [32, 115], strides = [1, 1]} : vector<32x128xf32> to vector<32x115xf32>
    %499 = vector.extract_strided_slice %79 {offsets = [0, 0], sizes = [32, 13], strides = [1, 1]} : vector<32x128xf32> to vector<32x13xf32>
    %cst_61 = arith.constant 0.000000e+00 : f32
    %500 = vector.broadcast %cst_61 : f32 to vector<32x13xf32>
    %501 = arith.mulf %499, %500 : vector<32x13xf32>
    %502 = tpu.concatenate %498, %501 in 1 : vector<32x115xf32>, vector<32x13xf32> -> vector<32x128xf32>
    %503 = vector.extract_strided_slice %82 {offsets = [0, 35], sizes = [32, 1], strides = [1, 1]} : vector<32x49xf32> to vector<32x1xf32>
    %504 = vector.broadcast %503 : vector<32x1xf32> to vector<32x128xf32>
    %505 = arith.mulf %502, %504 : vector<32x128xf32>
    %506 = vector.extract_strided_slice %83 {offsets = [35, 0], sizes = [1, 128], strides = [1, 1]} : vector<49x128xf32> to vector<1x128xf32>
    %507 = vector.broadcast %506 : vector<1x128xf32> to vector<32x128xf32>
    %508 = arith.mulf %505, %507 : vector<32x128xf32>
    %509 = arith.addf %497, %508 : vector<32x128xf32>
    %510 = vector.extract_strided_slice %79 {offsets = [0, 14], sizes = [32, 114], strides = [1, 1]} : vector<32x128xf32> to vector<32x114xf32>
    %511 = vector.extract_strided_slice %79 {offsets = [0, 0], sizes = [32, 14], strides = [1, 1]} : vector<32x128xf32> to vector<32x14xf32>
    %cst_62 = arith.constant 0.000000e+00 : f32
    %512 = vector.broadcast %cst_62 : f32 to vector<32x14xf32>
    %513 = arith.mulf %511, %512 : vector<32x14xf32>
    %514 = tpu.concatenate %510, %513 in 1 : vector<32x114xf32>, vector<32x14xf32> -> vector<32x128xf32>
    %515 = vector.extract_strided_slice %82 {offsets = [0, 36], sizes = [32, 1], strides = [1, 1]} : vector<32x49xf32> to vector<32x1xf32>
    %516 = vector.broadcast %515 : vector<32x1xf32> to vector<32x128xf32>
    %517 = arith.mulf %514, %516 : vector<32x128xf32>
    %518 = vector.extract_strided_slice %83 {offsets = [36, 0], sizes = [1, 128], strides = [1, 1]} : vector<49x128xf32> to vector<1x128xf32>
    %519 = vector.broadcast %518 : vector<1x128xf32> to vector<32x128xf32>
    %520 = arith.mulf %517, %519 : vector<32x128xf32>
    %521 = arith.addf %509, %520 : vector<32x128xf32>
    %522 = vector.extract_strided_slice %79 {offsets = [0, 15], sizes = [32, 113], strides = [1, 1]} : vector<32x128xf32> to vector<32x113xf32>
    %523 = vector.extract_strided_slice %79 {offsets = [0, 0], sizes = [32, 15], strides = [1, 1]} : vector<32x128xf32> to vector<32x15xf32>
    %cst_63 = arith.constant 0.000000e+00 : f32
    %524 = vector.broadcast %cst_63 : f32 to vector<32x15xf32>
    %525 = arith.mulf %523, %524 : vector<32x15xf32>
    %526 = tpu.concatenate %522, %525 in 1 : vector<32x113xf32>, vector<32x15xf32> -> vector<32x128xf32>
    %527 = vector.extract_strided_slice %82 {offsets = [0, 37], sizes = [32, 1], strides = [1, 1]} : vector<32x49xf32> to vector<32x1xf32>
    %528 = vector.broadcast %527 : vector<32x1xf32> to vector<32x128xf32>
    %529 = arith.mulf %526, %528 : vector<32x128xf32>
    %530 = vector.extract_strided_slice %83 {offsets = [37, 0], sizes = [1, 128], strides = [1, 1]} : vector<49x128xf32> to vector<1x128xf32>
    %531 = vector.broadcast %530 : vector<1x128xf32> to vector<32x128xf32>
    %532 = arith.mulf %529, %531 : vector<32x128xf32>
    %533 = arith.addf %521, %532 : vector<32x128xf32>
    %534 = vector.extract_strided_slice %79 {offsets = [0, 16], sizes = [32, 112], strides = [1, 1]} : vector<32x128xf32> to vector<32x112xf32>
    %535 = vector.extract_strided_slice %79 {offsets = [0, 0], sizes = [32, 16], strides = [1, 1]} : vector<32x128xf32> to vector<32x16xf32>
    %cst_64 = arith.constant 0.000000e+00 : f32
    %536 = vector.broadcast %cst_64 : f32 to vector<32x16xf32>
    %537 = arith.mulf %535, %536 : vector<32x16xf32>
    %538 = tpu.concatenate %534, %537 in 1 : vector<32x112xf32>, vector<32x16xf32> -> vector<32x128xf32>
    %539 = vector.extract_strided_slice %82 {offsets = [0, 38], sizes = [32, 1], strides = [1, 1]} : vector<32x49xf32> to vector<32x1xf32>
    %540 = vector.broadcast %539 : vector<32x1xf32> to vector<32x128xf32>
    %541 = arith.mulf %538, %540 : vector<32x128xf32>
    %542 = vector.extract_strided_slice %83 {offsets = [38, 0], sizes = [1, 128], strides = [1, 1]} : vector<49x128xf32> to vector<1x128xf32>
    %543 = vector.broadcast %542 : vector<1x128xf32> to vector<32x128xf32>
    %544 = arith.mulf %541, %543 : vector<32x128xf32>
    %545 = arith.addf %533, %544 : vector<32x128xf32>
    %546 = vector.extract_strided_slice %79 {offsets = [0, 17], sizes = [32, 111], strides = [1, 1]} : vector<32x128xf32> to vector<32x111xf32>
    %547 = vector.extract_strided_slice %79 {offsets = [0, 0], sizes = [32, 17], strides = [1, 1]} : vector<32x128xf32> to vector<32x17xf32>
    %cst_65 = arith.constant 0.000000e+00 : f32
    %548 = vector.broadcast %cst_65 : f32 to vector<32x17xf32>
    %549 = arith.mulf %547, %548 : vector<32x17xf32>
    %550 = tpu.concatenate %546, %549 in 1 : vector<32x111xf32>, vector<32x17xf32> -> vector<32x128xf32>
    %551 = vector.extract_strided_slice %82 {offsets = [0, 39], sizes = [32, 1], strides = [1, 1]} : vector<32x49xf32> to vector<32x1xf32>
    %552 = vector.broadcast %551 : vector<32x1xf32> to vector<32x128xf32>
    %553 = arith.mulf %550, %552 : vector<32x128xf32>
    %554 = vector.extract_strided_slice %83 {offsets = [39, 0], sizes = [1, 128], strides = [1, 1]} : vector<49x128xf32> to vector<1x128xf32>
    %555 = vector.broadcast %554 : vector<1x128xf32> to vector<32x128xf32>
    %556 = arith.mulf %553, %555 : vector<32x128xf32>
    %557 = arith.addf %545, %556 : vector<32x128xf32>
    %558 = vector.extract_strided_slice %79 {offsets = [0, 18], sizes = [32, 110], strides = [1, 1]} : vector<32x128xf32> to vector<32x110xf32>
    %559 = vector.extract_strided_slice %79 {offsets = [0, 0], sizes = [32, 18], strides = [1, 1]} : vector<32x128xf32> to vector<32x18xf32>
    %cst_66 = arith.constant 0.000000e+00 : f32
    %560 = vector.broadcast %cst_66 : f32 to vector<32x18xf32>
    %561 = arith.mulf %559, %560 : vector<32x18xf32>
    %562 = tpu.concatenate %558, %561 in 1 : vector<32x110xf32>, vector<32x18xf32> -> vector<32x128xf32>
    %563 = vector.extract_strided_slice %82 {offsets = [0, 40], sizes = [32, 1], strides = [1, 1]} : vector<32x49xf32> to vector<32x1xf32>
    %564 = vector.broadcast %563 : vector<32x1xf32> to vector<32x128xf32>
    %565 = arith.mulf %562, %564 : vector<32x128xf32>
    %566 = vector.extract_strided_slice %83 {offsets = [40, 0], sizes = [1, 128], strides = [1, 1]} : vector<49x128xf32> to vector<1x128xf32>
    %567 = vector.broadcast %566 : vector<1x128xf32> to vector<32x128xf32>
    %568 = arith.mulf %565, %567 : vector<32x128xf32>
    %569 = arith.addf %557, %568 : vector<32x128xf32>
    %570 = vector.extract_strided_slice %79 {offsets = [0, 19], sizes = [32, 109], strides = [1, 1]} : vector<32x128xf32> to vector<32x109xf32>
    %571 = vector.extract_strided_slice %79 {offsets = [0, 0], sizes = [32, 19], strides = [1, 1]} : vector<32x128xf32> to vector<32x19xf32>
    %cst_67 = arith.constant 0.000000e+00 : f32
    %572 = vector.broadcast %cst_67 : f32 to vector<32x19xf32>
    %573 = arith.mulf %571, %572 : vector<32x19xf32>
    %574 = tpu.concatenate %570, %573 in 1 : vector<32x109xf32>, vector<32x19xf32> -> vector<32x128xf32>
    %575 = vector.extract_strided_slice %82 {offsets = [0, 41], sizes = [32, 1], strides = [1, 1]} : vector<32x49xf32> to vector<32x1xf32>
    %576 = vector.broadcast %575 : vector<32x1xf32> to vector<32x128xf32>
    %577 = arith.mulf %574, %576 : vector<32x128xf32>
    %578 = vector.extract_strided_slice %83 {offsets = [41, 0], sizes = [1, 128], strides = [1, 1]} : vector<49x128xf32> to vector<1x128xf32>
    %579 = vector.broadcast %578 : vector<1x128xf32> to vector<32x128xf32>
    %580 = arith.mulf %577, %579 : vector<32x128xf32>
    %581 = arith.addf %569, %580 : vector<32x128xf32>
    %582 = vector.extract_strided_slice %79 {offsets = [0, 21], sizes = [32, 107], strides = [1, 1]} : vector<32x128xf32> to vector<32x107xf32>
    %583 = vector.extract_strided_slice %79 {offsets = [0, 0], sizes = [32, 21], strides = [1, 1]} : vector<32x128xf32> to vector<32x21xf32>
    %cst_68 = arith.constant 0.000000e+00 : f32
    %584 = vector.broadcast %cst_68 : f32 to vector<32x21xf32>
    %585 = arith.mulf %583, %584 : vector<32x21xf32>
    %586 = tpu.concatenate %582, %585 in 1 : vector<32x107xf32>, vector<32x21xf32> -> vector<32x128xf32>
    %587 = vector.extract_strided_slice %82 {offsets = [0, 42], sizes = [32, 1], strides = [1, 1]} : vector<32x49xf32> to vector<32x1xf32>
    %588 = vector.broadcast %587 : vector<32x1xf32> to vector<32x128xf32>
    %589 = arith.mulf %586, %588 : vector<32x128xf32>
    %590 = vector.extract_strided_slice %83 {offsets = [42, 0], sizes = [1, 128], strides = [1, 1]} : vector<49x128xf32> to vector<1x128xf32>
    %591 = vector.broadcast %590 : vector<1x128xf32> to vector<32x128xf32>
    %592 = arith.mulf %589, %591 : vector<32x128xf32>
    %593 = arith.addf %581, %592 : vector<32x128xf32>
    %594 = vector.extract_strided_slice %79 {offsets = [0, 22], sizes = [32, 106], strides = [1, 1]} : vector<32x128xf32> to vector<32x106xf32>
    %595 = vector.extract_strided_slice %79 {offsets = [0, 0], sizes = [32, 22], strides = [1, 1]} : vector<32x128xf32> to vector<32x22xf32>
    %cst_69 = arith.constant 0.000000e+00 : f32
    %596 = vector.broadcast %cst_69 : f32 to vector<32x22xf32>
    %597 = arith.mulf %595, %596 : vector<32x22xf32>
    %598 = tpu.concatenate %594, %597 in 1 : vector<32x106xf32>, vector<32x22xf32> -> vector<32x128xf32>
    %599 = vector.extract_strided_slice %82 {offsets = [0, 43], sizes = [32, 1], strides = [1, 1]} : vector<32x49xf32> to vector<32x1xf32>
    %600 = vector.broadcast %599 : vector<32x1xf32> to vector<32x128xf32>
    %601 = arith.mulf %598, %600 : vector<32x128xf32>
    %602 = vector.extract_strided_slice %83 {offsets = [43, 0], sizes = [1, 128], strides = [1, 1]} : vector<49x128xf32> to vector<1x128xf32>
    %603 = vector.broadcast %602 : vector<1x128xf32> to vector<32x128xf32>
    %604 = arith.mulf %601, %603 : vector<32x128xf32>
    %605 = arith.addf %593, %604 : vector<32x128xf32>
    %606 = vector.extract_strided_slice %79 {offsets = [0, 23], sizes = [32, 105], strides = [1, 1]} : vector<32x128xf32> to vector<32x105xf32>
    %607 = vector.extract_strided_slice %79 {offsets = [0, 0], sizes = [32, 23], strides = [1, 1]} : vector<32x128xf32> to vector<32x23xf32>
    %cst_70 = arith.constant 0.000000e+00 : f32
    %608 = vector.broadcast %cst_70 : f32 to vector<32x23xf32>
    %609 = arith.mulf %607, %608 : vector<32x23xf32>
    %610 = tpu.concatenate %606, %609 in 1 : vector<32x105xf32>, vector<32x23xf32> -> vector<32x128xf32>
    %611 = vector.extract_strided_slice %82 {offsets = [0, 44], sizes = [32, 1], strides = [1, 1]} : vector<32x49xf32> to vector<32x1xf32>
    %612 = vector.broadcast %611 : vector<32x1xf32> to vector<32x128xf32>
    %613 = arith.mulf %610, %612 : vector<32x128xf32>
    %614 = vector.extract_strided_slice %83 {offsets = [44, 0], sizes = [1, 128], strides = [1, 1]} : vector<49x128xf32> to vector<1x128xf32>
    %615 = vector.broadcast %614 : vector<1x128xf32> to vector<32x128xf32>
    %616 = arith.mulf %613, %615 : vector<32x128xf32>
    %617 = arith.addf %605, %616 : vector<32x128xf32>
    %618 = vector.extract_strided_slice %79 {offsets = [0, 24], sizes = [32, 104], strides = [1, 1]} : vector<32x128xf32> to vector<32x104xf32>
    %619 = vector.extract_strided_slice %79 {offsets = [0, 0], sizes = [32, 24], strides = [1, 1]} : vector<32x128xf32> to vector<32x24xf32>
    %cst_71 = arith.constant 0.000000e+00 : f32
    %620 = vector.broadcast %cst_71 : f32 to vector<32x24xf32>
    %621 = arith.mulf %619, %620 : vector<32x24xf32>
    %622 = tpu.concatenate %618, %621 in 1 : vector<32x104xf32>, vector<32x24xf32> -> vector<32x128xf32>
    %623 = vector.extract_strided_slice %82 {offsets = [0, 45], sizes = [32, 1], strides = [1, 1]} : vector<32x49xf32> to vector<32x1xf32>
    %624 = vector.broadcast %623 : vector<32x1xf32> to vector<32x128xf32>
    %625 = arith.mulf %622, %624 : vector<32x128xf32>
    %626 = vector.extract_strided_slice %83 {offsets = [45, 0], sizes = [1, 128], strides = [1, 1]} : vector<49x128xf32> to vector<1x128xf32>
    %627 = vector.broadcast %626 : vector<1x128xf32> to vector<32x128xf32>
    %628 = arith.mulf %625, %627 : vector<32x128xf32>
    %629 = arith.addf %617, %628 : vector<32x128xf32>
    %630 = vector.extract_strided_slice %79 {offsets = [0, 25], sizes = [32, 103], strides = [1, 1]} : vector<32x128xf32> to vector<32x103xf32>
    %631 = vector.extract_strided_slice %79 {offsets = [0, 0], sizes = [32, 25], strides = [1, 1]} : vector<32x128xf32> to vector<32x25xf32>
    %cst_72 = arith.constant 0.000000e+00 : f32
    %632 = vector.broadcast %cst_72 : f32 to vector<32x25xf32>
    %633 = arith.mulf %631, %632 : vector<32x25xf32>
    %634 = tpu.concatenate %630, %633 in 1 : vector<32x103xf32>, vector<32x25xf32> -> vector<32x128xf32>
    %635 = vector.extract_strided_slice %82 {offsets = [0, 46], sizes = [32, 1], strides = [1, 1]} : vector<32x49xf32> to vector<32x1xf32>
    %636 = vector.broadcast %635 : vector<32x1xf32> to vector<32x128xf32>
    %637 = arith.mulf %634, %636 : vector<32x128xf32>
    %638 = vector.extract_strided_slice %83 {offsets = [46, 0], sizes = [1, 128], strides = [1, 1]} : vector<49x128xf32> to vector<1x128xf32>
    %639 = vector.broadcast %638 : vector<1x128xf32> to vector<32x128xf32>
    %640 = arith.mulf %637, %639 : vector<32x128xf32>
    %641 = arith.addf %629, %640 : vector<32x128xf32>
    %642 = vector.extract_strided_slice %79 {offsets = [0, 26], sizes = [32, 102], strides = [1, 1]} : vector<32x128xf32> to vector<32x102xf32>
    %643 = vector.extract_strided_slice %79 {offsets = [0, 0], sizes = [32, 26], strides = [1, 1]} : vector<32x128xf32> to vector<32x26xf32>
    %cst_73 = arith.constant 0.000000e+00 : f32
    %644 = vector.broadcast %cst_73 : f32 to vector<32x26xf32>
    %645 = arith.mulf %643, %644 : vector<32x26xf32>
    %646 = tpu.concatenate %642, %645 in 1 : vector<32x102xf32>, vector<32x26xf32> -> vector<32x128xf32>
    %647 = vector.extract_strided_slice %82 {offsets = [0, 47], sizes = [32, 1], strides = [1, 1]} : vector<32x49xf32> to vector<32x1xf32>
    %648 = vector.broadcast %647 : vector<32x1xf32> to vector<32x128xf32>
    %649 = arith.mulf %646, %648 : vector<32x128xf32>
    %650 = vector.extract_strided_slice %83 {offsets = [47, 0], sizes = [1, 128], strides = [1, 1]} : vector<49x128xf32> to vector<1x128xf32>
    %651 = vector.broadcast %650 : vector<1x128xf32> to vector<32x128xf32>
    %652 = arith.mulf %649, %651 : vector<32x128xf32>
    %653 = arith.addf %641, %652 : vector<32x128xf32>
    %654 = vector.extract_strided_slice %79 {offsets = [0, 27], sizes = [32, 101], strides = [1, 1]} : vector<32x128xf32> to vector<32x101xf32>
    %655 = vector.extract_strided_slice %79 {offsets = [0, 0], sizes = [32, 27], strides = [1, 1]} : vector<32x128xf32> to vector<32x27xf32>
    %cst_74 = arith.constant 0.000000e+00 : f32
    %656 = vector.broadcast %cst_74 : f32 to vector<32x27xf32>
    %657 = arith.mulf %655, %656 : vector<32x27xf32>
    %658 = tpu.concatenate %654, %657 in 1 : vector<32x101xf32>, vector<32x27xf32> -> vector<32x128xf32>
    %659 = vector.extract_strided_slice %82 {offsets = [0, 48], sizes = [32, 1], strides = [1, 1]} : vector<32x49xf32> to vector<32x1xf32>
    %660 = vector.broadcast %659 : vector<32x1xf32> to vector<32x128xf32>
    %661 = arith.mulf %658, %660 : vector<32x128xf32>
    %662 = vector.extract_strided_slice %83 {offsets = [48, 0], sizes = [1, 128], strides = [1, 1]} : vector<49x128xf32> to vector<1x128xf32>
    %663 = vector.broadcast %662 : vector<1x128xf32> to vector<32x128xf32>
    %664 = arith.mulf %661, %663 : vector<32x128xf32>
    %665 = arith.addf %653, %664 : vector<32x128xf32>
    %c0_75 = arith.constant 0 : index
    %c0_76 = arith.constant 0 : index
    %666 = vector.load %arg6[%c0_75, %c0_76] : memref<32x1xf32, #tpu.memory_space<vmem>>, vector<32x1xf32>
    %667 = vector.broadcast %666 : vector<32x1xf32> to vector<32x128xf32>
    %668 = arith.addf %665, %667 : vector<32x128xf32>
    %cst_77 = arith.constant 5.000000e-01 : f32
    %669 = vector.broadcast %cst_77 : f32 to vector<32x128xf32>
    %670 = arith.mulf %669, %668 : vector<32x128xf32>
    %cst_78 = arith.constant 0.707106769 : f32
    %671 = vector.broadcast %cst_78 : f32 to vector<32x128xf32>
    %672 = arith.mulf %668, %671 : vector<32x128xf32>
    %673 = math.absf %672 : vector<32x128xf32>
    %cst_79 = arith.constant 0.327591091 : f32
    %674 = vector.broadcast %cst_79 : f32 to vector<32x128xf32>
    %675 = arith.mulf %674, %673 : vector<32x128xf32>
    %cst_80 = arith.constant 1.000000e+00 : f32
    %676 = vector.broadcast %cst_80 : f32 to vector<32x128xf32>
    %677 = arith.addf %676, %675 : vector<32x128xf32>
    %cst_81 = arith.constant 1.000000e+00 : f32
    %678 = vector.broadcast %cst_81 : f32 to vector<32x128xf32>
    %679 = arith.divf %678, %677 : vector<32x128xf32>
    %cst_82 = arith.constant 1.06140542 : f32
    %680 = vector.broadcast %cst_82 : f32 to vector<32x128xf32>
    %681 = arith.mulf %680, %679 : vector<32x128xf32>
    %cst_83 = arith.constant -1.45315206 : f32
    %682 = vector.broadcast %cst_83 : f32 to vector<32x128xf32>
    %683 = arith.addf %681, %682 : vector<32x128xf32>
    %684 = arith.mulf %683, %679 : vector<32x128xf32>
    %cst_84 = arith.constant 1.42141378 : f32
    %685 = vector.broadcast %cst_84 : f32 to vector<32x128xf32>
    %686 = arith.addf %684, %685 : vector<32x128xf32>
    %687 = arith.mulf %686, %679 : vector<32x128xf32>
    %cst_85 = arith.constant -0.284496725 : f32
    %688 = vector.broadcast %cst_85 : f32 to vector<32x128xf32>
    %689 = arith.addf %687, %688 : vector<32x128xf32>
    %690 = arith.mulf %689, %679 : vector<32x128xf32>
    %cst_86 = arith.constant 0.254829586 : f32
    %691 = vector.broadcast %cst_86 : f32 to vector<32x128xf32>
    %692 = arith.addf %690, %691 : vector<32x128xf32>
    %693 = arith.mulf %692, %679 : vector<32x128xf32>
    %694 = arith.mulf %673, %673 : vector<32x128xf32>
    %cst_87 = arith.constant 0.000000e+00 : f32
    %695 = vector.broadcast %cst_87 : f32 to vector<32x128xf32>
    %696 = arith.subf %695, %694 : vector<32x128xf32>
    %697 = math.exp %696 : vector<32x128xf32>
    %698 = arith.mulf %693, %697 : vector<32x128xf32>
    %cst_88 = arith.constant 1.000000e+00 : f32
    %699 = vector.broadcast %cst_88 : f32 to vector<32x128xf32>
    %700 = arith.subf %699, %698 : vector<32x128xf32>
    %cst_89 = arith.constant 0.000000e+00 : f32
    %701 = vector.broadcast %cst_89 : f32 to vector<32x128xf32>
    %702 = arith.cmpf olt, %672, %701 : vector<32x128xf32>
    %cst_90 = arith.constant 0.000000e+00 : f32
    %703 = vector.broadcast %cst_90 : f32 to vector<32x128xf32>
    %704 = arith.subf %703, %700 : vector<32x128xf32>
    %705 = arith.select %702, %704, %700 : vector<32x128xi1>, vector<32x128xf32>
    %cst_91 = arith.constant 1.000000e+00 : f32
    %706 = vector.broadcast %cst_91 : f32 to vector<32x128xf32>
    %707 = arith.addf %706, %705 : vector<32x128xf32>
    %708 = arith.mulf %670, %707 : vector<32x128xf32>
    %709 = arith.addf %708, %79 : vector<32x128xf32>
    %c0_92 = arith.constant 0 : index
    %c0_93 = arith.constant 0 : index
    %710 = vector.load %arg7[%c0_92, %c0_93] : memref<32x32xf32, #tpu.memory_space<vmem>>, vector<32x32xf32>
    %cst_94 = arith.constant dense<0.000000e+00> : vector<32x128xf32>
    %711 = tpu.matmul %710, %709, %cst_94 {dimension_numbers = #tpu.dot_dimension_numbers<[1], [0], [0], [1], [0, 0, 1, 1], [], []>} : vector<32x32xf32>, vector<32x128xf32>, vector<32x128xf32> -> vector<32x128xf32>
    %c0_95 = arith.constant 0 : index
    %c0_96 = arith.constant 0 : index
    %712 = vector.load %arg8[%c0_95, %c0_96] : memref<32x1xf32, #tpu.memory_space<vmem>>, vector<32x1xf32>
    %713 = vector.broadcast %712 : vector<32x1xf32> to vector<32x128xf32>
    %714 = arith.addf %711, %713 : vector<32x128xf32>
    %715 = arith.addf %714, %0 : vector<32x128xf32>
    %c0_97 = arith.constant 0 : index
    %c0_98 = arith.constant 0 : index
    %716 = vector.load %arg10[%c0_97, %c0_98] : memref<32x128xf32, #tpu.memory_space<vmem>>, vector<32x128xf32>
    tpu.vector_store %arg10[%c0_97, %c0_98], %715 {strides = array<i32>} : memref<32x128xf32, #tpu.memory_space<vmem>>, vector<32x128xf32>,
    return
  }
  func.func @transform_0(%arg0: i32) -> (i32, i32) {
    %c0_i32 = arith.constant 0 : i32
    %c0_i32_0 = arith.constant 0 : i32
    %c0_i32_1 = arith.constant 0 : i32
    return %c0_i32, %c0_i32_0 : i32, i32
  }
  func.func @transform_1(%arg0: i32) -> (i32, i32) {
    %c0_i32 = arith.constant 0 : i32
    %c0_i32_0 = arith.constant 0 : i32
    %c0_i32_1 = arith.constant 0 : i32
    return %c0_i32, %c0_i32_0 : i32, i32
  }
  func.func @transform_2(%arg0: i32) -> (i32, i32) {
    %c0_i32 = arith.constant 0 : i32
    %c0_i32_0 = arith.constant 0 : i32
    %c0_i32_1 = arith.constant 0 : i32
    return %c0_i32, %c0_i32_0 : i32, i32
  }
  func.func @transform_3(%arg0: i32) -> (i32, i32) {
    %c0_i32 = arith.constant 0 : i32
    %c0_i32_0 = arith.constant 0 : i32
    %c0_i32_1 = arith.constant 0 : i32
    return %c0_i32, %c0_i32_0 : i32, i32
  }
  func.func @transform_4(%arg0: i32) -> (i32, i32) {
    %c0_i32 = arith.constant 0 : i32
    %c0_i32_0 = arith.constant 0 : i32
    %c0_i32_1 = arith.constant 0 : i32
    return %c0_i32, %c0_i32_0 : i32, i32
  }
  func.func @transform_5(%arg0: i32) -> (i32, i32) {
    %c0_i32 = arith.constant 0 : i32
    %c0_i32_0 = arith.constant 0 : i32
    %c0_i32_1 = arith.constant 0 : i32
    return %c0_i32, %c0_i32_0 : i32, i32
  }
  func.func @transform_6(%arg0: i32) -> (i32, i32) {
    %c0_i32 = arith.constant 0 : i32
    %c0_i32_0 = arith.constant 0 : i32
    %c0_i32_1 = arith.constant 0 : i32
    return %c0_i32, %c0_i32_0 : i32, i32
  }
  func.func @transform_7(%arg0: i32) -> (i32, i32) {
    %c0_i32 = arith.constant 0 : i32
    %c0_i32_0 = arith.constant 0 : i32
    %c0_i32_1 = arith.constant 0 : i32
    return %c0_i32, %c0_i32_0 : i32, i32
  }
  func.func @transform_8(%arg0: i32) -> (i32, i32) {
    %c0_i32 = arith.constant 0 : i32
    %c0_i32_0 = arith.constant 0 : i32
    %c0_i32_1 = arith.constant 0 : i32
    return %c0_i32, %c0_i32_0 : i32, i32
  }
  func.func @transform_9(%arg0: i32) -> (i32, i32) {
    %c0_i32 = arith.constant 0 : i32
    %c0_i32_0 = arith.constant 0 : i32
    %c0_i32_1 = arith.constant 0 : i32
    return %c0_i32, %c0_i32_0 : i32, i32
  }
  func.func @transform_10(%arg0: i32) -> (i32, i32) {
    %c0_i32 = arith.constant 0 : i32
    %c0_i32_0 = arith.constant 0 : i32
    %c0_i32_1 = arith.constant 0 : i32
    return %c0_i32, %c0_i32_0 : i32, i32
  }
}

</mosaic_0001>

<bundles_post_ra>
// kernel: tpu_custom_call.1
= control target key start
LH: loop header
LB: loop body
LE: loop exit
PB: predicated region body
PF: predicated region fallthrough
CT: control target
= control target key end

     0   :  { %v8306_v4 = vmov 0   ;;  %vm8360_vm0 = vcmask 261120   ;;  %s8295_s0 = inlined_call_operand.vmem [shape: f32[32,128], index: 0, kind: input, shape index: {}]   ;;  %s8296_s1 = inlined_call_operand.vmem [shape: f32[96,32], index: 1, kind: input, shape index: {}]   ;;  %s8297_s2 = inlined_call_operand.vmem [shape: f32[96,1], index: 2, kind: input, shape index: {}]   ;;  %s8298_s3 = inlined_call_operand.vmem [shape: f32[32,49], index: 3, kind: input, shape index: {}]   ;;  %s8299_s4 = inlined_call_operand.vmem [shape: f32[49,128], index: 4, kind: input, shape index: {}]   ;;  %s8300_s5 = inlined_call_operand.vmem [shape: f32[32,1], index: 5, kind: input, shape index: {}]   ;;  %s8301_s6 = inlined_call_operand.vmem [shape: f32[32,32], index: 6, kind: input, shape index: {}]   ;;  %s8302_s7 = inlined_call_operand.vmem [shape: f32[32,1], index: 7, kind: input, shape index: {}]   ;;  %s8303_s8 = inlined_call_operand.vmem [shape: f32[32,32], index: 8, kind: input, shape index: {}]   ;;  %s8304_s9 = inlined_call_operand.hbm [shape: f32[32,128], index: 9, kind: output, shape index: {0}]   ;;  %s8305_s10 = inlined_call_operand.vmem [shape: f32[64,4], index: 10, kind: output, shape index: {1}]  }
   0x1   :  { %v38_v0 = vld [vmem:[%s8295_s0 + $0x18] sm:$0xff]  ;;  %v37_v1 = vld [vmem:[%s8295_s0 + $0x10] sm:$0xff]  ;;  %v36_v3 = vld [vmem:[%s8295_s0 + $0x8] sm:$0xff]  ;;  %4187 = vset.pattern.permute.xlu1 %v8306_v4  ;;  %4186 = vset.pattern.permute.xlu0 %v8306_v4 }
   0x2   :  { %176 = vmatpush.msra.mxu0 %v38_v0  ;;  %4078 = vmatpush.msra.mxu3 %v38_v0  ;;  %v57_v2 = vld [vmem:[%s8297_s2 + $0x10] sm:$0xff]  ;;  %v55_v5 = vld [vmem:[%s8297_s2] sm:$0xff]  ;;  %v52_v9 = vld [vmem:[%s8296_s1 + $0x48] sm:$0xff] }
   0x3   :  { %v59_v6 = vld [vmem:[%s8297_s2 + $0x20] sm:$0xff]  ;;  %79 = vperm.xlu1 %4187, %v57_v2   ;;  %4188 = vset.pattern.permute.xlu2 %v8306_v4  ;;  %v58_v10 = vld [vmem:[%s8297_s2 + $0x18] sm:$0xff] }
   0x4   :  { %177 = vmatpush.msra.mxu0 %v37_v1  ;;  %4079 = vmatpush.msra.mxu3 %v37_v1  ;;  %v35_v7 = vld [vmem:[%s8295_s0] sm:$0xff] }
   0x5   :  { %v43_v8 = vld [vmem:[%s8296_s1] sm:$0xff]  ;;  %69 = vperm.xlu0 %4186, %v55_v5   ;;  %89 = vperm.xlu2 %4188, %v59_v6  }
   0x6   :  { %178 = vmatpush.msra.mxu0 %v36_v3  ;;  %4080 = vmatpush.msra.mxu3 %v36_v3 }
   0x8   :  { %179 = vmatpush.msra.mxu0 %v35_v7  ;;  %4081 = vmatpush.msra.mxu3 %v35_v7 }
   0x9   :  { %4038 = vmatmul.msk.f32.vlgmr.msra.gmra.mxu0 %vm8360_vm0, %v43_v8  ;;  %4047 = vmatmul.msk.f32.vlgmr.msra.gmra.mxu3 %vm8360_vm0, %v52_v9 }
   0xa   :  { %16 = vsyncpa [#allocation3], 0  ;;  %v56_v11 = vld [vmem:[%s8297_s2 + $0x8] sm:$0xff]  ;;  %v53_v14 = vld [vmem:[%s8296_s1 + $0x50] sm:$0xff]  ;;  %v4445_v29 = vmov 1   ;;  %v4446_v32 = vmov 2  }
   0xb   :  { %v60_v12 = vld [vmem:[%s8297_s2 + $0x28] sm:$0xff]  ;;  %84 = vperm.xlu1 %4187, %v58_v10   ;;  %v62_v15 = vld [vmem:[%s8297_s2 + $0x38] sm:$0xff]  ;;  %v61_v16 = vld [vmem:[%s8297_s2 + $0x30] sm:$0xff]  ;;  %v4447_v34 = vmov 3   ;;  %v4448_v36 = vmov 4   ;;  %v4449_v37 = vmov 5  }
   0xc   :  { %v44_v13 = vld [vmem:[%s8296_s1 + $0x8] sm:$0xff]  ;;  %v63_v17 = vld [vmem:[%s8297_s2 + $0x40] sm:$0xff]  ;;  %v45_v18 = vld [vmem:[%s8296_s1 + $0x10] sm:$0xff]  ;;  %v4450_v38 = vmov 6   ;;  %v4451_v44 = vmov 7   ;;  %vm217_vm1 = vcmask 523264  }
   0xd   :  { %74 = vperm.xlu0 %4186, %v56_v11   ;;  %94 = vperm.xlu2 %4188, %v60_v12   ;;  %v54_v19 = vld [vmem:[%s8296_s1 + $0x58] sm:$0xff]  ;;  %v65_v20 = vld [vmem:[%s8297_s2 + $0x50] sm:$0xff]  ;;  %v64_v21 = vld [vmem:[%s8297_s2 + $0x48] sm:$0xff]  ;;  %s4455_s18 = smov 116   ;;  %s4456_s19 = smov 120   ;;  %vm902_vm5 = vcmask 31744  }
   0xe   :  { %v66_v22 = vld [vmem:[%s8297_s2 + $0x58] sm:$0xff]  ;;  %v4685_v24 = vld [vmem:[%s8298_s3 + $0x10] sm:$0xff]  ;;  %v4690_v25 = vld [vmem:[%s8298_s3 + $0x8] sm:$0xff]  ;;  %s4457_s20 = smov 124   ;;  %s4458_s21 = smov 104  }
   0xf   :  { %v46_v23 = vld [vmem:[%s8296_s1 + $0x18] sm:$0xff]  ;;  %v4695_v26 = vld [vmem:[%s8298_s3] sm:$0xff]  ;;  %v48_v30 = vld [vmem:[%s8296_s1 + $0x28] sm:$0xff]  ;;  %s4459_s22 = smov 108   ;;  %s4460_s2 = smov 112  }
  0x10   :  { %v47_v27 = vld [vmem:[%s8296_s1 + $0x20] sm:$0xff]  ;;  %v4707_v28 = vld [vmem:[%s8298_s3 + $0x18] sm:$0xff]  ;;  %v49_v31 = vld [vmem:[%s8296_s1 + $0x30] sm:$0xff]  ;;  %s4461_s25 = smov 100   ;;  %s4471_s14 = smov 27  }
  0x11   :  { %4039 = vmatmul.msk.f32.gmra.mxu0 %vm8360_vm0, %v44_v13  ;;  %4048 = vmatmul.msk.f32.gmra.mxu3 %vm8360_vm0, %v53_v14  ;;  %v50_v33 = vld [vmem:[%s8296_s1 + $0x38] sm:$0xff]  ;;  %v51_v35 = vld [vmem:[%s8296_s1 + $0x40] sm:$0xff]  ;;  %s4452_s1 = smov 64   ;;  %s4472_s15 = smov 21  }
  0x12   :  { %s4473_s16 = smov 26   ;;  %s4474_s17 = smov 25  }
  0x13   :  { %104 = vperm.xlu1 %4187, %v62_v15   ;;  %s4475_s23 = smov 17   ;;  %s4480_s24 = smov 18  }
  0x14   :  { %s4482_s26 = smov 16   ;;  %s4483_s27 = smov 15  }
  0x15   :  { %99 = vperm.xlu0 %4186, %v61_v16   ;;  %109 = vperm.xlu2 %4188, %v63_v17   ;;  %v4453_v17 = vmov 8   ;;  %s4484_s28 = smov 7   ;;  %s4485_s29 = smov 13  }
  0x16   :  { %s4487_s30 = smov 9   ;;  %s4488_s11 = smov 8  }
  0x17   :  { %s4516_s12 = smov 118   ;;  %s4518_s13 = smov 117  }
  0x19   :  { %4040 = vmatmul.msk.f32.gmra.mxu0 %vm8360_vm0, %v45_v18  ;;  %4049 = vmatmul.msk.f32.gmra.mxu3 %vm8360_vm0, %v54_v19 }
  0x1b   :  { %119 = vperm.xlu1 %4187, %v65_v20  }
  0x1d   :  { %114 = vperm.xlu0 %4186, %v64_v21   ;;  %124 = vperm.xlu2 %4188, %v66_v22  }
  0x21   :  { %4041 = vmatmul.msk.f32.gmra.mxu0 %vm8360_vm0, %v46_v23 }
  0x23   :  { %975 = vperm.xlu1 %4187, %v4685_v24  }
  0x25   :  { %970 = vperm.xlu0 %4186, %v4690_v25   ;;  %965 = vperm.xlu2 %4188, %v4695_v26  }
  0x29   :  { %4042 = vmatmul.msk.f32.gmra.mxu0 %vm8360_vm0, %v47_v27 }
  0x2b   :  { %4191 = vset.pattern.permute.xlu1 %v4445_v29 }
  0x2c   :  { %1030 = vperm.xlu1 %4191, %v4685_v24  }
  0x2d   :  { %980 = vperm.xlu2 %4188, %v4707_v28   ;;  %4190 = vset.pattern.permute.xlu0 %v4445_v29 }
  0x2e   :  { %1026 = vperm.xlu0 %4190, %v4690_v25  }
  0x31   :  { %4043 = vmatmul.msk.f32.gmra.mxu0 %vm8360_vm0, %v48_v30 }
  0x34   :  { %4193 = vset.pattern.permute.xlu1 %v4446_v32 }
  0x35   :  { %4189 = vset.pattern.permute.xlu2 %v4445_v29  ;;  %1084 = vperm.xlu1 %4193, %v4690_v25  }
  0x36   :  { %1022 = vperm.xlu2 %4189, %v4695_v26   ;;  %4192 = vset.pattern.permute.xlu0 %v4446_v32 }
  0x37   :  { %1080 = vperm.xlu0 %4192, %v4695_v26  }
  0x39   :  { %4044 = vmatmul.msk.f32.gmra.mxu0 %vm8360_vm0, %v49_v31 }
  0x3d   :  { %1092 = vperm.xlu1 %4193, %v4707_v28  }
  0x3e   :  { %1034 = vperm.xlu2 %4189, %v4707_v28  }
  0x3f   :  { %4197 = vset.pattern.permute.xlu0 %v4447_v34 }
  0x40   :  { %1146 = vperm.xlu0 %4197, %v4685_v24  }
  0x41   :  { %4045 = vmatmul.msk.f32.gmra.mxu0 %vm8360_vm0, %v50_v33 }
  0x45   :  { %4195 = vset.pattern.permute.xlu1 %v4447_v34 }
  0x46   :  { %4194 = vset.pattern.permute.xlu2 %v4446_v32  ;;  %1138 = vperm.xlu1 %4195, %v4695_v26  }
  0x47   :  { %1088 = vperm.xlu2 %4194, %v4685_v24  }
  0x48   :  { %4199 = vset.pattern.permute.xlu0 %v4448_v36 }
  0x49   :  { %4046 = vmatmul.msk.f32.gmra.mxu0 %vm8360_vm0, %v51_v35  ;;  %1200 = vperm.xlu0 %4199, %v4690_v25  }
  0x4e   :  { %1150 = vperm.xlu1 %4195, %v4707_v28  }
  0x4f   :  { %4196 = vset.pattern.permute.xlu2 %v4447_v34 }
  0x50   :  { %1142 = vperm.xlu2 %4196, %v4690_v25  }
  0x51   :  { %4201 = vset.pattern.permute.xlu0 %v4449_v37 }
  0x52   :  { %1254 = vperm.xlu0 %4201, %v4695_v26  }
  0x56   :  { %4200 = vset.pattern.permute.xlu1 %v4448_v36 }
  0x57   :  { %1204 = vperm.xlu1 %4200, %v4685_v24  }
  0x58   :  { %4198 = vset.pattern.permute.xlu2 %v4448_v36 }
  0x59   :  { %1196 = vperm.xlu2 %4198, %v4695_v26  }
  0x5a   :  { %4211 = vset.pattern.permute.xlu0 %v4450_v38 }
  0x5f   :  { %4202 = vset.pattern.permute.xlu1 %v4449_v37  ;;  %v90_v39 = vpop.permute.xlu2 %89 }
  0x60   :  { %1258 = vperm.xlu1 %4202, %v4690_v25  }
  0x61   :  { %1208 = vperm.xlu2 %4198, %v4707_v28  }
  0x67   :  { %v95_v40 = vpop.permute.xlu2 %94 }
  0x68   :  { %1266 = vperm.xlu1 %4202, %v4707_v28  }
  0x69   :  { %4203 = vset.pattern.permute.xlu2 %v4449_v37 }
  0x6a   :  { %1262 = vperm.xlu2 %4203, %v4685_v24  }
  0x6f   :  { %v4748_v41 = vpop.permute.xlu2 %109 }
  0x70   :  { %4204 = vset.pattern.permute.xlu1 %v4450_v38 }
  0x71   :  { %1312 = vperm.xlu1 %4204, %v4695_v26  }
  0x72   :  { %4205 = vset.pattern.permute.xlu2 %v4450_v38 }
  0x73   :  { %1316 = vperm.xlu2 %4205, %v4690_v25  }
  0x75   :  { %v80_v42 = vpop.permute.xlu1 %79 }
  0x77   :  { %v70_v43 = vpop.permute.xlu0 %69  ;;  %v125_v45 = vpop.permute.xlu2 %124 }
  0x7b   :  { %4212 = vset.pattern.permute.xlu2 %v4451_v44 }
  0x7d   :  { %v85_v48 = vpop.permute.xlu1 %84 }
  0x7f   :  { %v75_v49 = vpop.permute.xlu0 %74  ;;  %v4754_v51 = vpop.permute.xlu2 %965 }
  0x85   :  { %v105_v54 = vpop.permute.xlu1 %104 }
  0x86   :  { %v181_v46 = vpop.f32.mrf.mxu0 }
  0x87   :  { %v4750_v47 = vadd.f32 %v181_v46, %v70_v43  ;;  %v100_v55 = vpop.permute.xlu0 %99  ;;  %v4763_v59 = vpop.permute.xlu2 %980 }
  0x88   :  { %8377 = vst [vmem:[#allocation5_spill] sm:$0xff] %v4763_v59 }
  0x89   :  { %540 = vrot.lane.b32.xlu2 %v4750_v47, %s4452_s1 }
  0x8c   :  { %v208_v50 = vpop.f32.mrf.mxu3 }
  0x8d   :  { %v120_v60 = vpop.permute.xlu1 %119 }
  0x8e   :  { %v184_v52 = vpop.f32.mrf.mxu0 }
  0x8f   :  { %v4756_v53 = vadd.f32 %v184_v52, %v75_v49  ;;  %v115_v0 = vpop.permute.xlu0 %114 }
  0x90   :  { %v209_v3 = vadd.f32 %v208_v50, %v115_v0  ;;  %v4768_v5 = vpop.permute.xlu2 %1022 }
  0x91   :  { %542 = vrot.lane.b32.xlu0 %v4756_v53, %s4452_s1  ;;  %1370 = vperm.xlu2 %4212, %v4695_v26  }
  0x94   :  { %v211_v56 = vpop.f32.mrf.mxu3 }
  0x95   :  { %v212_v62 = vadd.f32 %v211_v56, %v120_v60  ;;  %v4775_v11 = vpop.permute.xlu1 %975 }
  0x96   :  { %v187_v57 = vpop.f32.mrf.mxu0  ;;  %8379 = vst [vmem:[#allocation7_spill] sm:$0xff] %v4775_v11 }
  0x97   :  { %v4761_v58 = vadd.f32 %v187_v57, %v80_v42  ;;  %v4807_v31 = vpop.permute.xlu0 %970 }
  0x98   :  { %v4773_v9 = vpop.permute.xlu2 %1034  ;;  %8385 = vst [vmem:[#allocation13_spill] sm:$0xff] %v4807_v31 }
  0x99   :  { %544 = vrot.lane.b32.xlu1 %v4761_v58, %s4452_s1  ;;  %8378 = vst [vmem:[#allocation6_spill] sm:$0xff] %v4773_v9 }
  0x9c   :  { %v214_v61 = vpop.f32.mrf.mxu3 }
  0x9d   :  { %v215_v63 = vadd.f32 %v214_v61, %v125_v45 }
  0x9e   :  { %v190_v1 = vpop.f32.mrf.mxu0  ;;  %v4782_v16 = vpop.permute.xlu1 %1030 }
  0x9f   :  { %v4206_v2 = vpack.i.bf16 %v215_v63, %v212_v62  ;;  %523 = vmatpush.msra.mxu2 %v215_v63  ;;  %v191_v7 = vadd.f32 %v190_v1, %v85_v48  ;;  %8381 = vst [vmem:[#allocation9_spill] sm:$0xff] %v4782_v16  ;;  %v4454_v63 = vmov 9  }
  0xa0   :  { %v4816_v34 = vpop.permute.xlu0 %1026 }
  0xa1   :  { %524 = vmatpush.msra.mxu2 %v212_v62  ;;  %4207 = vrot.lane.b32.xlu0 %v4206_v2, %s4452_s1  ;;  %v4780_v13 = vpop.permute.xlu2 %1088 }
  0xa2   :  { %1324 = vperm.xlu1 %4204, %v4707_v28   ;;  %8380 = vst [vmem:[#allocation8_spill] sm:$0xff] %v4780_v13 }
  0xa3   :  { %525 = vmatpush.msra.mxu2 %v209_v3 }
  0xa6   :  { %v193_v6 = vpop.f32.mrf.mxu0 }
  0xa7   :  { %v194_v8 = vadd.f32 %v193_v6, %v90_v39  ;;  %v4790_v21 = vpop.permute.xlu1 %1084 }
  0xa8   :  { %8383 = vst [vmem:[#allocation11_spill] sm:$0xff] %v4790_v21 }
  0xa9   :  { %546 = vrot.lane.b32.xlu0 %v191_v7, %s4452_s1  ;;  %548 = vrot.lane.b32.xlu2 %v194_v8, %s4452_s1  ;;  %v4824_v37 = vpop.permute.xlu0 %1080 }
  0xaa   :  { %4214 = vset.pattern.permute.xlu1 %v4451_v44  ;;  %v4787_v19 = vpop.permute.xlu2 %1142 }
  0xab   :  { %8382 = vst [vmem:[#allocation10_spill] sm:$0xff] %v4787_v19 }
  0xae   :  { %v196_v10 = vpop.f32.mrf.mxu0 }
  0xaf   :  { %v197_v12 = vadd.f32 %v196_v10, %v95_v40  ;;  %v4801_v29 = vpop.permute.xlu1 %1092  ;;  %v4871_v10 = vld [vmem:[%s8303_s8] sm:$0xff] }
  0xb0   :  { %8384 = vst [vmem:[#allocation12_spill] sm:$0xff] %v4801_v29  ;;  %vm391_vm2 = vcmp.gt.f32.partialorder %v4871_v10, 0.5 }
  0xb1   :  { %550 = vrot.lane.b32.xlu1 %v197_v12, %s4452_s1  ;;  %1320 = vperm.xlu0 %4211, %v4685_v24  }
  0xb2   :  { %1382 = vperm.xlu2 %4212, %v4707_v28   ;;  %v4831_v40 = vpop.permute.xlu0 %1146 }
  0xb3   :  { %v4797_v27 = vpop.permute.xlu2 %1196  ;;  %8391 = vst [vmem:[#allocation19_spill] sm:$0xff] %v4831_v40 }
  0xb6   :  { %v199_v14 = vpop.f32.mrf.mxu0 }
  0xb7   :  { %v200_v15 = vadd.f32 %v199_v14, %v100_v55 }
  0xb8   :  { %v4812_v33 = vpop.permute.xlu1 %1138 }
  0xb9   :  { %1378 = vperm.xlu1 %4214, %v4685_v24   ;;  %552 = vrot.lane.b32.xlu0 %v200_v15, %s4452_s1 }
  0xba   :  { %4217 = vset.pattern.permute.xlu2 %v4453_v17  ;;  %4213 = vset.pattern.permute.xlu0 %v4451_v44 }
  0xbb   :  { %1436 = vperm.xlu2 %4217, %v4685_v24   ;;  %v4810_v32 = vpop.permute.xlu2 %1208  ;;  %v4835_v43 = vpop.permute.xlu0 %1200 }
  0xbc   :  { %8386 = vst [vmem:[#allocation14_spill] sm:$0xff] %v4810_v32 }
  0xbd   :  { %8393 = vst [vmem:[#allocation21_spill] sm:$0xff] %v4835_v43 }
  0xbe   :  { %v202_v18 = vpop.f32.mrf.mxu0 }
  0xbf   :  { %v203_v20 = vadd.f32 %v202_v18, %v105_v54 }
  0xc0   :  { %v4820_v36 = vpop.permute.xlu1 %1150 }
  0xc1   :  { %4050 = vmatpush.xpose.msk.msra.mxu1 %vm217_vm1, %v203_v20  ;;  %4216 = vset.pattern.permute.xlu1 %v4453_v17  ;;  %8388 = vst [vmem:[#allocation16_spill] sm:$0xff] %v4820_v36 }
  0xc2   :  { %1432 = vperm.xlu1 %4216, %v4690_v25   ;;  %1374 = vperm.xlu0 %4213, %v4690_v25  }
  0xc3   :  { %554 = vrot.lane.b32.xlu2 %v203_v20, %s4452_s1  ;;  %v4901_v20 = vld [vmem:[%s8303_s8 + $0x10] sm:$0xff] }
  0xc4   :  { %v4818_v35 = vpop.permute.xlu2 %1262  ;;  %v4841_v46 = vpop.permute.xlu0 %1254  ;;  %4224 = vset.pattern.permute.xlu2 %v4454_v63  ;;  %vm393_vm4 = vcmp.gt.f32.partialorder %v4901_v20, 0.5 }
  0xc5   :  { %4051 = vmatpush.xpose.msk.msra.mxu1 %vm217_vm1, %v200_v15  ;;  %8387 = vst [vmem:[#allocation15_spill] sm:$0xff] %v4818_v35  ;;  %v4884_v15 = vld [vmem:[%s8303_s8 + $0x8] sm:$0xff] }
  0xc6   :  { %v205_v22 = vpop.f32.mrf.mxu0  ;;  %vm392_vm3 = vcmp.gt.f32.partialorder %v4884_v15, 0.5 }
  0xc7   :  { %v206_v23 = vadd.f32 %v205_v22, %v4748_v41 }
  0xc9   :  { %4052 = vmatpush.xpose.msk.msra.mxu1 %vm217_vm1, %v197_v12  ;;  %526 = vmatpush.msra.mxu2 %v206_v23  ;;  %v4218_v30 = vpack.i.bf16 %v209_v3, %v206_v23  ;;  %v4829_v39 = vpop.permute.xlu1 %1204 }
  0xca   :  { %1440 = vperm.xlu1 %4216, %v4707_v28   ;;  %4215 = vset.pattern.permute.xlu0 %v4453_v17  ;;  %8390 = vst [vmem:[#allocation18_spill] sm:$0xff] %v4829_v39 }
  0xcb   :  { %1428 = vperm.xlu0 %4215, %v4695_v26   ;;  %1490 = vperm.xlu2 %4224, %v4690_v25  }
  0xcd   :  { %4053 = vmatpush.xpose.msk.msra.mxu1 %vm217_vm1, %v194_v8  ;;  %v4826_v38 = vpop.permute.xlu2 %1316 }
  0xce   :  { %8389 = vst [vmem:[#allocation17_spill] sm:$0xff] %v4826_v38 }
  0xd0   :  { %4054 = vmatmul.msk.f32.vlgmr.msra.gmra.mxu1 %vm217_vm1, %v4750_v47 }
  0xd2   :  { %4219 = vrot.lane.b32.xlu1 %v4218_v30, %s4452_s1  ;;  %v4833_v42 = vpop.permute.xlu1 %1258 }
  0xd3   :  { %8392 = vst [vmem:[#allocation20_spill] sm:$0xff] %v4833_v42  ;;  %4223 = vset.pattern.permute.xlu1 %v4454_v63  ;;  %4225 = vset.pattern.permute.xlu0 %v4454_v63 }
  0xd8   :  { %4055 = vmatmul.msk.f32.gmra.mxu1 %vm217_vm1, %v4756_v53 }
  0xda   :  { %v4839_v45 = vpop.permute.xlu1 %1266  ;;  %1486 = vperm.xlu1 %4223, %v4695_v26  }
  0xdb   :  { %8394 = vst [vmem:[#allocation22_spill] sm:$0xff] %v4839_v45 }
  0xe0   :  { %4056 = vmatmul.msk.f32.gmra.mxu1 %vm217_vm1, %v4761_v58 }
  0xe3   :  { %v541_v41 = vpop.permute.xlu2 %540  ;;  %v4843_v48 = vpop.permute.xlu1 %1312 }
  0xe8   :  { %4057 = vmatmul.msk.f32.gmra.mxu1 %vm217_vm1, %v191_v7 }
  0xeb   :  { %v4837_v44 = vpop.permute.xlu2 %1370 }
 0x103   :  { %v549_v47 = vpop.permute.xlu2 %548  ;;  %v543_v49 = vpop.permute.xlu0 %542 }
 0x10b   :  { %v545_v52 = vpop.permute.xlu1 %544 }
 0x10c   :  { %v4845_v50 = vpop.permute.xlu2 %1382 }
 0x10d   :  { %8395 = vst [vmem:[#allocation23_spill] sm:$0xff] %v4845_v50 }
 0x113   :  { %v4208_v53 = vpop.permute.xlu0 %4207 }
 0x114   :  { %v4210_v54 = vunpack.i.h.bf16 %v4208_v53  ;;  %v4209_v56 = vunpack.i.l.bf16 %v4208_v53  ;;  %v4849_v57 = vpop.permute.xlu1 %1324 }
 0x115   :  { %v4847_v55 = vpop.permute.xlu2 %1436  ;;  %8397 = vst [vmem:[#allocation25_spill] sm:$0xff] %v4849_v57 }
 0x116   :  { %8396 = vst [vmem:[#allocation24_spill] sm:$0xff] %v4847_v55  ;;  %865 = vmatpush.msrb.mxu2 %v4210_v54 }
 0x118   :  { %866 = vmatpush.msrb.mxu2 %v4209_v56 }
 0x11b   :  { %v547_v58 = vpop.permute.xlu0 %546 }
 0x11d   :  { %v555_v60 = vpop.permute.xlu2 %554 }
 0x11e   :  { %4062 = vmatpush.xpose.msk.msrb.mxu3 %vm217_vm1, %v555_v60  ;;  %v4954_v60 = vld [vmem:[%s8303_s8 + $0x18] sm:$0xff]  ;;  %s4486_s8 = smov 11  }
 0x11f   :  { %vm394_vm6 = vcmp.gt.f32.partialorder %v4954_v60, 0.5 }
 0x123   :  { %v551_v61 = vpop.permute.xlu1 %550  ;;  %v4852_v62 = vpop.permute.xlu0 %1320 }
 0x124   :  { %8398 = vst [vmem:[#allocation26_spill] sm:$0xff] %v4852_v62 }
 0x12b   :  { %v553_v0 = vpop.permute.xlu0 %552  ;;  %v4856_v1 = vpop.permute.xlu1 %1378 }
 0x12c   :  { %8399 = vst [vmem:[#allocation27_spill] sm:$0xff] %v4856_v1  ;;  %4063 = vmatpush.xpose.msk.msrb.mxu3 %vm217_vm1, %v553_v0  ;;  %v4961_v0 = vpop.permute.xlu2 %1490 }
 0x12d   :  { %8403 = vst [vmem:[#allocation31_spill] sm:$0xff] %v4961_v0 }
 0x130   :  { %4064 = vmatpush.xpose.msk.msrb.mxu3 %vm217_vm1, %v551_v61 }
 0x134   :  { %v4860_v2 = vpop.permute.xlu1 %1432  ;;  %4065 = vmatpush.xpose.msk.msrb.mxu3 %vm217_vm1, %v549_v47  ;;  %v4939_v54 = vpop.permute.xlu0 %1374 }
 0x135   :  { %8400 = vst [vmem:[#allocation28_spill] sm:$0xff] %v4860_v2 }
 0x136   :  { %8402 = vst [vmem:[#allocation30_spill] sm:$0xff] %v4939_v54 }
 0x137   :  { %4066 = vmatmul.msk.f32.vlgmr.msrb.gmra.mxu3 %vm217_vm1, %v541_v41 }
 0x13c   :  { %v4864_v3 = vpop.permute.xlu1 %1440 }
 0x13d   :  { %8401 = vst [vmem:[#allocation29_spill] sm:$0xff] %v4864_v3 }
 0x13f   :  { %4067 = vmatmul.msk.f32.gmra.mxu3 %vm217_vm1, %v543_v49 }
 0x144   :  { %v4220_v6 = vpop.permute.xlu1 %4219 }
 0x145   :  { %v4222_v7 = vunpack.i.h.bf16 %v4220_v6  ;;  %v4221_v8 = vunpack.i.l.bf16 %v4220_v6 }
 0x147   :  { %867 = vmatpush.msrb.mxu2 %v4222_v7  ;;  %4068 = vmatmul.msk.f32.gmra.mxu3 %vm217_vm1, %v545_v52 }
 0x149   :  { %868 = vmatpush.msrb.mxu2 %v4221_v8 }
 0x14c   :  { %v4947_v56 = vpop.permute.xlu1 %1486 }
 0x14d   :  { %v259_v12 = vpop.f32.mrf.mxu1 }
 0x14e   :  { %v271_v14 = vmul.f32 %v259_v12, %v4871_v10  ;;  %v4911_v30 = vsel %vm391_vm2, %v259_v12, -1e+30 }
 0x14f   :  { %4069 = vmatmul.msk.f32.gmra.mxu3 %vm217_vm1, %v547_v58  ;;  %v399_v41 = vsel %vm8360_vm0, %v4911_v30, -inf  ;;  %v4949_v58 = vpop.permute.xlu0 %1428 }
 0x150   :  { %311 = vrot.lane.b32.xlu2 %v271_v14, %s4455_s18  ;;  %295 = vrot.lane.b32.xlu1 %v271_v14, %s4456_s19 }
 0x151   :  { %279 = vrot.lane.b32.xlu0 %v271_v14, %s4457_s20 }
 0x155   :  { %v262_v17 = vpop.f32.mrf.mxu1 }
 0x156   :  { %v4887_v18 = vmul.f32 %v262_v17, %v4884_v15  ;;  %v4920_v47 = vsel %vm392_vm3, %v262_v17, -1e+30 }
 0x157   :  { %v402_v49 = vsel %vm8360_vm0, %v4920_v47, -inf }
 0x158   :  { %359 = vrot.lane.b32.xlu2 %v271_v14, %s4458_s21  ;;  %343 = vrot.lane.b32.xlu1 %v271_v14, %s4459_s22 }
 0x159   :  { %327 = vrot.lane.b32.xlu0 %v271_v14, %s4460_s2 }
 0x15d   :  { %v265_v22 = vpop.f32.mrf.mxu1 }
 0x15e   :  { %v4904_v23 = vmul.f32 %v265_v22, %v4901_v20  ;;  %v4931_v52 = vsel %vm393_vm4, %v265_v22, -1e+30 }
 0x15f   :  { %v405_v53 = vsel %vm8360_vm0, %v4931_v52, -inf }
 0x160   :  { %297 = vrot.lane.b32.xlu2 %v4887_v18, %s4456_s19 }
 0x161   :  { %375 = vrot.lane.b32.xlu0 %v271_v14, %s4461_s25 }
 0x165   :  { %v268_v61 = vpop.f32.mrf.mxu1 }
 0x166   :  { %v4959_v63 = vmul.f32 %v268_v61, %v4954_v60 }
 0x168   :  { %345 = vrot.lane.b32.xlu2 %v4887_v18, %s4459_s22 }
 0x169   :  { %313 = vrot.lane.b32.xlu0 %v4887_v18, %s4455_s18 }
 0x171   :  { %361 = vrot.lane.b32.xlu0 %v4887_v18, %s4458_s21 }
 0x179   :  { %299 = vrot.lane.b32.xlu0 %v4904_v23, %s4456_s19 }
 0x181   :  { %347 = vrot.lane.b32.xlu0 %v4904_v23, %s4459_s22 }
 0x182   :  { %400 = vmax.xlane.f32.xlu1 %v399_v41 }
 0x191   :  { %403 = vmax.xlane.f32.xlu2 %v402_v49 }
 0x19b   :  { %281 = vrot.lane.b32.xlu1 %v4887_v18, %s4457_s20 }
 0x1a3   :  { %329 = vrot.lane.b32.xlu1 %v4887_v18, %s4460_s2 }
 0x1a9   :  { %283 = vrot.lane.b32.xlu2 %v4904_v23, %s4457_s20 }
 0x1aa   :  { %v312_v17 = vpop.permute.xlu2 %311 }
 0x1ab   :  { %406 = vmax.xlane.f32.xlu0 %v405_v53  ;;  %377 = vrot.lane.b32.xlu1 %v4887_v18, %s4461_s25 }
 0x1b1   :  { %331 = vrot.lane.b32.xlu2 %v4904_v23, %s4460_s2 }
 0x1b3   :  { %315 = vrot.lane.b32.xlu1 %v4904_v23, %s4455_s18 }
 0x1b9   :  { %379 = vrot.lane.b32.xlu2 %v4904_v23, %s4461_s25 }
 0x1ba   :  { %v589_v4 = vpop.f32.mrf.mxu3 }
 0x1bb   :  { %363 = vrot.lane.b32.xlu1 %v4904_v23, %s4458_s21 }
 0x1bf   :  { %285 = vrot.lane.b32.xlu0 %v4959_v63, %s4457_s20 }
 0x1c1   :  { %317 = vrot.lane.b32.xlu2 %v4959_v63, %s4455_s18 }
 0x1c2   :  { %v296_v6 = vpop.permute.xlu1 %295  ;;  %v592_v50 = vpop.f32.mrf.mxu3 }
 0x1c3   :  { %v280_v7 = vpop.permute.xlu0 %279  ;;  %301 = vrot.lane.b32.xlu1 %v4959_v63, %s4456_s19  ;;  %v5018_v45 = vmul.f32 %v592_v50, %v4884_v15 }
 0x1c4   :  { %v291_v8 = vadd.f32 %v280_v7, %v271_v14  ;;  %v360_v14 = vpop.permute.xlu2 %359 }
 0x1c6   :  { %v307_v12 = vadd.f32 %v296_v6, %v291_v8  ;;  %v4978_v6 = vmul.f32 %v589_v4, %v4871_v10 }
 0x1c7   :  { %333 = vrot.lane.b32.xlu0 %v4959_v63, %s4460_s2 }
 0x1c8   :  { %v323_v22 = vadd.f32 %v312_v17, %v307_v12 }
 0x1c9   :  { %365 = vrot.lane.b32.xlu2 %v4959_v63, %s4458_s21 }
 0x1ca   :  { %v344_v53 = vpop.permute.xlu1 %343 }
 0x1cb   :  { %v328_v41 = vpop.permute.xlu0 %327  ;;  %349 = vrot.lane.b32.xlu1 %v4959_v63, %s4459_s22 }
 0x1cc   :  { %v339_v49 = vadd.f32 %v328_v41, %v323_v22  ;;  %v298_v41 = vpop.permute.xlu2 %297 }
 0x1ce   :  { %v355_v3 = vadd.f32 %v344_v53, %v339_v49 }
 0x1cf   :  { %381 = vrot.lane.b32.xlu0 %v4959_v63, %s4461_s25 }
 0x1d0   :  { %v371_v7 = vadd.f32 %v360_v14, %v355_v3  ;;  %v4997_v3 = vsel %vm394_vm6, %v268_v61, -1e+30 }
 0x1d1   :  { %v408_v17 = vsel %vm8360_vm0, %v4997_v3, -inf }
 0x1d3   :  { %v376_v8 = vpop.permute.xlu0 %375  ;;  %609 = vrot.lane.b32.xlu1 %v4978_v6, %s4457_s20 }
 0x1d4   :  { %v387_v12 = vadd.f32 %v376_v8, %v371_v7  ;;  %v346_v7 = vpop.permute.xlu2 %345  ;;  %v5004_v8 = vsel %vm391_vm2, %v589_v4, -1e+30 }
 0x1d5   :  { %v725_v61 = vsel %vm8360_vm0, %v5004_v8, -inf }
 0x1d6   :  { %903 = vst.msk [vmem:[%s8305_s10] sm:$0xff] %vm902_vm5, %v387_v12 }
 0x1d7   :  { %625 = vrot.lane.b32.xlu0 %v4978_v6, %s4456_s19 }
 0x1db   :  { %657 = vrot.lane.b32.xlu1 %v4978_v6, %s4460_s2  ;;  %v314_v14 = vpop.permute.xlu0 %313 }
 0x1df   :  { %673 = vrot.lane.b32.xlu0 %v4978_v6, %s4459_s22 }
 0x1e3   :  { %705 = vrot.lane.b32.xlu1 %v4978_v6, %s4461_s25 }
 0x1f2   :  { %409 = vmax.xlane.f32.xlu2 %v408_v17  ;;  %v362_v17 = vpop.permute.xlu0 %361 }
 0x1f5   :  { %v401_v22 = vpop.xlane.xlu1 %400 }
 0x1f6   :  { %v411_v49 = vsub.f32 %v4911_v30, %v401_v22 }
 0x1f8   :  { %v415_v53 = vmul.f32 1.442695, %v411_v49 }
 0x1fa   :  { %4349 = vpow2.f32 %v415_v53  ;;  %v300_v0 = vpop.permute.xlu0 %299 }
 0x200   :  { %v5008_v12 = vpop.eup %4349 }
 0x201   :  { %v423_v30 = vsel %vm8360_vm0, %v5008_v12, 0.0 }
 0x204   :  { %v404_v22 = vpop.xlane.xlu2 %403 }
 0x209   :  { %726 = vmax.xlane.f32.xlu0 %v725_v61 }
 0x20a   :  { %641 = vrot.lane.b32.xlu2 %v4978_v6, %s4455_s18 }
 0x20c   :  { %v284_v57 = vpop.permute.xlu2 %283 }
 0x20d   :  { %v282_v49 = vpop.permute.xlu1 %281  ;;  %424 = vadd.xlane.f32.xlu1 %v423_v30 }
 0x20e   :  { %v292_v10 = vadd.f32 %v282_v49, %v4887_v18 }
 0x210   :  { %v308_v4 = vadd.f32 %v298_v41, %v292_v10 }
 0x212   :  { %689 = vrot.lane.b32.xlu2 %v4978_v6, %s4458_s21  ;;  %v324_v53 = vadd.f32 %v314_v14, %v308_v4  ;;  %v293_v14 = vadd.f32 %v284_v57, %v4904_v23 }
 0x214   :  { %v332_v49 = vpop.permute.xlu2 %331 }
 0x215   :  { %v330_v55 = vpop.permute.xlu1 %329 }
 0x216   :  { %v340_v61 = vadd.f32 %v330_v55, %v324_v53  ;;  %v348_v55 = vpop.permute.xlu0 %347 }
 0x218   :  { %v356_v2 = vadd.f32 %v346_v7, %v340_v61  ;;  %v309_v7 = vadd.f32 %v300_v0, %v293_v14  ;;  %v595_v0 = vpop.f32.mrf.mxu3 }
 0x21a   :  { %627 = vrot.lane.b32.xlu2 %v5018_v45, %s4456_s19  ;;  %v372_v30 = vadd.f32 %v362_v17, %v356_v2 }
 0x21c   :  { %v380_v10 = vpop.permute.xlu2 %379 }
 0x21d   :  { %611 = vrot.lane.b32.xlu0 %v5018_v45, %s4457_s20  ;;  %v378_v18 = vpop.permute.xlu1 %377 }
 0x21e   :  { %v388_v41 = vadd.f32 %v378_v18, %v372_v30  ;;  %v407_v23 = vpop.xlane.xlu0 %406 }
 0x220   :  { %904 = vst.msk [vmem:[%s8305_s10 + $0x8] sm:$0xff] %vm902_vm5, %v388_v41  ;;  %v5044_v41 = vmul.f32 %v595_v0, %v4901_v20 }
 0x222   :  { %675 = vrot.lane.b32.xlu2 %v5018_v45, %s4459_s22 }
 0x225   :  { %659 = vrot.lane.b32.xlu0 %v5018_v45, %s4460_s2  ;;  %v316_v2 = vpop.permute.xlu1 %315 }
 0x226   :  { %v325_v17 = vadd.f32 %v316_v2, %v309_v7  ;;  %643 = vrot.lane.b32.xlu1 %v5018_v45, %s4455_s18 }
 0x228   :  { %v341_v57 = vadd.f32 %v332_v49, %v325_v17 }
 0x22a   :  { %v357_v4 = vadd.f32 %v348_v55, %v341_v57  ;;  %v318_v55 = vpop.permute.xlu2 %317 }
 0x22d   :  { %707 = vrot.lane.b32.xlu0 %v5018_v45, %s4461_s25  ;;  %v364_v53 = vpop.permute.xlu1 %363 }
 0x22e   :  { %v373_v61 = vadd.f32 %v364_v53, %v357_v4  ;;  %691 = vrot.lane.b32.xlu1 %v5018_v45, %s4458_s21 }
 0x230   :  { %v389_v30 = vadd.f32 %v380_v10, %v373_v61  ;;  %v412_v61 = vsub.f32 %v4920_v47, %v404_v22  ;;  %v413_v22 = vsub.f32 %v4931_v52, %v407_v23 }
 0x231   :  { %v286_v18 = vpop.permute.xlu0 %285 }
 0x232   :  { %905 = vst.msk [vmem:[%s8305_s10 + $0x10] sm:$0xff] %vm902_vm5, %v389_v30  ;;  %v294_v14 = vadd.f32 %v286_v18, %v4959_v63  ;;  %v366_v63 = vpop.permute.xlu2 %365 }
 0x235   :  { %645 = vrot.lane.b32.xlu0 %v5044_v41, %s4455_s18  ;;  %v302_v49 = vpop.permute.xlu1 %301 }
 0x236   :  { %v310_v7 = vadd.f32 %v302_v49, %v294_v14  ;;  %629 = vrot.lane.b32.xlu1 %v5044_v41, %s4456_s19  ;;  %v417_v14 = vmul.f32 1.442695, %v412_v61 }
 0x238   :  { %v326_v2 = vadd.f32 %v318_v55, %v310_v7  ;;  %v5062_v55 = vsel %vm392_vm3, %v592_v50, -1e+30  ;;  %4351 = vpow2.f32 %v417_v14  ;;  %v5075_v50 = vsel %vm393_vm4, %v595_v0, -1e+30 }
 0x239   :  { %v334_v17 = vpop.permute.xlu0 %333  ;;  %v728_v49 = vsel %vm8360_vm0, %v5062_v55, -inf }
 0x23a   :  { %v342_v57 = vadd.f32 %v334_v17, %v326_v2  ;;  %v419_v2 = vmul.f32 1.442695, %v413_v22 }
 0x23c   :  { %4353 = vpow2.f32 %v419_v2 }
 0x23d   :  { %693 = vrot.lane.b32.xlu0 %v5044_v41, %s4458_s21  ;;  %v350_v10 = vpop.permute.xlu1 %349 }
 0x23e   :  { %v358_v4 = vadd.f32 %v350_v10, %v342_v57  ;;  %677 = vrot.lane.b32.xlu1 %v5044_v41, %s4459_s22  ;;  %v5066_v7 = vpop.eup %4351 }
 0x23f   :  { %v426_v47 = vsel %vm8360_vm0, %v5066_v7, 0.0 }
 0x240   :  { %v374_v53 = vadd.f32 %v366_v63, %v358_v4  ;;  %v731_v4 = vsel %vm8360_vm0, %v5075_v50, -inf }
 0x241   :  { %v382_v30 = vpop.permute.xlu0 %381 }
 0x242   :  { %v390_v18 = vadd.f32 %v382_v30, %v374_v53  ;;  %v5071_v17 = vpop.eup %4353  ;;  %v8308_v30 = vmov 10  }
 0x243   :  { %v429_v10 = vsel %vm8360_vm0, %v5071_v17, 0.0  ;;  %4226 = vset.pattern.permute.xlu2 %v8308_v30 }
 0x244   :  { %906 = vst.msk [vmem:[%s8305_s10 + $0x18] sm:$0xff] %vm902_vm5, %v390_v18 }
 0x245   :  { %v610_v15 = vpop.permute.xlu1 %609 }
 0x246   :  { %v621_v52 = vadd.f32 %v610_v15, %v4978_v6  ;;  %v598_v6 = vpop.f32.mrf.mxu3 }
 0x247   :  { %v5090_v15 = vmul.f32 %v598_v6, %v4954_v60 }
 0x249   :  { %v626_v23 = vpop.permute.xlu0 %625 }
 0x24a   :  { %v637_v63 = vadd.f32 %v626_v23, %v621_v52 }
 0x24b   :  { %729 = vmax.xlane.f32.xlu2 %v728_v49 }
 0x24d   :  { %v658_v20 = vpop.permute.xlu1 %657 }
 0x251   :  { %v674_v18 = vpop.permute.xlu0 %673 }
 0x253   :  { %427 = vadd.xlane.f32.xlu2 %v426_v47 }
 0x255   :  { %v706_v22 = vpop.permute.xlu1 %705 }
 0x265   :  { %v5077_v57 = vpop.xlane.xlu2 %409 }
 0x267   :  { %430 = vadd.xlane.f32.xlu0 %v429_v10 }
 0x268   :  { %732 = vmax.xlane.f32.xlu1 %v731_v4 }
 0x26b   :  { %613 = vrot.lane.b32.xlu2 %v5044_v41, %s4457_s20 }
 0x26d   :  { %v642_v0 = vpop.permute.xlu2 %641 }
 0x26e   :  { %v653_v53 = vadd.f32 %v642_v0, %v637_v63 }
 0x270   :  { %v669_v61 = vadd.f32 %v658_v20, %v653_v53 }
 0x272   :  { %v685_v14 = vadd.f32 %v674_v18, %v669_v61 }
 0x273   :  { %661 = vrot.lane.b32.xlu2 %v5044_v41, %s4460_s2 }
 0x275   :  { %v690_v49 = vpop.permute.xlu2 %689 }
 0x276   :  { %v701_v47 = vadd.f32 %v690_v49, %v685_v14 }
 0x278   :  { %v717_v2 = vadd.f32 %v706_v22, %v701_v47 }
 0x27a   :  { %907 = vst.msk [vmem:[%s8305_s10 + $0x20] sm:$0xff] %vm902_vm5, %v717_v2 }
 0x27b   :  { %631 = vrot.lane.b32.xlu0 %v5090_v15, %s4456_s19  ;;  %709 = vrot.lane.b32.xlu2 %v5044_v41, %s4461_s25 }
 0x27c   :  { %v5106_v4 = vpop.xlane.xlu0 %726 }
 0x280   :  { %v425_v10 = vpop.xlane.xlu1 %424 }
 0x281   :  { %615 = vrot.lane.b32.xlu1 %v5090_v15, %s4457_s20  ;;  %4355 = vrcp.f32 %v425_v10  ;;  %v446_v20 = vand.u32 2147483648, %v425_v10  ;;  %v444_v53 = vand.u32 2147483647, %v425_v10  ;;  %vm440_vm8 = vweird.f32 %v425_v10  ;;  %s4478_s20 = smov 14  }
 0x283   :  { %679 = vrot.lane.b32.xlu0 %v5090_v15, %s4459_s22  ;;  %647 = vrot.lane.b32.xlu2 %v5090_v15, %s4455_s18  ;;  %v447_v14 = vor.u32 1.1754944e-38, %v446_v20  ;;  %vm445_vm10 = vcmp.eq.f32.partialorder %v444_v53, 8.507059e+37  ;;  %s4476_s18 = smov 23   ;;  %s4479_s22 = smov 19  }
 0x287   :  { %v4356_v52 = vpop.eup %4355 }
 0x288   :  { %v436_v23 = vmul.f32 %v4356_v52, %v425_v10  ;;  %vm441_vm7 = vweird.f32 %v4356_v52 }
 0x289   :  { %663 = vrot.lane.b32.xlu1 %v5090_v15, %s4460_s2  ;;  %vm442_vm9 = vmor %vm440_vm8, %vm441_vm7 }
 0x28a   :  { %v437_v63 = vsub.f32 1.0, %v436_v23  ;;  %v628_v23 = vpop.permute.xlu2 %627 }
 0x28b   :  { %695 = vrot.lane.b32.xlu2 %v5090_v15, %s4458_s21 }
 0x28c   :  { %v438_v0 = vmul.f32 %v4356_v52, %v437_v63 }
 0x28e   :  { %v439_v18 = vadd.f32 %v4356_v52, %v438_v0 }
 0x28f   :  { %v612_v61 = vpop.permute.xlu0 %611 }
 0x290   :  { %v443_v49 = vsel %vm442_vm9, %v4356_v52, %v439_v18  ;;  %v622_v22 = vadd.f32 %v612_v61, %v5018_v45  ;;  %v8404_v18 = vmov 10  }
 0x291   :  { %711 = vrot.lane.b32.xlu1 %v5090_v15, %s4461_s25  ;;  %v448_v47 = vsel %vm445_vm10, %v447_v14, %v443_v49  ;;  %v4463_v49 = vmov 11   ;;  %s4481_s25 = smov 10  }
 0x292   :  { %v449_v2 = vmul.f32 2.0, %v448_v47  ;;  %v638_v0 = vadd.f32 %v628_v23, %v622_v22  ;;  %v676_v52 = vpop.permute.xlu2 %675  ;;  %v4465_v22 = vmov 13  }
 0x293   :  { %1544 = vperm.xlu2 %4226, %v4695_v26  }
 0x294   :  { %v495_v63 = vmul.f32 %v5008_v12, %v449_v2 }
 0x296   :  { %4058 = vmatmul.msk.f32.vlgmr.msra.gmra.mxu2 %vm8360_vm0, %v495_v63  ;;  %v414_v63 = vsub.f32 %v4997_v3, %v5077_v57 }
 0x297   :  { %v660_v10 = vpop.permute.xlu0 %659 }
 0x298   :  { %v644_v30 = vpop.permute.xlu1 %643 }
 0x299   :  { %v654_v20 = vadd.f32 %v644_v30, %v638_v0  ;;  %1498 = vperm.xlu1 %4223, %v4707_v28   ;;  %v4464_v30 = vmov 12  }
 0x29b   :  { %v670_v54 = vadd.f32 %v660_v10, %v654_v20  ;;  %1556 = vperm.xlu2 %4226, %v4707_v28  }
 0x29d   :  { %v686_v53 = vadd.f32 %v676_v52, %v670_v54  ;;  %v5129_v54 = vsel %vm394_vm6, %v598_v6, -1e+30  ;;  %v4466_v6 = vmov 14   ;;  %v421_v52 = vmul.f32 1.442695, %v414_v63 }
 0x29e   :  { %v734_v47 = vsel %vm8360_vm0, %v5129_v54, -inf }
 0x29f   :  { %v708_v14 = vpop.permute.xlu0 %707 }
 0x2a0   :  { %v692_v45 = vpop.permute.xlu1 %691 }
 0x2a1   :  { %v702_v61 = vadd.f32 %v692_v45, %v686_v53  ;;  %4228 = vset.pattern.permute.xlu1 %v8404_v18  ;;  %v4467_v45 = vmov 15  }
 0x2a2   :  { %1552 = vperm.xlu1 %4228, %v4685_v24  }
 0x2a3   :  { %v718_v12 = vadd.f32 %v708_v14, %v702_v61  ;;  %4231 = vset.pattern.permute.xlu2 %v4463_v49 }
 0x2a4   :  { %1610 = vperm.xlu2 %4231, %v4685_v24  }
 0x2a5   :  { %908 = vst.msk [vmem:[%s8305_s10 + $0x28] sm:$0xff] %vm902_vm5, %v718_v12 }
 0x2a7   :  { %v646_v23 = vpop.permute.xlu0 %645 }
 0x2a8   :  { %v630_v0 = vpop.permute.xlu1 %629 }
 0x2aa   :  { %4230 = vset.pattern.permute.xlu1 %v4463_v49 }
 0x2ab   :  { %1606 = vperm.xlu1 %4230, %v4690_v25  }
 0x2ac   :  { %4233 = vset.pattern.permute.xlu2 %v4464_v30 }
 0x2ad   :  { %735 = vmax.xlane.f32.xlu0 %v734_v47  ;;  %1664 = vperm.xlu2 %4233, %v4690_v25  }
 0x2af   :  { %v694_v14 = vpop.permute.xlu0 %693 }
 0x2b3   :  { %1614 = vperm.xlu1 %4230, %v4707_v28  }
 0x2b5   :  { %4235 = vset.pattern.permute.xlu2 %v4465_v22 }
 0x2b6   :  { %1718 = vperm.xlu2 %4235, %v4695_v26  }
 0x2bb   :  { %4232 = vset.pattern.permute.xlu1 %v4464_v30 }
 0x2be   :  { %1730 = vperm.xlu2 %4235, %v4707_v28   ;;  %v5139_v60 = vpop.xlane.xlu2 %729 }
 0x2c1   :  { %1494 = vperm.xlu0 %4225, %v4685_v24  }
 0x2c6   :  { %4240 = vset.pattern.permute.xlu2 %v4466_v6  ;;  %v428_v2 = vpop.xlane.xlu2 %427 }
 0x2c7   :  { %4357 = vrcp.f32 %v428_v2  ;;  %1784 = vperm.xlu2 %4240, %v4685_v24   ;;  %v459_v3 = vand.u32 2147483647, %v428_v2  ;;  %vm455_vm12 = vweird.f32 %v428_v2 }
 0x2c8   :  { %4359 = vpow2.f32 %v421_v52 }
 0x2c9   :  { %4227 = vset.pattern.permute.xlu0 %v8404_v18  ;;  %v461_v18 = vand.u32 2147483648, %v428_v2  ;;  %vm460_vm14 = vcmp.eq.f32.partialorder %v459_v3, 8.507059e+37 }
 0x2ca   :  { %1548 = vperm.xlu0 %4227, %v4690_v25  }
 0x2cd   :  { %v4358_v28 = vpop.eup %4357 }
 0x2ce   :  { %v451_v10 = vmul.f32 %v4358_v28, %v428_v2  ;;  %v614_v20 = vpop.permute.xlu2 %613  ;;  %vm456_vm11 = vweird.f32 %v4358_v28 }
 0x2cf   :  { %v623_v53 = vadd.f32 %v614_v20, %v5044_v41  ;;  %4242 = vset.pattern.permute.xlu2 %v4467_v45  ;;  %vm457_vm13 = vmor %vm455_vm12, %vm456_vm11  ;;  %v462_v41 = vor.u32 1.1754944e-38, %v461_v18 }
 0x2d0   :  { %v452_v61 = vsub.f32 1.0, %v451_v10  ;;  %1838 = vperm.xlu2 %4242, %v4690_v25  }
 0x2d1   :  { %v639_v24 = vadd.f32 %v630_v0, %v623_v53  ;;  %v678_v0 = vpop.permute.xlu1 %677  ;;  %v4468_v53 = vmov 16  }
 0x2d2   :  { %v453_v12 = vmul.f32 %v4358_v28, %v452_v61  ;;  %4229 = vset.pattern.permute.xlu0 %v4463_v49  ;;  %v5153_v61 = vpop.eup %4359 }
 0x2d3   :  { %1602 = vperm.xlu0 %4229, %v4695_v26   ;;  %v655_v47 = vadd.f32 %v646_v23, %v639_v24  ;;  %v5158_v26 = vld [vmem:[%s8298_s3] sm:$0xff]  ;;  %v432_v24 = vsel %vm8360_vm0, %v5153_v61, 0.0 }
 0x2d4   :  { %v454_v57 = vadd.f32 %v4358_v28, %v453_v12 }
 0x2d6   :  { %v662_v63 = vpop.permute.xlu2 %661  ;;  %v458_v20 = vsel %vm457_vm13, %v4358_v28, %v454_v57  ;;  %v5165_v28 = vld [vmem:[%s8298_s3 + $0x10] sm:$0xff] }
 0x2d7   :  { %v671_v10 = vadd.f32 %v662_v63, %v655_v47  ;;  %v463_v25 = vsel %vm460_vm14, %v462_v41, %v458_v20  ;;  %v5179_v47 = vld [vmem:[%s8298_s3 + $0x8] sm:$0xff] }
 0x2d8   :  { %4244 = vset.pattern.permute.xlu2 %v4468_v53  ;;  %v464_v49 = vmul.f32 2.0, %v463_v25 }
 0x2d9   :  { %v687_v52 = vadd.f32 %v678_v0, %v671_v10  ;;  %1892 = vperm.xlu2 %4244, %v5158_v26  }
 0x2da   :  { %v431_v2 = vpop.xlane.xlu0 %430  ;;  %v496_v23 = vmul.f32 %v5066_v7, %v464_v49 }
 0x2db   :  { %4361 = vrcp.f32 %v431_v2  ;;  %4234 = vset.pattern.permute.xlu0 %v4464_v30  ;;  %v703_v18 = vadd.f32 %v694_v14, %v687_v52  ;;  %v476_v14 = vand.u32 2147483648, %v431_v2  ;;  %v474_v63 = vand.u32 2147483647, %v431_v2  ;;  %v733_v0 = vpop.xlane.xlu1 %732 }
 0x2dc   :  { %1668 = vperm.xlu0 %4234, %v5165_v28   ;;  %4059 = vmatmul.msk.f32.gmra.mxu2 %vm8360_vm0, %v496_v23  ;;  %vm470_vm2 = vweird.f32 %v431_v2 }
 0x2dd   :  { %433 = vadd.xlane.f32.xlu1 %v432_v24  ;;  %v477_v10 = vor.u32 1.1754944e-38, %v476_v14  ;;  %vm475_vm4 = vcmp.eq.f32.partialorder %v474_v63, 8.507059e+37  ;;  %v737_v24 = vsub.f32 %v5004_v8, %v5106_v4 }
 0x2de   :  { %v710_v12 = vpop.permute.xlu2 %709 }
 0x2df   :  { %v719_v3 = vadd.f32 %v710_v12, %v703_v18  ;;  %v741_v12 = vmul.f32 1.442695, %v737_v24 }
 0x2e1   :  { %v4362_v57 = vpop.eup %4361  ;;  %909 = vst.msk [vmem:[%s8305_s10 + $0x30] sm:$0xff] %vm902_vm5, %v719_v3  ;;  %4363 = vpow2.f32 %v741_v12 }
 0x2e2   :  { %v466_v7 = vmul.f32 %v4362_v57, %v431_v2  ;;  %vm471_vm15 = vweird.f32 %v4362_v57 }
 0x2e3   :  { %vm472_vm3 = vmor %vm470_vm2, %vm471_vm15 }
 0x2e4   :  { %v467_v30 = vsub.f32 1.0, %v466_v7  ;;  %4236 = vset.pattern.permute.xlu0 %v4465_v22 }
 0x2e5   :  { %1722 = vperm.xlu0 %4236, %v5179_v47  }
 0x2e6   :  { %v468_v41 = vmul.f32 %v4362_v57, %v467_v30  ;;  %v648_v7 = vpop.permute.xlu2 %647 }
 0x2e7   :  { %v5192_v4 = vpop.eup %4363 }
 0x2e8   :  { %v469_v20 = vadd.f32 %v4362_v57, %v468_v41 }
 0x2ea   :  { %v473_v25 = vsel %vm472_vm3, %v4362_v57, %v469_v20  ;;  %v749_v20 = vsel %vm8360_vm0, %v5192_v4, 0.0 }
 0x2eb   :  { %v478_v49 = vsel %vm475_vm4, %v477_v10, %v473_v25 }
 0x2ec   :  { %v479_v52 = vmul.f32 2.0, %v478_v49 }
 0x2ed   :  { %4238 = vset.pattern.permute.xlu0 %v4466_v6  ;;  %v632_v18 = vpop.permute.xlu0 %631 }
 0x2ee   :  { %1776 = vperm.xlu0 %4238, %v5158_v26   ;;  %v497_v23 = vmul.f32 %v5071_v17, %v479_v52  ;;  %v696_v63 = vpop.permute.xlu2 %695  ;;  %v739_v52 = vsub.f32 %v5075_v50, %v733_v0  ;;  %v4469_v50 = vmov 17  }
 0x2f0   :  { %4060 = vmatmul.msk.f32.gmra.mxu2 %vm8360_vm0, %v497_v23  ;;  %v745_v23 = vmul.f32 1.442695, %v739_v52 }
 0x2f2   :  { %4365 = vpow2.f32 %v745_v23 }
 0x2f3   :  { %v616_v2 = vpop.permute.xlu1 %615 }
 0x2f4   :  { %v624_v3 = vadd.f32 %v616_v2, %v5090_v15  ;;  %v5197_v15 = vld [vmem:[%s8298_s3 + $0x18] sm:$0xff] }
 0x2f5   :  { %v680_v8 = vpop.permute.xlu0 %679 }
 0x2f6   :  { %v640_v57 = vadd.f32 %v632_v18, %v624_v3  ;;  %4243 = vset.pattern.permute.xlu0 %v4467_v45  ;;  %1660 = vperm.xlu1 %4232, %v5158_v26   ;;  %v5216_v18 = vpop.permute.xlu2 %1544 }
 0x2f7   :  { %1842 = vperm.xlu0 %4243, %v5165_v28  }
 0x2f8   :  { %v656_v17 = vadd.f32 %v648_v7, %v640_v57  ;;  %v5214_v24 = vpop.eup %4365 }
 0x2fb   :  { %v664_v30 = vpop.permute.xlu1 %663 }
 0x2fc   :  { %v672_v14 = vadd.f32 %v664_v30, %v656_v17 }
 0x2fe   :  { %v688_v41 = vadd.f32 %v680_v8, %v672_v14  ;;  %1672 = vperm.xlu1 %4232, %v5197_v15  }
 0x2ff   :  { %4245 = vset.pattern.permute.xlu0 %v4468_v53 }
 0x300   :  { %v704_v10 = vadd.f32 %v696_v63, %v688_v41 }
 0x302   :  { %750 = vadd.xlane.f32.xlu2 %v749_v20 }
 0x303   :  { %v712_v25 = vpop.permute.xlu1 %711 }
 0x304   :  { %v720_v49 = vadd.f32 %v712_v25, %v704_v10 }
 0x306   :  { %910 = vst.msk [vmem:[%s8305_s10 + $0x38] sm:$0xff] %vm902_vm5, %v720_v49  ;;  %4237 = vset.pattern.permute.xlu1 %v4465_v22  ;;  %v755_v22 = vsel %vm8360_vm0, %v5214_v24, 0.0  ;;  %s4470_s10 = smov 24  }
 0x307   :  { %1726 = vperm.xlu1 %4237, %v5165_v28  }
 0x30b   :  { %v5226_v0 = vpop.permute.xlu1 %1498 }
 0x30c   :  { %8406 = vst [vmem:[#allocation33_spill] sm:$0xff] %v5226_v0 }
 0x30f   :  { %4239 = vset.pattern.permute.xlu1 %v4466_v6  ;;  %v5223_v6 = vpop.permute.xlu2 %1556 }
 0x310   :  { %1780 = vperm.xlu1 %4239, %v5179_v47   ;;  %8405 = vst [vmem:[#allocation32_spill] sm:$0xff] %v5223_v6 }
 0x317   :  { %v5229_v2 = vpop.permute.xlu2 %1610 }
 0x318   :  { %1788 = vperm.xlu1 %4239, %v5197_v15   ;;  %8407 = vst [vmem:[#allocation34_spill] sm:$0xff] %v5229_v2 }
 0x31a   :  { %1904 = vperm.xlu2 %4244, %v5197_v15  }
 0x31f   :  { %v5235_v57 = vpop.permute.xlu2 %1664 }
 0x320   :  { %4241 = vset.pattern.permute.xlu1 %v4467_v45  ;;  %v5231_v45 = vpop.permute.xlu1 %1552  ;;  %v736_v12 = vpop.xlane.xlu0 %735  ;;  %8409 = vst [vmem:[#allocation36_spill] sm:$0xff] %v5235_v57 }
 0x321   :  { %756 = vadd.xlane.f32.xlu0 %v755_v22  ;;  %1834 = vperm.xlu1 %4241, %v5158_v26   ;;  %8408 = vst [vmem:[#allocation35_spill] sm:$0xff] %v5231_v45  ;;  %v740_v3 = vsub.f32 %v5129_v54, %v736_v12 }
 0x322   :  { %4249 = vset.pattern.permute.xlu2 %v4469_v50 }
 0x323   :  { %1958 = vperm.xlu2 %4249, %v5165_v28   ;;  %v747_v17 = vmul.f32 1.442695, %v740_v3 }
 0x325   :  { %4367 = vpow2.f32 %v747_v17 }
 0x327   :  { %v5242_v14 = vpop.permute.xlu2 %1718 }
 0x328   :  { %v5237_v7 = vpop.permute.xlu1 %1606  ;;  %8411 = vst [vmem:[#allocation38_spill] sm:$0xff] %v5242_v14 }
 0x329   :  { %1846 = vperm.xlu1 %4241, %v5197_v15   ;;  %8410 = vst [vmem:[#allocation37_spill] sm:$0xff] %v5237_v7 }
 0x32b   :  { %v5244_v8 = vpop.eup %4367 }
 0x32c   :  { %v758_v54 = vsel %vm8360_vm0, %v5244_v8, 0.0 }
 0x330   :  { %v5246_v41 = vpop.permute.xlu1 %1614 }
 0x331   :  { %4246 = vset.pattern.permute.xlu1 %v4468_v53  ;;  %v738_v53 = vsub.f32 %v5062_v55, %v5139_v60  ;;  %8412 = vst [vmem:[#allocation39_spill] sm:$0xff] %v5246_v41 }
 0x333   :  { %v743_v30 = vmul.f32 1.442695, %v738_v53 }
 0x335   :  { %1896 = vperm.xlu0 %4245, %v5179_v47   ;;  %4369 = vpow2.f32 %v743_v30 }
 0x33b   :  { %v5250_v63 = vpop.eup %4369 }
 0x33c   :  { %v752_v55 = vsel %vm8360_vm0, %v5250_v63, 0.0 }
 0x33d   :  { %4247 = vset.pattern.permute.xlu0 %v4469_v50 }
 0x33e   :  { %1950 = vperm.xlu0 %4247, %v5158_v26   ;;  %v5252_v26 = vpop.permute.xlu2 %1730 }
 0x33f   :  { %8413 = vst [vmem:[#allocation40_spill] sm:$0xff] %v5252_v26 }
 0x346   :  { %v5256_v25 = vpop.permute.xlu2 %1784 }
 0x347   :  { %8414 = vst [vmem:[#allocation41_spill] sm:$0xff] %v5256_v25 }
 0x34c   :  { %759 = vadd.xlane.f32.xlu2 %v758_v54 }
 0x34e   :  { %v5258_v54 = vpop.permute.xlu2 %1838 }
 0x34f   :  { %8415 = vst [vmem:[#allocation42_spill] sm:$0xff] %v5258_v54 }
 0x350   :  { %v434_v20 = vpop.xlane.xlu1 %433 }
 0x351   :  { %4371 = vrcp.f32 %v434_v20  ;;  %v491_v52 = vand.u32 2147483648, %v434_v20  ;;  %v489_v22 = vand.u32 2147483647, %v434_v20  ;;  %vm485_vm6 = vweird.f32 %v434_v20 }
 0x353   :  { %753 = vadd.xlane.f32.xlu1 %v752_v55  ;;  %v492_v3 = vor.u32 1.1754944e-38, %v491_v52  ;;  %vm490_vm8 = vcmp.eq.f32.partialorder %v489_v22, 8.507059e+37 }
 0x357   :  { %v4372_v60 = vpop.eup %4371 }
 0x358   :  { %v481_v10 = vmul.f32 %v4372_v60, %v434_v20  ;;  %vm486_vm5 = vweird.f32 %v4372_v60  ;;  %v5266_v20 = vpop.permute.xlu0 %1494 }
 0x359   :  { %vm487_vm7 = vmor %vm485_vm6, %vm486_vm5  ;;  %8417 = vst [vmem:[#allocation44_spill] sm:$0xff] %v5266_v20 }
 0x35a   :  { %v482_v49 = vsub.f32 1.0, %v481_v10  ;;  %v5263_v10 = vpop.permute.xlu2 %1892 }
 0x35b   :  { %8416 = vst [vmem:[#allocation43_spill] sm:$0xff] %v5263_v10 }
 0x35c   :  { %v483_v23 = vmul.f32 %v4372_v60, %v482_v49 }
 0x35e   :  { %v484_v12 = vadd.f32 %v4372_v60, %v483_v23 }
 0x360   :  { %v488_v17 = vsel %vm487_vm7, %v4372_v60, %v484_v12  ;;  %v5269_v22 = vpop.permute.xlu0 %1548 }
 0x361   :  { %v493_v53 = vsel %vm490_vm8, %v492_v3, %v488_v17  ;;  %8418 = vst [vmem:[#allocation45_spill] sm:$0xff] %v5269_v22 }
 0x362   :  { %v494_v30 = vmul.f32 2.0, %v493_v53 }
 0x364   :  { %v498_v55 = vmul.f32 %v5153_v61, %v494_v30 }
 0x366   :  { %4061 = vmatmul.msk.f32.gmra.mxu2 %vm8360_vm0, %v498_v55 }
 0x368   :  { %v5271_v3 = vpop.permute.xlu1 %1660  ;;  %v5274_v26 = vpop.permute.xlu0 %1602 }
 0x369   :  { %8419 = vst [vmem:[#allocation46_spill] sm:$0xff] %v5271_v3 }
 0x36c   :  { %1900 = vperm.xlu1 %4246, %v5165_v28  }
 0x374   :  { %4248 = vset.pattern.permute.xlu1 %v4469_v50 }
 0x375   :  { %v751_v49 = vpop.xlane.xlu2 %750  ;;  %1954 = vperm.xlu1 %4248, %v5179_v47  }
 0x376   :  { %4373 = vrcp.f32 %v751_v49  ;;  %v772_v61 = vand.u32 2147483648, %v751_v49  ;;  %v770_v28 = vand.u32 2147483647, %v751_v49  ;;  %vm766_vm10 = vweird.f32 %v751_v49 }
 0x378   :  { %v773_v47 = vor.u32 1.1754944e-38, %v772_v61  ;;  %vm771_vm12 = vcmp.eq.f32.partialorder %v770_v28, 8.507059e+37 }
 0x37c   :  { %v4374_v60 = vpop.eup %4373 }
 0x37d   :  { %v762_v52 = vmul.f32 %v4374_v60, %v751_v49  ;;  %1962 = vperm.xlu1 %4248, %v5197_v15   ;;  %vm767_vm9 = vweird.f32 %v4374_v60 }
 0x37e   :  { %vm768_vm11 = vmor %vm766_vm10, %vm767_vm9 }
 0x37f   :  { %v763_v23 = vsub.f32 1.0, %v762_v52  ;;  %v5277_v52 = vpop.permute.xlu1 %1672 }
 0x380   :  { %8420 = vst [vmem:[#allocation47_spill] sm:$0xff] %v5277_v52 }
 0x381   :  { %v764_v12 = vmul.f32 %v4374_v60, %v763_v23  ;;  %v5279_v23 = vpop.permute.xlu0 %1668 }
 0x382   :  { %8421 = vst [vmem:[#allocation48_spill] sm:$0xff] %v5279_v23 }
 0x383   :  { %v765_v50 = vadd.f32 %v4374_v60, %v764_v12 }
 0x385   :  { %v769_v17 = vsel %vm768_vm11, %v4374_v60, %v765_v50  ;;  %vm958_vm11 = vcmask 220160  }
 0x386   :  { %v774_v53 = vsel %vm771_vm12, %v773_v47, %v769_v17  ;;  %vm1074_vm12 = vcmask 203776  }
 0x387   :  { %v775_v30 = vmul.f32 2.0, %v774_v53  ;;  %v5281_v54 = vpop.permute.xlu1 %1726 }
 0x388   :  { %8422 = vst [vmem:[#allocation49_spill] sm:$0xff] %v5281_v54 }
 0x389   :  { %v821_v55 = vmul.f32 %v5192_v4, %v775_v30  ;;  %v5283_v12 = vpop.permute.xlu0 %1722  ;;  %v5293_v4 = vpop.permute.xlu2 %1904 }
 0x38a   :  { %8423 = vst [vmem:[#allocation50_spill] sm:$0xff] %v5283_v12 }
 0x38b   :  { %4070 = vmatmul.msk.f32.vlgmr.msrb.gmra.mxu2 %vm8360_vm0, %v821_v55  ;;  %8428 = vst [vmem:[#allocation55_spill] sm:$0xff] %v5293_v4 }
 0x38f   :  { %v5285_v49 = vpop.permute.xlu1 %1780 }
 0x390   :  { %8424 = vst [vmem:[#allocation51_spill] sm:$0xff] %v5285_v49 }
 0x391   :  { %v5287_v60 = vpop.permute.xlu0 %1776  ;;  %v5297_v47 = vpop.permute.xlu2 %1958 }
 0x392   :  { %8425 = vst [vmem:[#allocation52_spill] sm:$0xff] %v5287_v60 }
 0x393   :  { %8430 = vst [vmem:[#allocation57_spill] sm:$0xff] %v5297_v47 }
 0x397   :  { %v5289_v61 = vpop.permute.xlu1 %1788 }
 0x398   :  { %8426 = vst [vmem:[#allocation53_spill] sm:$0xff] %v5289_v61 }
 0x399   :  { %v5291_v28 = vpop.permute.xlu0 %1842 }
 0x39a   :  { %8427 = vst [vmem:[#allocation54_spill] sm:$0xff] %v5291_v28 }
 0x39f   :  { %v5295_v50 = vpop.permute.xlu1 %1834 }
 0x3a0   :  { %8429 = vst [vmem:[#allocation56_spill] sm:$0xff] %v5295_v50 }
 0x3a1   :  { %v757_v17 = vpop.xlane.xlu0 %756 }
 0x3a2   :  { %4375 = vrcp.f32 %v757_v17  ;;  %v802_v0 = vand.u32 2147483648, %v757_v17  ;;  %vm796_vm4 = vweird.f32 %v757_v17 }
 0x3a7   :  { %v5299_v53 = vpop.permute.xlu1 %1846 }
 0x3a8   :  { %8431 = vst [vmem:[#allocation58_spill] sm:$0xff] %v5299_v53  ;;  %v4376_v55 = vpop.eup %4375 }
 0x3a9   :  { %v792_v49 = vmul.f32 %v4376_v55, %v757_v17  ;;  %vm797_vm14 = vweird.f32 %v4376_v55 }
 0x3aa   :  { %vm798_vm5 = vmor %vm796_vm4, %vm797_vm14  ;;  %vm1190_vm14 = vcmask 187392   ;;  %vm1422_vm4 = vcmask 146432  }
 0x3ab   :  { %v793_v61 = vsub.f32 1.0, %v792_v49  ;;  %v800_v49 = vand.u32 2147483647, %v757_v17 }
 0x3ad   :  { %v794_v12 = vmul.f32 %v4376_v55, %v793_v61  ;;  %vm801_vm6 = vcmp.eq.f32.partialorder %v800_v49, 8.507059e+37  ;;  %v5379_v49 = vpop.permute.xlu0 %1896 }
 0x3ae   :  { %8435 = vst [vmem:[#allocation62_spill] sm:$0xff] %v5379_v49 }
 0x3af   :  { %v795_v57 = vadd.f32 %v4376_v55, %v794_v12 }
 0x3b1   :  { %v799_v45 = vsel %vm798_vm5, %v4376_v55, %v795_v57  ;;  %vm1480_vm5 = vcmask 138240  }
 0x3bf   :  { %v760_v30 = vpop.xlane.xlu2 %759 }
 0x3c0   :  { %4377 = vrcp.f32 %v760_v30  ;;  %vm811_vm8 = vweird.f32 %v760_v30 }
 0x3c6   :  { %v754_v25 = vpop.xlane.xlu1 %753  ;;  %v4378_v52 = vpop.eup %4377 }
 0x3c7   :  { %4379 = vrcp.f32 %v754_v25  ;;  %v807_v4 = vmul.f32 %v4378_v52, %v760_v30  ;;  %v787_v54 = vand.u32 2147483648, %v754_v25  ;;  %v785_v47 = vand.u32 2147483647, %v754_v25 }
 0x3c8   :  { %vm781_vm15 = vweird.f32 %v754_v25  ;;  %vm812_vm7 = vweird.f32 %v4378_v52 }
 0x3c9   :  { %v808_v53 = vsub.f32 1.0, %v807_v4  ;;  %v788_v2 = vor.u32 1.1754944e-38, %v787_v54  ;;  %vm786_vm3 = vcmp.eq.f32.partialorder %v785_v47, 8.507059e+37  ;;  %v817_v54 = vand.u32 2147483648, %v760_v30  ;;  %vm813_vm9 = vmor %vm811_vm8, %vm812_vm7 }
 0x3ca   :  { %vm1596_vm7 = vcmask 121856   ;;  %vm1654_vm8 = vcmask 113664  }
 0x3cb   :  { %v809_v61 = vmul.f32 %v4378_v52, %v808_v53 }
 0x3cd   :  { %v4380_v41 = vpop.eup %4379 }
 0x3ce   :  { %v777_v28 = vmul.f32 %v4380_v41, %v754_v25  ;;  %vm782_vm13 = vweird.f32 %v4380_v41  ;;  %v810_v25 = vadd.f32 %v4378_v52, %v809_v61 }
 0x3cf   :  { %vm783_vm2 = vmor %vm781_vm15, %vm782_vm13  ;;  %vm1132_vm13 = vcmask 195584   ;;  %vm1248_vm15 = vcmask 179200  }
 0x3d0   :  { %v778_v10 = vsub.f32 1.0, %v777_v28 }
 0x3d2   :  { %v779_v23 = vmul.f32 %v4380_v41, %v778_v10  ;;  %v803_v10 = vor.u32 1.1754944e-38, %v802_v0 }
 0x3d4   :  { %v780_v6 = vadd.f32 %v4380_v41, %v779_v23  ;;  %v804_v4 = vsel %vm801_vm6, %v803_v10, %v799_v45  ;;  %vm1538_vm6 = vcmask 130048  }
 0x3d5   :  { %v805_v23 = vmul.f32 2.0, %v804_v4 }
 0x3d6   :  { %v784_v7 = vsel %vm783_vm2, %v4380_v41, %v780_v6  ;;  %v815_v6 = vand.u32 2147483647, %v760_v30  ;;  %v814_v41 = vsel %vm813_vm9, %v4378_v52, %v810_v25  ;;  %vm1306_vm2 = vcmask 171008  }
 0x3d7   :  { %v789_v22 = vsel %vm786_vm3, %v788_v2, %v784_v7  ;;  %v818_v2 = vor.u32 1.1754944e-38, %v817_v54  ;;  %v823_v7 = vmul.f32 %v5214_v24, %v805_v23  ;;  %vm1364_vm3 = vcmask 154624  }
 0x3d8   :  { %v790_v28 = vmul.f32 2.0, %v789_v22  ;;  %vm816_vm10 = vcmp.eq.f32.partialorder %v815_v6, 8.507059e+37  ;;  %vm1770_vm9 = vcmask 89088  }
 0x3d9   :  { %v819_v57 = vsel %vm816_vm10, %v818_v2, %v814_v41  ;;  %vm1712_vm10 = vcmask 105472  }
 0x3da   :  { %v822_v20 = vmul.f32 %v5250_v63, %v790_v28  ;;  %v820_v0 = vmul.f32 2.0, %v819_v57  ;;  %v528_v63 = vpop.f32.mrf.mxu2  ;;  %v5391_v28 = vpop.permute.xlu0 %1950 }
 0x3db   :  { %8437 = vst [vmem:[#allocation64_spill] sm:$0xff] %v5391_v28 }
 0x3dc   :  { %4071 = vmatmul.msk.f32.gmra.mxu2 %vm8360_vm0, %v822_v20  ;;  %v824_v45 = vmul.f32 %v5244_v8, %v820_v0 }
 0x3de   :  { %v5377_v55 = vpop.permute.xlu1 %1900 }
 0x3df   :  { %8434 = vst [vmem:[#allocation61_spill] sm:$0xff] %v5377_v55 }
 0x3e2   :  { %v5307_v20 = vpop.f32.mrf.mxu2 }
 0x3e4   :  { %4072 = vmatmul.msk.f32.gmra.mxu2 %vm8360_vm0, %v823_v7 }
 0x3e7   :  { %v5385_v61 = vpop.permute.xlu1 %1954 }
 0x3e8   :  { %8436 = vst [vmem:[#allocation63_spill] sm:$0xff] %v5385_v61 }
 0x3ea   :  { %v5309_v22 = vpop.f32.mrf.mxu2 }
 0x3ec   :  { %4073 = vmatmul.msk.f32.gmra.mxu2 %vm8360_vm0, %v824_v45  ;;  %vm1828_vm0 = vcmask 80896  }
 0x3ef   :  { %v5399_v4 = vpop.permute.xlu1 %1962 }
 0x3f0   :  { %8438 = vst [vmem:[#allocation65_spill] sm:$0xff] %v5399_v4 }
 0x3f2   :  { %v5311_v12 = vpop.f32.mrf.mxu2 }
 0x40e   :  { %v870_v52 = vpop.f32.mrf.mxu2 }
 0x40f   :  { %886 = vrot.lane.b32.xlu2 %v870_v52, %s4452_s1 }
 0x45f   :  { %v873_v24 = vpop.f32.mrf.mxu2 }
 0x460   :  { %888 = vrot.lane.b32.xlu0 %v873_v24, %s4452_s1 }
 0x467   :  { %v876_v47 = vpop.f32.mrf.mxu2 }
 0x468   :  { %890 = vrot.lane.b32.xlu1 %v876_v47, %s4452_s1 }
 0x469   :  { %v887_v17 = vpop.permute.xlu2 %886 }
 0x46a   :  { %v5317_v8 = vsel %vm217_vm1, %v528_v63, %v887_v17 }
 0x46b   :  { %8432 = vst [vmem:[#allocation59_spill] sm:$0xff] %v5317_v8  ;;  %1120 = vrot.lane.b32.xlu0 %v5317_v8, %s4470_s10  ;;  %v5355_v30 = vmul.f32 0.0, %v5317_v8 }
 0x46d   :  { %8433 = vst [vmem:[#allocation60_spill] sm:$0xff] %v5355_v30 }
 0x46f   :  { %v879_v53 = vpop.f32.mrf.mxu2 }
 0x470   :  { %946 = vrot.lane.b32.xlu1 %v5317_v8, %s4471_s14  ;;  %892 = vrot.lane.b32.xlu2 %v879_v53, %s4452_s1  ;;  %s4477_s1 = smov 22  }
 0x473   :  { %1294 = vrot.lane.b32.xlu0 %v5317_v8, %s4472_s15 }
 0x478   :  { %1004 = vrot.lane.b32.xlu1 %v5317_v8, %s4473_s16  ;;  %1062 = vrot.lane.b32.xlu2 %v5317_v8, %s4474_s17 }
 0x47b   :  { %1468 = vrot.lane.b32.xlu0 %v5317_v8, %s4475_s23 }
 0x480   :  { %1178 = vrot.lane.b32.xlu1 %v5317_v8, %s4476_s18  ;;  %1236 = vrot.lane.b32.xlu2 %v5317_v8, %s4477_s1 }
 0x483   :  { %1642 = vrot.lane.b32.xlu0 %v5317_v8, %s4478_s20 }
 0x488   :  { %1352 = vrot.lane.b32.xlu1 %v5317_v8, %s4479_s22  ;;  %1410 = vrot.lane.b32.xlu2 %v5317_v8, %s4480_s24 }
 0x48b   :  { %1816 = vrot.lane.b32.xlu0 %v5317_v8, %s4481_s25 }
 0x490   :  { %1526 = vrot.lane.b32.xlu1 %v5317_v8, %s4482_s26  ;;  %1584 = vrot.lane.b32.xlu2 %v5317_v8, %s4483_s27 }
 0x493   :  { %1990 = vrot.lane.b32.xlu0 %v5317_v8, %s4484_s28 }
 0x498   :  { %1700 = vrot.lane.b32.xlu1 %v5317_v8, %s4485_s29  ;;  %1758 = vrot.lane.b32.xlu2 %v5317_v8, %s4486_s8 }
 0x49b   :  { %930 = vrot.lane.b32.xlu0 %v5355_v30, %s4471_s14 }
 0x4a0   :  { %1874 = vrot.lane.b32.xlu1 %v5317_v8, %s4487_s30  ;;  %1932 = vrot.lane.b32.xlu2 %v5317_v8, %s4488_s11 }
 0x4a3   :  { %992 = vrot.lane.b32.xlu0 %v5355_v30, %s4473_s16 }
 0x4a8   :  { %1050 = vrot.lane.b32.xlu1 %v5355_v30, %s4474_s17  ;;  %1108 = vrot.lane.b32.xlu2 %v5355_v30, %s4470_s10 }
 0x4b0   :  { %1224 = vrot.lane.b32.xlu1 %v5355_v30, %s4477_s1  ;;  %1166 = vrot.lane.b32.xlu2 %v5355_v30, %s4476_s18 }
 0x4b8   :  { %1398 = vrot.lane.b32.xlu1 %v5355_v30, %s4480_s24  ;;  %1282 = vrot.lane.b32.xlu2 %v5355_v30, %s4472_s15 }
 0x4c0   :  { %1572 = vrot.lane.b32.xlu1 %v5355_v30, %s4483_s27  ;;  %1340 = vrot.lane.b32.xlu2 %v5355_v30, %s4479_s22 }
 0x4c8   :  { %1746 = vrot.lane.b32.xlu1 %v5355_v30, %s4486_s8  ;;  %1456 = vrot.lane.b32.xlu2 %v5355_v30, %s4475_s23 }
 0x4ca   :  { %v5393_v10 = vpop.permute.xlu2 %892 }
 0x4cb   :  { %v5709_v16 = vsel %vm217_vm1, %v5311_v12, %v5393_v10 }
 0x4d0   :  { %1920 = vrot.lane.b32.xlu1 %v5355_v30, %s4488_s11  ;;  %1514 = vrot.lane.b32.xlu2 %v5355_v30, %s4482_s26 }
 0x4d2   :  { %v5401_v25 = vpop.permute.xlu2 %1062  ;;  %v889_v54 = vpop.permute.xlu0 %888 }
 0x4d3   :  { %v5405_v23 = vsel %vm217_vm1, %v5307_v20, %v889_v54 }
 0x4d4   :  { %8439 = vst [vmem:[#allocation66_spill] sm:$0xff] %v5405_v23  ;;  %1064 = vrot.lane.b32.xlu0 %v5405_v23, %s4474_s17  ;;  %v5472_v54 = vmul.f32 0.0, %v5405_v23 }
 0x4d6   :  { %8442 = vst [vmem:[#allocation69_spill] sm:$0xff] %v5472_v54 }
 0x4d8   :  { %1630 = vrot.lane.b32.xlu2 %v5355_v30, %s4478_s20  ;;  %1122 = vrot.lane.b32.xlu1 %v5405_v23, %s4470_s10 }
 0x4da   :  { %v5413_v6 = vpop.permute.xlu1 %890  ;;  %v5415_v41 = vpop.permute.xlu2 %1236 }
 0x4dc   :  { %1238 = vrot.lane.b32.xlu0 %v5405_v23, %s4477_s1 }
 0x4dd   :  { %v5449_v20 = vpop.permute.xlu0 %1120 }
 0x4e0   :  { %1688 = vrot.lane.b32.xlu2 %v5355_v30, %s4485_s29  ;;  %1296 = vrot.lane.b32.xlu1 %v5405_v23, %s4472_s15 }
 0x4e2   :  { %v5423_v2 = vpop.permute.xlu1 %946  ;;  %v5425_v7 = vpop.permute.xlu2 %1410 }
 0x4e4   :  { %1412 = vrot.lane.b32.xlu0 %v5405_v23, %s4480_s24 }
 0x4e5   :  { %v5465_v47 = vpop.permute.xlu0 %1294 }
 0x4e8   :  { %1804 = vrot.lane.b32.xlu2 %v5355_v30, %s4481_s25  ;;  %1470 = vrot.lane.b32.xlu1 %v5405_v23, %s4475_s23 }
 0x4ea   :  { %v5433_v57 = vpop.permute.xlu1 %1004  ;;  %v5435_v0 = vpop.permute.xlu2 %1584 }
 0x4ec   :  { %1586 = vrot.lane.b32.xlu0 %v5405_v23, %s4483_s27 }
 0x4ed   :  { %v5484_v49 = vpop.permute.xlu0 %1468 }
 0x4f0   :  { %1862 = vrot.lane.b32.xlu2 %v5355_v30, %s4487_s30  ;;  %1644 = vrot.lane.b32.xlu1 %v5405_v23, %s4478_s20 }
 0x4f2   :  { %v5443_v45 = vpop.permute.xlu1 %1178  ;;  %v5445_v63 = vpop.permute.xlu2 %1758 }
 0x4f3   :  { %8440 = vst [vmem:[#allocation67_spill] sm:$0xff] %v5445_v63 }
 0x4f4   :  { %1760 = vrot.lane.b32.xlu0 %v5405_v23, %s4486_s8 }
 0x4f8   :  { %1978 = vrot.lane.b32.xlu2 %v5355_v30, %s4484_s28  ;;  %1818 = vrot.lane.b32.xlu1 %v5405_v23, %s4481_s25 }
 0x4fa   :  { %v5455_v52 = vpop.permute.xlu1 %1352  ;;  %v5457_v24 = vpop.permute.xlu2 %1932 }
 0x4fb   :  { %8441 = vst [vmem:[#allocation68_spill] sm:$0xff] %v5457_v24  ;;  %v5498_v24 = vpop.permute.xlu0 %1642 }
 0x4fc   :  { %1934 = vrot.lane.b32.xlu0 %v5405_v23, %s4488_s11 }
 0x500   :  { %1992 = vrot.lane.b32.xlu1 %v5405_v23, %s4484_s28  ;;  %948 = vrot.lane.b32.xlu2 %v5405_v23, %s4471_s14 }
 0x502   :  { %v5467_v17 = vpop.permute.xlu1 %1526  ;;  %v5469_v53 = vpop.permute.xlu2 %1108 }
 0x504   :  { %1110 = vrot.lane.b32.xlu0 %v5472_v54, %s4470_s10 }
 0x508   :  { %1006 = vrot.lane.b32.xlu2 %v5405_v23, %s4473_s16  ;;  %932 = vrot.lane.b32.xlu1 %v5472_v54, %s4471_s14 }
 0x50a   :  { %v5480_v4 = vpop.permute.xlu1 %1700  ;;  %v5482_v61 = vpop.permute.xlu2 %1166 }
 0x50b   :  { %8443 = vst [vmem:[#allocation70_spill] sm:$0xff] %v5480_v4 }
 0x50c   :  { %1284 = vrot.lane.b32.xlu0 %v5472_v54, %s4472_s15 }
 0x510   :  { %1180 = vrot.lane.b32.xlu2 %v5405_v23, %s4476_s18  ;;  %994 = vrot.lane.b32.xlu1 %v5472_v54, %s4473_s16 }
 0x512   :  { %v5492_v55 = vpop.permute.xlu1 %1874  ;;  %v5494_v28 = vpop.permute.xlu2 %1282 }
 0x513   :  { %8444 = vst [vmem:[#allocation71_spill] sm:$0xff] %v5492_v55  ;;  %v5510_v55 = vpop.permute.xlu0 %1816 }
 0x514   :  { %1458 = vrot.lane.b32.xlu0 %v5472_v54, %s4475_s23  ;;  %8445 = vst [vmem:[#allocation72_spill] sm:$0xff] %v5510_v55 }
 0x518   :  { %1354 = vrot.lane.b32.xlu2 %v5405_v23, %s4479_s22  ;;  %1168 = vrot.lane.b32.xlu1 %v5472_v54, %s4476_s18 }
 0x51a   :  { %v5504_v1 = vpop.permute.xlu1 %1050  ;;  %v5506_v62 = vpop.permute.xlu2 %1340 }
 0x51b   :  { %v5526_v35 = vpop.permute.xlu0 %1990 }
 0x51c   :  { %1632 = vrot.lane.b32.xlu0 %v5472_v54, %s4478_s20  ;;  %8446 = vst [vmem:[#allocation73_spill] sm:$0xff] %v5526_v35  ;;  %v5545_v35 = vsel %vm217_vm1, %v5309_v22, %v5413_v6  ;;  %vm1016_vm1 = vcmask 211968  }
 0x51d   :  { %8447 = vst [vmem:[#allocation74_spill] sm:$0xff] %v5545_v35  ;;  %v5632_v4 = vmul.f32 0.0, %v5545_v35 }
 0x520   :  { %1528 = vrot.lane.b32.xlu2 %v5405_v23, %s4482_s26  ;;  %1342 = vrot.lane.b32.xlu1 %v5472_v54, %s4479_s22 }
 0x522   :  { %v5516_v32 = vpop.permute.xlu1 %1224  ;;  %v5518_v38 = vpop.permute.xlu2 %1456 }
 0x523   :  { %v5547_v55 = vpop.permute.xlu0 %930 }
 0x524   :  { %1806 = vrot.lane.b32.xlu0 %v5472_v54, %s4481_s25 }
 0x528   :  { %1702 = vrot.lane.b32.xlu2 %v5405_v23, %s4485_s29  ;;  %1516 = vrot.lane.b32.xlu1 %v5472_v54, %s4482_s26 }
 0x52a   :  { %v5528_v50 = vpop.permute.xlu1 %1398  ;;  %v5530_v36 = vpop.permute.xlu2 %1514 }
 0x52b   :  { %v5561_v22 = vpop.permute.xlu0 %992 }
 0x52c   :  { %1980 = vrot.lane.b32.xlu0 %v5472_v54, %s4484_s28 }
 0x530   :  { %1876 = vrot.lane.b32.xlu2 %v5405_v23, %s4487_s30  ;;  %1690 = vrot.lane.b32.xlu1 %v5472_v54, %s4485_s29 }
 0x532   :  { %v5538_v29 = vpop.permute.xlu1 %1572  ;;  %v5540_v59 = vpop.permute.xlu2 %1630 }
 0x534   :  { %950 = vrot.lane.b32.xlu0 %v5545_v35, %s4471_s14 }
 0x538   :  { %1052 = vrot.lane.b32.xlu2 %v5472_v54, %s4474_s17  ;;  %1864 = vrot.lane.b32.xlu1 %v5472_v54, %s4487_s30 }
 0x53a   :  { %v5555_v39 = vpop.permute.xlu1 %1746  ;;  %v5557_v40 = vpop.permute.xlu2 %1688 }
 0x53b   :  { %8448 = vst [vmem:[#allocation75_spill] sm:$0xff] %v5555_v39  ;;  %v5772_v39 = vmul.f32 0.0, %v5709_v16 }
 0x53c   :  { %8449 = vst [vmem:[#allocation76_spill] sm:$0xff] %v5557_v40  ;;  %1008 = vrot.lane.b32.xlu0 %v5545_v35, %s4473_s16 }
 0x540   :  { %1226 = vrot.lane.b32.xlu2 %v5472_v54, %s4477_s1  ;;  %1066 = vrot.lane.b32.xlu1 %v5545_v35, %s4474_s17 }
 0x542   :  { %v5567_v6 = vpop.permute.xlu1 %1920  ;;  %v5569_v9 = vpop.permute.xlu2 %1804 }
 0x543   :  { %8450 = vst [vmem:[#allocation77_spill] sm:$0xff] %v5567_v6 }
 0x544   :  { %8451 = vst [vmem:[#allocation78_spill] sm:$0xff] %v5569_v9  ;;  %1182 = vrot.lane.b32.xlu0 %v5545_v35, %s4476_s18 }
 0x546   :  { %v5573_v42 = vpop.permute.xlu0 %1064 }
 0x548   :  { %1400 = vrot.lane.b32.xlu2 %v5472_v54, %s4480_s24  ;;  %1240 = vrot.lane.b32.xlu1 %v5545_v35, %s4477_s1 }
 0x54a   :  { %v5579_v43 = vpop.permute.xlu2 %1862  ;;  %v5581_v14 = vpop.permute.xlu1 %1122 }
 0x54b   :  { %8452 = vst [vmem:[#allocation79_spill] sm:$0xff] %v5579_v43 }
 0x54c   :  { %8453 = vst [vmem:[#allocation80_spill] sm:$0xff] %v5581_v14  ;;  %1356 = vrot.lane.b32.xlu0 %v5545_v35, %s4479_s22 }
 0x54e   :  { %v5585_v6 = vpop.permute.xlu0 %1238 }
 0x54f   :  { %8454 = vst [vmem:[#allocation81_spill] sm:$0xff] %v5585_v6 }
 0x550   :  { %1574 = vrot.lane.b32.xlu2 %v5472_v54, %s4483_s27  ;;  %1414 = vrot.lane.b32.xlu1 %v5545_v35, %s4480_s24 }
 0x552   :  { %v5591_v9 = vpop.permute.xlu2 %1978  ;;  %v5593_v13 = vpop.permute.xlu1 %1296 }
 0x553   :  { %8455 = vst [vmem:[#allocation82_spill] sm:$0xff] %v5591_v9 }
 0x554   :  { %8456 = vst [vmem:[#allocation83_spill] sm:$0xff] %v5593_v13  ;;  %1530 = vrot.lane.b32.xlu0 %v5545_v35, %s4482_s26 }
 0x556   :  { %v5597_v43 = vpop.permute.xlu0 %1412 }
 0x557   :  { %8457 = vst [vmem:[#allocation84_spill] sm:$0xff] %v5597_v43 }
 0x558   :  { %1748 = vrot.lane.b32.xlu2 %v5472_v54, %s4486_s8  ;;  %1588 = vrot.lane.b32.xlu1 %v5545_v35, %s4483_s27 }
 0x55a   :  { %v5603_v6 = vpop.permute.xlu1 %1470  ;;  %v5605_v19 = vpop.permute.xlu2 %948 }
 0x55b   :  { %8458 = vst [vmem:[#allocation85_spill] sm:$0xff] %v5603_v6 }
 0x55c   :  { %1704 = vrot.lane.b32.xlu0 %v5545_v35, %s4485_s29 }
 0x55e   :  { %v5609_v9 = vpop.permute.xlu0 %1586 }
 0x55f   :  { %8459 = vst [vmem:[#allocation86_spill] sm:$0xff] %v5609_v9 }
 0x560   :  { %1922 = vrot.lane.b32.xlu2 %v5472_v54, %s4488_s11  ;;  %1762 = vrot.lane.b32.xlu1 %v5545_v35, %s4486_s8 }
 0x562   :  { %v5615_v43 = vpop.permute.xlu1 %1644  ;;  %v5617_v13 = vpop.permute.xlu2 %1006 }
 0x563   :  { %8460 = vst [vmem:[#allocation87_spill] sm:$0xff] %v5615_v43 }
 0x564   :  { %1878 = vrot.lane.b32.xlu0 %v5545_v35, %s4487_s30 }
 0x566   :  { %v5621_v6 = vpop.permute.xlu0 %1760 }
 0x567   :  { %8461 = vst [vmem:[#allocation88_spill] sm:$0xff] %v5621_v6 }
 0x568   :  { %1124 = vrot.lane.b32.xlu2 %v5545_v35, %s4470_s10  ;;  %1936 = vrot.lane.b32.xlu1 %v5545_v35, %s4488_s11 }
 0x56a   :  { %v5627_v9 = vpop.permute.xlu1 %1818  ;;  %v5629_v40 = vpop.permute.xlu2 %1180 }
 0x56b   :  { %8462 = vst [vmem:[#allocation89_spill] sm:$0xff] %v5627_v9 }
 0x56c   :  { %8463 = vst [vmem:[#allocation90_spill] sm:$0xff] %v5629_v40  ;;  %1054 = vrot.lane.b32.xlu0 %v5632_v4, %s4474_s17 }
 0x56e   :  { %v5636_v43 = vpop.permute.xlu0 %1934 }
 0x56f   :  { %8464 = vst [vmem:[#allocation91_spill] sm:$0xff] %v5636_v43 }
 0x570   :  { %1298 = vrot.lane.b32.xlu2 %v5545_v35, %s4472_s15  ;;  %1112 = vrot.lane.b32.xlu1 %v5632_v4, %s4470_s10 }
 0x572   :  { %v5642_v6 = vpop.permute.xlu1 %1992  ;;  %v5644_v60 = vpop.permute.xlu2 %1354 }
 0x573   :  { %8465 = vst [vmem:[#allocation92_spill] sm:$0xff] %v5642_v6 }
 0x574   :  { %8466 = vst [vmem:[#allocation93_spill] sm:$0xff] %v5644_v60  ;;  %1228 = vrot.lane.b32.xlu0 %v5632_v4, %s4477_s1 }
 0x576   :  { %v5648_v9 = vpop.permute.xlu0 %1110 }
 0x577   :  { %8467 = vst [vmem:[#allocation94_spill] sm:$0xff] %v5648_v9 }
 0x578   :  { %1472 = vrot.lane.b32.xlu2 %v5545_v35, %s4475_s23  ;;  %1286 = vrot.lane.b32.xlu1 %v5632_v4, %s4472_s15 }
 0x57a   :  { %v5654_v43 = vpop.permute.xlu2 %1528  ;;  %v5656_v40 = vpop.permute.xlu1 %932 }
 0x57b   :  { %8468 = vst [vmem:[#allocation95_spill] sm:$0xff] %v5654_v43 }
 0x57c   :  { %1402 = vrot.lane.b32.xlu0 %v5632_v4, %s4480_s24 }
 0x57e   :  { %v5660_v6 = vpop.permute.xlu0 %1284 }
 0x57f   :  { %8469 = vst [vmem:[#allocation96_spill] sm:$0xff] %v5660_v6 }
 0x580   :  { %1646 = vrot.lane.b32.xlu2 %v5545_v35, %s4478_s20  ;;  %1460 = vrot.lane.b32.xlu1 %v5632_v4, %s4475_s23 }
 0x582   :  { %v5666_v60 = vpop.permute.xlu2 %1702  ;;  %v5668_v11 = vpop.permute.xlu1 %994 }
 0x583   :  { %8470 = vst [vmem:[#allocation97_spill] sm:$0xff] %v5666_v60 }
 0x584   :  { %1576 = vrot.lane.b32.xlu0 %v5632_v4, %s4483_s27 }
 0x586   :  { %v5672_v43 = vpop.permute.xlu0 %1458 }
 0x587   :  { %8471 = vst [vmem:[#allocation98_spill] sm:$0xff] %v5672_v43 }
 0x588   :  { %1820 = vrot.lane.b32.xlu2 %v5545_v35, %s4481_s25  ;;  %1634 = vrot.lane.b32.xlu1 %v5632_v4, %s4478_s20 }
 0x58a   :  { %v5678_v6 = vpop.permute.xlu2 %1876  ;;  %v5680_v9 = vpop.permute.xlu1 %1168 }
 0x58b   :  { %8472 = vst [vmem:[#allocation99_spill] sm:$0xff] %v5678_v6 }
 0x58c   :  { %8473 = vst [vmem:[#allocation100_spill] sm:$0xff] %v5680_v9  ;;  %1750 = vrot.lane.b32.xlu0 %v5632_v4, %s4486_s8 }
 0x58e   :  { %v5684_v60 = vpop.permute.xlu0 %1632 }
 0x58f   :  { %8474 = vst [vmem:[#allocation101_spill] sm:$0xff] %v5684_v60 }
 0x590   :  { %1994 = vrot.lane.b32.xlu2 %v5545_v35, %s4484_s28  ;;  %1808 = vrot.lane.b32.xlu1 %v5632_v4, %s4481_s25 }
 0x592   :  { %v5690_v43 = vpop.permute.xlu2 %1052  ;;  %v5692_v14 = vpop.permute.xlu1 %1342 }
 0x593   :  { %8475 = vst [vmem:[#allocation102_spill] sm:$0xff] %v5692_v14 }
 0x594   :  { %1924 = vrot.lane.b32.xlu0 %v5632_v4, %s4488_s11 }
 0x596   :  { %v5696_v6 = vpop.permute.xlu0 %1806 }
 0x597   :  { %8476 = vst [vmem:[#allocation103_spill] sm:$0xff] %v5696_v6 }
 0x598   :  { %934 = vrot.lane.b32.xlu2 %v5632_v4, %s4471_s14  ;;  %1982 = vrot.lane.b32.xlu1 %v5632_v4, %s4484_s28 }
 0x59a   :  { %v5702_v60 = vpop.permute.xlu2 %1226  ;;  %v5704_v9 = vpop.permute.xlu1 %1516 }
 0x59b   :  { %8477 = vst [vmem:[#allocation104_spill] sm:$0xff] %v5702_v60 }
 0x59c   :  { %8478 = vst [vmem:[#allocation105_spill] sm:$0xff] %v5704_v9  ;;  %1126 = vrot.lane.b32.xlu0 %v5709_v16, %s4470_s10 }
 0x59e   :  { %v5713_v14 = vpop.permute.xlu0 %1980 }
 0x59f   :  { %8479 = vst [vmem:[#allocation106_spill] sm:$0xff] %v5713_v14 }
 0x5a0   :  { %996 = vrot.lane.b32.xlu2 %v5632_v4, %s4473_s16  ;;  %952 = vrot.lane.b32.xlu1 %v5709_v16, %s4471_s14 }
 0x5a2   :  { %v5719_v6 = vpop.permute.xlu2 %1400  ;;  %v5721_v60 = vpop.permute.xlu1 %1690 }
 0x5a3   :  { %8480 = vst [vmem:[#allocation107_spill] sm:$0xff] %v5719_v6 }
 0x5a4   :  { %8481 = vst [vmem:[#allocation108_spill] sm:$0xff] %v5721_v60  ;;  %1300 = vrot.lane.b32.xlu0 %v5709_v16, %s4472_s15 }
 0x5a6   :  { %v5725_v12 = vpop.permute.xlu0 %950 }
 0x5a7   :  { %8482 = vst [vmem:[#allocation109_spill] sm:$0xff] %v5725_v12  ;;  %v4491_v12 = vmov 19  }
 0x5a8   :  { %1170 = vrot.lane.b32.xlu2 %v5632_v4, %s4476_s18  ;;  %1010 = vrot.lane.b32.xlu1 %v5709_v16, %s4473_s16 }
 0x5aa   :  { %v5731_v10 = vpop.permute.xlu2 %1574  ;;  %v5733_v14 = vpop.permute.xlu1 %1864 }
 0x5ab   :  { %8483 = vst [vmem:[#allocation110_spill] sm:$0xff] %v5731_v10 }
 0x5ac   :  { %8484 = vst [vmem:[#allocation111_spill] sm:$0xff] %v5733_v14  ;;  %1474 = vrot.lane.b32.xlu0 %v5709_v16, %s4475_s23 }
 0x5ae   :  { %v5737_v9 = vpop.permute.xlu0 %1008 }
 0x5af   :  { %8485 = vst [vmem:[#allocation112_spill] sm:$0xff] %v5737_v9 }
 0x5b0   :  { %1344 = vrot.lane.b32.xlu2 %v5632_v4, %s4479_s22  ;;  %1184 = vrot.lane.b32.xlu1 %v5709_v16, %s4476_s18 }
 0x5b2   :  { %v5743_v60 = vpop.permute.xlu2 %1748  ;;  %v5745_v6 = vpop.permute.xlu1 %1066 }
 0x5b3   :  { %8486 = vst [vmem:[#allocation113_spill] sm:$0xff] %v5743_v60 }
 0x5b4   :  { %8487 = vst [vmem:[#allocation114_spill] sm:$0xff] %v5745_v6  ;;  %1648 = vrot.lane.b32.xlu0 %v5709_v16, %s4478_s20 }
 0x5b6   :  { %v5749_v10 = vpop.permute.xlu0 %1182 }
 0x5b7   :  { %8488 = vst [vmem:[#allocation115_spill] sm:$0xff] %v5749_v10 }
 0x5b8   :  { %1518 = vrot.lane.b32.xlu2 %v5632_v4, %s4482_s26  ;;  %1358 = vrot.lane.b32.xlu1 %v5709_v16, %s4479_s22 }
 0x5ba   :  { %v5755_v14 = vpop.permute.xlu2 %1922  ;;  %v5757_v21 = vpop.permute.xlu1 %1240 }
 0x5bb   :  { %8489 = vst [vmem:[#allocation116_spill] sm:$0xff] %v5755_v14 }
 0x5bc   :  { %8490 = vst [vmem:[#allocation117_spill] sm:$0xff] %v5757_v21  ;;  %1822 = vrot.lane.b32.xlu0 %v5709_v16, %s4481_s25 }
 0x5be   :  { %v5761_v60 = vpop.permute.xlu0 %1356 }
 0x5bf   :  { %8491 = vst [vmem:[#allocation118_spill] sm:$0xff] %v5761_v60 }
 0x5c0   :  { %1692 = vrot.lane.b32.xlu2 %v5632_v4, %s4485_s29  ;;  %1532 = vrot.lane.b32.xlu1 %v5709_v16, %s4482_s26 }
 0x5c2   :  { %v5767_v10 = vpop.permute.xlu2 %1124  ;;  %v5769_v6 = vpop.permute.xlu1 %1414 }
 0x5c3   :  { %8492 = vst [vmem:[#allocation119_spill] sm:$0xff] %v5767_v10 }
 0x5c4   :  { %8493 = vst [vmem:[#allocation120_spill] sm:$0xff] %v5769_v6  ;;  %936 = vrot.lane.b32.xlu0 %v5772_v39, %s4471_s14  ;;  %s4522_s14 = smov 114  }
 0x5c6   :  { %v5776_v14 = vpop.permute.xlu0 %1530 }
 0x5c7   :  { %8494 = vst [vmem:[#allocation121_spill] sm:$0xff] %v5776_v14 }
 0x5c8   :  { %1866 = vrot.lane.b32.xlu2 %v5632_v4, %s4487_s30  ;;  %1706 = vrot.lane.b32.xlu1 %v5709_v16, %s4485_s29 }
 0x5ca   :  { %v5782_v60 = vpop.permute.xlu2 %1298  ;;  %v5784_v21 = vpop.permute.xlu1 %1588 }
 0x5cb   :  { %8495 = vst [vmem:[#allocation122_spill] sm:$0xff] %v5782_v60 }
 0x5cc   :  { %8496 = vst [vmem:[#allocation123_spill] sm:$0xff] %v5784_v21  ;;  %998 = vrot.lane.b32.xlu0 %v5772_v39, %s4473_s16  ;;  %s4490_s16 = smov 6  }
 0x5ce   :  { %v5788_v6 = vpop.permute.xlu0 %1704 }
 0x5cf   :  { %8497 = vst [vmem:[#allocation124_spill] sm:$0xff] %v5788_v6 }
 0x5d0   :  { %1068 = vrot.lane.b32.xlu2 %v5709_v16, %s4474_s17  ;;  %1880 = vrot.lane.b32.xlu1 %v5709_v16, %s4487_s30 }
 0x5d2   :  { %v5794_v14 = vpop.permute.xlu2 %1472  ;;  %v5796_v10 = vpop.permute.xlu1 %1762 }
 0x5d3   :  { %8498 = vst [vmem:[#allocation125_spill] sm:$0xff] %v5794_v14 }
 0x5d4   :  { %8499 = vst [vmem:[#allocation126_spill] sm:$0xff] %v5796_v10  ;;  %1172 = vrot.lane.b32.xlu0 %v5772_v39, %s4476_s18  ;;  %s4494_s18 = smov 3  }
 0x5d6   :  { %v5800_v60 = vpop.permute.xlu0 %1878 }
 0x5d7   :  { %8500 = vst [vmem:[#allocation127_spill] sm:$0xff] %v5800_v60 }
 0x5d8   :  { %1242 = vrot.lane.b32.xlu2 %v5709_v16, %s4477_s1  ;;  %1056 = vrot.lane.b32.xlu1 %v5772_v39, %s4474_s17  ;;  %s4531_s17 = smov 109  }
 0x5da   :  { %v5806_v6 = vpop.permute.xlu2 %1646  ;;  %v5808_v21 = vpop.permute.xlu1 %1936 }
 0x5db   :  { %8501 = vst [vmem:[#allocation128_spill] sm:$0xff] %v5806_v6  ;;  %v4489_v6 = vmov 18  }
 0x5dc   :  { %8502 = vst [vmem:[#allocation129_spill] sm:$0xff] %v5808_v21  ;;  %1346 = vrot.lane.b32.xlu0 %v5772_v39, %s4479_s22  ;;  %4250 = vset.pattern.permute.xlu1 %v4489_v6  ;;  %s4496_s22 = smov 2  }
 0x5dd   :  { %4252 = vset.pattern.permute.xlu0 %v4489_v6  ;;  %4251 = vset.pattern.permute.xlu2 %v4489_v6 }
 0x5de   :  { %v5812_v14 = vpop.permute.xlu0 %1054 }
 0x5df   :  { %8503 = vst [vmem:[#allocation130_spill] sm:$0xff] %v5812_v14 }
 0x5e0   :  { %1416 = vrot.lane.b32.xlu2 %v5709_v16, %s4480_s24  ;;  %1230 = vrot.lane.b32.xlu1 %v5772_v39, %s4477_s1 }
 0x5e2   :  { %v5818_v60 = vpop.permute.xlu2 %1820  ;;  %v5820_v10 = vpop.permute.xlu1 %1112 }
 0x5e3   :  { %8504 = vst [vmem:[#allocation131_spill] sm:$0xff] %v5818_v60 }
 0x5e4   :  { %8505 = vst [vmem:[#allocation132_spill] sm:$0xff] %v5820_v10  ;;  %1520 = vrot.lane.b32.xlu0 %v5772_v39, %s4482_s26  ;;  %s4503_s26 = smov 126  }
 0x5e6   :  { %v5824_v21 = vpop.permute.xlu0 %1228 }
 0x5e7   :  { %8506 = vst [vmem:[#allocation133_spill] sm:$0xff] %v5824_v21 }
 0x5e8   :  { %1590 = vrot.lane.b32.xlu2 %v5709_v16, %s4483_s27  ;;  %1404 = vrot.lane.b32.xlu1 %v5772_v39, %s4480_s24  ;;  %s4498_s24 = smov 1  }
 0x5ea   :  { %v5830_v14 = vpop.permute.xlu2 %1994  ;;  %v5832_v60 = vpop.permute.xlu1 %1286 }
 0x5eb   :  { %8507 = vst [vmem:[#allocation134_spill] sm:$0xff] %v5830_v14 }
 0x5ec   :  { %8508 = vst [vmem:[#allocation135_spill] sm:$0xff] %v5832_v60  ;;  %1694 = vrot.lane.b32.xlu0 %v5772_v39, %s4485_s29  ;;  %s4509_s29 = smov 122  }
 0x5ee   :  { %v5836_v10 = vpop.permute.xlu0 %1402 }
 0x5ef   :  { %8509 = vst [vmem:[#allocation136_spill] sm:$0xff] %v5836_v10 }
 0x5f0   :  { %1764 = vrot.lane.b32.xlu2 %v5709_v16, %s4486_s8  ;;  %1578 = vrot.lane.b32.xlu1 %v5772_v39, %s4483_s27  ;;  %s4505_s27 = smov 125  }
 0x5f2   :  { %v5842_v6 = vpop.permute.xlu2 %934  ;;  %v5844_v21 = vpop.permute.xlu1 %1460 }
 0x5f3   :  { %8510 = vst [vmem:[#allocation137_spill] sm:$0xff] %v5842_v6  ;;  %v5873_v6 = vld [vmem:[%s8298_s3 + $0x10] sm:$0xff] }
 0x5f4   :  { %8511 = vst [vmem:[#allocation138_spill] sm:$0xff] %v5844_v21  ;;  %1868 = vrot.lane.b32.xlu0 %v5772_v39, %s4487_s30  ;;  %s4514_s30 = smov 119  }
 0x5f6   :  { %v5848_v14 = vpop.permute.xlu0 %1576 }
 0x5f7   :  { %8512 = vst [vmem:[#allocation139_spill] sm:$0xff] %v5848_v14 }
 0x5f8   :  { %1938 = vrot.lane.b32.xlu2 %v5709_v16, %s4488_s11  ;;  %1752 = vrot.lane.b32.xlu1 %v5772_v39, %s4486_s8  ;;  %s4511_s8 = smov 121  }
 0x5fa   :  { %v5854_v10 = vpop.permute.xlu2 %996  ;;  %v5856_v60 = vpop.permute.xlu1 %1634 }
 0x5fb   :  { %8513 = vst [vmem:[#allocation140_spill] sm:$0xff] %v5854_v10 }
 0x5fc   :  { %8514 = vst [vmem:[#allocation141_spill] sm:$0xff] %v5856_v60  ;;  %1996 = vrot.lane.b32.xlu0 %v5709_v16, %s4484_s28 }
 0x5fe   :  { %v5860_v63 = vpop.permute.xlu0 %1750 }
 0x5ff   :  { %8515 = vst [vmem:[#allocation142_spill] sm:$0xff] %v5860_v63  ;;  %v5883_v63 = vld [vmem:[%s8298_s3] sm:$0xff] }
 0x600   :  { %1114 = vrot.lane.b32.xlu2 %v5772_v39, %s4470_s10  ;;  %1926 = vrot.lane.b32.xlu1 %v5772_v39, %s4488_s11  ;;  %s4520_s10 = smov 115  }
 0x602   :  { %v5866_v14 = vpop.permute.xlu2 %1170  ;;  %v5868_v21 = vpop.permute.xlu1 %1808 }
 0x603   :  { %8516 = vst [vmem:[#allocation143_spill] sm:$0xff] %v5866_v14 }
 0x604   :  { %8517 = vst [vmem:[#allocation144_spill] sm:$0xff] %v5868_v21  ;;  %2016 = vperm.xlu0 %4252, %v5873_v6  }
 0x606   :  { %v5876_v60 = vpop.permute.xlu0 %1924 }
 0x607   :  { %8518 = vst [vmem:[#allocation145_spill] sm:$0xff] %v5876_v60 }
 0x608   :  { %1288 = vrot.lane.b32.xlu2 %v5772_v39, %s4472_s15  ;;  %2008 = vperm.xlu1 %4250, %v5883_v63   ;;  %s4529_s15 = smov 110  }
 0x60a   :  { %v5886_v21 = vpop.permute.xlu2 %1344  ;;  %v5888_v14 = vpop.permute.xlu1 %1982 }
 0x60b   :  { %8519 = vst [vmem:[#allocation146_spill] sm:$0xff] %v5886_v21 }
 0x60c   :  { %8520 = vst [vmem:[#allocation147_spill] sm:$0xff] %v5888_v14  ;;  %2042 = vrot.lane.b32.xlu0 %v5772_v39, %s4490_s16 }
 0x60d   :  { %4254 = vset.pattern.permute.xlu0 %v4491_v12 }
 0x60e   :  { %v5892_v60 = vpop.permute.xlu0 %1126 }
 0x60f   :  { %8521 = vst [vmem:[#allocation148_spill] sm:$0xff] %v5892_v60 }
 0x610   :  { %1462 = vrot.lane.b32.xlu2 %v5772_v39, %s4475_s23  ;;  %2020 = vperm.xlu1 %4250, %v5197_v15   ;;  %v5916_v15 = vld [vmem:[%s8298_s3 + $0x8] sm:$0xff]  ;;  %s4492_s23 = smov 5  }
 0x612   :  { %v5897_v31 = vpop.permute.xlu2 %1518  ;;  %v5899_v3 = vpop.permute.xlu1 %952 }
 0x613   :  { %8522 = vst [vmem:[#allocation149_spill] sm:$0xff] %v5897_v31 }
 0x614   :  { %8523 = vst [vmem:[#allocation150_spill] sm:$0xff] %v5899_v3  ;;  %2052 = vrot.lane.b32.xlu0 %v5545_v35, %s4490_s16  ;;  %v4493_v3 = vmov 20  }
 0x616   :  { %v5903_v14 = vpop.permute.xlu0 %1300 }
 0x617   :  { %8524 = vst [vmem:[#allocation151_spill] sm:$0xff] %v5903_v14 }
 0x618   :  { %1636 = vrot.lane.b32.xlu2 %v5772_v39, %s4478_s20  ;;  %2038 = vrot.lane.b32.xlu1 %v5472_v54, %s4490_s16 }
 0x619   :  { %4255 = vset.pattern.permute.xlu1 %v4491_v12 }
 0x61a   :  { %v5909_v21 = vpop.permute.xlu2 %1692  ;;  %v5911_v60 = vpop.permute.xlu1 %1010 }
 0x61b   :  { %8525 = vst [vmem:[#allocation152_spill] sm:$0xff] %v5909_v21 }
 0x61c   :  { %8526 = vst [vmem:[#allocation153_spill] sm:$0xff] %v5911_v60  ;;  %2070 = vperm.xlu0 %4254, %v5916_v15  }
 0x61e   :  { %v5919_v31 = vpop.permute.xlu0 %1474 }
 0x61f   :  { %8527 = vst [vmem:[#allocation154_spill] sm:$0xff] %v5919_v31 }
 0x620   :  { %1810 = vrot.lane.b32.xlu2 %v5772_v39, %s4481_s25  ;;  %2048 = vrot.lane.b32.xlu1 %v5317_v8, %s4490_s16  ;;  %s4501_s25 = smov 127  }
 0x622   :  { %v5925_v14 = vpop.permute.xlu2 %1866  ;;  %v5927_v21 = vpop.permute.xlu1 %1184 }
 0x623   :  { %8528 = vst [vmem:[#allocation155_spill] sm:$0xff] %v5925_v14 }
 0x624   :  { %8529 = vst [vmem:[#allocation156_spill] sm:$0xff] %v5927_v21  ;;  %2098 = vrot.lane.b32.xlu0 %v5632_v4, %s4492_s23 }
 0x625   :  { %4256 = vset.pattern.permute.xlu0 %v4493_v3 }
 0x626   :  { %v5931_v60 = vpop.permute.xlu0 %1648 }
 0x627   :  { %8530 = vst [vmem:[#allocation157_spill] sm:$0xff] %v5931_v60 }
 0x628   :  { %1984 = vrot.lane.b32.xlu2 %v5772_v39, %s4484_s28  ;;  %2054 = vrot.lane.b32.xlu1 %v5709_v16, %s4490_s16  ;;  %s4507_s28 = smov 123  }
 0x62a   :  { %v5937_v31 = vpop.permute.xlu2 %1068  ;;  %v5939_v10 = vpop.permute.xlu1 %1358 }
 0x62b   :  { %8531 = vst [vmem:[#allocation158_spill] sm:$0xff] %v5937_v31 }
 0x62c   :  { %8532 = vst [vmem:[#allocation159_spill] sm:$0xff] %v5939_v10  ;;  %2108 = vrot.lane.b32.xlu0 %v5405_v23, %s4492_s23 }
 0x62e   :  { %v5943_v14 = vpop.permute.xlu0 %1822 }
 0x62f   :  { %8533 = vst [vmem:[#allocation160_spill] sm:$0xff] %v5943_v14 }
 0x630   :  { %2012 = vperm.xlu2 %4251, %v5916_v15   ;;  %2074 = vperm.xlu1 %4255, %v5873_v6  }
 0x632   :  { %v5947_v60 = vpop.permute.xlu2 %1242  ;;  %v5949_v21 = vpop.permute.xlu1 %1532 }
 0x633   :  { %8534 = vst [vmem:[#allocation161_spill] sm:$0xff] %v5947_v60 }
 0x634   :  { %8535 = vst [vmem:[#allocation162_spill] sm:$0xff] %v5949_v21  ;;  %2124 = vperm.xlu0 %4256, %v5883_v63   ;;  %v4495_v21 = vmov 21  }
 0x636   :  { %v5952_v9 = vpop.permute.xlu0 %936 }
 0x637   :  { %8536 = vst [vmem:[#allocation163_spill] sm:$0xff] %v5952_v9 }
 0x638   :  { %2036 = vrot.lane.b32.xlu2 %v5355_v30, %s4490_s16  ;;  %2094 = vrot.lane.b32.xlu1 %v5355_v30, %s4492_s23 }
 0x639   :  { %4253 = vset.pattern.permute.xlu2 %v4491_v12  ;;  %4257 = vset.pattern.permute.xlu1 %v4493_v3 }
 0x63a   :  { %v5958_v14 = vpop.permute.xlu2 %1416  ;;  %v5960_v10 = vpop.permute.xlu1 %1706 }
 0x63b   :  { %8537 = vst [vmem:[#allocation164_spill] sm:$0xff] %v5958_v14 }
 0x63c   :  { %8538 = vst [vmem:[#allocation165_spill] sm:$0xff] %v5960_v10  ;;  %2154 = vrot.lane.b32.xlu0 %v5472_v54, %s4494_s18 }
 0x63d   :  { %4261 = vset.pattern.permute.xlu0 %v4495_v21 }
 0x63e   :  { %v5964_v60 = vpop.permute.xlu0 %998 }
 0x63f   :  { %8539 = vst [vmem:[#allocation166_spill] sm:$0xff] %v5964_v60 }
 0x640   :  { %2040 = vrot.lane.b32.xlu2 %v5632_v4, %s4490_s16  ;;  %2100 = vrot.lane.b32.xlu1 %v5772_v39, %s4492_s23 }
 0x642   :  { %v5970_v12 = vpop.permute.xlu2 %1590  ;;  %v5972_v31 = vpop.permute.xlu1 %1880 }
 0x643   :  { %8540 = vst [vmem:[#allocation167_spill] sm:$0xff] %v5970_v12 }
 0x644   :  { %8541 = vst [vmem:[#allocation168_spill] sm:$0xff] %v5972_v31  ;;  %2164 = vrot.lane.b32.xlu0 %v5317_v8, %s4494_s18 }
 0x646   :  { %v5976_v10 = vpop.permute.xlu0 %1172 }
 0x647   :  { %8542 = vst [vmem:[#allocation169_spill] sm:$0xff] %v5976_v10 }
 0x648   :  { %2050 = vrot.lane.b32.xlu2 %v5405_v23, %s4490_s16  ;;  %2110 = vrot.lane.b32.xlu1 %v5545_v35, %s4492_s23  ;;  %s4524_s16 = smov 113  }
 0x64a   :  { %v5982_v14 = vpop.permute.xlu2 %1764  ;;  %v5984_v9 = vpop.permute.xlu1 %1056 }
 0x64b   :  { %8543 = vst [vmem:[#allocation170_spill] sm:$0xff] %v5982_v14  ;;  %v6002_v14 = vld [vmem:[%s8298_s3 + $0x18] sm:$0xff] }
 0x64c   :  { %8544 = vst [vmem:[#allocation171_spill] sm:$0xff] %v5984_v9  ;;  %2170 = vrot.lane.b32.xlu0 %v5709_v16, %s4494_s18 }
 0x64e   :  { %v5988_v12 = vpop.permute.xlu0 %1346 }
 0x64f   :  { %8545 = vst [vmem:[#allocation172_spill] sm:$0xff] %v5988_v12 }
 0x650   :  { %2066 = vperm.xlu2 %4253, %v5883_v63   ;;  %2128 = vperm.xlu1 %4257, %v5916_v15  }
 0x652   :  { %v5992_v31 = vpop.permute.xlu2 %1938  ;;  %v5994_v10 = vpop.permute.xlu1 %1230 }
 0x653   :  { %8546 = vst [vmem:[#allocation173_spill] sm:$0xff] %v5992_v31  ;;  %v8310_v31 = vmov 22  }
 0x654   :  { %8547 = vst [vmem:[#allocation174_spill] sm:$0xff] %v5994_v10  ;;  %2190 = vperm.xlu0 %4261, %v5873_v6  }
 0x656   :  { %v5997_v60 = vpop.permute.xlu0 %1520 }
 0x657   :  { %8548 = vst [vmem:[#allocation175_spill] sm:$0xff] %v5997_v60 }
 0x658   :  { %2078 = vperm.xlu2 %4253, %v6002_v14   ;;  %2136 = vperm.xlu1 %4257, %v6002_v14  }
 0x65a   :  { %v6006_v12 = vpop.permute.xlu2 %1114  ;;  %v6008_v9 = vpop.permute.xlu1 %1404 }
 0x65b   :  { %8549 = vst [vmem:[#allocation176_spill] sm:$0xff] %v6006_v12 }
 0x65c   :  { %8550 = vst [vmem:[#allocation177_spill] sm:$0xff] %v6008_v9  ;;  %2216 = vrot.lane.b32.xlu0 %v5772_v39, %s4496_s22 }
 0x65d   :  { %4263 = vset.pattern.permute.xlu0 %v8310_v31 }
 0x65e   :  { %v6013_v60 = vpop.permute.xlu0 %1694 }
 0x65f   :  { %8551 = vst [vmem:[#allocation178_spill] sm:$0xff] %v6013_v60 }
 0x660   :  { %2096 = vrot.lane.b32.xlu2 %v5472_v54, %s4492_s23  ;;  %2156 = vrot.lane.b32.xlu1 %v5632_v4, %s4494_s18 }
 0x661   :  { %4259 = vset.pattern.permute.xlu1 %v4495_v21  ;;  %4258 = vset.pattern.permute.xlu2 %v4493_v3 }
 0x662   :  { %v6019_v10 = vpop.permute.xlu2 %1288  ;;  %v6021_v9 = vpop.permute.xlu1 %1578 }
 0x663   :  { %8552 = vst [vmem:[#allocation179_spill] sm:$0xff] %v6019_v10 }
 0x664   :  { %8553 = vst [vmem:[#allocation180_spill] sm:$0xff] %v6021_v9  ;;  %2226 = vrot.lane.b32.xlu0 %v5545_v35, %s4496_s22 }
 0x666   :  { %v6025_v12 = vpop.permute.xlu0 %1868 }
 0x667   :  { %8554 = vst [vmem:[#allocation181_spill] sm:$0xff] %v6025_v12 }
 0x668   :  { %2106 = vrot.lane.b32.xlu2 %v5317_v8, %s4492_s23  ;;  %2166 = vrot.lane.b32.xlu1 %v5405_v23, %s4494_s18 }
 0x66a   :  { %v6031_v31 = vpop.permute.xlu2 %1462  ;;  %v6033_v60 = vpop.permute.xlu1 %1752 }
 0x66b   :  { %8555 = vst [vmem:[#allocation182_spill] sm:$0xff] %v6031_v31  ;;  %v8312_v31 = vmov 23  }
 0x66c   :  { %8556 = vst [vmem:[#allocation183_spill] sm:$0xff] %v6033_v60  ;;  %2244 = vperm.xlu0 %4263, %v5916_v15  }
 0x66e   :  { %v6036_v3 = vpop.permute.xlu0 %1996 }
 0x66f   :  { %8557 = vst [vmem:[#allocation184_spill] sm:$0xff] %v6036_v3 }
 0x670   :  { %2112 = vrot.lane.b32.xlu2 %v5709_v16, %s4492_s23  ;;  %2182 = vperm.xlu1 %4259, %v5883_v63   ;;  %s4543_s23 = smov 101  }
 0x672   :  { %v6041_v12 = vpop.permute.xlu2 %1636  ;;  %v6043_v9 = vpop.permute.xlu1 %1926 }
 0x673   :  { %8558 = vst [vmem:[#allocation185_spill] sm:$0xff] %v6041_v12 }
 0x674   :  { %8559 = vst [vmem:[#allocation186_spill] sm:$0xff] %v6043_v9  ;;  %2272 = vrot.lane.b32.xlu0 %v5632_v4, %s4498_s24 }
 0x675   :  { %4265 = vset.pattern.permute.xlu0 %v8312_v31  ;;  %v8564_v31 = vmov 22  }
 0x676   :  { %v6048_v60 = vpop.permute.xlu0 %2016 }
 0x677   :  { %8560 = vst [vmem:[#allocation187_spill] sm:$0xff] %v6048_v60 }
 0x678   :  { %2132 = vperm.xlu2 %4258, %v5873_v6   ;;  %2194 = vperm.xlu1 %4259, %v6002_v14  }
 0x67a   :  { %v6052_v3 = vpop.permute.xlu2 %1810  ;;  %v6054_v10 = vpop.permute.xlu1 %2008 }
 0x67b   :  { %8561 = vst [vmem:[#allocation188_spill] sm:$0xff] %v6052_v3 }
 0x67c   :  { %8562 = vst [vmem:[#allocation189_spill] sm:$0xff] %v6054_v10  ;;  %2282 = vrot.lane.b32.xlu0 %v5405_v23, %s4498_s24 }
 0x67e   :  { %v6058_v9 = vpop.permute.xlu0 %2042 }
 0x67f   :  { %8563 = vst [vmem:[#allocation190_spill] sm:$0xff] %v6058_v9 }
 0x680   :  { %2152 = vrot.lane.b32.xlu2 %v5355_v30, %s4494_s18  ;;  %2212 = vrot.lane.b32.xlu1 %v5472_v54, %s4496_s22 }
 0x681   :  { %4260 = vset.pattern.permute.xlu2 %v4495_v21  ;;  %4264 = vset.pattern.permute.xlu1 %v8564_v31  ;;  %v8314_v21 = vmov 24  }
 0x682   :  { %v6065_v60 = vpop.permute.xlu2 %1984  ;;  %v6067_v12 = vpop.permute.xlu1 %2020 }
 0x683   :  { %8565 = vst [vmem:[#allocation191_spill] sm:$0xff] %v6065_v60 }
 0x684   :  { %8566 = vst [vmem:[#allocation192_spill] sm:$0xff] %v6067_v12  ;;  %2298 = vperm.xlu0 %4265, %v5883_v63  }
 0x686   :  { %v6070_v10 = vpop.permute.xlu0 %2052 }
 0x687   :  { %8567 = vst [vmem:[#allocation193_spill] sm:$0xff] %v6070_v10 }
 0x688   :  { %2158 = vrot.lane.b32.xlu2 %v5772_v39, %s4494_s18  ;;  %2222 = vrot.lane.b32.xlu1 %v5317_v8, %s4496_s22 }
 0x68a   :  { %v6076_v9 = vpop.permute.xlu2 %2012  ;;  %v6078_v3 = vpop.permute.xlu1 %2038 }
 0x68b   :  { %8568 = vst [vmem:[#allocation194_spill] sm:$0xff] %v6076_v9 }
 0x68c   :  { %8569 = vst [vmem:[#allocation195_spill] sm:$0xff] %v6078_v3  ;;  %4269 = vset.pattern.permute.xlu0 %v8314_v21  ;;  %v8316_v3 = vmov 25  }
 0x68d   :  { %2331 = vperm.xlu0 %4269, %v5916_v15  }
 0x68e   :  { %v6086_v10 = vpop.permute.xlu0 %2070 }
 0x68f   :  { %8570 = vst [vmem:[#allocation196_spill] sm:$0xff] %v6086_v10 }
 0x690   :  { %2168 = vrot.lane.b32.xlu2 %v5545_v35, %s4494_s18  ;;  %2228 = vrot.lane.b32.xlu1 %v5709_v16, %s4496_s22  ;;  %s4546_s18 = smov [#allocation2]  }
 0x692   :  { %v6088_v12 = vpop.permute.xlu2 %2036  ;;  %v6090_v60 = vpop.permute.xlu1 %2048 }
 0x693   :  { %8571 = vst [vmem:[#allocation197_spill] sm:$0xff] %v6088_v12 }
 0x694   :  { %8572 = vst [vmem:[#allocation198_spill] sm:$0xff] %v6090_v60 }
 0x695   :  { %2359 = vrot.lane.b32.xlu0 %v5545_v35, %s4501_s25 }
 0x696   :  { %4271 = vset.pattern.permute.xlu0 %v8316_v3  ;;  %v6101_v10 = vpop.permute.xlu0 %2098  ;;  %v8576_v3 = vmov 23  }
 0x697   :  { %8575 = vst [vmem:[#allocation201_spill] sm:$0xff] %v6101_v10 }
 0x698   :  { %2186 = vperm.xlu2 %4260, %v5916_v15   ;;  %2248 = vperm.xlu1 %4264, %v5873_v6  }
 0x69a   :  { %v6097_v21 = vpop.permute.xlu2 %2040  ;;  %v6099_v9 = vpop.permute.xlu1 %2054 }
 0x69b   :  { %8573 = vst [vmem:[#allocation199_spill] sm:$0xff] %v6097_v21 }
 0x69c   :  { %8574 = vst [vmem:[#allocation200_spill] sm:$0xff] %v6099_v9 }
 0x69d   :  { %2369 = vrot.lane.b32.xlu0 %v5472_v54, %s4501_s25 }
 0x69e   :  { %v6115_v9 = vpop.permute.xlu0 %2108 }
 0x69f   :  { %8579 = vst [vmem:[#allocation204_spill] sm:$0xff] %v6115_v9 }
 0x6a0   :  { %2210 = vrot.lane.b32.xlu2 %v5355_v30, %s4496_s22  ;;  %2268 = vrot.lane.b32.xlu1 %v5355_v30, %s4498_s24 }
 0x6a1   :  { %4262 = vset.pattern.permute.xlu2 %v8564_v31  ;;  %4266 = vset.pattern.permute.xlu1 %v8576_v3  ;;  %v8318_v31 = vmov 26  }
 0x6a2   :  { %v6111_v12 = vpop.permute.xlu2 %2050  ;;  %v6113_v60 = vpop.permute.xlu1 %2074 }
 0x6a3   :  { %8577 = vst [vmem:[#allocation202_spill] sm:$0xff] %v6111_v12 }
 0x6a4   :  { %8578 = vst [vmem:[#allocation203_spill] sm:$0xff] %v6113_v60 }
 0x6a5   :  { %2385 = vperm.xlu0 %4271, %v5883_v63  }
 0x6a6   :  { %v6129_v9 = vpop.permute.xlu0 %2124 }
 0x6a7   :  { %8582 = vst [vmem:[#allocation207_spill] sm:$0xff] %v6129_v9 }
 0x6a8   :  { %2214 = vrot.lane.b32.xlu2 %v5632_v4, %s4496_s22  ;;  %2274 = vrot.lane.b32.xlu1 %v5772_v39, %s4498_s24 }
 0x6aa   :  { %v6122_v10 = vpop.permute.xlu2 %2066  ;;  %v6124_v21 = vpop.permute.xlu1 %2094 }
 0x6ab   :  { %8580 = vst [vmem:[#allocation205_spill] sm:$0xff] %v6122_v10 }
 0x6ac   :  { %8581 = vst [vmem:[#allocation206_spill] sm:$0xff] %v6124_v21 }
 0x6ad   :  { %2415 = vrot.lane.b32.xlu0 %v5405_v23, %s4503_s26 }
 0x6ae   :  { %4276 = vset.pattern.permute.xlu0 %v8318_v31  ;;  %v6143_v31 = vpop.permute.xlu0 %2154 }
 0x6af   :  { %8585 = vst [vmem:[#allocation210_spill] sm:$0xff] %v6143_v31  ;;  %v8591_v31 = vmov 24  }
 0x6b0   :  { %2224 = vrot.lane.b32.xlu2 %v5405_v23, %s4496_s22  ;;  %2284 = vrot.lane.b32.xlu1 %v5545_v35, %s4498_s24  ;;  %s4533_s22 = smov 107  }
 0x6b2   :  { %v6135_v60 = vpop.permute.xlu2 %2078  ;;  %v6137_v10 = vpop.permute.xlu1 %2100 }
 0x6b3   :  { %8583 = vst [vmem:[#allocation208_spill] sm:$0xff] %v6135_v60 }
 0x6b4   :  { %8584 = vst [vmem:[#allocation209_spill] sm:$0xff] %v6137_v10 }
 0x6b5   :  { %2425 = vrot.lane.b32.xlu0 %v5355_v30, %s4503_s26 }
 0x6b6   :  { %v6157_v12 = vpop.permute.xlu0 %2164 }
 0x6b7   :  { %8590 = vst [vmem:[#allocation215_spill] sm:$0xff] %v6157_v12  ;;  %v8320_v12 = vmov 27  }
 0x6b8   :  { %2240 = vperm.xlu2 %4262, %v5883_v63   ;;  %2302 = vperm.xlu1 %4266, %v5916_v15  }
 0x6ba   :  { %v6145_v9 = vpop.permute.xlu2 %2096  ;;  %v6147_v21 = vpop.permute.xlu1 %2110 }
 0x6bb   :  { %8586 = vst [vmem:[#allocation211_spill] sm:$0xff] %v6145_v9 }
 0x6bc   :  { %8587 = vst [vmem:[#allocation212_spill] sm:$0xff] %v6147_v21 }
 0x6bd   :  { %2431 = vrot.lane.b32.xlu0 %v5772_v39, %s4503_s26 }
 0x6c0   :  { %2252 = vperm.xlu2 %4262, %v6002_v14   ;;  %2310 = vperm.xlu1 %4266, %v6002_v14  }
 0x6c2   :  { %v6153_v60 = vpop.permute.xlu2 %2106  ;;  %v6155_v10 = vpop.permute.xlu1 %2128 }
 0x6c3   :  { %8588 = vst [vmem:[#allocation213_spill] sm:$0xff] %v6153_v60  ;;  %v6169_v60 = vpop.permute.xlu0 %2170 }
 0x6c4   :  { %8589 = vst [vmem:[#allocation214_spill] sm:$0xff] %v6155_v10 }
 0x6c5   :  { %2451 = vperm.xlu0 %4276, %v5873_v6   ;;  %8594 = vst [vmem:[#allocation218_spill] sm:$0xff] %v6169_v60 }
 0x6c8   :  { %2270 = vrot.lane.b32.xlu2 %v5472_v54, %s4498_s24  ;;  %4270 = vset.pattern.permute.xlu1 %v8591_v31 }
 0x6c9   :  { %2335 = vperm.xlu1 %4270, %v5873_v6   ;;  %4267 = vset.pattern.permute.xlu2 %v8576_v3 }
 0x6ca   :  { %v6165_v21 = vpop.permute.xlu2 %2112  ;;  %v6167_v9 = vpop.permute.xlu1 %2136 }
 0x6cb   :  { %8592 = vst [vmem:[#allocation216_spill] sm:$0xff] %v6165_v21  ;;  %v6185_v60 = vpop.permute.xlu0 %2190 }
 0x6cc   :  { %8593 = vst [vmem:[#allocation217_spill] sm:$0xff] %v6167_v9  ;;  %v8597_v9 = vmov 25  }
 0x6cd   :  { %2477 = vrot.lane.b32.xlu0 %v5709_v16, %s4505_s27  ;;  %8598 = vst [vmem:[#allocation221_spill] sm:$0xff] %v6185_v60 }
 0x6ce   :  { %4278 = vset.pattern.permute.xlu0 %v8320_v12 }
 0x6d0   :  { %2280 = vrot.lane.b32.xlu2 %v5317_v8, %s4498_s24 }
 0x6d1   :  { %2355 = vrot.lane.b32.xlu1 %v5317_v8, %s4501_s25 }
 0x6d2   :  { %v6178_v3 = vpop.permute.xlu2 %2132  ;;  %v6180_v10 = vpop.permute.xlu1 %2156  ;;  %4272 = vset.pattern.permute.xlu1 %v8597_v9 }
 0x6d3   :  { %8595 = vst [vmem:[#allocation219_spill] sm:$0xff] %v6178_v3 }
 0x6d4   :  { %8596 = vst [vmem:[#allocation220_spill] sm:$0xff] %v6180_v10  ;;  %v6197_v10 = vpop.permute.xlu0 %2216 }
 0x6d5   :  { %2487 = vrot.lane.b32.xlu0 %v5632_v4, %s4505_s27  ;;  %8601 = vst [vmem:[#allocation224_spill] sm:$0xff] %v6197_v10 }
 0x6d8   :  { %2286 = vrot.lane.b32.xlu2 %v5709_v16, %s4498_s24 }
 0x6d9   :  { %2361 = vrot.lane.b32.xlu1 %v5709_v16, %s4501_s25 }
 0x6da   :  { %v6191_v12 = vpop.permute.xlu2 %2152  ;;  %v6193_v21 = vpop.permute.xlu1 %2166 }
 0x6db   :  { %8599 = vst [vmem:[#allocation222_spill] sm:$0xff] %v6191_v12  ;;  %v8322_v12 = vmov 28  }
 0x6dc   :  { %8600 = vst [vmem:[#allocation223_spill] sm:$0xff] %v6193_v21 }
 0x6dd   :  { %2505 = vperm.xlu0 %4278, %v5916_v15  }
 0x6e0   :  { %2306 = vperm.xlu2 %4267, %v5873_v6  }
 0x6e1   :  { %2371 = vrot.lane.b32.xlu1 %v5632_v4, %s4501_s25 }
 0x6e2   :  { %v6201_v60 = vpop.permute.xlu2 %2158  ;;  %v6203_v3 = vpop.permute.xlu1 %2182 }
 0x6e3   :  { %8602 = vst [vmem:[#allocation225_spill] sm:$0xff] %v6201_v60  ;;  %v6215_v60 = vpop.permute.xlu0 %2226 }
 0x6e4   :  { %8603 = vst [vmem:[#allocation226_spill] sm:$0xff] %v6203_v3 }
 0x6e5   :  { %2533 = vrot.lane.b32.xlu0 %v5545_v35, %s4507_s28  ;;  %8606 = vst [vmem:[#allocation229_spill] sm:$0xff] %v6215_v60 }
 0x6e6   :  { %4280 = vset.pattern.permute.xlu0 %v8322_v12 }
 0x6e8   :  { %4268 = vset.pattern.permute.xlu2 %v8591_v31 }
 0x6e9   :  { %2327 = vperm.xlu2 %4268, %v5883_v63   ;;  %2389 = vperm.xlu1 %4272, %v5916_v15  }
 0x6ea   :  { %v6211_v10 = vpop.permute.xlu2 %2168  ;;  %v6213_v21 = vpop.permute.xlu1 %2194 }
 0x6eb   :  { %8604 = vst [vmem:[#allocation227_spill] sm:$0xff] %v6211_v10  ;;  %v6225_v3 = vpop.permute.xlu0 %2244  ;;  %v8612_v10 = vmov 26  }
 0x6ec   :  { %8605 = vst [vmem:[#allocation228_spill] sm:$0xff] %v6213_v21 }
 0x6ed   :  { %2543 = vrot.lane.b32.xlu0 %v5472_v54, %s4507_s28  ;;  %8609 = vst [vmem:[#allocation232_spill] sm:$0xff] %v6225_v3  ;;  %v8324_v3 = vmov 29  }
 0x6f1   :  { %2339 = vperm.xlu2 %4268, %v6002_v14   ;;  %2397 = vperm.xlu1 %4272, %v6002_v14  }
 0x6f2   :  { %v6221_v12 = vpop.permute.xlu2 %2186  ;;  %v6223_v31 = vpop.permute.xlu1 %2212 }
 0x6f3   :  { %8607 = vst [vmem:[#allocation230_spill] sm:$0xff] %v6221_v12  ;;  %v8624_v12 = vmov 27  }
 0x6f4   :  { %8608 = vst [vmem:[#allocation231_spill] sm:$0xff] %v6223_v31  ;;  %v6241_v31 = vpop.permute.xlu0 %2272 }
 0x6f5   :  { %2559 = vperm.xlu0 %4280, %v5883_v63   ;;  %8613 = vst [vmem:[#allocation235_spill] sm:$0xff] %v6241_v31 }
 0x6f9   :  { %2357 = vrot.lane.b32.xlu2 %v5405_v23, %s4501_s25  ;;  %2417 = vrot.lane.b32.xlu1 %v5545_v35, %s4503_s26 }
 0x6fa   :  { %v6232_v60 = vpop.permute.xlu2 %2210  ;;  %v6234_v21 = vpop.permute.xlu1 %2222  ;;  %4274 = vset.pattern.permute.xlu1 %v8612_v10  ;;  %4273 = vset.pattern.permute.xlu2 %v8597_v9 }
 0x6fb   :  { %8610 = vst [vmem:[#allocation233_spill] sm:$0xff] %v6232_v60 }
 0x6fc   :  { %8611 = vst [vmem:[#allocation234_spill] sm:$0xff] %v6234_v21  ;;  %v6253_v9 = vpop.permute.xlu0 %2282 }
 0x6fd   :  { %2589 = vrot.lane.b32.xlu0 %v5405_v23, %s4509_s29  ;;  %8616 = vst [vmem:[#allocation238_spill] sm:$0xff] %v6253_v9 }
 0x6fe   :  { %4285 = vset.pattern.permute.xlu0 %v8324_v3 }
 0x701   :  { %2367 = vrot.lane.b32.xlu2 %v5355_v30, %s4501_s25  ;;  %2427 = vrot.lane.b32.xlu1 %v5472_v54, %s4503_s26 }
 0x702   :  { %v6247_v60 = vpop.permute.xlu2 %2214  ;;  %v6249_v21 = vpop.permute.xlu1 %2228 }
 0x703   :  { %8614 = vst [vmem:[#allocation236_spill] sm:$0xff] %v6247_v60 }
 0x704   :  { %8615 = vst [vmem:[#allocation237_spill] sm:$0xff] %v6249_v21  ;;  %v6270_v9 = vpop.permute.xlu0 %2298 }
 0x705   :  { %2599 = vrot.lane.b32.xlu0 %v5355_v30, %s4509_s29  ;;  %8621 = vst [vmem:[#allocation243_spill] sm:$0xff] %v6270_v9  ;;  %v8326_v9 = vmov 30  }
 0x709   :  { %2373 = vrot.lane.b32.xlu2 %v5772_v39, %s4501_s25  ;;  %2443 = vperm.xlu1 %4274, %v5883_v63  }
 0x70a   :  { %v6258_v3 = vpop.permute.xlu2 %2224  ;;  %v6260_v31 = vpop.permute.xlu1 %2248 }
 0x70b   :  { %8617 = vst [vmem:[#allocation239_spill] sm:$0xff] %v6258_v3 }
 0x70c   :  { %8618 = vst [vmem:[#allocation240_spill] sm:$0xff] %v6260_v31 }
 0x70d   :  { %2605 = vrot.lane.b32.xlu0 %v5772_v39, %s4509_s29 }
 0x711   :  { %2393 = vperm.xlu2 %4273, %v5873_v6   ;;  %2455 = vperm.xlu1 %4274, %v6002_v14  }
 0x712   :  { %v6266_v21 = vpop.permute.xlu2 %2240  ;;  %v6268_v60 = vpop.permute.xlu1 %2268 }
 0x713   :  { %8619 = vst [vmem:[#allocation241_spill] sm:$0xff] %v6266_v21  ;;  %v6283_v21 = vpop.permute.xlu0 %2331 }
 0x714   :  { %8620 = vst [vmem:[#allocation242_spill] sm:$0xff] %v6268_v60  ;;  %v8328_v60 = vmov 31  }
 0x715   :  { %2625 = vperm.xlu0 %4285, %v5873_v6   ;;  %8625 = vst [vmem:[#allocation246_spill] sm:$0xff] %v6283_v21 }
 0x719   :  { %2413 = vrot.lane.b32.xlu2 %v5317_v8, %s4503_s26  ;;  %2473 = vrot.lane.b32.xlu1 %v5405_v23, %s4505_s27 }
 0x71a   :  { %v6277_v31 = vpop.permute.xlu2 %2252  ;;  %v6279_v3 = vpop.permute.xlu1 %2274  ;;  %4275 = vset.pattern.permute.xlu2 %v8612_v10  ;;  %4279 = vset.pattern.permute.xlu1 %v8624_v12 }
 0x71b   :  { %8622 = vst [vmem:[#allocation244_spill] sm:$0xff] %v6277_v31  ;;  %v6298_v21 = vpop.permute.xlu0 %2359 }
 0x71c   :  { %8623 = vst [vmem:[#allocation245_spill] sm:$0xff] %v6279_v3 }
 0x71d   :  { %2651 = vrot.lane.b32.xlu0 %v5709_v16, %s4511_s8  ;;  %8628 = vst [vmem:[#allocation249_spill] sm:$0xff] %v6298_v21 }
 0x71e   :  { %4287 = vset.pattern.permute.xlu0 %v8326_v9 }
 0x721   :  { %2419 = vrot.lane.b32.xlu2 %v5709_v16, %s4503_s26  ;;  %2483 = vrot.lane.b32.xlu1 %v5355_v30, %s4505_s27 }
 0x722   :  { %v6292_v31 = vpop.permute.xlu2 %2270  ;;  %v6294_v10 = vpop.permute.xlu1 %2284 }
 0x723   :  { %8626 = vst [vmem:[#allocation247_spill] sm:$0xff] %v6292_v31  ;;  %v6309_v31 = vpop.permute.xlu0 %2369 }
 0x724   :  { %8627 = vst [vmem:[#allocation248_spill] sm:$0xff] %v6294_v10 }
 0x725   :  { %2661 = vrot.lane.b32.xlu0 %v5632_v4, %s4511_s8  ;;  %8631 = vst [vmem:[#allocation252_spill] sm:$0xff] %v6309_v31 }
 0x729   :  { %2429 = vrot.lane.b32.xlu2 %v5632_v4, %s4503_s26  ;;  %2489 = vrot.lane.b32.xlu1 %v5772_v39, %s4505_s27  ;;  %s4535_s26 = smov 106  }
 0x72a   :  { %v6304_v9 = vpop.permute.xlu2 %2280  ;;  %v6306_v3 = vpop.permute.xlu1 %2302 }
 0x72b   :  { %8629 = vst [vmem:[#allocation250_spill] sm:$0xff] %v6304_v9 }
 0x72c   :  { %8630 = vst [vmem:[#allocation251_spill] sm:$0xff] %v6306_v3  ;;  %v8635_v3 = vmov 28  }
 0x72d   :  { %2679 = vperm.xlu0 %4287, %v5916_v15  }
 0x731   :  { %2447 = vperm.xlu2 %4275, %v5916_v15   ;;  %2509 = vperm.xlu1 %4279, %v5873_v6  }
 0x732   :  { %v6313_v10 = vpop.permute.xlu2 %2286  ;;  %v6315_v21 = vpop.permute.xlu1 %2310 }
 0x733   :  { %8632 = vst [vmem:[#allocation253_spill] sm:$0xff] %v6313_v10 }
 0x734   :  { %8633 = vst [vmem:[#allocation254_spill] sm:$0xff] %v6315_v21  ;;  %v6330_v21 = vpop.permute.xlu0 %2385 }
 0x735   :  { %2707 = vrot.lane.b32.xlu0 %v5545_v35, %s4456_s19  ;;  %8637 = vst [vmem:[#allocation257_spill] sm:$0xff] %v6330_v21 }
 0x736   :  { %4289 = vset.pattern.permute.xlu0 %v8328_v60 }
 0x739   :  { %2471 = vrot.lane.b32.xlu2 %v5317_v8, %s4505_s27  ;;  %2529 = vrot.lane.b32.xlu1 %v5317_v8, %s4507_s28 }
 0x73a   :  { %v6324_v31 = vpop.permute.xlu2 %2306  ;;  %4277 = vset.pattern.permute.xlu2 %v8624_v12  ;;  %4281 = vset.pattern.permute.xlu1 %v8635_v3 }
 0x73b   :  { %8634 = vst [vmem:[#allocation255_spill] sm:$0xff] %v6324_v31  ;;  %v6328_v10 = vpop.permute.xlu1 %2335 }
 0x73c   :  { %8636 = vst [vmem:[#allocation256_spill] sm:$0xff] %v6328_v10  ;;  %v6343_v12 = vpop.permute.xlu0 %2415 }
 0x73d   :  { %2717 = vrot.lane.b32.xlu0 %v5472_v54, %s4456_s19  ;;  %8640 = vst [vmem:[#allocation260_spill] sm:$0xff] %v6343_v12 }
 0x741   :  { %2475 = vrot.lane.b32.xlu2 %v5545_v35, %s4505_s27  ;;  %2535 = vrot.lane.b32.xlu1 %v5709_v16, %s4507_s28 }
 0x743   :  { %v6338_v60 = vpop.permute.xlu2 %2327  ;;  %v6340_v31 = vpop.permute.xlu1 %2355 }
 0x744   :  { %8638 = vst [vmem:[#allocation258_spill] sm:$0xff] %v6338_v60  ;;  %v8330_v60 = vmov 32  }
 0x745   :  { %8639 = vst [vmem:[#allocation259_spill] sm:$0xff] %v6340_v31  ;;  %2733 = vperm.xlu0 %4289, %v5883_v63   ;;  %v6356_v31 = vpop.permute.xlu0 %2425 }
 0x746   :  { %8643 = vst [vmem:[#allocation263_spill] sm:$0xff] %v6356_v31 }
 0x749   :  { %2485 = vrot.lane.b32.xlu2 %v5472_v54, %s4505_s27  ;;  %2545 = vrot.lane.b32.xlu1 %v5632_v4, %s4507_s28 }
 0x74b   :  { %v6349_v21 = vpop.permute.xlu2 %2339  ;;  %v6351_v10 = vpop.permute.xlu1 %2361 }
 0x74c   :  { %8641 = vst [vmem:[#allocation261_spill] sm:$0xff] %v6349_v21 }
 0x74d   :  { %8642 = vst [vmem:[#allocation262_spill] sm:$0xff] %v6351_v10  ;;  %2763 = vrot.lane.b32.xlu0 %v5405_v23, %s4514_s30  ;;  %v6368_v21 = vpop.permute.xlu0 %2431 }
 0x74e   :  { %4294 = vset.pattern.permute.xlu0 %v8330_v60  ;;  %8646 = vst [vmem:[#allocation266_spill] sm:$0xff] %v6368_v21 }
 0x751   :  { %2501 = vperm.xlu2 %4277, %v5883_v63   ;;  %2563 = vperm.xlu1 %4281, %v5916_v15  }
 0x753   :  { %v6360_v12 = vpop.permute.xlu2 %2357  ;;  %v6362_v9 = vpop.permute.xlu1 %2371 }
 0x754   :  { %8644 = vst [vmem:[#allocation264_spill] sm:$0xff] %v6360_v12 }
 0x755   :  { %8645 = vst [vmem:[#allocation265_spill] sm:$0xff] %v6362_v9  ;;  %2773 = vrot.lane.b32.xlu0 %v5355_v30, %s4514_s30  ;;  %v8649_v9 = vmov 29   ;;  %v6386_v10 = vpop.permute.xlu0 %2451 }
 0x756   :  { %8652 = vst [vmem:[#allocation271_spill] sm:$0xff] %v6386_v10 }
 0x759   :  { %2513 = vperm.xlu2 %4277, %v6002_v14   ;;  %2571 = vperm.xlu1 %4281, %v6002_v14  }
 0x75b   :  { %v6370_v60 = vpop.permute.xlu2 %2367  ;;  %v6372_v31 = vpop.permute.xlu1 %2389 }
 0x75c   :  { %8647 = vst [vmem:[#allocation267_spill] sm:$0xff] %v6370_v60 }
 0x75d   :  { %8648 = vst [vmem:[#allocation268_spill] sm:$0xff] %v6372_v31  ;;  %2779 = vrot.lane.b32.xlu0 %v5772_v39, %s4514_s30 }
 0x761   :  { %2531 = vrot.lane.b32.xlu2 %v5405_v23, %s4507_s28  ;;  %2591 = vrot.lane.b32.xlu1 %v5545_v35, %s4509_s29 }
 0x762   :  { %4283 = vset.pattern.permute.xlu1 %v8649_v9  ;;  %4282 = vset.pattern.permute.xlu2 %v8635_v3  ;;  %v6399_v3 = vpop.permute.xlu0 %2477 }
 0x763   :  { %v6382_v12 = vpop.permute.xlu2 %2373  ;;  %v6384_v21 = vpop.permute.xlu1 %2397  ;;  %8655 = vst [vmem:[#allocation274_spill] sm:$0xff] %v6399_v3 }
 0x764   :  { %8650 = vst [vmem:[#allocation269_spill] sm:$0xff] %v6382_v12 }
 0x765   :  { %8651 = vst [vmem:[#allocation270_spill] sm:$0xff] %v6384_v21  ;;  %2799 = vperm.xlu0 %4294, %v5873_v6   ;;  %v8332_v21 = vmov 33  }
 0x769   :  { %2541 = vrot.lane.b32.xlu2 %v5355_v30, %s4507_s28  ;;  %2601 = vrot.lane.b32.xlu1 %v5472_v54, %s4509_s29 }
 0x76b   :  { %v6393_v31 = vpop.permute.xlu2 %2393  ;;  %v6395_v60 = vpop.permute.xlu1 %2417 }
 0x76c   :  { %8653 = vst [vmem:[#allocation272_spill] sm:$0xff] %v6393_v31  ;;  %v6411_v31 = vpop.permute.xlu0 %2487 }
 0x76d   :  { %8654 = vst [vmem:[#allocation273_spill] sm:$0xff] %v6395_v60  ;;  %2825 = vrot.lane.b32.xlu0 %v5709_v16, %s4516_s12 }
 0x76e   :  { %4296 = vset.pattern.permute.xlu0 %v8332_v21  ;;  %8658 = vst [vmem:[#allocation277_spill] sm:$0xff] %v6411_v31  ;;  %v8662_v31 = vmov 30  }
 0x771   :  { %2547 = vrot.lane.b32.xlu2 %v5772_v39, %s4507_s28  ;;  %2617 = vperm.xlu1 %4283, %v5883_v63  }
 0x773   :  { %v6405_v10 = vpop.permute.xlu2 %2413  ;;  %v6407_v12 = vpop.permute.xlu1 %2427 }
 0x774   :  { %8656 = vst [vmem:[#allocation275_spill] sm:$0xff] %v6405_v10 }
 0x775   :  { %8657 = vst [vmem:[#allocation276_spill] sm:$0xff] %v6407_v12  ;;  %2835 = vrot.lane.b32.xlu0 %v5632_v4, %s4516_s12  ;;  %v6424_v12 = vpop.permute.xlu0 %2505 }
 0x776   :  { %8661 = vst [vmem:[#allocation280_spill] sm:$0xff] %v6424_v12 }
 0x779   :  { %2567 = vperm.xlu2 %4282, %v5873_v6   ;;  %2629 = vperm.xlu1 %4283, %v6002_v14  }
 0x77b   :  { %v6415_v3 = vpop.permute.xlu2 %2419  ;;  %v6417_v21 = vpop.permute.xlu1 %2443 }
 0x77c   :  { %8659 = vst [vmem:[#allocation278_spill] sm:$0xff] %v6415_v3 }
 0x77d   :  { %8660 = vst [vmem:[#allocation279_spill] sm:$0xff] %v6417_v21  ;;  %2853 = vperm.xlu0 %4296, %v5916_v15   ;;  %v8334_v21 = vmov 34   ;;  %v6443_v3 = vpop.permute.xlu0 %2533 }
 0x77e   :  { %8667 = vst [vmem:[#allocation285_spill] sm:$0xff] %v6443_v3 }
 0x781   :  { %2587 = vrot.lane.b32.xlu2 %v5317_v8, %s4509_s29  ;;  %2647 = vrot.lane.b32.xlu1 %v5405_v23, %s4511_s8 }
 0x782   :  { %4284 = vset.pattern.permute.xlu2 %v8649_v9  ;;  %4288 = vset.pattern.permute.xlu1 %v8662_v31 }
 0x783   :  { %v6428_v10 = vpop.permute.xlu2 %2429  ;;  %v6430_v60 = vpop.permute.xlu1 %2455 }
 0x784   :  { %8663 = vst [vmem:[#allocation281_spill] sm:$0xff] %v6428_v10  ;;  %v8336_v10 = vmov 35  }
 0x785   :  { %8664 = vst [vmem:[#allocation282_spill] sm:$0xff] %v6430_v60  ;;  %2881 = vrot.lane.b32.xlu0 %v5545_v35, %s4518_s13 }
 0x786   :  { %4298 = vset.pattern.permute.xlu0 %v8334_v21 }
 0x789   :  { %2593 = vrot.lane.b32.xlu2 %v5709_v16, %s4509_s29  ;;  %2657 = vrot.lane.b32.xlu1 %v5355_v30, %s4511_s8 }
 0x78b   :  { %v6439_v9 = vpop.permute.xlu2 %2447  ;;  %v6441_v12 = vpop.permute.xlu1 %2473 }
 0x78c   :  { %8665 = vst [vmem:[#allocation283_spill] sm:$0xff] %v6439_v9  ;;  %v6456_v9 = vpop.permute.xlu0 %2543 }
 0x78d   :  { %8666 = vst [vmem:[#allocation284_spill] sm:$0xff] %v6441_v12  ;;  %2891 = vrot.lane.b32.xlu0 %v5472_v54, %s4518_s13 }
 0x78e   :  { %8670 = vst [vmem:[#allocation288_spill] sm:$0xff] %v6456_v9  ;;  %v8674_v9 = vmov 31  }
 0x791   :  { %2603 = vrot.lane.b32.xlu2 %v5632_v4, %s4509_s29  ;;  %2663 = vrot.lane.b32.xlu1 %v5772_v39, %s4511_s8  ;;  %s4537_s29 = smov 105  }
 0x793   :  { %v6451_v21 = vpop.permute.xlu2 %2471  ;;  %v6453_v60 = vpop.permute.xlu1 %2483 }
 0x794   :  { %8668 = vst [vmem:[#allocation286_spill] sm:$0xff] %v6451_v21  ;;  %v6467_v21 = vpop.permute.xlu0 %2559 }
 0x795   :  { %8669 = vst [vmem:[#allocation287_spill] sm:$0xff] %v6453_v60  ;;  %2907 = vperm.xlu0 %4298, %v5883_v63  }
 0x796   :  { %8673 = vst [vmem:[#allocation291_spill] sm:$0xff] %v6467_v21 }
 0x799   :  { %2621 = vperm.xlu2 %4284, %v5916_v15   ;;  %2683 = vperm.xlu1 %4288, %v5873_v6  }
 0x79b   :  { %v6460_v3 = vpop.permute.xlu2 %2475  ;;  %v6462_v12 = vpop.permute.xlu1 %2489 }
 0x79c   :  { %8671 = vst [vmem:[#allocation289_spill] sm:$0xff] %v6460_v3 }
 0x79d   :  { %8672 = vst [vmem:[#allocation290_spill] sm:$0xff] %v6462_v12  ;;  %2937 = vrot.lane.b32.xlu0 %v5405_v23, %s4520_s10 }
 0x79e   :  { %4303 = vset.pattern.permute.xlu0 %v8336_v10  ;;  %v6485_v10 = vpop.permute.xlu0 %2589 }
 0x79f   :  { %8677 = vst [vmem:[#allocation294_spill] sm:$0xff] %v6485_v10 }
 0x7a1   :  { %2645 = vrot.lane.b32.xlu2 %v5317_v8, %s4511_s8  ;;  %2703 = vrot.lane.b32.xlu1 %v5317_v8, %s4456_s19 }
 0x7a2   :  { %4286 = vset.pattern.permute.xlu2 %v8662_v31  ;;  %4290 = vset.pattern.permute.xlu1 %v8674_v9 }
 0x7a3   :  { %v6475_v12 = vpop.permute.xlu2 %2485  ;;  %v6477_v3 = vpop.permute.xlu1 %2509 }
 0x7a4   :  { %8675 = vst [vmem:[#allocation292_spill] sm:$0xff] %v6475_v12 }
 0x7a5   :  { %8676 = vst [vmem:[#allocation293_spill] sm:$0xff] %v6477_v3  ;;  %2947 = vrot.lane.b32.xlu0 %v5355_v30, %s4520_s10 }
 0x7a6   :  { %v6501_v12 = vpop.permute.xlu0 %2599 }
 0x7a7   :  { %8682 = vst [vmem:[#allocation299_spill] sm:$0xff] %v6501_v12 }
 0x7a9   :  { %2649 = vrot.lane.b32.xlu2 %v5545_v35, %s4511_s8  ;;  %2709 = vrot.lane.b32.xlu1 %v5709_v16, %s4456_s19 }
 0x7ab   :  { %v6487_v21 = vpop.permute.xlu2 %2501  ;;  %v6489_v31 = vpop.permute.xlu1 %2529 }
 0x7ac   :  { %8678 = vst [vmem:[#allocation295_spill] sm:$0xff] %v6487_v21 }
 0x7ad   :  { %8679 = vst [vmem:[#allocation296_spill] sm:$0xff] %v6489_v31  ;;  %2953 = vrot.lane.b32.xlu0 %v5772_v39, %s4520_s10 }
 0x7ae   :  { %v6512_v31 = vpop.permute.xlu0 %2605 }
 0x7af   :  { %8685 = vst [vmem:[#allocation302_spill] sm:$0xff] %v6512_v31 }
 0x7b1   :  { %2659 = vrot.lane.b32.xlu2 %v5472_v54, %s4511_s8  ;;  %2719 = vrot.lane.b32.xlu1 %v5632_v4, %s4456_s19 }
 0x7b3   :  { %v6497_v3 = vpop.permute.xlu2 %2513  ;;  %v6499_v60 = vpop.permute.xlu1 %2535 }
 0x7b4   :  { %8680 = vst [vmem:[#allocation297_spill] sm:$0xff] %v6497_v3  ;;  %v8338_v3 = vmov 36  }
 0x7b5   :  { %8681 = vst [vmem:[#allocation298_spill] sm:$0xff] %v6499_v60  ;;  %2973 = vperm.xlu0 %4303, %v5873_v6  }
 0x7b9   :  { %2675 = vperm.xlu2 %4286, %v5883_v63   ;;  %2737 = vperm.xlu1 %4290, %v5916_v15  }
 0x7bb   :  { %v6506_v10 = vpop.permute.xlu2 %2531  ;;  %v6508_v21 = vpop.permute.xlu1 %2545 }
 0x7bc   :  { %8683 = vst [vmem:[#allocation300_spill] sm:$0xff] %v6506_v10  ;;  %v6523_v10 = vpop.permute.xlu0 %2625 }
 0x7bd   :  { %8684 = vst [vmem:[#allocation301_spill] sm:$0xff] %v6508_v21  ;;  %2999 = vrot.lane.b32.xlu0 %v5709_v16, %s4522_s14 }
 0x7be   :  { %4305 = vset.pattern.permute.xlu0 %v8338_v3  ;;  %8688 = vst [vmem:[#allocation305_spill] sm:$0xff] %v6523_v10  ;;  %v8689_v3 = vmov 32  }
 0x7c1   :  { %2687 = vperm.xlu2 %4286, %v6002_v14   ;;  %2745 = vperm.xlu1 %4290, %v6002_v14  }
 0x7c3   :  { %v6517_v12 = vpop.permute.xlu2 %2541  ;;  %v6519_v60 = vpop.permute.xlu1 %2563 }
 0x7c4   :  { %8686 = vst [vmem:[#allocation303_spill] sm:$0xff] %v6517_v12  ;;  %v6540_v10 = vpop.permute.xlu0 %2651 }
 0x7c5   :  { %8687 = vst [vmem:[#allocation304_spill] sm:$0xff] %v6519_v60  ;;  %3009 = vrot.lane.b32.xlu0 %v5632_v4, %s4522_s14 }
 0x7c6   :  { %8692 = vst [vmem:[#allocation308_spill] sm:$0xff] %v6540_v10 }
 0x7c9   :  { %2705 = vrot.lane.b32.xlu2 %v5405_v23, %s4456_s19  ;;  %2765 = vrot.lane.b32.xlu1 %v5545_v35, %s4514_s30 }
 0x7ca   :  { %4292 = vset.pattern.permute.xlu1 %v8689_v3  ;;  %4291 = vset.pattern.permute.xlu2 %v8674_v9  ;;  %v8340_v9 = vmov 37  }
 0x7cb   :  { %v6531_v31 = vpop.permute.xlu2 %2547  ;;  %v6533_v21 = vpop.permute.xlu1 %2571 }
 0x7cc   :  { %8690 = vst [vmem:[#allocation306_spill] sm:$0xff] %v6531_v31  ;;  %v6556_v10 = vpop.permute.xlu0 %2661 }
 0x7cd   :  { %8691 = vst [vmem:[#allocation307_spill] sm:$0xff] %v6533_v21  ;;  %3027 = vperm.xlu0 %4305, %v5916_v15  }
 0x7ce   :  { %8697 = vst [vmem:[#allocation313_spill] sm:$0xff] %v6556_v10  ;;  %v8701_v10 = vmov 33  }
 0x7d1   :  { %2715 = vrot.lane.b32.xlu2 %v5355_v30, %s4456_s19  ;;  %2775 = vrot.lane.b32.xlu1 %v5472_v54, %s4514_s30 }
 0x7d3   :  { %v6542_v60 = vpop.permute.xlu2 %2567  ;;  %v6544_v12 = vpop.permute.xlu1 %2591 }
 0x7d4   :  { %8693 = vst [vmem:[#allocation309_spill] sm:$0xff] %v6542_v60  ;;  %v6567_v60 = vpop.permute.xlu0 %2679 }
 0x7d5   :  { %8694 = vst [vmem:[#allocation310_spill] sm:$0xff] %v6544_v12  ;;  %3055 = vrot.lane.b32.xlu0 %v5545_v35, %s4524_s16 }
 0x7d6   :  { %4307 = vset.pattern.permute.xlu0 %v8340_v9  ;;  %8700 = vst [vmem:[#allocation316_spill] sm:$0xff] %v6567_v60 }
 0x7d9   :  { %2721 = vrot.lane.b32.xlu2 %v5772_v39, %s4456_s19  ;;  %2791 = vperm.xlu1 %4292, %v5883_v63   ;;  %s4527_s19 = smov 111  }
 0x7db   :  { %v6552_v21 = vpop.permute.xlu2 %2587  ;;  %v6554_v31 = vpop.permute.xlu1 %2601 }
 0x7dc   :  { %8695 = vst [vmem:[#allocation311_spill] sm:$0xff] %v6552_v21  ;;  %v6582_v60 = vpop.permute.xlu0 %2707 }
 0x7dd   :  { %8696 = vst [vmem:[#allocation312_spill] sm:$0xff] %v6554_v31  ;;  %3065 = vrot.lane.b32.xlu0 %v5472_v54, %s4524_s16 }
 0x7de   :  { %8704 = vst [vmem:[#allocation319_spill] sm:$0xff] %v6582_v60 }
 0x7e1   :  { %2741 = vperm.xlu2 %4291, %v5873_v6   ;;  %2803 = vperm.xlu1 %4292, %v6002_v14  }
 0x7e3   :  { %v6562_v12 = vpop.permute.xlu2 %2593  ;;  %v6564_v9 = vpop.permute.xlu1 %2617 }
 0x7e4   :  { %8698 = vst [vmem:[#allocation314_spill] sm:$0xff] %v6562_v12 }
 0x7e5   :  { %8699 = vst [vmem:[#allocation315_spill] sm:$0xff] %v6564_v9  ;;  %3081 = vperm.xlu0 %4307, %v5883_v63   ;;  %v8342_v9 = vmov 38  }
 0x7e9   :  { %2761 = vrot.lane.b32.xlu2 %v5317_v8, %s4514_s30  ;;  %2821 = vrot.lane.b32.xlu1 %v5405_v23, %s4516_s12 }
 0x7ea   :  { %4293 = vset.pattern.permute.xlu2 %v8689_v3  ;;  %4297 = vset.pattern.permute.xlu1 %v8701_v10 }
 0x7eb   :  { %v6575_v31 = vpop.permute.xlu2 %2603  ;;  %v6577_v21 = vpop.permute.xlu1 %2629 }
 0x7ec   :  { %8702 = vst [vmem:[#allocation317_spill] sm:$0xff] %v6575_v31 }
 0x7ed   :  { %8703 = vst [vmem:[#allocation318_spill] sm:$0xff] %v6577_v21  ;;  %3111 = vrot.lane.b32.xlu0 %v5405_v23, %s4460_s2 }
 0x7ee   :  { %4312 = vset.pattern.permute.xlu0 %v8342_v9  ;;  %v6598_v9 = vpop.permute.xlu0 %2717 }
 0x7ef   :  { %8707 = vst [vmem:[#allocation322_spill] sm:$0xff] %v6598_v9  ;;  %v8713_v9 = vmov 34  }
 0x7f1   :  { %2767 = vrot.lane.b32.xlu2 %v5709_v16, %s4514_s30  ;;  %2831 = vrot.lane.b32.xlu1 %v5355_v30, %s4516_s12 }
 0x7f3   :  { %v6588_v3 = vpop.permute.xlu2 %2621  ;;  %v6590_v12 = vpop.permute.xlu1 %2647 }
 0x7f4   :  { %8705 = vst [vmem:[#allocation320_spill] sm:$0xff] %v6588_v3 }
 0x7f5   :  { %8706 = vst [vmem:[#allocation321_spill] sm:$0xff] %v6590_v12  ;;  %3121 = vrot.lane.b32.xlu0 %v5355_v30, %s4460_s2 }
 0x7f6   :  { %v6612_v31 = vpop.permute.xlu0 %2733 }
 0x7f7   :  { %8712 = vst [vmem:[#allocation327_spill] sm:$0xff] %v6612_v31 }
 0x7f9   :  { %2777 = vrot.lane.b32.xlu2 %v5632_v4, %s4514_s30  ;;  %2837 = vrot.lane.b32.xlu1 %v5772_v39, %s4516_s12 }
 0x7fb   :  { %v6600_v60 = vpop.permute.xlu2 %2645  ;;  %v6602_v21 = vpop.permute.xlu1 %2657 }
 0x7fc   :  { %8708 = vst [vmem:[#allocation323_spill] sm:$0xff] %v6600_v60 }
 0x7fd   :  { %8709 = vst [vmem:[#allocation324_spill] sm:$0xff] %v6602_v21  ;;  %3127 = vrot.lane.b32.xlu0 %v5772_v39, %s4460_s2 }
 0x7fe   :  { %v6627_v31 = vpop.permute.xlu0 %2763 }
 0x7ff   :  { %8716 = vst [vmem:[#allocation330_spill] sm:$0xff] %v6627_v31 }
 0x801   :  { %2795 = vperm.xlu2 %4293, %v5916_v15   ;;  %2857 = vperm.xlu1 %4297, %v5873_v6  }
 0x803   :  { %v6608_v12 = vpop.permute.xlu2 %2649  ;;  %v6610_v3 = vpop.permute.xlu1 %2663 }
 0x804   :  { %8710 = vst [vmem:[#allocation325_spill] sm:$0xff] %v6608_v12  ;;  %v8346_v12 = vmov 40  }
 0x805   :  { %8711 = vst [vmem:[#allocation326_spill] sm:$0xff] %v6610_v3  ;;  %3147 = vperm.xlu0 %4312, %v5873_v6   ;;  %v8344_v6 = vmov 39  }
 0x809   :  { %2819 = vrot.lane.b32.xlu2 %v5317_v8, %s4516_s12  ;;  %2877 = vrot.lane.b32.xlu1 %v5317_v8, %s4518_s13 }
 0x80a   :  { %4295 = vset.pattern.permute.xlu2 %v8701_v10  ;;  %4299 = vset.pattern.permute.xlu1 %v8713_v9 }
 0x80b   :  { %v6621_v60 = vpop.permute.xlu2 %2659  ;;  %v6623_v21 = vpop.permute.xlu1 %2683 }
 0x80c   :  { %8714 = vst [vmem:[#allocation328_spill] sm:$0xff] %v6621_v60 }
 0x80d   :  { %8715 = vst [vmem:[#allocation329_spill] sm:$0xff] %v6623_v21  ;;  %3173 = vrot.lane.b32.xlu0 %v5709_v16, %s4527_s19  ;;  %v6640_v21 = vpop.permute.xlu0 %2773 }
 0x80e   :  { %4314 = vset.pattern.permute.xlu0 %v8344_v6  ;;  %8719 = vst [vmem:[#allocation333_spill] sm:$0xff] %v6640_v21 }
 0x811   :  { %2823 = vrot.lane.b32.xlu2 %v5545_v35, %s4516_s12  ;;  %2883 = vrot.lane.b32.xlu1 %v5709_v16, %s4518_s13 }
 0x813   :  { %v6634_v10 = vpop.permute.xlu2 %2675  ;;  %v6636_v3 = vpop.permute.xlu1 %2703 }
 0x814   :  { %8717 = vst [vmem:[#allocation331_spill] sm:$0xff] %v6634_v10 }
 0x815   :  { %8718 = vst [vmem:[#allocation332_spill] sm:$0xff] %v6636_v3  ;;  %3183 = vrot.lane.b32.xlu0 %v5632_v4, %s4527_s19  ;;  %v6653_v3 = vpop.permute.xlu0 %2779 }
 0x816   :  { %8722 = vst [vmem:[#allocation336_spill] sm:$0xff] %v6653_v3 }
 0x819   :  { %2833 = vrot.lane.b32.xlu2 %v5472_v54, %s4516_s12  ;;  %2893 = vrot.lane.b32.xlu1 %v5632_v4, %s4518_s13 }
 0x81b   :  { %v6646_v6 = vpop.permute.xlu2 %2687  ;;  %v6648_v31 = vpop.permute.xlu1 %2709 }
 0x81c   :  { %8720 = vst [vmem:[#allocation334_spill] sm:$0xff] %v6646_v6 }
 0x81d   :  { %8721 = vst [vmem:[#allocation335_spill] sm:$0xff] %v6648_v31  ;;  %3201 = vperm.xlu0 %4314, %v5916_v15   ;;  %v6668_v3 = vpop.permute.xlu0 %2799 }
 0x81e   :  { %8727 = vst [vmem:[#allocation341_spill] sm:$0xff] %v6668_v3 }
 0x821   :  { %2849 = vperm.xlu2 %4295, %v5883_v63   ;;  %2911 = vperm.xlu1 %4299, %v5916_v15  }
 0x823   :  { %v6655_v10 = vpop.permute.xlu2 %2705  ;;  %v6657_v21 = vpop.permute.xlu1 %2719 }
 0x824   :  { %8723 = vst [vmem:[#allocation337_spill] sm:$0xff] %v6655_v10 }
 0x825   :  { %8724 = vst [vmem:[#allocation338_spill] sm:$0xff] %v6657_v21  ;;  %3229 = vrot.lane.b32.xlu0 %v5545_v35, %s4529_s15  ;;  %v6683_v3 = vpop.permute.xlu0 %2825 }
 0x826   :  { %4316 = vset.pattern.permute.xlu0 %v8346_v12  ;;  %v8728_v12 = vmov 35   ;;  %8731 = vst [vmem:[#allocation344_spill] sm:$0xff] %v6683_v3  ;;  %v6703_v3 = vld [vmem:[%s8298_s3] sm:$0xff] }
 0x829   :  { %2861 = vperm.xlu2 %4295, %v6002_v14   ;;  %2919 = vperm.xlu1 %4299, %v6002_v14  }
 0x82b   :  { %v6664_v31 = vpop.permute.xlu2 %2715  ;;  %v6666_v15 = vpop.permute.xlu1 %2737 }
 0x82c   :  { %8725 = vst [vmem:[#allocation339_spill] sm:$0xff] %v6664_v31 }
 0x82d   :  { %8726 = vst [vmem:[#allocation340_spill] sm:$0xff] %v6666_v15  ;;  %3239 = vrot.lane.b32.xlu0 %v5472_v54, %s4529_s15 }
 0x831   :  { %2879 = vrot.lane.b32.xlu2 %v5405_v23, %s4518_s13  ;;  %2939 = vrot.lane.b32.xlu1 %v5545_v35, %s4520_s10 }
 0x832   :  { %4301 = vset.pattern.permute.xlu1 %v8728_v12  ;;  %4300 = vset.pattern.permute.xlu2 %v8713_v9  ;;  %v8348_v9 = vmov 41  }
 0x833   :  { %v6678_v21 = vpop.permute.xlu2 %2721  ;;  %v6680_v10 = vpop.permute.xlu1 %2745 }
 0x834   :  { %8729 = vst [vmem:[#allocation342_spill] sm:$0xff] %v6678_v21 }
 0x835   :  { %8730 = vst [vmem:[#allocation343_spill] sm:$0xff] %v6680_v10  ;;  %3255 = vperm.xlu0 %4316, %v5883_v63   ;;  %v6696_v63 = vpop.permute.xlu0 %2835 }
 0x836   :  { %8734 = vst [vmem:[#allocation347_spill] sm:$0xff] %v6696_v63 }
 0x839   :  { %2889 = vrot.lane.b32.xlu2 %v5355_v30, %s4518_s13  ;;  %2949 = vrot.lane.b32.xlu1 %v5472_v54, %s4520_s10 }
 0x83b   :  { %v6689_v15 = vpop.permute.xlu2 %2741  ;;  %v6691_v31 = vpop.permute.xlu1 %2765 }
 0x83c   :  { %8732 = vst [vmem:[#allocation345_spill] sm:$0xff] %v6689_v15 }
 0x83d   :  { %8733 = vst [vmem:[#allocation346_spill] sm:$0xff] %v6691_v31  ;;  %3285 = vrot.lane.b32.xlu0 %v5405_v23, %s4531_s17  ;;  %v6719_v63 = vpop.permute.xlu0 %2853 }
 0x83e   :  { %4321 = vset.pattern.permute.xlu0 %v8348_v9  ;;  %v6715_v9 = vld [vmem:[%s8298_s3 + $0x10] sm:$0xff]  ;;  %8738 = vst [vmem:[#allocation351_spill] sm:$0xff] %v6719_v63 }
 0x83f   :  { %8737 = vst [vmem:[#allocation350_spill] sm:$0xff] %v6715_v9 }
 0x841   :  { %2895 = vrot.lane.b32.xlu2 %v5772_v39, %s4518_s13  ;;  %2965 = vperm.xlu1 %4301, %v6703_v3  }
 0x843   :  { %v6706_v15 = vpop.permute.xlu2 %2761  ;;  %v6708_v10 = vpop.permute.xlu1 %2775 }
 0x844   :  { %8735 = vst [vmem:[#allocation348_spill] sm:$0xff] %v6706_v15 }
 0x845   :  { %8736 = vst [vmem:[#allocation349_spill] sm:$0xff] %v6708_v10  ;;  %3295 = vrot.lane.b32.xlu0 %v5355_v30, %s4531_s17  ;;  %v8741_v10 = vmov 36  }
 0x849   :  { %2915 = vperm.xlu2 %4300, %v6715_v9   ;;  %2977 = vperm.xlu1 %4301, %v6002_v14  }
 0x84b   :  { %v6721_v31 = vpop.permute.xlu2 %2767  ;;  %v6723_v21 = vpop.permute.xlu1 %2791 }
 0x84c   :  { %8739 = vst [vmem:[#allocation352_spill] sm:$0xff] %v6721_v31  ;;  %v6737_v31 = vpop.permute.xlu0 %2881 }
 0x84d   :  { %8740 = vst [vmem:[#allocation353_spill] sm:$0xff] %v6723_v21  ;;  %3301 = vrot.lane.b32.xlu0 %v5772_v39, %s4531_s17 }
 0x84e   :  { %8744 = vst [vmem:[#allocation356_spill] sm:$0xff] %v6737_v31 }
 0x851   :  { %2935 = vrot.lane.b32.xlu2 %v5317_v8, %s4520_s10  ;;  %2995 = vrot.lane.b32.xlu1 %v5405_v23, %s4522_s14 }
 0x852   :  { %4302 = vset.pattern.permute.xlu2 %v8728_v12  ;;  %4306 = vset.pattern.permute.xlu1 %v8741_v10 }
 0x853   :  { %v6733_v14 = vpop.permute.xlu2 %2777  ;;  %v6735_v63 = vpop.permute.xlu1 %2803 }
 0x854   :  { %8742 = vst [vmem:[#allocation354_spill] sm:$0xff] %v6733_v14  ;;  %v6750_v12 = vpop.permute.xlu0 %2891 }
 0x855   :  { %8743 = vst [vmem:[#allocation355_spill] sm:$0xff] %v6735_v63  ;;  %3321 = vperm.xlu0 %4321, %v6715_v9   ;;  %v8350_v63 = vmov 42  }
 0x856   :  { %8747 = vst [vmem:[#allocation359_spill] sm:$0xff] %v6750_v12  ;;  %v6768_v12 = vld [vmem:[%s8298_s3 + $0x8] sm:$0xff] }
 0x859   :  { %2941 = vrot.lane.b32.xlu2 %v5709_v16, %s4520_s10  ;;  %3005 = vrot.lane.b32.xlu1 %v5355_v30, %s4522_s14 }
 0x85b   :  { %v6744_v21 = vpop.permute.xlu2 %2795  ;;  %v6746_v15 = vpop.permute.xlu1 %2821 }
 0x85c   :  { %8745 = vst [vmem:[#allocation357_spill] sm:$0xff] %v6744_v21 }
 0x85d   :  { %8746 = vst [vmem:[#allocation358_spill] sm:$0xff] %v6746_v15  ;;  %3347 = vrot.lane.b32.xlu0 %v5709_v16, %s4533_s22  ;;  %v6763_v15 = vpop.permute.xlu0 %2907 }
 0x85e   :  { %4323 = vset.pattern.permute.xlu0 %v8350_v63  ;;  %8750 = vst [vmem:[#allocation362_spill] sm:$0xff] %v6763_v15 }
 0x861   :  { %2951 = vrot.lane.b32.xlu2 %v5632_v4, %s4520_s10  ;;  %3011 = vrot.lane.b32.xlu1 %v5772_v39, %s4522_s14  ;;  %s4539_s10 = smov 103  }
 0x863   :  { %v6757_v31 = vpop.permute.xlu2 %2819  ;;  %v6759_v21 = vpop.permute.xlu1 %2831 }
 0x864   :  { %8748 = vst [vmem:[#allocation360_spill] sm:$0xff] %v6757_v31  ;;  %v8754_v31 = vmov 37  }
 0x865   :  { %8749 = vst [vmem:[#allocation361_spill] sm:$0xff] %v6759_v21  ;;  %3357 = vrot.lane.b32.xlu0 %v5632_v4, %s4533_s22  ;;  %v6781_v15 = vpop.permute.xlu0 %2937 }
 0x866   :  { %8753 = vst [vmem:[#allocation365_spill] sm:$0xff] %v6781_v15 }
 0x869   :  { %2969 = vperm.xlu2 %4302, %v6768_v12   ;;  %3031 = vperm.xlu1 %4306, %v6715_v9  }
 0x86b   :  { %v6772_v63 = vpop.permute.xlu2 %2823  ;;  %v6774_v14 = vpop.permute.xlu1 %2837 }
 0x86c   :  { %8751 = vst [vmem:[#allocation363_spill] sm:$0xff] %v6772_v63 }
 0x86d   :  { %8752 = vst [vmem:[#allocation364_spill] sm:$0xff] %v6774_v14  ;;  %3375 = vperm.xlu0 %4323, %v6768_v12   ;;  %v8352_v14 = vmov 43   ;;  %v6800_v63 = vpop.permute.xlu0 %2947 }
 0x86e   :  { %8759 = vst [vmem:[#allocation370_spill] sm:$0xff] %v6800_v63  ;;  %v1017_v63 = vsel %vm1016_vm1, %v5561_v22, %v5433_v57 }
 0x86f   :  { %v1037_v57 = vmul.f32 %v4768_v5, %v1017_v63  ;;  %v1133_v5 = vsel %vm1132_vm13, %v5469_v53, %v5449_v20  ;;  %v1191_v20 = vsel %vm1190_vm14, %v5482_v61, %v5443_v45 }
 0x870   :  { %v1211_v45 = vmul.f32 %v4797_v27, %v1191_v20 }
 0x871   :  { %2993 = vrot.lane.b32.xlu2 %v5317_v8, %s4522_s14  ;;  %3051 = vrot.lane.b32.xlu1 %v5317_v8, %s4524_s16 }
 0x872   :  { %4304 = vset.pattern.permute.xlu2 %v8741_v10  ;;  %4308 = vset.pattern.permute.xlu1 %v8754_v31 }
 0x873   :  { %v6785_v21 = vpop.permute.xlu2 %2833  ;;  %v6787_v6 = vpop.permute.xlu1 %2857 }
 0x874   :  { %8755 = vst [vmem:[#allocation366_spill] sm:$0xff] %v6785_v21 }
 0x875   :  { %8756 = vst [vmem:[#allocation367_spill] sm:$0xff] %v6787_v6  ;;  %3403 = vrot.lane.b32.xlu0 %v5545_v35, %s4535_s26  ;;  %v6825_v21 = vpop.permute.xlu0 %2953 }
 0x876   :  { %4325 = vset.pattern.permute.xlu0 %v8352_v14  ;;  %8762 = vst [vmem:[#allocation373_spill] sm:$0xff] %v6825_v21  ;;  %v8794_v21 = vld [vmem:[#allocation100_spill] sm:$0xff] }
 0x879   :  { %2997 = vrot.lane.b32.xlu2 %v5545_v35, %s4522_s14  ;;  %3057 = vrot.lane.b32.xlu1 %v5709_v16, %s4524_s16 }
 0x87b   :  { %v6796_v10 = vpop.permute.xlu2 %2849  ;;  %v6798_v15 = vpop.permute.xlu1 %2877 }
 0x87c   :  { %8757 = vst [vmem:[#allocation368_spill] sm:$0xff] %v6796_v10  ;;  %v959_v10 = vsel %vm958_vm11, %v5547_v55, %v5423_v2 }
 0x87d   :  { %8758 = vst [vmem:[#allocation369_spill] sm:$0xff] %v6798_v15  ;;  %3413 = vrot.lane.b32.xlu0 %v5472_v54, %s4535_s26  ;;  %v915_v15 = vld [vmem:[%s8299_s4] sm:$0xff]  ;;  %v983_v60 = vmul.f32 %v4754_v51, %v959_v10  ;;  %v6860_v53 = vpop.permute.xlu0 %2973 }
 0x87e   :  { %v6830_v22 = vperm.slane %v915_v15, 0  ;;  %v6833_v8 = vperm.slane %v915_v15, 2  ;;  %v6851_v63 = vperm.slane %v915_v15, 3  ;;  %8763 = vst [vmem:[#allocation374_spill] sm:$0xff] %v6860_v53  ;;  %v8813_v53 = vld [vmem:[#allocation6_spill] sm:$0xff] }
 0x880   :  { %v988_v51 = vmul.f32 %v6830_v22, %v983_v60  ;;  %v1249_v60 = vsel %vm1248_vm15, %v5516_v32, %v5415_v41  ;;  %v6873_v32 = vperm.slane %v915_v15, 5 }
 0x881   :  { %3007 = vrot.lane.b32.xlu2 %v5472_v54, %s4522_s14  ;;  %3067 = vrot.lane.b32.xlu1 %v5632_v4, %s4524_s16  ;;  %v1269_v41 = vmul.f32 %v4841_v46, %v1249_v60 }
 0x883   :  { %v6808_v14 = vpop.permute.xlu2 %2861  ;;  %v6810_v6 = vpop.permute.xlu1 %2883  ;;  %v1274_v27 = vmul.f32 %v6873_v32, %v1269_v41  ;;  %v6908_v41 = vperm.slane %v915_v15, 7 }
 0x884   :  { %8760 = vst [vmem:[#allocation371_spill] sm:$0xff] %v6808_v14  ;;  %v1075_v14 = vsel %vm1074_vm12, %v5504_v1, %v5401_v25 }
 0x885   :  { %8761 = vst [vmem:[#allocation372_spill] sm:$0xff] %v6810_v6  ;;  %3429 = vperm.xlu0 %4325, %v6703_v3   ;;  %v6827_v6 = vperm.slane %v915_v15, 1  ;;  %v1095_v9 = vmul.f32 %v4824_v37, %v1075_v14  ;;  %v8358_v37 = vmov 45   ;;  %v1153_v14 = vmul.f32 %v4812_v33, %v1133_v5  ;;  %v6900_v60 = vpop.permute.xlu0 %2999 }
 0x886   :  { %v6869_v33 = vperm.slane %v915_v15, 4  ;;  %8764 = vst [vmem:[#allocation375_spill] sm:$0xff] %v6900_v60 }
 0x887   :  { %v1042_v1 = vmul.f32 %v6827_v6, %v1037_v57  ;;  %v1100_v2 = vmul.f32 %v6833_v8, %v1095_v9  ;;  %v6865_v57 = vld [vmem:[%s8298_s3 + $0x18] sm:$0xff]  ;;  %v1158_v61 = vmul.f32 %v6851_v63, %v1153_v14 }
 0x888   :  { %v1216_v14 = vmul.f32 %v6869_v33, %v1211_v45 }
 0x889   :  { %3023 = vperm.xlu2 %4304, %v6703_v3   ;;  %3085 = vperm.xlu1 %4308, %v6768_v12   ;;  %v1046_v10 = vadd.f32 %v1042_v1, %v988_v51 }
 0x88b   :  { %v6839_v55 = vpop.permute.xlu2 %2879  ;;  %v6841_v25 = vpop.permute.xlu1 %2893  ;;  %v1104_v9 = vadd.f32 %v1100_v2, %v1046_v10  ;;  %v1307_v2 = vsel %vm1306_vm2, %v5494_v28, %v5465_v47  ;;  %v6887_v10 = vperm.slane %v915_v15, 6  ;;  %v1365_v28 = vsel %vm1364_vm3, %v5506_v62, %v5455_v52  ;;  %v6913_v62 = vld [vmem:[%s8299_s4 + $0x8] sm:$0xff] }
 0x88c   :  { %v1327_v46 = vmul.f32 %v4843_v48, %v1307_v2  ;;  %v1423_v47 = vsel %vm1422_vm4, %v5528_v50, %v5425_v7  ;;  %v1385_v7 = vmul.f32 %v4837_v44, %v1365_v28  ;;  %v6918_v52 = vperm.slane %v6913_v62, 0 }
 0x88d   :  { %3459 = vrot.lane.b32.xlu0 %v5405_v23, %s4537_s29  ;;  %v1162_v51 = vadd.f32 %v1158_v61, %v1104_v9  ;;  %v8765_v9 = vmov 38   ;;  %v6933_v44 = vperm.slane %v6913_v62, 1  ;;  %v6946_v28 = vpop.permute.xlu0 %3009 }
 0x88e   :  { %4330 = vset.pattern.permute.xlu0 %v8358_v37  ;;  %v1332_v50 = vmul.f32 %v6887_v10, %v1327_v46  ;;  %v1390_v2 = vmul.f32 %v6908_v41, %v1385_v7  ;;  %8769 = vst [vmem:[#allocation379_spill] sm:$0xff] %v6946_v28  ;;  %v1655_v7 = vsel %vm1654_vm8, %v5540_v59, %v5498_v24  ;;  %v8771_v24 = vld [vmem:[#allocation140_spill] sm:$0xff]  ;;  %v8810_v28 = vld [vmem:[#allocation171_spill] sm:$0xff] }
 0x88f   :  { %v1220_v20 = vadd.f32 %v1216_v14, %v1162_v51  ;;  %v1481_v51 = vsel %vm1480_vm5, %v5518_v38, %v5484_v49  ;;  %v1539_v38 = vsel %vm1538_vm6, %v5530_v36, %v5467_v17  ;;  %v1076_v59 = vsel %vm1074_vm12, %v5690_v43, %v5573_v42  ;;  %v8778_v43 = vld [vmem:[#allocation350_spill] sm:$0xff] }
 0x890   :  { %v1559_v36 = vmul.f32 %v5216_v18, %v1539_v38  ;;  %v8776_v38 = vld [vmem:[#allocation109_spill] sm:$0xff] }
 0x891   :  { %3035 = vperm.xlu2 %4304, %v6865_v57   ;;  %3093 = vperm.xlu1 %4308, %v6865_v57   ;;  %v1278_v48 = vadd.f32 %v1274_v27, %v1220_v20  ;;  %v1597_v20 = vsel %vm1596_vm7, %v5538_v29, %v5435_v0  ;;  %v1018_v0 = vsel %vm1016_vm1, %v5668_v11, %v5617_v13  ;;  %v8770_v13 = vld [vmem:[#allocation112_spill] sm:$0xff] }
 0x892   :  { %v1617_v29 = vmul.f32 %v5274_v26, %v1597_v20  ;;  %v960_v26 = vsel %vm958_vm11, %v5656_v40, %v5605_v19  ;;  %v1038_v11 = vmul.f32 %v4816_v34, %v1018_v0  ;;  %v8774_v19 = vld [vmem:[#allocation46_spill] sm:$0xff]  ;;  %v8777_v20 = vld [vmem:[#allocation137_spill] sm:$0xff] }
 0x893   :  { %v6876_v1 = vpop.permute.xlu2 %2889  ;;  %v6878_v5 = vpop.permute.xlu1 %2911  ;;  %v1336_v15 = vadd.f32 %v1332_v50, %v1278_v48  ;;  %v6956_v48 = vperm.slane %v6913_v62, 3  ;;  %v1675_v40 = vmul.f32 %v8774_v19, %v1655_v7  ;;  %v961_v42 = vsel %vm958_vm11, %v8777_v20, %v8776_v38  ;;  %v8785_v38 = vld [vmem:[#allocation94_spill] sm:$0xff]  ;;  %v8786_v20 = vld [vmem:[#allocation7_spill] sm:$0xff] }
 0x894   :  { %v7006_v19 = vperm.slane %v6913_v62, 5 }
 0x895   :  { %3469 = vrot.lane.b32.xlu0 %v5355_v30, %s4537_s29  ;;  %v1394_v27 = vadd.f32 %v1390_v2, %v1336_v15  ;;  %v1019_v15 = vsel %vm1016_vm1, %v8771_v24, %v8770_v13  ;;  %v8782_v13 = vld [vmem:[#allocation9_spill] sm:$0xff]  ;;  %v6998_v37 = vpop.permute.xlu0 %3027 }
 0x896   :  { %v1039_v24 = vmul.f32 %v8782_v13, %v1019_v15  ;;  %8783 = vst [vmem:[#allocation46_spill] sm:$0xff] %v6998_v37  ;;  %v985_v15 = vmul.f32 %v8786_v20, %v961_v42  ;;  %v8791_v13 = vld [vmem:[#allocation76_spill] sm:$0xff] }
 0x897   :  { %v8798_v37 = vld [vmem:[#allocation104_spill] sm:$0xff] }
 0x898   :  { %v1044_v42 = vmul.f32 %v6827_v6, %v1039_v24  ;;  %v990_v24 = vmul.f32 %v6830_v22, %v985_v15 }
 0x899   :  { %3053 = vrot.lane.b32.xlu2 %v5405_v23, %s4524_s16  ;;  %3113 = vrot.lane.b32.xlu1 %v5545_v35, %s4460_s2 }
 0x89a   :  { %4310 = vset.pattern.permute.xlu1 %v8765_v9  ;;  %4309 = vset.pattern.permute.xlu2 %v8754_v31  ;;  %v1443_v31 = vmul.f32 %v4949_v58, %v1423_v47  ;;  %v1501_v58 = vmul.f32 %v4947_v56, %v1481_v51  ;;  %v6951_v56 = vperm.slane %v6913_v62, 2 }
 0x89b   :  { %v6904_v61 = vpop.permute.xlu2 %2895  ;;  %v6906_v45 = vpop.permute.xlu1 %2919 }
 0x89c   :  { %8766 = vst [vmem:[#allocation376_spill] sm:$0xff] %v6904_v61  ;;  %v1448_v14 = vmul.f32 %v6918_v52, %v1443_v31  ;;  %v1506_v17 = vmul.f32 %v6933_v44, %v1501_v58  ;;  %v1564_v18 = vmul.f32 %v6951_v56, %v1559_v36  ;;  %v1622_v31 = vmul.f32 %v6956_v48, %v1617_v29  ;;  %v8780_v36 = vld [vmem:[#allocation75_spill] sm:$0xff] }
 0x89d   :  { %8767 = vst [vmem:[#allocation377_spill] sm:$0xff] %v6906_v45  ;;  %3473 = vrot.lane.b32.xlu0 %v5632_v4, %s4537_s29  ;;  %v8781_v29 = vld [vmem:[#allocation11_spill] sm:$0xff] }
 0x89e   :  { %v1452_v47 = vadd.f32 %v1448_v14, %v1394_v27  ;;  %v6985_v14 = vperm.slane %v6913_v62, 4  ;;  %v8775_v27 = vld [vmem:[#allocation13_spill] sm:$0xff]  ;;  %v1096_v0 = vmul.f32 %v8781_v29, %v1076_v59  ;;  %v8789_v29 = vld [vmem:[#allocation130_spill] sm:$0xff]  ;;  %v8806_v61 = vld [vmem:[#allocation143_spill] sm:$0xff] }
 0x89f   :  { %v984_v34 = vmul.f32 %v8775_v27, %v960_v26  ;;  %v8784_v27 = vld [vmem:[#allocation80_spill] sm:$0xff] }
 0x8a0   :  { %v1510_v50 = vadd.f32 %v1506_v17, %v1452_v47  ;;  %v8779_v47 = vld [vmem:[#allocation67_spill] sm:$0xff]  ;;  %v1680_v26 = vmul.f32 %v6985_v14, %v1675_v40  ;;  %v1134_v59 = vsel %vm1132_vm13, %v8785_v38, %v8784_v27  ;;  %v8790_v40 = vld [vmem:[#allocation70_spill] sm:$0xff]  ;;  %v1101_v27 = vmul.f32 %v6833_v8, %v1096_v0  ;;  %v8799_v0 = vld [vmem:[#allocation8_spill] sm:$0xff] }
 0x8a1   :  { %3063 = vrot.lane.b32.xlu2 %v5355_v30, %s4524_s16  ;;  %3123 = vrot.lane.b32.xlu1 %v5472_v54, %s4460_s2  ;;  %v1771_v17 = vsel %vm1770_vm9, %v8780_v36, %v8779_v47  ;;  %v8787_v47 = vld [vmem:[#allocation52_spill] sm:$0xff]  ;;  %v1713_v60 = vsel %vm1712_vm10, %v8791_v13, %v8790_v40  ;;  %v8792_v38 = vld [vmem:[#allocation10_spill] sm:$0xff] }
 0x8a2   :  { %v1568_v58 = vadd.f32 %v1564_v18, %v1510_v50  ;;  %v7001_v50 = vperm.slane %v6913_v62, 6  ;;  %v1043_v18 = vmul.f32 %v6827_v6, %v1038_v11  ;;  %v1791_v36 = vmul.f32 %v8787_v47, %v1771_v17  ;;  %v8793_v47 = vld [vmem:[#allocation90_spill] sm:$0xff] }
 0x8a3   :  { %v6939_v49 = vpop.permute.xlu2 %2915  ;;  %v6941_v46 = vpop.permute.xlu1 %2939 }
 0x8a4   :  { %8768 = vst [vmem:[#allocation378_spill] sm:$0xff] %v6941_v46  ;;  %v1626_v7 = vadd.f32 %v1622_v31, %v1568_v58  ;;  %v989_v31 = vmul.f32 %v6830_v22, %v984_v34  ;;  %v8788_v58 = vld [vmem:[#allocation114_spill] sm:$0xff]  ;;  %v1154_v34 = vmul.f32 %v8792_v38, %v1134_v59  ;;  %v7043_v59 = vmul.f32 %v7001_v50, %v1791_v36  ;;  %v8803_v38 = vld [vmem:[#allocation119_spill] sm:$0xff]  ;;  %v8819_v46 = vld [vmem:[#allocation72_spill] sm:$0xff] }
 0x8a5   :  { %3579 = vrot.lane.b32.xlu0 %v5709_v16, %s4539_s10  ;;  %v1077_v11 = vsel %vm1074_vm12, %v8789_v29, %v8788_v58  ;;  %v1192_v58 = vsel %vm1190_vm14, %v8794_v21, %v8793_v47  ;;  %v8802_v21 = vld [vmem:[#allocation38_spill] sm:$0xff]  ;;  %v8804_v47 = vld [vmem:[#allocation132_spill] sm:$0xff] }
 0x8a6   :  { %v7024_v17 = vadd.f32 %v1680_v26, %v1626_v7  ;;  %v1047_v20 = vadd.f32 %v1043_v18, %v989_v31  ;;  %v1097_v13 = vmul.f32 %v8799_v0, %v1077_v11  ;;  %v8800_v7 = vld [vmem:[#allocation153_spill] sm:$0xff]  ;;  %v8801_v26 = vld [vmem:[#allocation166_spill] sm:$0xff]  ;;  %v1733_v31 = vmul.f32 %v8802_v21, %v1713_v60 }
 0x8a7   :  { %v1020_v18 = vsel %vm1016_vm1, %v8801_v26, %v8800_v7  ;;  %v1048_v11 = vadd.f32 %v1044_v42, %v990_v24  ;;  %v8807_v0 = vld [vmem:[#allocation150_spill] sm:$0xff]  ;;  %v8808_v7 = vld [vmem:[#allocation163_spill] sm:$0xff]  ;;  %v1159_v21 = vmul.f32 %v6851_v63, %v1154_v34  ;;  %vm1944_vm1 = vcmask 64512  }
 0x8a8   :  { %v1105_v15 = vadd.f32 %v1101_v27, %v1047_v20  ;;  %v962_v36 = vsel %vm958_vm11, %v8808_v7, %v8807_v0  ;;  %v8809_v26 = vld [vmem:[#allocation158_spill] sm:$0xff]  ;;  %v1102_v27 = vmul.f32 %v6833_v8, %v1097_v13  ;;  %v8814_v42 = vld [vmem:[#allocation19_spill] sm:$0xff]  ;;  %v8816_v7 = vld [vmem:[#allocation148_spill] sm:$0xff]  ;;  %vm1886_vm11 = vcmask 72704  }
 0x8a9   :  { %3069 = vrot.lane.b32.xlu2 %v5772_v39, %s4524_s16  ;;  %3139 = vperm.xlu1 %4310, %v6703_v3   ;;  %v1078_v60 = vsel %vm1074_vm12, %v8810_v28, %v8809_v26  ;;  %v8815_v24 = vld [vmem:[#allocation18_spill] sm:$0xff]  ;;  %v7070_v26 = vpop.permute.xlu0 %3055  ;;  %v8823_v13 = vld [vmem:[#allocation59_spill] sm:$0xff]  ;;  %s4542_s16 = smov 102   ;;  %vm2002_vm12 = vcmask 56320  }
 0x8aa   :  { %8818 = vst [vmem:[#allocation137_spill] sm:$0xff] %v7070_v26  ;;  %v8820_v34 = vld [vmem:[#allocation78_spill] sm:$0xff]  ;;  %v8833_v26 = vld [vmem:[#allocation15_spill] sm:$0xff] }
 0x8ab   :  { %v6980_v51 = vpop.permute.xlu2 %2935  ;;  %v6982_v2 = vpop.permute.xlu1 %2949 }
 0x8ac   :  { %8772 = vst [vmem:[#allocation112_spill] sm:$0xff] %v6980_v51  ;;  %v8797_v51 = vld [vmem:[#allocation81_spill] sm:$0xff] }
 0x8ad   :  { %8773 = vst [vmem:[#allocation140_spill] sm:$0xff] %v6982_v2  ;;  %3553 = vperm.xlu0 %4330, %v8778_v43   ;;  %v1250_v40 = vsel %vm1248_vm15, %v8798_v37, %v8797_v51  ;;  %v8361_v51 = vmov 44   ;;  %v8817_v2 = vld [vmem:[#allocation176_spill] sm:$0xff] }
 0x8ae   :  { %v1136_v28 = vsel %vm1132_vm13, %v8817_v2, %v8816_v7  ;;  %v8825_v2 = vld [vmem:[#allocation133_spill] sm:$0xff] }
 0x8b1   :  { %3089 = vperm.xlu2 %4309, %v8778_v43   ;;  %3151 = vperm.xlu1 %4310, %v6865_v57  }
 0x8b3   :  { %v7030_v29 = vpop.permute.xlu2 %2941  ;;  %v7032_v45 = vpop.permute.xlu1 %2965 }
 0x8b4   :  { %8795 = vst [vmem:[#allocation13_spill] sm:$0xff] %v7030_v29  ;;  %v1135_v29 = vsel %vm1132_vm13, %v8804_v47, %v8803_v38  ;;  %v8811_v38 = vld [vmem:[#allocation21_spill] sm:$0xff]  ;;  %vm2118_vm13 = vcmask 39936  }
 0x8b5   :  { %8796 = vst [vmem:[#allocation109_spill] sm:$0xff] %v7032_v45  ;;  %v8805_v45 = vld [vmem:[#allocation115_spill] sm:$0xff]  ;;  %4331 = vset.pattern.permute.xlu0 %v8361_v51  ;;  %v1212_v47 = vmul.f32 %v8811_v38, %v1192_v58  ;;  %v1040_v51 = vmul.f32 %v8813_v53, %v1020_v18  ;;  %v1155_v20 = vmul.f32 %v8814_v42, %v1135_v29  ;;  %v8821_v38 = vld [vmem:[#allocation5_spill] sm:$0xff] }
 0x8b6   :  { %v1193_v37 = vsel %vm1190_vm14, %v8806_v61, %v8805_v45  ;;  %3495 = vperm.xlu0 %4331, %v8778_v43   ;;  %v8812_v61 = vld [vmem:[#allocation20_spill] sm:$0xff]  ;;  %v1829_v58 = vsel %vm1828_vm0, %v8820_v34, %v8819_v46  ;;  %v1163_v29 = vadd.f32 %v1159_v21, %v1105_v15  ;;  %v8824_v18 = vld [vmem:[#allocation117_spill] sm:$0xff]  ;;  %v1106_v42 = vadd.f32 %v1102_v27, %v1048_v11 }
 0x8b7   :  { %v1270_v45 = vmul.f32 %v8812_v61, %v1250_v40  ;;  %v1213_v0 = vmul.f32 %v8815_v24, %v1193_v37  ;;  %v986_v40 = vmul.f32 %v8821_v38, %v962_v36  ;;  %v8822_v61 = vld [vmem:[#allocation12_spill] sm:$0xff]  ;;  %v1251_v37 = vsel %vm1248_vm15, %v8825_v2, %v8824_v18 }
 0x8b8   :  { %v1098_v53 = vmul.f32 %v8822_v61, %v1078_v60  ;;  %v8826_v46 = vmov 39   ;;  %v1738_v36 = vmul.f32 %v7006_v19, %v1733_v31  ;;  %v8827_v60 = vld [vmem:[#allocation83_spill] sm:$0xff]  ;;  %v8828_v24 = vld [vmem:[#allocation96_spill] sm:$0xff]  ;;  %v1045_v34 = vmul.f32 %v6827_v6, %v1040_v51 }
 0x8b9   :  { %3109 = vrot.lane.b32.xlu2 %v8823_v13, %s4460_s2  ;;  %3169 = vrot.lane.b32.xlu1 %v5405_v23, %s4527_s19  ;;  %v1308_v7 = vsel %vm1306_vm2, %v8828_v24, %v8827_v60  ;;  %v8829_v38 = vld [vmem:[#allocation16_spill] sm:$0xff]  ;;  %v1217_v11 = vmul.f32 %v6869_v33, %v1212_v47  ;;  %v1160_v27 = vmul.f32 %v6851_v63, %v1155_v20  ;;  %v8836_v47 = vld [vmem:[#allocation169_spill] sm:$0xff]  ;;  %v8837_v20 = vld [vmem:[#allocation122_spill] sm:$0xff] }
 0x8ba   :  { %4311 = vset.pattern.permute.xlu2 %v8765_v9  ;;  %4315 = vset.pattern.permute.xlu1 %v8826_v46  ;;  %v1156_v61 = vmul.f32 %v8829_v38, %v1136_v28  ;;  %v1275_v9 = vmul.f32 %v6873_v32, %v1270_v45  ;;  %v1218_v31 = vmul.f32 %v6869_v33, %v1213_v0  ;;  %v8832_v18 = vld [vmem:[#allocation56_spill] sm:$0xff]  ;;  %v8834_v28 = vld [vmem:[#allocation17_spill] sm:$0xff]  ;;  %v8838_v0 = vld [vmem:[#allocation135_spill] sm:$0xff] }
 0x8bb   :  { %v7092_v15 = vpop.permute.xlu2 %2951  ;;  %v7094_v21 = vpop.permute.xlu1 %2977  ;;  %v1849_v2 = vmul.f32 %v8832_v18, %v1829_v58  ;;  %v1271_v60 = vmul.f32 %v8833_v26, %v1251_v37  ;;  %v991_v6 = vmul.f32 %v6830_v22, %v986_v40  ;;  %v1103_v51 = vmul.f32 %v6833_v8, %v1098_v53  ;;  %v8839_v26 = vld [vmem:[#allocation118_spill] sm:$0xff]  ;;  %v8841_v53 = vld [vmem:[#allocation93_spill] sm:$0xff] }
 0x8bc   :  { %8830 = vst [vmem:[#allocation350_spill] sm:$0xff] %v7092_v15  ;;  %v1328_v24 = vmul.f32 %v8834_v28, %v1308_v7  ;;  %v1221_v38 = vadd.f32 %v1217_v11, %v1163_v29  ;;  %v8835_v15 = vld [vmem:[#allocation156_spill] sm:$0xff]  ;;  %v1309_v58 = vsel %vm1306_vm2, %v8838_v0, %v8837_v20  ;;  %v8840_v37 = vld [vmem:[#allocation146_spill] sm:$0xff]  ;;  %v1161_v40 = vmul.f32 %v6851_v63, %v1156_v61  ;;  %v8844_v11 = vld [vmem:[#allocation107_spill] sm:$0xff] }
 0x8bd   :  { %8831 = vst [vmem:[#allocation67_spill] sm:$0xff] %v7094_v21  ;;  %v1164_v21 = vadd.f32 %v1160_v27, %v1106_v42  ;;  %v1194_v45 = vsel %vm1190_vm14, %v8836_v47, %v8835_v15  ;;  %v1367_v22 = vsel %vm1364_vm3, %v8840_v37, %v8839_v26  ;;  %v1049_v8 = vadd.f32 %v1045_v34, %v991_v6  ;;  %v8842_v29 = vld [vmem:[#allocation102_spill] sm:$0xff]  ;;  %v8843_v15 = vld [vmem:[#allocation84_spill] sm:$0xff]  ;;  %v8851_v26 = vld [vmem:[#allocation179_spill] sm:$0xff] }
 0x8be   :  { %3589 = vrot.lane.b32.xlu0 %v5632_v4, %s4539_s10  ;;  %v1366_v42 = vsel %vm1364_vm3, %v8842_v29, %v8841_v53  ;;  %v1279_v7 = vadd.f32 %v1275_v9, %v1221_v38  ;;  %v1424_v27 = vsel %vm1422_vm4, %v8844_v11, %v8843_v15  ;;  %v7124_v28 = vperm.slane %v6913_v62, 7  ;;  %v8845_v20 = vld [vmem:[#allocation14_spill] sm:$0xff]  ;;  %v8847_v9 = vld [vmem:[#allocation27_spill] sm:$0xff]  ;;  %v8848_v38 = vld [vmem:[#allocation161_spill] sm:$0xff] }
 0x8bf   :  { %v1222_v18 = vadd.f32 %v1218_v31, %v1164_v21  ;;  %v1276_v47 = vmul.f32 %v6873_v32, %v1271_v60  ;;  %v1214_v0 = vmul.f32 %v8845_v20, %v1194_v45  ;;  %v1107_v34 = vadd.f32 %v1103_v51, %v1049_v8  ;;  %v8846_v63 = vld [vmem:[#allocation26_spill] sm:$0xff]  ;;  %v8850_v31 = vld [vmem:[#allocation151_spill] sm:$0xff]  ;;  %v7140_v45 = vpop.permute.xlu0 %3065  ;;  %v8855_v15 = vld [vmem:[#allocation85_spill] sm:$0xff] }
 0x8c0   :  { %v1329_v61 = vmul.f32 %v8846_v63, %v1309_v58  ;;  %v1387_v6 = vmul.f32 %v8847_v9, %v1367_v22  ;;  %v8849_v21 = vld [vmem:[#allocation174_spill] sm:$0xff]  ;;  %v1310_v60 = vsel %vm1306_vm2, %v8851_v26, %v8850_v31  ;;  %8852 = vst [vmem:[#allocation75_spill] sm:$0xff] %v7140_v45  ;;  %v1742_v51 = vadd.f32 %v1738_v36, %v7024_v17  ;;  %v8857_v63 = vld [vmem:[#allocation28_spill] sm:$0xff] }
 0x8c1   :  { %3115 = vrot.lane.b32.xlu2 %v5709_v16, %s4460_s2  ;;  %3179 = vrot.lane.b32.xlu1 %v5355_v30, %s4527_s19  ;;  %v1252_v62 = vsel %vm1248_vm15, %v8849_v21, %v8848_v38  ;;  %v1333_v37 = vmul.f32 %v6887_v10, %v1328_v24  ;;  %v8853_v8 = vld [vmem:[#allocation30_spill] sm:$0xff]  ;;  %v1165_v29 = vadd.f32 %v1161_v40, %v1107_v34  ;;  %v8858_v38 = vld [vmem:[#allocation120_spill] sm:$0xff]  ;;  %v8861_v24 = vld [vmem:[#allocation77_spill] sm:$0xff]  ;;  %vm2176_vm14 = vcmask 23552  }
 0x8c2   :  { %v1386_v53 = vmul.f32 %v8853_v8, %v1366_v42  ;;  %v8856_v11 = vld [vmem:[#allocation98_spill] sm:$0xff]  ;;  %v1444_v9 = vmul.f32 %v8857_v63, %v1424_v27  ;;  %v8859_v21 = vld [vmem:[#allocation136_spill] sm:$0xff]  ;;  %v1280_v17 = vadd.f32 %v1276_v47, %v1222_v18  ;;  %v1219_v40 = vmul.f32 %v6869_v33, %v1214_v0  ;;  %v8863_v8 = vld [vmem:[#allocation25_spill] sm:$0xff] }
 0x8c3   :  { %v7145_v58 = vpop.permute.xlu2 %2969  ;;  %v7147_v22 = vpop.permute.xlu1 %2995  ;;  %v1482_v20 = vsel %vm1480_vm5, %v8856_v11, %v8855_v15  ;;  %v1425_v31 = vsel %vm1422_vm4, %v8859_v21, %v8858_v38  ;;  %v8860_v36 = vld [vmem:[#allocation68_spill] sm:$0xff]  ;;  %v8862_v34 = vld [vmem:[#allocation22_spill] sm:$0xff]  ;;  %v1330_v45 = vmul.f32 %v8863_v8, %v1310_v60  ;;  %v1337_v15 = vadd.f32 %v1333_v37, %v1279_v7  ;;  %v8864_v18 = vld [vmem:[#allocation31_spill] sm:$0xff] }
 0x8c4   :  { %8854 = vst [vmem:[#allocation11_spill] sm:$0xff] %v7147_v22  ;;  %v1945_v42 = vsel %vm1944_vm1, %v8861_v24, %v8860_v36  ;;  %v1272_v26 = vmul.f32 %v8862_v34, %v1252_v62  ;;  %v1854_v22 = vmul.f32 %v7124_v28, %v1849_v2  ;;  %v1334_v27 = vmul.f32 %v6887_v10, %v1329_v61  ;;  %v8865_v38 = vld [vmem:[#allocation24_spill] sm:$0xff]  ;;  %v8866_v62 = vld [vmem:[#allocation125_spill] sm:$0xff]  ;;  %v8867_v60 = vld [vmem:[#allocation138_spill] sm:$0xff] }
 0x8c5   :  { %v1392_v11 = vmul.f32 %v6908_v41, %v1387_v6  ;;  %v1502_v47 = vmul.f32 %v8864_v18, %v1482_v20  ;;  %v1391_v63 = vmul.f32 %v6908_v41, %v1386_v53  ;;  %v1445_v21 = vmul.f32 %v8865_v38, %v1425_v31  ;;  %v8868_v37 = vld [vmem:[#allocation159_spill] sm:$0xff]  ;;  %v8869_v61 = vld [vmem:[#allocation172_spill] sm:$0xff]  ;;  %v8870_v36 = vld [vmem:[#allocation121_spill] sm:$0xff] }
 0x8c6   :  { %3487 = vperm.xlu0 %4331, %v6703_v3   ;;  %v1223_v33 = vadd.f32 %v1219_v40, %v1165_v29  ;;  %v1449_v0 = vmul.f32 %v6918_v52, %v1444_v9  ;;  %v1483_v2 = vsel %vm1480_vm5, %v8867_v60, %v8866_v62  ;;  %v1338_v7 = vadd.f32 %v1334_v27, %v1280_v17  ;;  %v8871_v24 = vld [vmem:[#allocation149_spill] sm:$0xff]  ;;  %v8872_v9 = vld [vmem:[#allocation95_spill] sm:$0xff]  ;;  %v8874_v34 = vld [vmem:[#allocation86_spill] sm:$0xff] }
 0x8c7   :  { %v1368_v6 = vsel %vm1364_vm3, %v8869_v61, %v8868_v37  ;;  %v1541_v20 = vsel %vm1538_vm6, %v8871_v24, %v8870_v36  ;;  %v1277_v53 = vmul.f32 %v6873_v32, %v1272_v26  ;;  %v1335_v29 = vmul.f32 %v6887_v10, %v1330_v45  ;;  %v8873_v31 = vld [vmem:[#allocation105_spill] sm:$0xff]  ;;  %v8875_v8 = vld [vmem:[#allocation110_spill] sm:$0xff]  ;;  %v8876_v26 = vld [vmem:[#allocation44_spill] sm:$0xff] }
 0x8c8   :  { %v1540_v17 = vsel %vm1538_vm6, %v8873_v31, %v8872_v9  ;;  %v1395_v40 = vadd.f32 %v1391_v63, %v1337_v15  ;;  %v1598_v27 = vsel %vm1596_vm7, %v8875_v8, %v8874_v34  ;;  %v1396_v18 = vadd.f32 %v1392_v11, %v1338_v7  ;;  %v8877_v45 = vld [vmem:[#allocation23_spill] sm:$0xff]  ;;  %v8880_v24 = vld [vmem:[#allocation164_spill] sm:$0xff]  ;;  %v8881_v15 = vld [vmem:[#allocation177_spill] sm:$0xff] }
 0x8c9   :  { %3125 = vrot.lane.b32.xlu2 %v5632_v4, %s4460_s2  ;;  %3185 = vrot.lane.b32.xlu1 %v5772_v39, %s4527_s19  ;;  %v1450_v32 = vmul.f32 %v6918_v52, %v1445_v21  ;;  %v1503_v10 = vmul.f32 %v8876_v26, %v1483_v2  ;;  %v1388_v38 = vmul.f32 %v8877_v45, %v1368_v6  ;;  %v8879_v61 = vld [vmem:[#allocation35_spill] sm:$0xff]  ;;  %v8882_v9 = vld [vmem:[#allocation154_spill] sm:$0xff]  ;;  %v7205_v21 = vpop.permute.xlu0 %3081  ;;  %v8885_v2 = vld [vmem:[#allocation64_spill] sm:$0xff]  ;;  %vm2234_vm15 = vcmask 15360  }
 0x8ca   :  { %v1281_v62 = vadd.f32 %v1277_v53, %v1223_v33  ;;  %v1561_v36 = vmul.f32 %v8879_v61, %v1541_v20  ;;  %v1426_v63 = vsel %vm1422_vm4, %v8881_v15, %v8880_v24  ;;  %v8883_v31 = vld [vmem:[#allocation182_spill] sm:$0xff]  ;;  %8884 = vst [vmem:[#allocation80_spill] sm:$0xff] %v7205_v21  ;;  %v7208_v7 = vmul.f32 %v8885_v2, %v1945_v42  ;;  %v8886_v34 = vld [vmem:[#allocation45_spill] sm:$0xff]  ;;  %v8888_v45 = vld [vmem:[#allocation123_spill] sm:$0xff] }
 0x8cb   :  { %v7194_v60 = vpop.permute.xlu2 %2993  ;;  %v7196_v37 = vpop.permute.xlu1 %3005  ;;  %v1484_v11 = vsel %vm1480_vm5, %v8883_v31, %v8882_v9  ;;  %v1800_v33 = vadd.f32 %v7043_v59, %v1742_v51  ;;  %v1453_v6 = vadd.f32 %v1449_v0, %v1395_v40  ;;  %v1560_v8 = vmul.f32 %v8886_v34, %v1540_v17  ;;  %v8887_v20 = vld [vmem:[#allocation37_spill] sm:$0xff]  ;;  %v8889_v61 = vld [vmem:[#allocation139_spill] sm:$0xff] }
 0x8cc   :  { %8878 = vst [vmem:[#allocation9_spill] sm:$0xff] %v7194_v60  ;;  %v1339_v53 = vadd.f32 %v1335_v29, %v1281_v62  ;;  %v1618_v26 = vmul.f32 %v8887_v20, %v1598_v27  ;;  %v1599_v24 = vsel %vm1596_vm7, %v8889_v61, %v8888_v45  ;;  %v1454_v15 = vadd.f32 %v1450_v32, %v1396_v18  ;;  %v8890_v31 = vld [vmem:[#allocation29_spill] sm:$0xff]  ;;  %v7226_v17 = vld [vmem:[%s8299_s4 + $0x10] sm:$0xff]  ;;  %v8895_v20 = vld [vmem:[#allocation162_spill] sm:$0xff] }
 0x8cd   :  { %v1507_v9 = vmul.f32 %v6933_v44, %v1502_v47  ;;  %v1393_v42 = vmul.f32 %v6908_v41, %v1388_v38  ;;  %v1446_v59 = vmul.f32 %v8890_v31, %v1426_v63  ;;  %v8891_v51 = vld [vmem:[#allocation33_spill] sm:$0xff]  ;;  %v8362_v29 = vmov 47   ;;  %v8892_v27 = vld [vmem:[#allocation87_spill] sm:$0xff]  ;;  %v8894_v63 = vld [vmem:[#allocation34_spill] sm:$0xff] }
 0x8ce   :  { %3527 = vrot.lane.b32.xlu0 %v5355_v30, %s4458_s21  ;;  %v1504_v0 = vmul.f32 %v8891_v51, %v1484_v11  ;;  %v7228_v40 = vadd.f32 %v1854_v22, %v1800_v33  ;;  %v8893_v18 = vld [vmem:[#allocation101_spill] sm:$0xff]  ;;  %v1508_v41 = vmul.f32 %v6933_v44, %v1503_v10  ;;  %v1566_v32 = vmul.f32 %v6951_v56, %v1561_v36  ;;  %v8896_v10 = vld [vmem:[#allocation175_spill] sm:$0xff]  ;;  %v8897_v45 = vld [vmem:[#allocation128_spill] sm:$0xff] }
 0x8cf   :  { %4337 = vset.pattern.permute.xlu0 %v8362_v29  ;;  %v1656_v47 = vsel %vm1654_vm8, %v8893_v18, %v8892_v27  ;;  %v7236_v38 = vperm.slane %v7226_v17, 0  ;;  %v1511_v62 = vadd.f32 %v1507_v9, %v1453_v6  ;;  %v1619_v11 = vmul.f32 %v8894_v63, %v1599_v24  ;;  %v8898_v61 = vld [vmem:[#allocation141_spill] sm:$0xff]  ;;  %v8899_v9 = vld [vmem:[#allocation124_spill] sm:$0xff]  ;;  %v8903_v51 = vld [vmem:[#allocation79_spill] sm:$0xff] }
 0x8d0   :  { %v1397_v2 = vadd.f32 %v1393_v42, %v1339_v53  ;;  %v1565_v22 = vmul.f32 %v6951_v56, %v1560_v8  ;;  %v1623_v33 = vmul.f32 %v6956_v48, %v1618_v26  ;;  %v1512_v34 = vadd.f32 %v1508_v41, %v1454_v15  ;;  %v8900_v24 = vld [vmem:[#allocation152_spill] sm:$0xff]  ;;  %v8902_v15 = vld [vmem:[#allocation71_spill] sm:$0xff]  ;;  %v8905_v63 = vld [vmem:[#allocation97_spill] sm:$0xff] }
 0x8d1   :  { %3143 = vperm.xlu2 %4311, %v6768_v12   ;;  %3205 = vperm.xlu1 %4315, %v8778_v43   ;;  %v1542_v36 = vsel %vm1538_vm6, %v8896_v10, %v8895_v20  ;;  %v1657_v6 = vsel %vm1654_vm8, %v8898_v61, %v8897_v45  ;;  %v1715_v53 = vsel %vm1712_vm10, %v8900_v24, %v8899_v9  ;;  %v8904_v18 = vld [vmem:[#allocation36_spill] sm:$0xff]  ;;  %v8909_v29 = vld [vmem:[#allocation49_spill] sm:$0xff]  ;;  %v8910_v21 = vld [vmem:[#allocation167_spill] sm:$0xff]  ;;  %vm2292_vm2 = vcmask 7168  }
 0x8d2   :  { %v1451_v42 = vmul.f32 %v6918_v52, %v1446_v59  ;;  %v1509_v31 = vmul.f32 %v6933_v44, %v1504_v0  ;;  %v1887_v27 = vsel %vm1886_vm11, %v8903_v51, %v8902_v15  ;;  %v1676_v41 = vmul.f32 %v8904_v18, %v1656_v47  ;;  %v8906_v20 = vld [vmem:[#allocation108_spill] sm:$0xff]  ;;  %v8912_v47 = vld [vmem:[#allocation157_spill] sm:$0xff] }
 0x8d3   :  { %v7254_v8 = vpop.permute.xlu2 %2997  ;;  %v7256_v26 = vpop.permute.xlu1 %3011  ;;  %v1714_v10 = vsel %vm1712_vm10, %v8906_v20, %v8905_v63  ;;  %v1570_v45 = vadd.f32 %v1566_v32, %v1512_v34  ;;  %v1569_v61 = vadd.f32 %v1565_v22, %v1511_v62  ;;  %v1624_v52 = vmul.f32 %v6956_v48, %v1619_v11  ;;  %v8907_v59 = vld [vmem:[#allocation32_spill] sm:$0xff]  ;;  %v8913_v51 = vld [vmem:[#allocation185_spill] sm:$0xff]  ;;  %v8914_v32 = vld [vmem:[#allocation43_spill] sm:$0xff] }
 0x8d4   :  { %8901 = vst [vmem:[#allocation94_spill] sm:$0xff] %v7256_v26  ;;  %v1562_v44 = vmul.f32 %v8907_v59, %v1542_v36  ;;  %v1455_v0 = vadd.f32 %v1451_v42, %v1397_v2  ;;  %v8908_v9 = vld [vmem:[#allocation48_spill] sm:$0xff]  ;;  %v1735_v26 = vmul.f32 %v8909_v29, %v1715_v53  ;;  %v1658_v18 = vsel %vm1654_vm8, %v8913_v51, %v8912_v47  ;;  %v7275_v63 = vpop.permute.xlu0 %3111  ;;  %v8916_v22 = vld [vmem:[#allocation113_spill] sm:$0xff]  ;;  %v8919_v53 = vld [vmem:[#allocation142_spill] sm:$0xff] }
 0x8d5   :  { %v1677_v24 = vmul.f32 %v8908_v9, %v1657_v6  ;;  %v8911_v60 = vld [vmem:[#allocation180_spill] sm:$0xff]  ;;  %v1907_v62 = vmul.f32 %v8914_v32, %v1887_v27  ;;  %v1627_v11 = vadd.f32 %v1623_v33, %v1569_v61  ;;  %v8918_v6 = vld [vmem:[#allocation126_spill] sm:$0xff]  ;;  %v1628_v20 = vadd.f32 %v1624_v52, %v1570_v45  ;;  %v8920_v9 = vld [vmem:[#allocation39_spill] sm:$0xff] }
 0x8d6   :  { %v1600_v15 = vsel %vm1596_vm7, %v8911_v60, %v8910_v21  ;;  %3635 = vrot.lane.b32.xlu0 %v5545_v35, %s4542_s16  ;;  %v8915_v2 = vld [vmem:[#allocation88_spill] sm:$0xff]  ;;  %v1513_v34 = vadd.f32 %v1509_v31, %v1455_v0  ;;  %v1681_v60 = vmul.f32 %v6985_v14, %v1676_v41  ;;  %v8917_v21 = vld [vmem:[#allocation50_spill] sm:$0xff]  ;;  %v1773_v42 = vsel %vm1770_vm9, %v8919_v53, %v8918_v6  ;;  %v8921_v27 = vld [vmem:[#allocation47_spill] sm:$0xff] }
 0x8d7   :  { %v1772_v29 = vsel %vm1770_vm9, %v8916_v22, %v8915_v2  ;;  %v1734_v36 = vmul.f32 %v8917_v21, %v1714_v10  ;;  %v1567_v59 = vmul.f32 %v6951_v56, %v1562_v44  ;;  %v1620_v47 = vmul.f32 %v8920_v9, %v1600_v15  ;;  %v8922_v41 = vld [vmem:[#allocation51_spill] sm:$0xff]  ;;  %v8924_v52 = vld [vmem:[#allocation89_spill] sm:$0xff]  ;;  %v8928_v21 = vld [vmem:[#allocation178_spill] sm:$0xff] }
 0x8d8   :  { %v1678_v33 = vmul.f32 %v8921_v27, %v1658_v18  ;;  %v7296_v31 = vperm.slane %v7226_v17, 1  ;;  %v1792_v10 = vmul.f32 %v8922_v41, %v1772_v29  ;;  %v1682_v61 = vmul.f32 %v6985_v14, %v1677_v24  ;;  %v8925_v44 = vld [vmem:[#allocation103_spill] sm:$0xff]  ;;  %v8926_v51 = vld [vmem:[#allocation41_spill] sm:$0xff]  ;;  %v8930_v9 = vld [vmem:[#allocation144_spill] sm:$0xff] }
 0x8d9   :  { %3167 = vrot.lane.b32.xlu2 %v8823_v13, %s4527_s19  ;;  %3225 = vrot.lane.b32.xlu1 %v8823_v13, %s4529_s15  ;;  %v1740_v45 = vmul.f32 %v7006_v19, %v1735_v26  ;;  %v8923_v56 = vmov 40   ;;  %v1830_v0 = vsel %vm1828_vm0, %v8925_v44, %v8924_v52  ;;  %v1685_v15 = vadd.f32 %v1681_v60, %v1627_v11  ;;  %v8929_v53 = vld [vmem:[#allocation131_spill] sm:$0xff] }
 0x8da   :  { %4313 = vset.pattern.permute.xlu2 %v8826_v46  ;;  %4317 = vset.pattern.permute.xlu1 %v8923_v56  ;;  %v1793_v18 = vmul.f32 %v8926_v51, %v1773_v42  ;;  %v1571_v32 = vadd.f32 %v1567_v59, %v1513_v34  ;;  %v1912_v24 = vmul.f32 %v7236_v38, %v1907_v62  ;;  %v8927_v46 = vld [vmem:[#allocation165_spill] sm:$0xff]  ;;  %v8931_v60 = vld [vmem:[#allocation127_spill] sm:$0xff]  ;;  %v8933_v62 = vld [vmem:[#allocation42_spill] sm:$0xff]  ;;  %vm2379_vm3 = vcmask 1039360  }
 0x8db   :  { %v7307_v2 = vpop.permute.xlu2 %3007  ;;  %v7309_v22 = vpop.permute.xlu1 %3031  ;;  %v1739_v26 = vmul.f32 %v7006_v19, %v1734_v36  ;;  %v1686_v29 = vadd.f32 %v1682_v61, %v1628_v20  ;;  %v1716_v6 = vsel %vm1712_vm10, %v8928_v21, %v8927_v46  ;;  %v1831_v11 = vsel %vm1828_vm0, %v8930_v9, %v8929_v53  ;;  %v8932_v42 = vld [vmem:[#allocation155_spill] sm:$0xff]  ;;  %v8936_v21 = vld [vmem:[#allocation40_spill] sm:$0xff]  ;;  %v8939_v9 = vld [vmem:[#allocation170_spill] sm:$0xff] }
 0x8dc   :  { %v1889_v34 = vsel %vm1886_vm11, %v8932_v42, %v8931_v60  ;;  %v1625_v59 = vmul.f32 %v6956_v48, %v1620_v47  ;;  %v1683_v27 = vmul.f32 %v6985_v14, %v1678_v33  ;;  %v1850_v41 = vmul.f32 %v8933_v62, %v1830_v0  ;;  %v8934_v36 = vld [vmem:[#allocation99_spill] sm:$0xff]  ;;  %v8937_v14 = vld [vmem:[#allocation54_spill] sm:$0xff]  ;;  %v8938_v0 = vld [vmem:[#allocation61_spill] sm:$0xff]  ;;  %v7341_v62 = vpop.permute.xlu0 %3121 }
 0x8dd   :  { %v8935_v20 = vld [vmem:[#allocation111_spill] sm:$0xff]  ;;  %v1797_v52 = vmul.f32 %v7001_v50, %v1792_v10  ;;  %v1744_v44 = vadd.f32 %v1740_v45, %v1686_v29  ;;  %v1743_v51 = vadd.f32 %v1739_v26, %v1685_v15  ;;  %v1798_v46 = vmul.f32 %v7001_v50, %v1793_v18  ;;  %v8941_v10 = vld [vmem:[#allocation160_spill] sm:$0xff]  ;;  %8943 = vst [vmem:[#allocation7_spill] sm:$0xff] %v7341_v62 }
 0x8de   :  { %v1888_v61 = vsel %vm1886_vm11, %v8935_v20, %v8934_v36  ;;  %3707 = vrot.lane.b32.xlu0 %v5772_v39, %s4543_s23  ;;  %v1736_v48 = vmul.f32 %v8936_v21, %v1716_v6  ;;  %v1629_v47 = vadd.f32 %v1625_v59, %v1571_v32  ;;  %v1851_v33 = vmul.f32 %v8937_v14, %v1831_v11  ;;  %v8940_v60 = vld [vmem:[#allocation183_spill] sm:$0xff]  ;;  %v8942_v45 = vld [vmem:[#allocation188_spill] sm:$0xff] }
 0x8df   :  { %v1909_v53 = vmul.f32 %v8938_v0, %v1889_v34  ;;  %v1774_v42 = vsel %vm1770_vm9, %v8940_v60, %v8939_v9  ;;  %v1832_v29 = vsel %vm1828_vm0, %v8942_v45, %v8941_v10  ;;  %v1916_v15 = vadd.f32 %v1912_v24, %v7228_v40  ;;  %v8944_v18 = vld [vmem:[#allocation91_spill] sm:$0xff]  ;;  %v8945_v26 = vld [vmem:[#allocation116_spill] sm:$0xff]  ;;  %v8946_v34 = vld [vmem:[#allocation62_spill] sm:$0xff] }
 0x8e0   :  { %v1946_v32 = vsel %vm1944_vm1, %v8945_v26, %v8944_v18  ;;  %v1687_v6 = vadd.f32 %v1683_v27, %v1629_v47  ;;  %v1970_v11 = vmul.f32 %v7296_v31, %v7208_v7  ;;  %v1908_v59 = vmul.f32 %v8946_v34, %v1888_v61  ;;  %v8947_v40 = vld [vmem:[#allocation129_spill] sm:$0xff]  ;;  %v8950_v0 = vld [vmem:[#allocation58_spill] sm:$0xff]  ;;  %v8953_v45 = vld [vmem:[#allocation63_spill] sm:$0xff] }
 0x8e1   :  { %3171 = vrot.lane.b32.xlu2 %v5545_v35, %s4527_s19  ;;  %3231 = vrot.lane.b32.xlu1 %v5709_v16, %s4529_s15  ;;  %v1801_v36 = vadd.f32 %v1797_v52, %v1743_v51  ;;  %v1802_v20 = vadd.f32 %v1798_v46, %v1744_v44  ;;  %v8948_v24 = vld [vmem:[#allocation145_spill] sm:$0xff]  ;;  %v1741_v14 = vmul.f32 %v7006_v19, %v1736_v48  ;;  %v8955_v46 = vld [vmem:[#allocation82_spill] sm:$0xff]  ;;  %v8956_v48 = vld [vmem:[#allocation168_spill] sm:$0xff]  ;;  %vm2060_vm0 = vcmask 48128  }
 0x8e2   :  { %v1947_v21 = vsel %vm1944_vm1, %v8948_v24, %v8947_v40  ;;  %v8949_v27 = vld [vmem:[#allocation53_spill] sm:$0xff]  ;;  %v1852_v9 = vmul.f32 %v8950_v0, %v1832_v29  ;;  %v1855_v7 = vmul.f32 %v7124_v28, %v1850_v41  ;;  %v1966_v61 = vmul.f32 %v8953_v45, %v1946_v32  ;;  %v8962_v0 = vld [vmem:[#allocation106_spill] sm:$0xff] }
 0x8e3   :  { %v1794_v47 = vmul.f32 %v8949_v27, %v1774_v42  ;;  %v7360_v60 = vpop.permute.xlu2 %3023  ;;  %v7362_v10 = vpop.permute.xlu1 %3051  ;;  %v1856_v52 = vmul.f32 %v7124_v28, %v1851_v33  ;;  %v1914_v44 = vmul.f32 %v7236_v38, %v1909_v53  ;;  %v8954_v51 = vld [vmem:[#allocation73_spill] sm:$0xff]  ;;  %v1745_v18 = vadd.f32 %v1741_v14, %v1687_v6  ;;  %v8960_v27 = vld [vmem:[#allocation186_spill] sm:$0xff]  ;;  %v8961_v53 = vld [vmem:[#allocation92_spill] sm:$0xff] }
 0x8e4   :  { %8951 = vst [vmem:[#allocation52_spill] sm:$0xff] %v7360_v60  ;;  %v2003_v19 = vsel %vm2002_vm12, %v8955_v46, %v8954_v51  ;;  %v8957_v42 = vld [vmem:[#allocation181_spill] sm:$0xff]  ;;  %v7374_v26 = vadd.f32 %v1970_v11, %v1916_v15  ;;  %v1859_v34 = vadd.f32 %v1855_v7, %v1801_v36  ;;  %v2004_v45 = vsel %vm2002_vm12, %v8962_v0, %v8961_v53  ;;  %v8963_v36 = vld [vmem:[#allocation134_spill] sm:$0xff]  ;;  %v8965_v7 = vld [vmem:[#allocation55_spill] sm:$0xff] }
 0x8e5   :  { %8952 = vst [vmem:[#allocation114_spill] sm:$0xff] %v7362_v10  ;;  %v1890_v29 = vsel %vm1886_vm11, %v8957_v42, %v8956_v48  ;;  %v8958_v40 = vld [vmem:[#allocation57_spill] sm:$0xff]  ;;  %v1860_v24 = vadd.f32 %v1856_v52, %v1802_v20  ;;  %v1913_v51 = vmul.f32 %v7236_v38, %v1908_v59  ;;  %v1799_v6 = vmul.f32 %v7001_v50, %v1794_v47  ;;  %v8964_v20 = vld [vmem:[#allocation147_spill] sm:$0xff]  ;;  %v8968_v47 = vld [vmem:[#allocation184_spill] sm:$0xff] }
 0x8e6   :  { %v1967_v41 = vmul.f32 %v8958_v40, %v1947_v21  ;;  %v8959_v32 = vld [vmem:[#allocation173_spill] sm:$0xff]  ;;  %3669 = vperm.xlu0 %4337, %v8778_v43   ;;  %v1857_v15 = vmul.f32 %v7124_v28, %v1852_v9  ;;  %v1971_v11 = vmul.f32 %v7296_v31, %v1966_v61  ;;  %v2005_v21 = vsel %vm2002_vm12, %v8964_v20, %v8963_v36  ;;  %v8967_v40 = vld [vmem:[#allocation187_spill] sm:$0xff]  ;;  %v9034_v60 = vld [vmem:[#allocation254_spill] sm:$0xff] }
 0x8e7   :  { %v1948_v33 = vsel %vm1944_vm1, %v8960_v27, %v8959_v32  ;;  %v1918_v14 = vadd.f32 %v1914_v44, %v1860_v24  ;;  %v1910_v52 = vmul.f32 %v8965_v7, %v1890_v29  ;;  %v1803_v43 = vadd.f32 %v1799_v6, %v1745_v18  ;;  %v8966_v46 = vld [vmem:[#allocation65_spill] sm:$0xff]  ;;  %v8969_v9 = vld [vmem:[#allocation191_spill] sm:$0xff]  ;;  %v7403_v44 = vpop.permute.xlu0 %3127  ;;  %v8972_v32 = vld [vmem:[#allocation194_spill] sm:$0xff] }
 0x8e8   :  { %v1968_v48 = vmul.f32 %v8966_v46, %v1948_v33  ;;  %v2027_v42 = vperm.slane %v7226_v17, 2  ;;  %v2025_v59 = vmul.f32 %v8967_v40, %v2005_v21  ;;  %v1917_v50 = vadd.f32 %v1913_v51, %v1859_v34  ;;  %8970 = vst [vmem:[#allocation130_spill] sm:$0xff] %v7403_v44  ;;  %v8971_v18 = vld [vmem:[#allocation189_spill] sm:$0xff]  ;;  %v8973_v33 = vld [vmem:[#allocation202_spill] sm:$0xff]  ;;  %v8974_v53 = vld [vmem:[#allocation195_spill] sm:$0xff] }
 0x8e9   :  { %3181 = vrot.lane.b32.xlu2 %v5472_v54, %s4527_s19  ;;  %3241 = vrot.lane.b32.xlu1 %v5632_v4, %s4529_s15  ;;  %v1972_v28 = vmul.f32 %v7296_v31, %v1967_v41  ;;  %v2006_v61 = vsel %vm2002_vm12, %v8969_v9, %v8968_v47  ;;  %v1861_v29 = vadd.f32 %v1857_v15, %v1803_v43  ;;  %v8977_v15 = vld [vmem:[#allocation192_spill] sm:$0xff]  ;;  %v8979_v43 = vld [vmem:[#allocation199_spill] sm:$0xff]  ;;  %v2085_v46 = vperm.slane %v7226_v17, 3  ;;  %s4022_s19 = sshll.u32 %s8304_s9, 4  ;;  %s4023_s19 = int_to_ptr.hbm [resolvable:$true] %s4022_s19 }
 0x8ea   :  { %v2023_v24 = vmul.f32 %v8971_v18, %v2003_v19  ;;  %v2024_v27 = vmul.f32 %v8972_v32, %v2004_v45  ;;  %v2062_v0 = vsel %vm2060_vm0, %v8974_v53, %v8973_v33  ;;  %v1975_v41 = vadd.f32 %v1971_v11, %v1917_v50  ;;  %v8978_v19 = vld [vmem:[#allocation193_spill] sm:$0xff]  ;;  %v8980_v40 = vld [vmem:[#allocation196_spill] sm:$0xff]  ;;  %v8981_v9 = vld [vmem:[#allocation203_spill] sm:$0xff] }
 0x8eb   :  { %v7410_v6 = vpop.permute.xlu2 %3035  ;;  %v7412_v34 = vpop.permute.xlu1 %3057  ;;  %v1915_v51 = vmul.f32 %v7236_v38, %v1910_v52  ;;  %v1976_v36 = vadd.f32 %v1972_v28, %v1918_v14  ;;  %v1973_v20 = vmul.f32 %v7296_v31, %v1968_v48  ;;  %v2030_v21 = vmul.f32 %v2027_v42, %v2025_v59  ;;  %v8982_v14 = vld [vmem:[#allocation198_spill] sm:$0xff]  ;;  %v8983_v52 = vld [vmem:[#allocation197_spill] sm:$0xff]  ;;  %v8984_v50 = vld [vmem:[#allocation200_spill] sm:$0xff] }
 0x8ec   :  { %8975 = vst [vmem:[#allocation70_spill] sm:$0xff] %v7410_v6  ;;  %v2026_v7 = vmul.f32 %v8977_v15, %v2006_v61  ;;  %v2063_v45 = vsel %vm2060_vm0, %v8979_v43, %v8978_v19  ;;  %v2082_v47 = vmul.f32 %v8980_v40, %v2062_v0  ;;  %v2028_v11 = vmul.f32 %v2027_v42, %v2023_v24  ;;  %v8985_v28 = vld [vmem:[#allocation190_spill] sm:$0xff]  ;;  %v8986_v32 = vld [vmem:[#allocation205_spill] sm:$0xff]  ;;  %v8991_v19 = vld [vmem:[#allocation208_spill] sm:$0xff] }
 0x8ed   :  { %8976 = vst [vmem:[#allocation76_spill] sm:$0xff] %v7412_v34  ;;  %v2083_v18 = vmul.f32 %v8981_v9, %v2063_v45  ;;  %v1919_v38 = vadd.f32 %v1915_v51, %v1861_v29  ;;  %v2029_v31 = vmul.f32 %v2027_v42, %v2024_v27  ;;  %v2061_v48 = vsel %vm2060_vm0, %v8983_v52, %v8982_v14  ;;  %v8987_v53 = vld [vmem:[#allocation213_spill] sm:$0xff]  ;;  %v8988_v0 = vld [vmem:[#allocation206_spill] sm:$0xff]  ;;  %v8989_v29 = vld [vmem:[#allocation216_spill] sm:$0xff] }
 0x8ee   :  { %3645 = vrot.lane.b32.xlu0 %v5472_v54, %s4542_s16  ;;  %v8364_v59 = vmov 46   ;;  %v2064_v61 = vsel %vm2060_vm0, %v8985_v28, %v8984_v50  ;;  %v2081_v33 = vmul.f32 %v8986_v32, %v2061_v48  ;;  %v2119_v15 = vsel %vm2118_vm13, %v8988_v0, %v8987_v53  ;;  %v8990_v24 = vld [vmem:[#allocation209_spill] sm:$0xff]  ;;  %v8992_v45 = vld [vmem:[#allocation204_spill] sm:$0xff]  ;;  %v8993_v40 = vld [vmem:[#allocation211_spill] sm:$0xff] }
 0x8ef   :  { %4339 = vset.pattern.permute.xlu0 %v8364_v59  ;;  %v2122_v27 = vsel %vm2118_vm13, %v8990_v24, %v8989_v29  ;;  %v2031_v51 = vmul.f32 %v2027_v42, %v2026_v7  ;;  %v2084_v43 = vmul.f32 %v8991_v19, %v2064_v61  ;;  %v2120_v9 = vsel %vm2118_vm13, %v8993_v40, %v8992_v45  ;;  %v8994_v50 = vld [vmem:[#allocation212_spill] sm:$0xff]  ;;  %v8995_v28 = vld [vmem:[#allocation201_spill] sm:$0xff]  ;;  %v8996_v53 = vld [vmem:[#allocation214_spill] sm:$0xff]  ;;  %v7457_v59 = vpop.permute.xlu0 %3147 }
 0x8f0   :  { %v2143_v14 = vperm.slane %v7226_v17, 4  ;;  %v2087_v52 = vmul.f32 %v2085_v46, %v2082_v47  ;;  %v2088_v48 = vmul.f32 %v2085_v46, %v2083_v18  ;;  %v2121_v32 = vsel %vm2118_vm13, %v8995_v28, %v8994_v50  ;;  %v8997_v61 = vld [vmem:[#allocation207_spill] sm:$0xff]  ;;  %v8998_v29 = vld [vmem:[#allocation217_spill] sm:$0xff] }
 0x8f1   :  { %3197 = vperm.xlu2 %4313, %v6703_v3   ;;  %3259 = vperm.xlu1 %4317, %v6768_v12   ;;  %v2140_v42 = vmul.f32 %v8996_v53, %v2120_v9  ;;  %v1977_v7 = vadd.f32 %v1973_v20, %v1919_v38  ;;  %v2139_v0 = vmul.f32 %v8997_v61, %v2119_v15  ;;  %v8999_v19 = vld [vmem:[#allocation219_spill] sm:$0xff]  ;;  %v9001_v53 = vld [vmem:[#allocation220_spill] sm:$0xff]  ;;  %vm2437_vm4 = vcmask 1031168  }
 0x8f2   :  { %v2142_v24 = vmul.f32 %v8998_v29, %v2122_v27  ;;  %v2141_v45 = vmul.f32 %v8999_v19, %v2121_v32  ;;  %v2034_v12 = vadd.f32 %v2030_v21, %v1976_v36  ;;  %v2033_v47 = vadd.f32 %v2029_v31, %v1975_v41  ;;  %v9000_v27 = vld [vmem:[#allocation227_spill] sm:$0xff]  ;;  %v7466_v36 = vld [vmem:[%s8298_s3] sm:$0xff] }
 0x8f3   :  { %v7453_v40 = vpop.permute.xlu2 %3053  ;;  %v7455_v3 = vpop.permute.xlu1 %3067  ;;  %v2086_v18 = vmul.f32 %v2085_v46, %v2081_v33  ;;  %v2032_v50 = vadd.f32 %v2028_v11, %v7374_v26  ;;  %v2035_v9 = vadd.f32 %v2031_v51, %v1977_v7  ;;  %v2089_v20 = vmul.f32 %v2085_v46, %v2084_v43  ;;  %9002 = vst [vmem:[#allocation10_spill] sm:$0xff] %v7466_v36  ;;  %v9003_v26 = vld [vmem:[#allocation215_spill] sm:$0xff]  ;;  %v9004_v11 = vld [vmem:[#allocation222_spill] sm:$0xff]  ;;  %v9006_v43 = vld [vmem:[#allocation225_spill] sm:$0xff] }
 0x8f4   :  { %v2091_v38 = vadd.f32 %v2087_v52, %v2033_v47  ;;  %v2092_v15 = vadd.f32 %v2088_v48, %v2034_v12  ;;  %v2145_v28 = vmul.f32 %v2143_v14, %v2140_v42  ;;  %v2179_v32 = vsel %vm2176_vm14, %v9001_v53, %v9000_v27  ;;  %v9005_v51 = vld [vmem:[#allocation218_spill] sm:$0xff]  ;;  %v9008_v29 = vld [vmem:[#allocation221_spill] sm:$0xff]  ;;  %v9009_v12 = vld [vmem:[#allocation228_spill] sm:$0xff] }
 0x8f5   :  { %v2144_v41 = vmul.f32 %v2143_v14, %v2139_v0  ;;  %v2147_v21 = vmul.f32 %v2143_v14, %v2142_v24  ;;  %v2146_v31 = vmul.f32 %v2143_v14, %v2141_v45  ;;  %v2177_v46 = vsel %vm2176_vm14, %v9004_v11, %v9003_v26  ;;  %v9007_v42 = vld [vmem:[#allocation226_spill] sm:$0xff]  ;;  %v9013_v11 = vld [vmem:[#allocation239_spill] sm:$0xff] }
 0x8f6   :  { %3603 = vperm.xlu0 %4339, %v7466_v36   ;;  %v2090_v33 = vadd.f32 %v2086_v18, %v2032_v50  ;;  %v2180_v52 = vsel %vm2176_vm14, %v9006_v43, %v9005_v51  ;;  %v2201_v48 = vperm.slane %v7226_v17, 5  ;;  %v2197_v7 = vmul.f32 %v9007_v42, %v2177_v46  ;;  %v9010_v18 = vld [vmem:[#allocation223_spill] sm:$0xff]  ;;  %v9011_v50 = vld [vmem:[#allocation210_spill] sm:$0xff]  ;;  %v9018_v51 = vld [vmem:[#allocation236_spill] sm:$0xff] }
 0x8f7   :  { %v2093_v61 = vadd.f32 %v2089_v20, %v2035_v9  ;;  %v2199_v19 = vmul.f32 %v9008_v29, %v2179_v32  ;;  %v2200_v0 = vmul.f32 %v9009_v12, %v2180_v52  ;;  %v2149_v14 = vadd.f32 %v2145_v28, %v2091_v38  ;;  %v9012_v32 = vld [vmem:[#allocation230_spill] sm:$0xff]  ;;  %v9014_v46 = vld [vmem:[#allocation231_spill] sm:$0xff]  ;;  %v9019_v52 = vld [vmem:[#allocation237_spill] sm:$0xff] }
 0x8f8   :  { %v2148_v24 = vadd.f32 %v2144_v41, %v2090_v33  ;;  %v2150_v47 = vadd.f32 %v2146_v31, %v2092_v15  ;;  %v2178_v27 = vsel %vm2176_vm14, %v9011_v50, %v9010_v18  ;;  %v2202_v20 = vmul.f32 %v2201_v48, %v2197_v7  ;;  %v9015_v41 = vld [vmem:[#allocation234_spill] sm:$0xff]  ;;  %v9016_v15 = vld [vmem:[#allocation233_spill] sm:$0xff]  ;;  %v9020_v42 = vld [vmem:[#allocation224_spill] sm:$0xff]  ;;  %v7508_v50 = vpop.permute.xlu0 %3173 }
 0x8f9   :  { %3209 = vperm.xlu2 %4313, %v6865_v57   ;;  %3267 = vperm.xlu1 %4317, %v6865_v57   ;;  %v2151_v45 = vadd.f32 %v2147_v21, %v2093_v61  ;;  %v2198_v26 = vmul.f32 %v9012_v32, %v2178_v27  ;;  %v2236_v57 = vsel %vm2234_vm15, %v9014_v46, %v9013_v11  ;;  %v2259_v31 = vperm.slane %v7226_v17, 6  ;;  %v9017_v33 = vld [vmem:[#allocation229_spill] sm:$0xff]  ;;  %v9021_v61 = vld [vmem:[#allocation250_spill] sm:$0xff]  ;;  %v7515_v27 = vld [vmem:[%s8299_s4 + $0x18] sm:$0xff] }
 0x8fa   :  { %v2204_v38 = vmul.f32 %v2201_v48, %v2199_v19  ;;  %v2205_v28 = vmul.f32 %v2201_v48, %v2200_v0  ;;  %v2235_v21 = vsel %vm2234_vm15, %v9016_v15, %v9015_v41  ;;  %v2237_v43 = vsel %vm2234_vm15, %v9018_v51, %v9017_v33  ;;  %v9022_v29 = vld [vmem:[#allocation242_spill] sm:$0xff]  ;;  %v9023_v19 = vld [vmem:[#allocation253_spill] sm:$0xff]  ;;  %9025 = vst [vmem:[#allocation90_spill] sm:$0xff] %v7508_v50  ;;  %v9026_v32 = vld [vmem:[#allocation232_spill] sm:$0xff] }
 0x8fb   :  { %v7484_v53 = vpop.permute.xlu2 %3063  ;;  %v7486_v9 = vpop.permute.xlu1 %3085  ;;  %v2238_v7 = vsel %vm2234_vm15, %v9020_v42, %v9019_v52  ;;  %v2293_v12 = vsel %vm2292_vm2, %v9022_v29, %v9021_v61  ;;  %v9024_v0 = vld [vmem:[#allocation245_spill] sm:$0xff]  ;;  %v2256_v11 = vmul.f32 %v9026_v32, %v2236_v57  ;;  %v9028_v15 = vld [vmem:[#allocation244_spill] sm:$0xff]  ;;  %v9029_v51 = vld [vmem:[#allocation238_spill] sm:$0xff]  ;;  %v2203_v61 = vmul.f32 %v2201_v48, %v2198_v26 }
 0x8fc   :  { %v2296_v18 = vsel %vm2292_vm2, %v9024_v0, %v9023_v19  ;;  %v9027_v46 = vld [vmem:[#allocation241_spill] sm:$0xff]  ;;  %v2258_v33 = vmul.f32 %v9028_v15, %v2238_v7  ;;  %v9030_v52 = vld [vmem:[#allocation247_spill] sm:$0xff]  ;;  %v9031_v29 = vld [vmem:[#allocation240_spill] sm:$0xff]  ;;  %v2317_v0 = vperm.slane %v7226_v17, 7  ;;  %v2206_v6 = vadd.f32 %v2202_v20, %v2148_v24 }
 0x8fd   :  { %v2255_v41 = vmul.f32 %v9027_v46, %v2235_v21  ;;  %v2294_v42 = vsel %vm2292_vm2, %v9030_v52, %v9029_v51  ;;  %v2257_v19 = vmul.f32 %v9031_v29, %v2237_v43  ;;  %v9032_v50 = vld [vmem:[#allocation251_spill] sm:$0xff]  ;;  %v2316_v57 = vmul.f32 %v9034_v60, %v2296_v18  ;;  %v9035_v26 = vld [vmem:[#allocation248_spill] sm:$0xff] }
 0x8fe   :  { %3691 = vrot.lane.b32.xlu0 %v5405_v23, %s4543_s23  ;;  %v2314_v44 = vmul.f32 %v9032_v50, %v2294_v42  ;;  %v9033_v34 = vld [vmem:[#allocation243_spill] sm:$0xff]  ;;  %v2208_v21 = vadd.f32 %v2204_v38, %v2150_v47  ;;  %v2209_v7 = vadd.f32 %v2205_v28, %v2151_v45  ;;  %v2346_v48 = vperm.slane %v7515_v27, 0  ;;  %v9046_v29 = vld [vmem:[#allocation256_spill] sm:$0xff] }
 0x8ff   :  { %v2313_v62 = vmul.f32 %v9033_v34, %v2293_v12  ;;  %v9036_v43 = vld [vmem:[#allocation235_spill] sm:$0xff]  ;;  %v9037_v50 = vmov 41   ;;  %v2261_v34 = vmul.f32 %v2259_v31, %v2256_v11  ;;  %v2260_v60 = vmul.f32 %v2259_v31, %v2255_v41  ;;  %v9044_v11 = vld [vmem:[#allocation262_spill] sm:$0xff] }
 0x900   :  { %v2295_v17 = vsel %vm2292_vm2, %v9036_v43, %v9035_v26  ;;  %v2263_v24 = vmul.f32 %v2259_v31, %v2258_v33  ;;  %v9038_v20 = vld [vmem:[#allocation255_spill] sm:$0xff]  ;;  %v2207_v45 = vadd.f32 %v2203_v61, %v2149_v14  ;;  %v2262_v47 = vmul.f32 %v2259_v31, %v2257_v19  ;;  %v9045_v33 = vld [vmem:[#allocation246_spill] sm:$0xff] }
 0x901   :  { %3227 = vrot.lane.b32.xlu2 %v5405_v23, %s4529_s15  ;;  %3287 = vrot.lane.b32.xlu1 %v5545_v35, %s4531_s17  ;;  %v2315_v12 = vmul.f32 %v9038_v20, %v2295_v17  ;;  %v2319_v38 = vmul.f32 %v2317_v0, %v2314_v44  ;;  %v2318_v28 = vmul.f32 %v2317_v0, %v2313_v62  ;;  %v9041_v15 = vld [vmem:[#allocation267_spill] sm:$0xff]  ;;  %v9047_v14 = vld [vmem:[#allocation258_spill] sm:$0xff]  ;;  %v9048_v62 = vld [vmem:[#allocation261_spill] sm:$0xff]  ;;  %v2404_v20 = vperm.slane %v7515_v27, 1 }
 0x902   :  { %4319 = vset.pattern.permute.xlu1 %v9037_v50  ;;  %4318 = vset.pattern.permute.xlu2 %v8923_v56  ;;  %v2321_v46 = vmul.f32 %v2317_v0, %v2316_v57  ;;  %v9042_v51 = vld [vmem:[#allocation259_spill] sm:$0xff]  ;;  %v9043_v56 = vld [vmem:[#allocation269_spill] sm:$0xff]  ;;  %v2343_v42 = vmul.f32 %v9045_v33, %v5405_v23  ;;  %v2344_v26 = vmul.f32 %v9046_v29, %v5545_v35  ;;  %v7560_v33 = vpop.permute.xlu0 %3183  ;;  %vm2495_vm5 = vcmask 1022976  }
 0x903   :  { %v7539_v18 = vpop.permute.xlu2 %3069  ;;  %v7541_v32 = vpop.permute.xlu1 %3093  ;;  %v2380_v52 = vsel %vm2379_vm3, %v9042_v51, %v9041_v15  ;;  %v2383_v41 = vsel %vm2379_vm3, %v9044_v11, %v9043_v56  ;;  %v2342_v44 = vmul.f32 %v9047_v14, %v8823_v13  ;;  %v2345_v31 = vmul.f32 %v9048_v62, %v5709_v16  ;;  %v9049_v15 = vld [vmem:[#allocation257_spill] sm:$0xff]  ;;  %v9050_v56 = vld [vmem:[#allocation270_spill] sm:$0xff]  ;;  %9051 = vst [vmem:[#allocation104_spill] sm:$0xff] %v7560_v33 }
 0x904   :  { %9039 = vst [vmem:[#allocation100_spill] sm:$0xff] %v7539_v18  ;;  %v2265_v61 = vadd.f32 %v2261_v34, %v2207_v45  ;;  %v2264_v19 = vadd.f32 %v2260_v60, %v2206_v6  ;;  %v2267_v57 = vadd.f32 %v2263_v24, %v2209_v7  ;;  %v2320_v43 = vmul.f32 %v2317_v0, %v2315_v12  ;;  %v9052_v7 = vld [vmem:[#allocation252_spill] sm:$0xff]  ;;  %v9054_v12 = vld [vmem:[#allocation265_spill] sm:$0xff] }
 0x905   :  { %9040 = vst [vmem:[#allocation81_spill] sm:$0xff] %v7541_v32  ;;  %v2266_v17 = vadd.f32 %v2262_v47, %v2208_v21  ;;  %v2400_v51 = vmul.f32 %v9049_v15, %v2380_v52  ;;  %v2403_v11 = vmul.f32 %v9050_v56, %v2383_v41  ;;  %v2349_v6 = vmul.f32 %v2346_v48, %v2344_v26  ;;  %v9053_v34 = vld [vmem:[#allocation264_spill] sm:$0xff]  ;;  %v9055_v45 = vld [vmem:[#allocation249_spill] sm:$0xff]  ;;  %v9062_v15 = vld [vmem:[#allocation266_spill] sm:$0xff] }
 0x906   :  { %v2322_v29 = vadd.f32 %v2318_v28, %v2264_v19  ;;  %v2323_v32 = vadd.f32 %v2319_v38, %v2265_v61  ;;  %v2325_v35 = vadd.f32 %v2321_v46, %v2267_v57  ;;  %v2347_v0 = vmul.f32 %v2346_v48, %v2342_v44  ;;  %v9056_v38 = vld [vmem:[#allocation268_spill] sm:$0xff]  ;;  %v9057_v46 = vld [vmem:[#allocation281_spill] sm:$0xff]  ;;  %v9060_v19 = vld [vmem:[#allocation263_spill] sm:$0xff] }
 0x907   :  { %v2350_v21 = vmul.f32 %v2346_v48, %v2345_v31  ;;  %v2381_v60 = vsel %vm2379_vm3, %v9053_v34, %v9052_v7  ;;  %v2324_v24 = vadd.f32 %v2320_v43, %v2266_v17  ;;  %v2382_v47 = vsel %vm2379_vm3, %v9055_v45, %v9054_v12  ;;  %v9058_v52 = vld [vmem:[#allocation273_spill] sm:$0xff]  ;;  %v9059_v31 = vld [vmem:[#allocation272_spill] sm:$0xff]  ;;  %v9061_v57 = vld [vmem:[#allocation275_spill] sm:$0xff] }
 0x908   :  { %v2401_v28 = vmul.f32 %v9056_v38, %v2381_v60  ;;  %v2440_v41 = vsel %vm2437_vm4, %v9058_v52, %v9057_v46  ;;  %v2405_v44 = vmul.f32 %v2404_v20, %v2400_v51  ;;  %v2408_v62 = vmul.f32 %v2404_v20, %v2403_v11  ;;  %v9063_v56 = vld [vmem:[#allocation278_spill] sm:$0xff]  ;;  %v9064_v60 = vld [vmem:[#allocation279_spill] sm:$0xff]  ;;  %v9092_v33 = vld [vmem:[#allocation309_spill] sm:$0xff] }
 0x909   :  { %3237 = vrot.lane.b32.xlu2 %v5355_v30, %s4529_s15  ;;  %3297 = vrot.lane.b32.xlu1 %v5472_v54, %s4531_s17  ;;  %v2402_v61 = vmul.f32 %v9059_v31, %v2382_v47  ;;  %v2438_v43 = vsel %vm2437_vm4, %v9061_v57, %v9060_v19  ;;  %v2348_v17 = vmul.f32 %v2346_v48, %v2343_v42  ;;  %v2462_v34 = vperm.slane %v7515_v27, 2  ;;  %v9065_v46 = vld [vmem:[#allocation271_spill] sm:$0xff]  ;;  %v9066_v11 = vld [vmem:[#allocation282_spill] sm:$0xff]  ;;  %v9067_v42 = vld [vmem:[#allocation276_spill] sm:$0xff] }
 0x90a   :  { %v2441_v7 = vsel %vm2437_vm4, %v9063_v56, %v9062_v15  ;;  %v2458_v12 = vmul.f32 %v9064_v60, %v2438_v43  ;;  %v2351_v45 = vadd.f32 %v2347_v0, %v2322_v29  ;;  %v2354_v38 = vadd.f32 %v2350_v21, %v2325_v35  ;;  %v9068_v57 = vld [vmem:[#allocation260_spill] sm:$0xff]  ;;  %v9071_v21 = vld [vmem:[#allocation283_spill] sm:$0xff]  ;;  %v9078_v60 = vld [vmem:[#allocation274_spill] sm:$0xff] }
 0x90b   :  { %v7576_v14 = vpop.permute.xlu2 %3089  ;;  %v7578_v26 = vpop.permute.xlu1 %3113  ;;  %v2460_v51 = vmul.f32 %v9065_v46, %v2440_v41  ;;  %v2461_v52 = vmul.f32 %v9066_v11, %v2441_v7  ;;  %v2353_v47 = vadd.f32 %v2349_v6, %v2324_v24  ;;  %v2352_v31 = vadd.f32 %v2348_v17, %v2323_v32  ;;  %v9069_v29 = vld [vmem:[#allocation292_spill] sm:$0xff]  ;;  %v9074_v41 = vld [vmem:[#allocation286_spill] sm:$0xff] }
 0x90c   :  { %v2406_v54 = vmul.f32 %v2404_v20, %v2401_v28  ;;  %v2409_v18 = vadd.f32 %v2405_v44, %v2351_v45  ;;  %v2412_v19 = vadd.f32 %v2408_v62, %v2354_v38  ;;  %v2407_v48 = vmul.f32 %v2404_v20, %v2402_v61  ;;  %v9070_v35 = vld [vmem:[#allocation284_spill] sm:$0xff]  ;;  %v7601_v24 = vpop.permute.xlu0 %3201  ;;  %v9073_v28 = vld [vmem:[#allocation287_spill] sm:$0xff]  ;;  %v9075_v62 = vld [vmem:[#allocation277_spill] sm:$0xff] }
 0x90d   :  { %v2439_v15 = vsel %vm2437_vm4, %v9068_v57, %v9067_v42  ;;  %v2463_v56 = vmul.f32 %v2462_v34, %v2458_v12  ;;  %v2520_v43 = vperm.slane %v7515_v27, 3  ;;  %v2497_v0 = vsel %vm2495_vm5, %v9070_v35, %v9069_v29  ;;  %9072 = vst [vmem:[#allocation8_spill] sm:$0xff] %v7601_v24  ;;  %v9076_v61 = vld [vmem:[#allocation289_spill] sm:$0xff]  ;;  %v9077_v7 = vld [vmem:[#allocation290_spill] sm:$0xff]  ;;  %v9079_v45 = vld [vmem:[#allocation303_spill] sm:$0xff] }
 0x90e   :  { %v2465_v32 = vmul.f32 %v2462_v34, %v2460_v51  ;;  %v2466_v6 = vmul.f32 %v2462_v34, %v2461_v52  ;;  %v2459_v20 = vmul.f32 %v9071_v21, %v2439_v15  ;;  %vm2553_vm6 = vcmask 1006592   ;;  %v9080_v38 = vld [vmem:[#allocation296_spill] sm:$0xff]  ;;  %v9083_v57 = vld [vmem:[#allocation293_spill] sm:$0xff]  ;;  %v9084_v29 = vld [vmem:[#allocation295_spill] sm:$0xff] }
 0x90f   :  { %v2496_v44 = vsel %vm2495_vm5, %v9074_v41, %v9073_v28  ;;  %v2498_v17 = vsel %vm2495_vm5, %v9076_v61, %v9075_v62  ;;  %v2499_v12 = vsel %vm2495_vm5, %v9078_v60, %v9077_v7  ;;  %v2554_v46 = vsel %vm2553_vm6, %v9080_v38, %v9079_v45  ;;  %v9082_v52 = vld [vmem:[#allocation280_spill] sm:$0xff]  ;;  %v9085_v21 = vld [vmem:[#allocation306_spill] sm:$0xff]  ;;  %v9087_v60 = vld [vmem:[#allocation297_spill] sm:$0xff] }
 0x910   :  { %v2517_v42 = vmul.f32 %v9082_v52, %v2497_v0  ;;  %v2518_v15 = vmul.f32 %v9083_v57, %v2498_v17  ;;  %v2516_v35 = vmul.f32 %v9084_v29, %v2496_v44  ;;  %v9086_v28 = vld [vmem:[#allocation298_spill] sm:$0xff]  ;;  %v2410_v62 = vadd.f32 %v2406_v54, %v2352_v31  ;;  %v9088_v38 = vld [vmem:[#allocation301_spill] sm:$0xff]  ;;  %v9090_v52 = vld [vmem:[#allocation291_spill] sm:$0xff] }
 0x911   :  { %3243 = vrot.lane.b32.xlu2 %v5772_v39, %s4529_s15  ;;  %3313 = vperm.xlu1 %4319, %v7466_v36   ;;  %v2557_v41 = vsel %vm2553_vm6, %v9086_v28, %v9085_v21  ;;  %v2411_v61 = vadd.f32 %v2407_v48, %v2353_v47  ;;  %v2467_v7 = vadd.f32 %v2463_v56, %v2409_v18  ;;  %v9089_v24 = vld [vmem:[#allocation285_spill] sm:$0xff]  ;;  %v2578_v0 = vperm.slane %v7515_v27, 4  ;;  %v9091_v44 = vld [vmem:[#allocation307_spill] sm:$0xff]  ;;  %v9094_v56 = vld [vmem:[#allocation300_spill] sm:$0xff]  ;;  %s4547_s15 = smov 128  }
 0x912   :  { %v2519_v36 = vmul.f32 %v9087_v60, %v2499_v12  ;;  %v2470_v45 = vadd.f32 %v2466_v6, %v2412_v19  ;;  %v2574_v17 = vmul.f32 %v9090_v52, %v2554_v46  ;;  %v2577_v29 = vmul.f32 %v9091_v44, %v2557_v41  ;;  %v9093_v19 = vld [vmem:[#allocation288_spill] sm:$0xff]  ;;  %v9096_v12 = vld [vmem:[#allocation310_spill] sm:$0xff]  ;;  %v9100_v46 = vld [vmem:[#allocation311_spill] sm:$0xff] }
 0x913   :  { %v7612_v51 = vpop.permute.xlu2 %3109  ;;  %v7614_v11 = vpop.permute.xlu1 %3123  ;;  %v2469_v57 = vadd.f32 %v2465_v32, %v2411_v61  ;;  %vm2611_vm7 = vcmask 998400   ;;  %v2464_v54 = vmul.f32 %v2462_v34, %v2459_v20  ;;  %v2522_v47 = vmul.f32 %v2520_v43, %v2517_v42  ;;  %v7639_v32 = vld [vmem:[%s8298_s3 + $0x10] sm:$0xff]  ;;  %v9098_v34 = vld [vmem:[#allocation304_spill] sm:$0xff]  ;;  %v9101_v28 = vld [vmem:[#allocation302_spill] sm:$0xff] }
 0x914   :  { %9081 = vst [vmem:[#allocation153_spill] sm:$0xff] %v7612_v51  ;;  %v2556_v51 = vsel %vm2553_vm6, %v9089_v24, %v9088_v38  ;;  %v2523_v18 = vmul.f32 %v2520_v43, %v2518_v15  ;;  %v2521_v31 = vmul.f32 %v2520_v43, %v2516_v35  ;;  %v2524_v48 = vmul.f32 %v2520_v43, %v2519_v36  ;;  %v9095_v24 = vld [vmem:[#allocation317_spill] sm:$0xff]  ;;  %v9099_v20 = vld [vmem:[#allocation299_spill] sm:$0xff]  ;;  %v9102_v41 = vld [vmem:[#allocation314_spill] sm:$0xff] }
 0x915   :  { %v2576_v10 = vmul.f32 %v9092_v33, %v2556_v51  ;;  %v2555_v6 = vsel %vm2553_vm6, %v9094_v56, %v9093_v19  ;;  %v2614_v21 = vsel %vm2611_vm7, %v9096_v12, %v9095_v24  ;;  %v7645_v33 = vld [vmem:[%s8298_s3 + $0x18] sm:$0xff]  ;;  %v2579_v36 = vmul.f32 %v2578_v0, %v2574_v17  ;;  %v9103_v60 = vld [vmem:[#allocation315_spill] sm:$0xff]  ;;  %v9105_v56 = vld [vmem:[#allocation305_spill] sm:$0xff] }
 0x916   :  { %9097 = vst [vmem:[#allocation166_spill] sm:$0xff] %v7645_v33  ;;  %v2575_v43 = vmul.f32 %v9098_v34, %v2555_v6  ;;  %v2612_v51 = vsel %vm2611_vm7, %v9100_v46, %v9099_v20  ;;  %v2636_v42 = vperm.slane %v7515_v27, 5  ;;  %v2582_v15 = vmul.f32 %v2578_v0, %v2577_v29  ;;  %v9106_v24 = vld [vmem:[#allocation318_spill] sm:$0xff]  ;;  %v7663_v34 = vpop.permute.xlu0 %3229  ;;  %v9108_v20 = vld [vmem:[#allocation312_spill] sm:$0xff] }
 0x917   :  { %v2581_v35 = vmul.f32 %v2578_v0, %v2576_v10  ;;  %v2615_v61 = vsel %vm2611_vm7, %v9102_v41, %v9101_v28  ;;  %v2632_v38 = vmul.f32 %v9103_v60, %v2612_v51  ;;  %v2468_v17 = vadd.f32 %v2464_v54, %v2410_v62  ;;  %9107 = vst [vmem:[#allocation119_spill] sm:$0xff] %v7663_v34  ;;  %v9109_v46 = vld [vmem:[#allocation294_spill] sm:$0xff]  ;;  %v9110_v60 = vld [vmem:[#allocation320_spill] sm:$0xff]  ;;  %v9112_v62 = vld [vmem:[#allocation321_spill] sm:$0xff] }
 0x918   :  { %v2527_v19 = vadd.f32 %v2523_v18, %v2469_v57  ;;  %v2634_v6 = vmul.f32 %v9105_v56, %v2614_v21  ;;  %v2635_v12 = vmul.f32 %v9106_v24, %v2615_v61  ;;  %v2525_v29 = vadd.f32 %v2521_v31, %v2467_v7  ;;  %v9113_v7 = vld [vmem:[#allocation324_spill] sm:$0xff]  ;;  %v9116_v34 = vld [vmem:[#allocation325_spill] sm:$0xff] }
 0x919   :  { %3263 = vperm.xlu2 %4318, %v7639_v32   ;;  %3325 = vperm.xlu1 %4319, %v7645_v33   ;;  %v2528_v10 = vadd.f32 %v2524_v48, %v2470_v45  ;;  %v2613_v28 = vsel %vm2611_vm7, %v9109_v46, %v9108_v20  ;;  %vm2669_vm8 = vcmask 990208   ;;  %v2526_v51 = vadd.f32 %v2522_v47, %v2468_v17  ;;  %v9114_v45 = vld [vmem:[#allocation323_spill] sm:$0xff]  ;;  %v9115_v48 = vld [vmem:[#allocation313_spill] sm:$0xff]  ;;  %v9117_v46 = vld [vmem:[#allocation326_spill] sm:$0xff] }
 0x91a   :  { %v2580_v41 = vmul.f32 %v2578_v0, %v2575_v43  ;;  %v2633_v33 = vmul.f32 %v9110_v60, %v2613_v28  ;;  %v2583_v54 = vadd.f32 %v2579_v36, %v2525_v29  ;;  %v2585_v21 = vadd.f32 %v2581_v35, %v2527_v19  ;;  %v9118_v47 = vld [vmem:[#allocation308_spill] sm:$0xff]  ;;  %v9121_v35 = vld [vmem:[#allocation331_spill] sm:$0xff]  ;;  %v9122_v19 = vld [vmem:[#allocation334_spill] sm:$0xff] }
 0x91b   :  { %v7657_v52 = vpop.permute.xlu2 %3115  ;;  %v7659_v44 = vpop.permute.xlu1 %3139  ;;  %v2586_v18 = vadd.f32 %v2582_v15, %v2528_v10  ;;  %v2637_v61 = vmul.f32 %v2636_v42, %v2632_v38  ;;  %v2639_v56 = vmul.f32 %v2636_v42, %v2634_v6  ;;  %v2640_v24 = vmul.f32 %v2636_v42, %v2635_v12  ;;  %v9119_v17 = vld [vmem:[#allocation316_spill] sm:$0xff] }
 0x91c   :  { %9104 = vst [vmem:[#allocation38_spill] sm:$0xff] %v7657_v52  ;;  %v9111_v52 = vld [vmem:[#allocation328_spill] sm:$0xff]  ;;  %v2670_v31 = vsel %vm2669_vm8, %v9114_v45, %v9113_v7  ;;  %v2672_v20 = vsel %vm2669_vm8, %v9116_v34, %v9115_v48  ;;  %v2673_v0 = vsel %vm2669_vm8, %v9118_v47, %v9117_v46  ;;  %v2694_v43 = vperm.slane %v7515_v27, 6  ;;  %v9125_v7 = vld [vmem:[#allocation339_spill] sm:$0xff]  ;;  %v9127_v48 = vld [vmem:[#allocation342_spill] sm:$0xff] }
 0x91d   :  { %v2671_v57 = vsel %vm2669_vm8, %v9112_v62, %v9111_v52  ;;  %v9120_v52 = vld [vmem:[#allocation329_spill] sm:$0xff]  ;;  %v2638_v15 = vmul.f32 %v2636_v42, %v2633_v33  ;;  %v2690_v38 = vmul.f32 %v9121_v35, %v2670_v31  ;;  %v2693_v6 = vmul.f32 %v9122_v19, %v2673_v0  ;;  %v9126_v45 = vld [vmem:[#allocation332_spill] sm:$0xff]  ;;  %v9133_v0 = vld [vmem:[#allocation319_spill] sm:$0xff] }
 0x91e   :  { %v2691_v28 = vmul.f32 %v9119_v17, %v2671_v57  ;;  %v2692_v36 = vmul.f32 %v9120_v52, %v2672_v20  ;;  %v9123_v12 = vmov 42   ;;  %v2584_v34 = vadd.f32 %v2580_v41, %v2526_v51  ;;  %v9128_v20 = vld [vmem:[#allocation335_spill] sm:$0xff] }
 0x91f   :  { %vm2727_vm9 = vcmask 982016   ;;  %v2641_v60 = vadd.f32 %v2637_v61, %v2583_v54  ;;  %v2643_v62 = vadd.f32 %v2639_v56, %v2585_v21  ;;  %v2644_v57 = vadd.f32 %v2640_v24, %v2586_v18  ;;  %v7702_v54 = vld [vmem:[%s8299_s4 + $0x20] sm:$0xff]  ;;  %v7704_v18 = vpop.permute.xlu0 %3239  ;;  %v9130_v21 = vld [vmem:[#allocation322_spill] sm:$0xff] }
 0x920   :  { %v2728_v33 = vsel %vm2727_vm9, %v9126_v45, %v9125_v7  ;;  %v2696_v42 = vmul.f32 %v2694_v43, %v2691_v28  ;;  %v2697_v31 = vmul.f32 %v2694_v43, %v2692_v36  ;;  %vm2785_vm10 = vcmask 973824   ;;  %9129 = vst [vmem:[#allocation115_spill] sm:$0xff] %v7704_v18  ;;  %v9131_v61 = vld [vmem:[#allocation337_spill] sm:$0xff]  ;;  %v9132_v24 = vld [vmem:[#allocation338_spill] sm:$0xff]  ;;  %v9134_v28 = vld [vmem:[#allocation327_spill] sm:$0xff] }
 0x921   :  { %3283 = vrot.lane.b32.xlu2 %v8823_v13, %s4531_s17  ;;  %3343 = vrot.lane.b32.xlu1 %v5405_v23, %s4533_s22  ;;  %v2642_v51 = vadd.f32 %v2638_v15, %v2584_v34  ;;  %v2695_v41 = vmul.f32 %v2694_v43, %v2690_v38  ;;  %v2698_v46 = vmul.f32 %v2694_v43, %v2693_v6  ;;  %v2752_v47 = vperm.slane %v7515_v27, 7  ;;  %v9135_v43 = vld [vmem:[#allocation354_spill] sm:$0xff]  ;;  %v9137_v15 = vld [vmem:[#allocation340_spill] sm:$0xff]  ;;  %v9138_v38 = vld [vmem:[#allocation343_spill] sm:$0xff] }
 0x922   :  { %4320 = vset.pattern.permute.xlu2 %v9037_v50  ;;  %4324 = vset.pattern.permute.xlu1 %v9123_v12  ;;  %v2731_v50 = vsel %vm2727_vm9, %v9128_v20, %v9127_v48  ;;  %v2729_v56 = vsel %vm2727_vm9, %v9131_v61, %v9130_v21  ;;  %v2730_v17 = vsel %vm2727_vm9, %v9133_v0, %v9132_v24  ;;  %v9136_v36 = vld [vmem:[#allocation346_spill] sm:$0xff]  ;;  %v9139_v6 = vld [vmem:[#allocation345_spill] sm:$0xff]  ;;  %v9141_v45 = vld [vmem:[#allocation348_spill] sm:$0xff]  ;;  %v2810_v61 = vperm.slane %v7702_v54, 0 }
 0x923   :  { %v7688_v29 = vpop.permute.xlu2 %3125  ;;  %v7690_v10 = vpop.permute.xlu1 %3151  ;;  %v2748_v52 = vmul.f32 %v9134_v28, %v2728_v33  ;;  %v2788_v27 = vsel %vm2785_vm10, %v9136_v36, %v9135_v43  ;;  %v2749_v35 = vmul.f32 %v9137_v15, %v2729_v56  ;;  %v2751_v19 = vmul.f32 %v9138_v38, %v2731_v50  ;;  %v9140_v7 = vld [vmem:[#allocation333_spill] sm:$0xff]  ;;  %v9144_v0 = vld [vmem:[#allocation330_spill] sm:$0xff] }
 0x924   :  { %9124 = vst [vmem:[#allocation132_spill] sm:$0xff] %v7690_v10  ;;  %v2750_v34 = vmul.f32 %v9139_v6, %v2730_v17  ;;  %v2786_v48 = vsel %vm2785_vm10, %v9141_v45, %v9140_v7  ;;  %v2700_v20 = vadd.f32 %v2696_v42, %v2642_v51  ;;  %v2701_v21 = vadd.f32 %v2697_v31, %v2643_v62  ;;  %v9142_v24 = vld [vmem:[#allocation353_spill] sm:$0xff]  ;;  %v9147_v36 = vld [vmem:[#allocation366_spill] sm:$0xff] }
 0x925   :  { %v2806_v33 = vmul.f32 %v9142_v24, %v2786_v48  ;;  %v2699_v56 = vadd.f32 %v2695_v41, %v2641_v60  ;;  %v9143_v50 = vld [vmem:[#allocation349_spill] sm:$0xff]  ;;  %vm2843_vm1 = vcmask 965632   ;;  %v2702_v42 = vadd.f32 %v2698_v46, %v2644_v57  ;;  %v9148_v15 = vld [vmem:[#allocation358_spill] sm:$0xff]  ;;  %v9149_v48 = vld [vmem:[#allocation336_spill] sm:$0xff] }
 0x926   :  { %v2787_v17 = vsel %vm2785_vm10, %v9144_v0, %v9143_v50  ;;  %v9145_v28 = vld [vmem:[#allocation341_spill] sm:$0xff]  ;;  %v2753_v62 = vmul.f32 %v2752_v47, %v2748_v52  ;;  %v2845_v38 = vsel %vm2843_vm1, %v9148_v15, %v9147_v36  ;;  %v2754_v60 = vmul.f32 %v2752_v47, %v2749_v35  ;;  %v9150_v24 = vld [vmem:[#allocation352_spill] sm:$0xff]  ;;  %v9151_v57 = vld [vmem:[#allocation355_spill] sm:$0xff] }
 0x927   :  { %v2808_v43 = vmul.f32 %v9145_v28, %v2788_v27  ;;  %v9146_v31 = vld [vmem:[#allocation357_spill] sm:$0xff]  ;;  %v2756_v41 = vmul.f32 %v2752_v47, %v2751_v19  ;;  %v2755_v45 = vmul.f32 %v2752_v47, %v2750_v34  ;;  %v2789_v27 = vsel %vm2785_vm10, %v9150_v24, %v9149_v48  ;;  %v9152_v52 = vld [vmem:[#allocation347_spill] sm:$0xff]  ;;  %v9155_v15 = vld [vmem:[#allocation360_spill] sm:$0xff]  ;;  %v7754_v10 = vpop.permute.xlu0 %3255 }
 0x928   :  { %v2807_v51 = vmul.f32 %v9146_v31, %v2787_v17  ;;  %v2811_v50 = vmul.f32 %v2810_v61, %v2806_v33  ;;  %v2809_v46 = vmul.f32 %v9151_v57, %v2789_v27  ;;  %v9153_v0 = vld [vmem:[#allocation363_spill] sm:$0xff]  ;;  %v2868_v28 = vperm.slane %v7702_v54, 1  ;;  %v9154_v36 = vld [vmem:[#allocation361_spill] sm:$0xff]  ;;  %v9158_v33 = vld [vmem:[#allocation368_spill] sm:$0xff] }
 0x929   :  { %3289 = vrot.lane.b32.xlu2 %v5709_v16, %s4531_s17  ;;  %3353 = vrot.lane.b32.xlu1 %v5355_v30, %s4533_s22  ;;  %v2846_v17 = vsel %vm2843_vm1, %v9153_v0, %v9152_v52  ;;  %v2813_v31 = vmul.f32 %v2810_v61, %v2808_v43  ;;  %v2844_v35 = vsel %vm2843_vm1, %v9155_v15, %v9154_v36  ;;  %v9156_v19 = vld [vmem:[#allocation351_spill] sm:$0xff]  ;;  %vm2901_vm11 = vcmask 957440  }
 0x92a   :  { %v2865_v47 = vmul.f32 %v9156_v19, %v2845_v38  ;;  %v9157_v34 = vld [vmem:[#allocation367_spill] sm:$0xff]  ;;  %v2757_v23 = vadd.f32 %v2753_v62, %v2699_v56  ;;  %v2812_v48 = vmul.f32 %v2810_v61, %v2807_v51  ;;  %v2864_v24 = vmul.f32 %v9158_v33, %v2844_v35  ;;  %v9159_v56 = vld [vmem:[#allocation364_spill] sm:$0xff]  ;;  %v9165_v35 = vld [vmem:[#allocation350_spill] sm:$0xff] }
 0x92b   :  { %v7736_v6 = vpop.permute.xlu2 %3143  ;;  %v7738_v7 = vpop.permute.xlu1 %3169  ;;  %v2866_v30 = vmul.f32 %v9157_v34, %v2846_v17  ;;  %v2758_v27 = vadd.f32 %v2754_v60, %v2700_v20  ;;  %v2760_v57 = vadd.f32 %v2756_v41, %v2702_v42  ;;  %v2759_v18 = vadd.f32 %v2755_v45, %v2701_v21  ;;  %v9160_v62 = vld [vmem:[#allocation344_spill] sm:$0xff]  ;;  %v9161_v60 = vld [vmem:[#allocation371_spill] sm:$0xff]  ;;  %v9166_v19 = vld [vmem:[#allocation378_spill] sm:$0xff] }
 0x92c   :  { %v2815_v52 = vadd.f32 %v2811_v50, %v2757_v23  ;;  %v2814_v0 = vmul.f32 %v2810_v61, %v2809_v46  ;;  %vm3191_vm12 = vcmask 908288   ;;  %v2847_v51 = vsel %vm2843_vm1, %v9160_v62, %v9159_v56  ;;  %v9162_v61 = vld [vmem:[#allocation369_spill] sm:$0xff]  ;;  %v9163_v46 = vld [vmem:[#allocation359_spill] sm:$0xff]  ;;  %v9164_v17 = vld [vmem:[#allocation356_spill] sm:$0xff] }
 0x92d   :  { %v2817_v43 = vadd.f32 %v2813_v31, %v2759_v18  ;;  %v2870_v20 = vmul.f32 %v2868_v28, %v2865_v47  ;;  %v2871_v42 = vmul.f32 %v2868_v28, %v2866_v30  ;;  %v2816_v21 = vadd.f32 %v2812_v48, %v2758_v27  ;;  %v9168_v56 = vld [vmem:[#allocation140_spill] sm:$0xff]  ;;  %v9169_v62 = vld [vmem:[#allocation365_spill] sm:$0xff] }
 0x92e   :  { %v2869_v38 = vmul.f32 %v2868_v28, %v2864_v24  ;;  %v2867_v23 = vmul.f32 %v9161_v60, %v2847_v51  ;;  %v2902_v41 = vsel %vm2901_vm11, %v9162_v61, %v6876_v1  ;;  %v2903_v18 = vsel %vm2901_vm11, %v6839_v55, %v9163_v46  ;;  %v9174_v61 = vld [vmem:[#allocation372_spill] sm:$0xff]  ;;  %v9176_v46 = vld [vmem:[#allocation137_spill] sm:$0xff] }
 0x92f   :  { %v2904_v31 = vsel %vm2901_vm11, %v9164_v17, %v6841_v25  ;;  %vm2959_vm0 = vcmask 941056   ;;  %v7777_v36 = vperm.slane %v7702_v54, 2  ;;  %v2923_v15 = vmul.f32 %v6878_v5, %v2903_v18  ;;  %v9167_v25 = vld [vmem:[#allocation362_spill] sm:$0xff] }
 0x930   :  { %v2924_v1 = vmul.f32 %v6939_v49, %v2904_v31  ;;  %v2962_v47 = vsel %vm2959_vm0, %v9166_v19, %v9165_v35  ;;  %v7784_v55 = vadd.f32 %v2814_v0, %v2760_v57  ;;  %v2874_v34 = vadd.f32 %v2870_v20, %v2816_v21  ;;  %v9170_v49 = vld [vmem:[#allocation374_spill] sm:$0xff]  ;;  %v9171_v57 = vld [vmem:[#allocation11_spill] sm:$0xff]  ;;  %v7815_v21 = vpop.permute.xlu0 %3285 }
 0x931   :  { %3299 = vrot.lane.b32.xlu2 %v5632_v4, %s4531_s17  ;;  %3359 = vrot.lane.b32.xlu1 %v5772_v39, %s4533_s22  ;;  %v2875_v48 = vadd.f32 %v2871_v42, %v2817_v43  ;;  %v2922_v33 = vmul.f32 %v9167_v25, %v2902_v41  ;;  %v7787_v24 = vadd.f32 %v2869_v38, %v2815_v52  ;;  %vm3017_vm13 = vcmask 932864   ;;  %v9172_v20 = vld [vmem:[#allocation379_spill] sm:$0xff] }
 0x932   :  { %v7789_v27 = vmul.f32 %v2868_v28, %v2867_v23  ;;  %v2961_v5 = vsel %vm2959_vm0, %v9169_v62, %v9168_v56  ;;  %v2982_v51 = vmul.f32 %v9170_v49, %v2962_v47  ;;  %v3019_v0 = vsel %vm3017_vm13, %v9171_v57, %v7307_v2  ;;  %v9177_v35 = vld [vmem:[#allocation75_spill] sm:$0xff]  ;;  %v9179_v56 = vld [vmem:[#allocation112_spill] sm:$0xff] }
 0x933   :  { %v3168_v45 = vpop.permute.xlu2 %3167  ;;  %v3180_v50 = vpop.permute.xlu1 %3179  ;;  %v2981_v60 = vmul.f32 %v7145_v58, %v2961_v5  ;;  %vm3075_vm14 = vcmask 924672   ;;  %v2928_v43 = vmul.f32 %v7777_v36, %v2923_v15  ;;  %v2929_v52 = vmul.f32 %v7777_v36, %v2924_v1  ;;  %v7810_v58 = vld [vmem:[%s8298_s3 + $0x8] sm:$0xff] }
 0x934   :  { %v7774_v30 = vsel %vm3191_vm12, %v3168_v45, %v3180_v50  ;;  %v7802_v28 = vperm.slane %v7702_v54, 3  ;;  %v3020_v42 = vsel %vm3017_vm13, %v7254_v8, %v9172_v20  ;;  %v2927_v2 = vmul.f32 %v7777_v36, %v2922_v33  ;;  %v9173_v8 = vld [vmem:[#allocation376_spill] sm:$0xff]  ;;  %v9175_v45 = vld [vmem:[#allocation46_spill] sm:$0xff] }
 0x935   :  { %v7818_v38 = vperm.slane %v7702_v54, 4  ;;  %v3040_v23 = vmul.f32 %v7309_v22, %v3020_v42  ;;  %vm3133_vm15 = vcmask 916480   ;;  %v2905_v41 = vsel %vm2901_vm11, %v9174_v61, %v9173_v8 }
 0x936   :  { %v3039_v50 = vmul.f32 %v9175_v45, %v3019_v0  ;;  %v3078_v18 = vsel %vm3075_vm14, %v9176_v46, %v7455_v3  ;;  %v3136_v17 = vsel %vm3133_vm15, %v7578_v26, %v7688_v29  ;;  %v2987_v22 = vmul.f32 %v7802_v28, %v2982_v51  ;;  %v9178_v29 = vld [vmem:[#allocation370_spill] sm:$0xff] }
 0x937   :  { %v2986_v1 = vmul.f32 %v7802_v28, %v2981_v60  ;;  %v3077_v19 = vsel %vm3075_vm14, %v7453_v40, %v9177_v35  ;;  %v3098_v47 = vmul.f32 %v7576_v14, %v3078_v18  ;;  %v2932_v25 = vadd.f32 %v2928_v43, %v2874_v34  ;;  %v9180_v14 = vld [vmem:[#allocation377_spill] sm:$0xff]  ;;  %v9187_v35 = vld [vmem:[#allocation80_spill] sm:$0xff] }
 0x938   :  { %v2933_v33 = vadd.f32 %v2929_v52, %v2875_v48  ;;  %v7840_v3 = vperm.slane %v7702_v54, 5  ;;  %v3097_v26 = vmul.f32 %v7486_v9, %v3077_v19  ;;  %v2960_v62 = vsel %vm2959_vm0, %v9179_v56, %v9178_v29  ;;  %v9181_v48 = vld [vmem:[#allocation109_spill] sm:$0xff] }
 0x939   :  { %3317 = vperm.xlu2 %4320, %v7810_v58   ;;  %3379 = vperm.xlu1 %4324, %v7639_v32   ;;  %v3045_v5 = vmul.f32 %v7818_v38, %v3040_v23  ;;  %v3156_v49 = vmul.f32 %v7457_v59, %v3136_v17  ;;  %v3135_v40 = vsel %vm3133_vm15, %v7275_v63, %v7614_v11  ;;  %v7857_v52 = vperm.slane %v7702_v54, 6  ;;  %v9182_v59 = vld [vmem:[#allocation9_spill] sm:$0xff]  ;;  %v9183_v63 = vld [vmem:[#allocation114_spill] sm:$0xff]  ;;  %v9184_v23 = vld [vmem:[#allocation52_spill] sm:$0xff] }
 0x93a   :  { %v2925_v34 = vmul.f32 %v9180_v14, %v2905_v41  ;;  %v2980_v51 = vmul.f32 %v9181_v48, %v2960_v62  ;;  %v3044_v60 = vmul.f32 %v7818_v38, %v3039_v50  ;;  %v3155_v9 = vmul.f32 %v7736_v6, %v3135_v40  ;;  %v9186_v17 = vld [vmem:[#allocation104_spill] sm:$0xff]  ;;  %v9189_v29 = vld [vmem:[#allocation153_spill] sm:$0xff] }
 0x93b   :  { %v3172_v31 = vpop.permute.xlu2 %3171  ;;  %v7831_v15 = vpop.permute.xlu1 %3185  ;;  %v2991_v57 = vadd.f32 %v2987_v22, %v2933_v33  ;;  %v2990_v0 = vadd.f32 %v2986_v1, %v2932_v25  ;;  %v3103_v43 = vmul.f32 %v7840_v3, %v3098_v47  ;;  %v3018_v20 = vsel %vm3017_vm13, %v9182_v59, %v7196_v37  ;;  %v9190_v62 = vld [vmem:[#allocation8_spill] sm:$0xff] }
 0x93c   :  { %v3076_v11 = vsel %vm3075_vm14, %v9183_v63, %v7484_v53  ;;  %v3102_v42 = vmul.f32 %v7840_v3, %v3097_v26  ;;  %v3038_v8 = vmul.f32 %v9184_v23, %v3018_v20  ;;  %v3161_v61 = vmul.f32 %v7857_v52, %v3156_v49  ;;  %v7881_v1 = vpop.permute.xlu0 %3295  ;;  %v9188_v26 = vld [vmem:[#allocation7_spill] sm:$0xff] }
 0x93d   :  { %v3049_v6 = vadd.f32 %v3045_v5, %v2991_v57  ;;  %v7873_v41 = vperm.slane %v7702_v54, 7  ;;  %v9185_v37 = vmov 43   ;;  %v2985_v53 = vmul.f32 %v7802_v28, %v2980_v51  ;;  %v9192_v51 = vld [vmem:[#allocation13_spill] sm:$0xff]  ;;  %v9193_v57 = vld [vmem:[#allocation67_spill] sm:$0xff] }
 0x93e   :  { %v3048_v45 = vadd.f32 %v3044_v60, %v2990_v0  ;;  %v3160_v50 = vmul.f32 %v7857_v52, %v3155_v9  ;;  %v3194_v22 = vsel %vm3191_vm12, %v3172_v31, %v9186_v17  ;;  %v3096_v19 = vmul.f32 %v9187_v35, %v3076_v11  ;;  %v9195_v20 = vld [vmem:[#allocation375_spill] sm:$0xff]  ;;  %v9196_v11 = vld [vmem:[#allocation100_spill] sm:$0xff]  ;;  %v9200_v17 = vld [vmem:[#allocation81_spill] sm:$0xff] }
 0x93f   :  { %v3107_v54 = vadd.f32 %v3103_v43, %v3049_v6  ;;  %v2931_v25 = vadd.f32 %v2927_v2, %v7787_v24  ;;  %v3134_v56 = vsel %vm3133_vm15, %v9189_v29, %v9188_v26  ;;  %v3043_v31 = vmul.f32 %v7818_v38, %v3038_v8  ;;  %v9199_v8 = vld [vmem:[#allocation70_spill] sm:$0xff] }
 0x940   :  { %v3106_v33 = vadd.f32 %v3102_v42, %v3048_v45  ;;  %v3154_v49 = vmul.f32 %v7659_v44, %v3134_v56  ;;  %v2930_v48 = vmul.f32 %v7777_v36, %v2925_v34  ;;  %v3101_v43 = vmul.f32 %v7840_v3, %v3096_v19  ;;  %v9194_v44 = vld [vmem:[#allocation94_spill] sm:$0xff]  ;;  %v9197_v36 = vld [vmem:[#allocation76_spill] sm:$0xff] }
 0x941   :  { %3341 = vrot.lane.b32.xlu2 %v8823_v13, %s4533_s22  ;;  %3399 = vrot.lane.b32.xlu1 %v8823_v13, %s4535_s26  ;;  %v3165_v40 = vadd.f32 %v3161_v61, %v3107_v54  ;;  %v2989_v9 = vadd.f32 %v2985_v53, %v2931_v25  ;;  %v3021_v63 = vsel %vm3017_vm13, %v9195_v20, %v9194_v44  ;;  %v9198_v42 = vld [vmem:[#allocation74_spill] sm:$0xff]  ;;  %vm3249_vm2 = vcmask 900096  }
 0x942   :  { %4322 = vset.pattern.permute.xlu2 %v9123_v12  ;;  %4326 = vset.pattern.permute.xlu1 %v9185_v37  ;;  %v3164_v2 = vadd.f32 %v3160_v50, %v3106_v33  ;;  %v3079_v34 = vsel %vm3075_vm14, %v9197_v36, %v9196_v11  ;;  %v3041_v61 = vmul.f32 %v9199_v8, %v3021_v63  ;;  %v9208_v63 = vld [vmem:[#allocation115_spill] sm:$0xff]  ;;  %vm3307_vm3 = vcmask 891904  }
 0x943   :  { %v3182_v46 = vpop.permute.xlu2 %3181  ;;  %v3206_v18 = vpop.permute.xlu1 %3205  ;;  %v3047_v23 = vadd.f32 %v3043_v31, %v2989_v9  ;;  %v3159_v53 = vmul.f32 %v7857_v52, %v3154_v49  ;;  %v2876_v45 = vadd.f32 %v7789_v27, %v7784_v55  ;;  %v9203_v55 = vld [vmem:[#allocation132_spill] sm:$0xff]  ;;  %v9206_v9 = vld [vmem:[#allocation10_spill] sm:$0xff]  ;;  %vm3365_vm4 = vcmask 875520  }
 0x944   :  { %v3193_v12 = vsel %vm3191_vm12, %v7738_v7, %v3182_v46  ;;  %v3214_v47 = vmul.f32 %v3206_v18, %v3194_v22  ;;  %v9191_v7 = vld [vmem:[#allocation373_spill] sm:$0xff]  ;;  %v3099_v22 = vmul.f32 %v9200_v17, %v3079_v34  ;;  %v7923_v33 = vpop.permute.xlu0 %3301  ;;  %v3046_v26 = vmul.f32 %v7818_v38, %v3041_v61  ;;  %v9205_v38 = vld [vmem:[#allocation90_spill] sm:$0xff] }
 0x945   :  { %v3213_v5 = vmul.f32 %v9190_v62, %v3193_v12  ;;  %v2963_v24 = vsel %vm2959_vm0, %v9192_v51, %v9191_v7  ;;  %v3105_v35 = vadd.f32 %v3101_v43, %v3047_v23  ;;  %v2934_v54 = vadd.f32 %v2930_v48, %v2876_v45  ;;  %v9201_v12 = vld [vmem:[#allocation130_spill] sm:$0xff] }
 0x946   :  { %v3219_v14 = vmul.f32 %v7873_v41, %v3214_v47  ;;  %v2983_v0 = vmul.f32 %v9193_v57, %v2963_v24  ;;  %v9202_v47 = vld [vmem:[#allocation38_spill] sm:$0xff]  ;;  %v3104_v62 = vmul.f32 %v7840_v3, %v3099_v22  ;;  %vm3423_vm5 = vcmask 867328  }
 0x947   :  { %v3218_v60 = vmul.f32 %v7873_v41, %v3213_v5  ;;  %v3137_v25 = vsel %vm3133_vm15, %v9202_v47, %v9201_v12  ;;  %v3163_v29 = vadd.f32 %v3159_v53, %v3105_v35  ;;  %v9209_v45 = vld [vmem:[#allocation66_spill] sm:$0xff]  ;;  %v9212_v47 = vld [vmem:[#allocation119_spill] sm:$0xff]  ;;  %vm3481_vm6 = vcmask 859136  }
 0x948   :  { %v7901_v59 = vadd.f32 %v3219_v14, %v3165_v40  ;;  %v2988_v18 = vmul.f32 %v7802_v28, %v2983_v0  ;;  %v3157_v27 = vmul.f32 %v9203_v55, %v3137_v25  ;;  %v3195_v14 = vsel %vm3191_vm12, %v9205_v38, %v7831_v15  ;;  %v7945_v0 = vld [vmem:[%s8299_s4 + $0x28] sm:$0xff] }
 0x949   :  { %3345 = vrot.lane.b32.xlu2 %v9198_v42, %s4533_s22  ;;  %3405 = vrot.lane.b32.xlu1 %v5709_v16, %s4535_s26  ;;  %v3222_v6 = vadd.f32 %v3218_v60, %v3164_v2  ;;  %v9207_v15 = vld [vmem:[#allocation166_spill] sm:$0xff]  ;;  %v3274_v43 = vperm.slane %v7945_v0, 0  ;;  %vm3539_vm7 = vcmask 850944   ;;  %vm3597_vm8 = vcmask 842752  }
 0x94a   :  { %v2992_v28 = vadd.f32 %v2988_v18, %v2934_v54  ;;  %v3162_v49 = vmul.f32 %v7857_v52, %v3157_v27  ;;  %v9210_v18 = vmov 45   ;;  %v9211_v54 = vld [vmem:[#allocation60_spill] sm:$0xff]  ;;  %vm3655_vm9 = vcmask 834560  }
 0x94b   :  { %v3198_v50 = vpop.permute.xlu2 %3197  ;;  %v3226_v46 = vpop.permute.xlu1 %3225  ;;  %vm3713_vm10 = vcmask 826368  }
 0x94c   :  { %v3212_v19 = vmul.f32 %v3198_v50, %v7774_v30  ;;  %v9204_v30 = vld [vmem:[#allocation69_spill] sm:$0xff]  ;;  %v3050_v31 = vadd.f32 %v3046_v26, %v2992_v28  ;;  %v7938_v2 = vpop.permute.xlu0 %3321 }
 0x94e   :  { %v3217_v56 = vmul.f32 %v7873_v41, %v3212_v19  ;;  %v3108_v7 = vadd.f32 %v3104_v62, %v3050_v31 }
 0x950   :  { %v3221_v5 = vadd.f32 %v3217_v56, %v3163_v29  ;;  %v3166_v24 = vadd.f32 %v3162_v49, %v3108_v7  ;;  %v9213_v7 = vmov 44  }
 0x951   :  { %3355 = vrot.lane.b32.xlu2 %v9204_v30, %s4533_s22  ;;  %3415 = vrot.lane.b32.xlu1 %v5632_v4, %s4535_s26 }
 0x953   :  { %v3210_v40 = vpop.permute.xlu2 %3209  ;;  %v3232_v48 = vpop.permute.xlu1 %3231 }
 0x954   :  { %v3215_v51 = vmul.f32 %v3210_v40, %v3195_v14 }
 0x956   :  { %v3220_v3 = vmul.f32 %v7873_v41, %v3215_v51  ;;  %v7949_v41 = vpop.permute.xlu0 %3347  ;;  %v9214_v51 = vmov 46  }
 0x958   :  { %v3224_v60 = vadd.f32 %v3220_v3, %v3166_v24 }
 0x959   :  { %3371 = vperm.xlu2 %4322, %v9206_v9   ;;  %3433 = vperm.xlu1 %4326, %v7810_v58  }
 0x95b   :  { %v3228_v57 = vpop.permute.xlu2 %3227  ;;  %v3242_v52 = vpop.permute.xlu1 %3241 }
 0x95c   :  { %v3251_v11 = vsel %vm3249_vm2, %v3228_v57, %v9208_v63 }
 0x961   :  { %3383 = vperm.xlu2 %4322, %v9207_v15   ;;  %3441 = vperm.xlu1 %4326, %v9207_v15  }
 0x963   :  { %v3238_v44 = vpop.permute.xlu2 %3237  ;;  %v3260_v20 = vpop.permute.xlu1 %3259 }
 0x964   :  { %v3250_v36 = vsel %vm3249_vm2, %v3226_v46, %v3238_v44  ;;  %v3271_v34 = vmul.f32 %v3260_v20, %v3251_v11  ;;  %v7962_v46 = vpop.permute.xlu0 %3357 }
 0x965   :  { %v3270_v23 = vmul.f32 %v7754_v10, %v3250_v36 }
 0x966   :  { %v3276_v8 = vmul.f32 %v3274_v43, %v3271_v34 }
 0x967   :  { %v3275_v61 = vmul.f32 %v3274_v43, %v3270_v23 }
 0x968   :  { %v3280_v53 = vadd.f32 %v3276_v8, %v3222_v6 }
 0x969   :  { %3401 = vrot.lane.b32.xlu2 %v9209_v45, %s4535_s26  ;;  %3461 = vrot.lane.b32.xlu1 %v9198_v42, %s4537_s29  ;;  %v3279_v50 = vadd.f32 %v3275_v61, %v3221_v5  ;;  %v3332_v5 = vperm.slane %v7945_v0, 1 }
 0x96a   :  { %4327 = vset.pattern.permute.xlu2 %v9185_v37  ;;  %4329 = vset.pattern.permute.xlu1 %v9210_v18  ;;  %v3252_v37 = vsel %vm3249_vm2, %v9212_v47, %v3242_v52 }
 0x96b   :  { %v3244_v17 = vpop.permute.xlu2 %3243  ;;  %v3268_v22 = vpop.permute.xlu1 %3267 }
 0x96c   :  { %v3253_v10 = vsel %vm3249_vm2, %v3232_v48, %v3244_v17  ;;  %v7971_v29 = vpop.permute.xlu0 %3375 }
 0x96d   :  { %v3273_v35 = vmul.f32 %v3268_v22, %v3253_v10  ;;  %v3390_v10 = vperm.slane %v7945_v0, 2 }
 0x96f   :  { %v3278_v19 = vmul.f32 %v3274_v43, %v3273_v35 }
 0x971   :  { %v3282_v6 = vadd.f32 %v3278_v19, %v3224_v60  ;;  %3411 = vrot.lane.b32.xlu2 %v9211_v54, %s4535_s26  ;;  %3475 = vrot.lane.b32.xlu1 %v5772_v39, %s4537_s29 }
 0x973   :  { %v3264_v12 = vpop.permute.xlu2 %3263  ;;  %v3288_v25 = vpop.permute.xlu1 %3287 }
 0x974   :  { %v3272_v26 = vmul.f32 %v3264_v12, %v3252_v37  ;;  %v7978_v62 = vpop.permute.xlu0 %3403 }
 0x976   :  { %v3277_v55 = vmul.f32 %v3274_v43, %v3272_v26 }
 0x978   :  { %v3281_v27 = vadd.f32 %v3277_v55, %v7901_v59 }
 0x979   :  { %3417 = vrot.lane.b32.xlu2 %v5772_v39, %s4535_s26  ;;  %3521 = vrot.lane.b32.xlu1 %v5709_v16, %s4458_s21 }
 0x97b   :  { %v3284_v56 = vpop.permute.xlu2 %3283  ;;  %v3298_v28 = vpop.permute.xlu1 %3297 }
 0x97c   :  { %v3308_v59 = vsel %vm3307_vm3, %v3284_v56, %v7881_v1  ;;  %v7989_v48 = vpop.permute.xlu0 %3413  ;;  %v3309_v11 = vsel %vm3307_vm3, %v7815_v21, %v3298_v28 }
 0x981   :  { %3437 = vperm.xlu2 %4327, %v7639_v32   ;;  %3557 = vperm.xlu1 %4329, %v9207_v15  }
 0x983   :  { %v3290_v31 = vpop.permute.xlu2 %3289  ;;  %v3314_v49 = vpop.permute.xlu1 %3313 }
 0x984   :  { %v3328_v40 = vmul.f32 %v3314_v49, %v3308_v59  ;;  %v3311_v1 = vsel %vm3307_vm3, %v3290_v31, %v7923_v33  ;;  %v8003_v36 = vpop.permute.xlu0 %3429  ;;  %v9215_v59 = vmov 47  }
 0x986   :  { %v3333_v38 = vmul.f32 %v3332_v5, %v3328_v40 }
 0x988   :  { %v3337_v14 = vadd.f32 %v3333_v38, %v3279_v50 }
 0x989   :  { %3457 = vrot.lane.b32.xlu2 %v8823_v13, %s4537_s29  ;;  %3519 = vrot.lane.b32.xlu1 %v9198_v42, %s4458_s21 }
 0x98a   :  { %4328 = vset.pattern.permute.xlu2 %v9213_v7  ;;  %4332 = vset.pattern.permute.xlu1 %v9214_v51 }
 0x98b   :  { %v3300_v24 = vpop.permute.xlu2 %3299  ;;  %v3326_v3 = vpop.permute.xlu1 %3325 }
 0x98c   :  { %v3310_v60 = vsel %vm3307_vm3, %v3288_v25, %v3300_v24  ;;  %v3331_v9 = vmul.f32 %v3326_v3, %v3311_v1  ;;  %v8008_v17 = vpop.permute.xlu0 %3459 }
 0x98d   :  { %v3330_v57 = vmul.f32 %v7938_v2, %v3310_v60 }
 0x98e   :  { %v3336_v52 = vmul.f32 %v3332_v5, %v3331_v9 }
 0x98f   :  { %v3335_v43 = vmul.f32 %v3332_v5, %v3330_v57 }
 0x990   :  { %v3340_v44 = vadd.f32 %v3336_v52, %v3282_v6  ;;  %v3448_v52 = vperm.slane %v7945_v0, 3 }
 0x991   :  { %3463 = vrot.lane.b32.xlu2 %v5709_v16, %s4537_s29  ;;  %3591 = vrot.lane.b32.xlu1 %v5772_v39, %s4539_s10  ;;  %v3339_v20 = vadd.f32 %v3335_v43, %v3281_v27 }
 0x993   :  { %v3318_v63 = vpop.permute.xlu2 %3317  ;;  %v3344_v33 = vpop.permute.xlu1 %3343 }
 0x994   :  { %v3329_v34 = vmul.f32 %v3318_v63, %v3309_v11  ;;  %v8015_v22 = vpop.permute.xlu0 %3469 }
 0x996   :  { %v3334_v23 = vmul.f32 %v3332_v5, %v3329_v34 }
 0x998   :  { %v3338_v2 = vadd.f32 %v3334_v23, %v3280_v53 }
 0x999   :  { %3499 = vperm.xlu2 %4328, %v9207_v15   ;;  %3615 = vperm.xlu1 %4332, %v9207_v15  }
 0x99b   :  { %v3342_v8 = vpop.permute.xlu2 %3341  ;;  %v3354_v61 = vpop.permute.xlu1 %3353 }
 0x99c   :  { %v3366_v50 = vsel %vm3365_vm4, %v3342_v8, %v3354_v61  ;;  %v3474_v56 = vpop.permute.xlu0 %3473  ;;  %v8065_v8 = vld [vmem:[%s8298_s3] sm:$0xff] }
 0x9a1   :  { %3533 = vrot.lane.b32.xlu2 %v5772_v39, %s4458_s21  ;;  %3529 = vrot.lane.b32.xlu1 %v9204_v30, %s4458_s21 }
 0x9a2   :  { %4333 = vset.pattern.permute.xlu1 %v9210_v18 }
 0x9a3   :  { %v3346_v21 = vpop.permute.xlu2 %3345  ;;  %v3360_v53 = vpop.permute.xlu1 %3359 }
 0x9a4   :  { %v3368_v6 = vsel %vm3365_vm4, %v3346_v21, %v7962_v46  ;;  %v3369_v38 = vsel %vm3365_vm4, %v7949_v41, %v3360_v53  ;;  %v8038_v24 = vpop.permute.xlu0 %3579  ;;  %v9216_v41 = vmov 0  }
 0x9a9   :  { %3471 = vrot.lane.b32.xlu2 %v9204_v30, %s4537_s29  ;;  %3637 = vrot.lane.b32.xlu1 %v5709_v16, %s4542_s16 }
 0x9ab   :  { %v3356_v35 = vpop.permute.xlu2 %3355  ;;  %v3380_v19 = vpop.permute.xlu1 %3379 }
 0x9ac   :  { %v3367_v12 = vsel %vm3365_vm4, %v3344_v33, %v3356_v35  ;;  %v3388_v47 = vmul.f32 %v3380_v19, %v3368_v6  ;;  %v8047_v57 = vpop.permute.xlu0 %3553  ;;  %v8077_v19 = vperm.slane %v7945_v0, 4 }
 0x9ad   :  { %v3387_v37 = vmul.f32 %v7971_v29, %v3367_v12  ;;  %v4545_v29 = vmov 48  }
 0x9ae   :  { %v3393_v25 = vmul.f32 %v3390_v10, %v3388_v47  ;;  %4343 = vset.pattern.permute.xlu0 %v4545_v29 }
 0x9af   :  { %v3392_v26 = vmul.f32 %v3390_v10, %v3387_v37  ;;  %3723 = vperm.xlu0 %4343, %v7810_v58  }
 0x9b0   :  { %v8026_v55 = vadd.f32 %v3393_v25, %v3339_v20 }
 0x9b1   :  { %3531 = vrot.lane.b32.xlu2 %v5632_v4, %s4458_s21  ;;  %3549 = vperm.xlu1 %4333, %v7810_v58   ;;  %v3396_v27 = vadd.f32 %v3392_v26, %v3338_v2 }
 0x9b3   :  { %v3372_v28 = vpop.permute.xlu2 %3371  ;;  %v3400_v5 = vpop.permute.xlu1 %3399 }
 0x9b4   :  { %v3386_v31 = vmul.f32 %v3372_v28, %v3366_v50  ;;  %v3496_v34 = vpop.permute.xlu0 %3495 }
 0x9b6   :  { %v3391_v46 = vmul.f32 %v3390_v10, %v3386_v31 }
 0x9b7   :  { %4346 = vset.pattern.permute.xlu0 %v9216_v41 }
 0x9b8   :  { %v3395_v49 = vadd.f32 %v3391_v46, %v3337_v14 }
 0x9b9   :  { %3491 = vperm.xlu2 %4328, %v7810_v58   ;;  %4335 = vset.pattern.permute.xlu1 %v9215_v59 }
 0x9ba   :  { %3673 = vperm.xlu1 %4335, %v9207_v15  }
 0x9bb   :  { %v3384_v40 = vpop.permute.xlu2 %3383  ;;  %v3406_v7 = vpop.permute.xlu1 %3405 }
 0x9bc   :  { %v3389_v3 = vmul.f32 %v3384_v40, %v3369_v38 }
 0x9be   :  { %v3394_v14 = vmul.f32 %v3390_v10, %v3389_v3  ;;  %v8070_v10 = vpop.permute.xlu0 %3589 }
 0x9c0   :  { %v3398_v1 = vadd.f32 %v3394_v14, %v3340_v44 }
 0x9c1   :  { %3517 = vrot.lane.b32.xlu2 %v9209_v45, %s4458_s21 }
 0x9c2   :  { %3575 = vrot.lane.b32.xlu1 %v9209_v45, %s4539_s10  ;;  %4334 = vset.pattern.permute.xlu2 %v9214_v51 }
 0x9c3   :  { %v3402_v60 = vpop.permute.xlu2 %3401  ;;  %v3416_v9 = vpop.permute.xlu1 %3415  ;;  %4336 = vset.pattern.permute.xlu1 %v9210_v18 }
 0x9c4   :  { %v3425_v51 = vsel %vm3423_vm5, %v3402_v60, %v7989_v48  ;;  %v3426_v35 = vsel %vm3423_vm5, %v7978_v62, %v3416_v9  ;;  %v8106_v9 = vperm.slane %v7945_v0, 5 }
 0x9c9   :  { %3577 = vrot.lane.b32.xlu2 %v9198_v42, %s4539_s10 }
 0x9ca   :  { %3647 = vrot.lane.b32.xlu1 %v5632_v4, %s4542_s16 }
 0x9cb   :  { %v3412_v43 = vpop.permute.xlu2 %3411  ;;  %v3434_v44 = vpop.permute.xlu1 %3433 }
 0x9cc   :  { %v3424_v18 = vsel %vm3423_vm5, %v3400_v5, %v3412_v43  ;;  %v3445_v20 = vmul.f32 %v3434_v44, %v3425_v51  ;;  %v3749_v5 = vld [vmem:[%s8300_s5 + $0x10] sm:$0xff] }
 0x9cd   :  { %v3444_v63 = vmul.f32 %v8003_v36, %v3424_v18  ;;  %3763 = vperm.xlu0 %4346, %v3749_v5   ;;  %v3946_v5 = vld [vmem:[%s8302_s7 + $0x18] sm:$0xff] }
 0x9ce   :  { %v3450_v11 = vmul.f32 %v3448_v52, %v3445_v20 }
 0x9cf   :  { %v3449_v33 = vmul.f32 %v3448_v52, %v3444_v63 }
 0x9d0   :  { %v8058_v23 = vadd.f32 %v3450_v11, %v3396_v27  ;;  %v3945_v11 = vld [vmem:[%s8302_s7 + $0x10] sm:$0xff] }
 0x9d1   :  { %v3453_v2 = vadd.f32 %v3449_v33, %v3395_v49  ;;  %3649 = vrot.lane.b32.xlu2 %v5772_v39, %s4542_s16  ;;  %v8124_v33 = vperm.slane %v7945_v0, 6 }
 0x9d2   :  { %3545 = vperm.xlu1 %4336, %v8065_v8  }
 0x9d3   :  { %v3418_v48 = vpop.permute.xlu2 %3417  ;;  %v3442_v61 = vpop.permute.xlu1 %3441 }
 0x9d4   :  { %v3427_v36 = vsel %vm3423_vm5, %v3406_v7, %v3418_v48 }
 0x9d5   :  { %v3447_v50 = vmul.f32 %v3442_v61, %v3427_v36  ;;  %3959 = vperm.xlu0 %4346, %v3945_v11  }
 0x9d7   :  { %v3452_v21 = vmul.f32 %v3448_v52, %v3447_v50 }
 0x9d9   :  { %v3456_v53 = vadd.f32 %v3452_v21, %v3398_v1  ;;  %3611 = vperm.xlu2 %4334, %v7639_v32  }
 0x9da   :  { %4338 = vset.pattern.permute.xlu1 %v4545_v29 }
 0x9db   :  { %v3438_v39 = vpop.permute.xlu2 %3437  ;;  %3731 = vperm.xlu1 %4338, %v9207_v15   ;;  %v3462_v6 = vpop.permute.xlu1 %3461 }
 0x9dc   :  { %v3446_v12 = vmul.f32 %v3438_v39, %v3426_v35  ;;  %v3484_v47 = vsel %vm3481_vm6, %v3462_v6, %v3474_v56  ;;  %v3488_v56 = vpop.permute.xlu0 %3487 }
 0x9dd   :  { %v3504_v37 = vmul.f32 %v3496_v34, %v3484_v47  ;;  %v3748_v47 = vld [vmem:[%s8300_s5 + $0x8] sm:$0xff] }
 0x9de   :  { %v3451_v25 = vmul.f32 %v3448_v52, %v3446_v12 }
 0x9df   :  { %v3509_v26 = vmul.f32 %v8077_v19, %v3504_v37 }
 0x9e0   :  { %v3455_v27 = vadd.f32 %v3451_v25, %v8026_v55 }
 0x9e1   :  { %3515 = vrot.lane.b32.xlu2 %v8823_v13, %s4458_s21 }
 0x9e2   :  { %v3513_v28 = vadd.f32 %v3509_v26, %v3455_v27 }
 0x9e3   :  { %v3458_v62 = vpop.permute.xlu2 %3457  ;;  %3585 = vrot.lane.b32.xlu1 %v9211_v54, %s4539_s10  ;;  %v3476_v15 = vpop.permute.xlu1 %3475 }
 0x9e4   :  { %v3482_v31 = vsel %vm3481_vm6, %v3458_v62, %v8015_v22  ;;  %4340 = vset.pattern.permute.xlu1 %v9215_v59  ;;  %v3528_v25 = vpop.permute.xlu0 %3527 }
 0x9e5   :  { %v3502_v55 = vmul.f32 %v3488_v56, %v3482_v31 }
 0x9e7   :  { %v3507_v46 = vmul.f32 %v8077_v19, %v3502_v55 }
 0x9e9   :  { %3587 = vrot.lane.b32.xlu2 %v9204_v30, %s4539_s10  ;;  %v8095_v49 = vadd.f32 %v3507_v46, %v3453_v2 }
 0x9eb   :  { %v3464_v40 = vpop.permute.xlu2 %3463  ;;  %3693 = vrot.lane.b32.xlu1 %v9198_v42, %s4543_s23  ;;  %v3522_v38 = vpop.permute.xlu1 %3521 }
 0x9ec   :  { %v3485_v7 = vsel %vm3481_vm6, %v3464_v40, %v3476_v15  ;;  %v3636_v15 = vpop.permute.xlu0 %3635 }
 0x9f1   :  { %3695 = vrot.lane.b32.xlu2 %v5709_v16, %s4543_s23 }
 0x9f3   :  { %v3500_v22 = vpop.permute.xlu2 %3499  ;;  %3665 = vperm.xlu1 %4340, %v7810_v58   ;;  %v3558_v3 = vpop.permute.xlu1 %3557 }
 0x9f4   :  { %v3505_v14 = vmul.f32 %v3500_v22, %v3485_v7  ;;  %v3708_v40 = vpop.permute.xlu0 %3707 }
 0x9f6   :  { %v3510_v1 = vmul.f32 %v8077_v19, %v3505_v14 }
 0x9f8   :  { %v3514_v60 = vadd.f32 %v3510_v1, %v3456_v53 }
 0x9f9   :  { %3607 = vperm.xlu2 %4334, %v7810_v58  }
 0x9fb   :  { %v3534_v52 = vpop.permute.xlu2 %3533  ;;  %3631 = vrot.lane.b32.xlu1 %v8823_v13, %s4542_s16  ;;  %v3520_v43 = vpop.permute.xlu1 %3519 }
 0x9fc   :  { %v3543_v44 = vsel %vm3539_vm7, %v3522_v38, %v3534_v52  ;;  %4344 = vset.pattern.permute.xlu1 %v4545_v29  ;;  %v3670_v52 = vpop.permute.xlu0 %3669 }
 0x9fd   :  { %v3563_v51 = vmul.f32 %v3558_v3, %v3543_v44  ;;  %v3750_v3 = vld [vmem:[%s8300_s5 + $0x18] sm:$0xff] }
 0x9ff   :  { %v3568_v18 = vmul.f32 %v8106_v9, %v3563_v51 }
 0xa01   :  { %3573 = vrot.lane.b32.xlu2 %v8823_v13, %s4539_s10  ;;  %v3572_v58 = vadd.f32 %v3568_v18, %v3514_v60 }
 0xa02   :  { %4341 = vset.pattern.permute.xlu2 %v4545_v29 }
 0xa03   :  { %v3472_v20 = vpop.permute.xlu2 %3471  ;;  %3703 = vrot.lane.b32.xlu1 %v9204_v30, %s4543_s23  ;;  %v3592_v63 = vpop.permute.xlu1 %3591 }
 0xa04   :  { %v3601_v30 = vsel %vm3597_vm8, %v8038_v24, %v3592_v63  ;;  %v3483_v35 = vsel %vm3481_vm6, %v8008_v17, %v3472_v20 }
 0xa09   :  { %3633 = vrot.lane.b32.xlu2 %v9209_v45, %s4542_s16 }
 0xa0b   :  { %v3532_v34 = vpop.permute.xlu2 %3531  ;;  %3689 = vrot.lane.b32.xlu1 %v8823_v13, %s4543_s23  ;;  %v3616_v29 = vpop.permute.xlu1 %3615 }
 0xa0c   :  { %v3542_v2 = vsel %vm3539_vm7, %v3520_v43, %v3532_v34  ;;  %v3621_v48 = vmul.f32 %v3616_v29, %v3601_v30  ;;  %v3944_v34 = vld [vmem:[%s8302_s7 + $0x8] sm:$0xff] }
 0xa0d   :  { %v3562_v61 = vmul.f32 %v8047_v57, %v3542_v2 }
 0xa0e   :  { %v3626_v36 = vmul.f32 %v8124_v33, %v3621_v48  ;;  %v8189_v48 = vld [vmem:[%s8299_s4 + $0x30] ss:$0 sm:$0xff] }
 0xa0f   :  { %v3567_v50 = vmul.f32 %v8106_v9, %v3562_v61 }
 0xa10   :  { %v3630_v21 = vadd.f32 %v3626_v36, %v3572_v58 }
 0xa11   :  { %3705 = vrot.lane.b32.xlu2 %v5632_v4, %s4543_s23  ;;  %v3571_v53 = vadd.f32 %v3567_v50, %v3513_v28 }
 0xa13   :  { %v3492_v39 = vpop.permute.xlu2 %3491  ;;  %3719 = vperm.xlu1 %4344, %v8065_v8   ;;  %v3530_v24 = vpop.permute.xlu1 %3529 }
 0xa14   :  { %v3503_v6 = vmul.f32 %v3492_v39, %v3483_v35 }
 0xa16   :  { %v3508_v12 = vmul.f32 %v8077_v19, %v3503_v6 }
 0xa18   :  { %v3512_v57 = vadd.f32 %v3508_v12, %v8058_v23  ;;  %v3943_v23 = vld [vmem:[%s8302_s7] sm:$0xff] }
 0xa19   :  { %3727 = vperm.xlu2 %4341, %v7639_v32  }
 0xa1b   :  { %v3518_v4 = vpop.permute.xlu2 %3517  ;;  %4347 = vset.pattern.permute.xlu1 %v9216_v41  ;;  %v3638_v37 = vpop.permute.xlu1 %3637 }
 0xa1c   :  { %3758 = vperm.xlu1 %4347, %v3748_v47   ;;  %v3541_v17 = vsel %vm3539_vm7, %v3518_v4, %v3530_v24 }
 0xa21   :  { %3643 = vrot.lane.b32.xlu2 %v9211_v54, %s4542_s16  ;;  %s4020_s16 = sshll.u32 %s4546_s18, 4  ;;  %s4021_s16 = int_to_ptr.vmem [resolvable:$true] %s4020_s16 }
 0xa22   :  { %4342 = vset.pattern.permute.xlu2 %v9215_v59  ;;  %v8161_v59 = vperm.slane %v7945_v0, 7 }
 0xa23   :  { %v3578_v32 = vpop.permute.xlu2 %3577  ;;  %v3550_v19 = vpop.permute.xlu1 %3549 }
 0xa24   :  { %v3561_v26 = vmul.f32 %v3550_v19, %v3541_v17  ;;  %3949 = vperm.xlu1 %4347, %v3943_v23   ;;  %v3600_v27 = vsel %vm3597_vm8, %v3578_v32, %v8070_v10 }
 0xa26   :  { %v3566_v28 = vmul.f32 %v8106_v9, %v3561_v26 }
 0xa28   :  { %v3570_v62 = vadd.f32 %v3566_v28, %v3512_v57 }
 0xa29   :  { %3661 = vperm.xlu2 %4342, %v8065_v8  }
 0xa2b   :  { %v3650_v56 = vpop.permute.xlu2 %3649 }
 0xa2c   :  { %v3659_v31 = vsel %vm3655_vm9, %v3638_v37, %v3650_v56  ;;  %v3674_v55 = vpop.permute.xlu1 %3673  ;;  %3964 = vperm.xlu1 %4347, %v3946_v5  }
 0xa2d   :  { %v3679_v10 = vmul.f32 %v3674_v55, %v3659_v31 }
 0xa2f   :  { %v3684_v46 = vmul.f32 %v8161_v59, %v3679_v10 }
 0xa31   :  { %3701 = vrot.lane.b32.xlu2 %v9211_v54, %s4543_s23  ;;  %v3688_v8 = vadd.f32 %v3684_v46, %v3630_v21 }
 0xa32   :  { %4345 = vset.pattern.permute.xlu2 %v9216_v41  ;;  %v3747_v41 = vld [vmem:[%s8300_s5] sm:$0xff] }
 0xa33   :  { %v3612_v38 = vpop.permute.xlu2 %3611 }
 0xa34   :  { %v3620_v7 = vmul.f32 %v3612_v38, %v3600_v27  ;;  %v3576_v22 = vpop.permute.xlu1 %3575 }
 0xa36   :  { %v3625_v0 = vmul.f32 %v8124_v33, %v3620_v7 }
 0xa38   :  { %v3629_v14 = vadd.f32 %v3625_v0, %v3571_v53  ;;  %v3646_v53 = vpop.permute.xlu0 %3645 }
 0xa39   :  { %3768 = vperm.xlu2 %4345, %v3750_v3  }
 0xa3b   :  { %v3516_v1 = vpop.permute.xlu2 %3515 }
 0xa3c   :  { %v3648_v60 = vpop.permute.xlu1 %3647  ;;  %v3540_v20 = vsel %vm3539_vm7, %v3516_v1, %v3528_v25 }
 0xa3d   :  { %v3658_v54 = vsel %vm3655_vm9, %v3636_v15, %v3648_v60 }
 0xa3e   :  { %v3678_v43 = vmul.f32 %v3670_v52, %v3658_v54 }
 0xa40   :  { %v3683_v44 = vmul.f32 %v8161_v59, %v3678_v43  ;;  %v3604_v12 = vpop.permute.xlu0 %3603 }
 0xa41   :  { %3753 = vperm.xlu2 %4345, %v3747_v41  }
 0xa42   :  { %v3687_v51 = vadd.f32 %v3683_v44, %v3629_v14 }
 0xa43   :  { %v3588_v18 = vpop.permute.xlu2 %3587 }
 0xa44   :  { %v3546_v58 = vpop.permute.xlu1 %3545  ;;  %v3599_v63 = vsel %vm3597_vm8, %v3576_v22, %v3588_v18 }
 0xa45   :  { %v3560_v11 = vmul.f32 %v3546_v58, %v3540_v20 }
 0xa47   :  { %v3565_v29 = vmul.f32 %v8106_v9, %v3560_v11 }
 0xa48   :  { %v3692_v37 = vpop.permute.xlu0 %3691 }
 0xa49   :  { %v8184_v30 = vadd.f32 %v3565_v29, %v8095_v49  ;;  %3954 = vperm.xlu2 %4345, %v3944_v34  }
 0xa4b   :  { %v3696_v2 = vpop.permute.xlu2 %3695 }
 0xa4c   :  { %v3717_v61 = vsel %vm3713_vm10, %v3696_v2, %v3708_v40 }
 0xa4d   :  { %v3732_v36 = vpop.permute.xlu1 %3731 }
 0xa4e   :  { %v3737_v50 = vmul.f32 %v3732_v36, %v3717_v61 }
 0xa50   :  { %v3742_v21 = vmul.f32 %v8189_v48, %v3737_v50  ;;  %v3724_v32 = vpop.permute.xlu0 %3723 }
 0xa52   :  { %v8193_v39 = vadd.f32 %v3742_v21, %v3688_v8 }
 0xa53   :  { %v3608_v9 = vpop.permute.xlu2 %3607 }
 0xa54   :  { %v3619_v49 = vmul.f32 %v3608_v9, %v3599_v63 }
 0xa55   :  { %v3586_v35 = vpop.permute.xlu1 %3585 }
 0xa56   :  { %v3624_v24 = vmul.f32 %v8124_v33, %v3619_v49 }
 0xa58   :  { %v3628_v6 = vadd.f32 %v3624_v24, %v3570_v62  ;;  %v3764_v5 = vpop.permute.xlu0 %3763 }
 0xa5b   :  { %v3574_v57 = vpop.permute.xlu2 %3573 }
 0xa5c   :  { %v3598_v54 = vsel %vm3597_vm8, %v3574_v57, %v3586_v35 }
 0xa5d   :  { %v3694_v47 = vpop.permute.xlu1 %3693  ;;  %v3618_v58 = vmul.f32 %v3604_v12, %v3598_v54 }
 0xa63   :  { %v3634_v4 = vpop.permute.xlu2 %3633 }
 0xa64   :  { %v3657_v8 = vsel %vm3655_vm9, %v3634_v4, %v3646_v53  ;;  %v3623_v53 = vmul.f32 %v8124_v33, %v3618_v58 }
 0xa65   :  { %v3666_v17 = vpop.permute.xlu1 %3665 }
 0xa66   :  { %v3677_v22 = vmul.f32 %v3666_v17, %v3657_v8  ;;  %v3627_v17 = vadd.f32 %v3623_v53, %v8184_v30 }
 0xa68   :  { %v3682_v1 = vmul.f32 %v8161_v59, %v3677_v22 }
 0xa6a   :  { %v3686_v44 = vadd.f32 %v3682_v1, %v3628_v6 }
 0xa6b   :  { %v3706_v25 = vpop.permute.xlu2 %3705 }
 0xa6c   :  { %v3716_v26 = vsel %vm3713_vm10, %v3694_v47, %v3706_v25 }
 0xa6d   :  { %v3632_v23 = vpop.permute.xlu1 %3631 }
 0xa73   :  { %v3728_v19 = vpop.permute.xlu2 %3727 }
 0xa74   :  { %v3736_v27 = vmul.f32 %v3728_v19, %v3716_v26 }
 0xa75   :  { %v3704_v28 = vpop.permute.xlu1 %3703 }
 0xa76   :  { %v3741_v15 = vmul.f32 %v8189_v48, %v3736_v27  ;;  %v3715_v38 = vsel %vm3713_vm10, %v3692_v37, %v3704_v28 }
 0xa77   :  { %v3735_v3 = vmul.f32 %v3724_v32, %v3715_v38 }
 0xa78   :  { %v3745_v56 = vadd.f32 %v3741_v15, %v3687_v51 }
 0xa79   :  { %v3740_v60 = vmul.f32 %v8189_v48, %v3735_v3 }
 0xa7a   :  { %v8198_v31 = vadd.f32 %v3764_v5, %v3745_v56 }
 0xa7b   :  { %v3644_v62 = vpop.permute.xlu2 %3643  ;;  %v3744_v18 = vadd.f32 %v3740_v60, %v3686_v44 }
 0xa7c   :  { %v8201_v55 = vmul.f32 0.70710677, %v8198_v31  ;;  %v3656_v11 = vsel %vm3655_vm9, %v3632_v23, %v3644_v62 }
 0xa7d   :  { %v3690_v10 = vpop.permute.xlu1 %3689 }
 0xa7e   :  { %v8204_v46 = vand.u32 2147483647, %v8201_v55 }
 0xa80   :  { %v3789_v40 = vmul.f32 0.3275911, %v8204_v46  ;;  %v3893_v8 = vmul.f32 %v8204_v46, %v8204_v46 }
 0xa82   :  { %v3793_v7 = vadd.f32 1.0, %v3789_v40 }
 0xa83   :  { %v3662_v0 = vpop.permute.xlu2 %3661 }
 0xa84   :  { %4381 = vrcp.f32 %v3793_v7  ;;  %v3834_v20 = vand.u32 2147483647, %v3793_v7  ;;  %v3836_v63 = vand.u32 2147483648, %v3793_v7  ;;  %v3676_v36 = vmul.f32 %v3662_v0, %v3656_v11 }
 0xa85   :  { %v3720_v14 = vpop.permute.xlu1 %3719  ;;  %vm3830_vm11 = vweird.f32 %v3793_v7 }
 0xa86   :  { %v3837_v9 = vor.u32 1.1754944e-38, %v3836_v63  ;;  %vm3835_vm0 = vcmp.eq.f32.partialorder %v3834_v20, 8.507059e+37  ;;  %v3681_v12 = vmul.f32 %v8161_v59, %v3676_v36 }
 0xa88   :  { %v3685_v59 = vadd.f32 %v3681_v12, %v3627_v17 }
 0xa8a   :  { %v4382_v52 = vpop.eup %4381 }
 0xa8b   :  { %v3826_v43 = vmul.f32 %v4382_v52, %v3793_v7  ;;  %v3702_v41 = vpop.permute.xlu2 %3701  ;;  %vm3831_vm1 = vweird.f32 %v4382_v52 }
 0xa8c   :  { %v3714_v2 = vsel %vm3713_vm10, %v3690_v10, %v3702_v41  ;;  %vm3832_vm12 = vmor %vm3830_vm11, %vm3831_vm1  ;;  %vm3917_vm1 = vcmp.lt.f32.partialorder %v8201_v55, 0.0 }
 0xa8d   :  { %v3827_v51 = vsub.f32 1.0, %v3826_v43  ;;  %v3734_v49 = vmul.f32 %v3720_v14, %v3714_v2 }
 0xa8e   :  { %v3759_v34 = vpop.permute.xlu1 %3758 }
 0xa8f   :  { %v3828_v29 = vmul.f32 %v4382_v52, %v3827_v51  ;;  %v8214_v61 = vadd.f32 %v3759_v34, %v3744_v18  ;;  %v3739_v25 = vmul.f32 %v8189_v48, %v3734_v49 }
 0xa91   :  { %v3829_v50 = vadd.f32 %v4382_v52, %v3828_v29  ;;  %v8217_v21 = vmul.f32 0.70710677, %v8214_v61  ;;  %v3743_v26 = vadd.f32 %v3739_v25, %v3685_v59 }
 0xa93   :  { %v3784_v35 = vand.u32 2147483647, %v8217_v21  ;;  %v3769_v24 = vpop.permute.xlu2 %3768  ;;  %v3833_v6 = vsel %vm3832_vm12, %v4382_v52, %v3829_v50  ;;  %v3897_v52 = vsub.f32 0.0, %v3893_v8  ;;  %vm3916_vm11 = vcmp.lt.f32.partialorder %v8217_v21, 0.0 }
 0xa94   :  { %v8223_v57 = vadd.f32 %v3769_v24, %v8193_v39  ;;  %v8225_v47 = vsel %vm3835_vm0, %v3837_v9, %v3833_v6 }
 0xa95   :  { %v3788_v4 = vmul.f32 0.3275911, %v3784_v35  ;;  %v3857_v37 = vmul.f32 1.0614054, %v8225_v47  ;;  %v3892_v44 = vmul.f32 %v3784_v35, %v3784_v35  ;;  %v3903_v2 = vmul.f32 1.442695, %v3897_v52 }
 0xa96   :  { %v8229_v33 = vmul.f32 0.70710677, %v8223_v57 }
 0xa97   :  { %v3792_v23 = vadd.f32 1.0, %v3788_v4  ;;  %v3861_v32 = vadd.f32 -1.4531521, %v3857_v37  ;;  %v3896_v36 = vsub.f32 0.0, %v3892_v44 }
 0xa98   :  { %v3786_v19 = vand.u32 2147483647, %v8229_v33  ;;  %vm3918_vm12 = vcmp.lt.f32.partialorder %v8229_v33, 0.0 }
 0xa99   :  { %4383 = vrcp.f32 %v3792_v23  ;;  %v3865_v28 = vmul.f32 %v3861_v32, %v8225_v47  ;;  %v3821_v38 = vand.u32 2147483648, %v3792_v23  ;;  %v3819_v14 = vand.u32 2147483647, %v3792_v23 }
 0xa9a   :  { %v3790_v39 = vmul.f32 0.3275911, %v3786_v19  ;;  %vm3815_vm14 = vweird.f32 %v3792_v23  ;;  %v3894_v35 = vmul.f32 %v3786_v19, %v3786_v19  ;;  %v3901_v17 = vmul.f32 1.442695, %v3896_v36 }
 0xa9b   :  { %v3754_v27 = vpop.permute.xlu2 %3753  ;;  %v3869_v48 = vadd.f32 1.4214138, %v3865_v28  ;;  %v3822_v43 = vor.u32 1.1754944e-38, %v3821_v38  ;;  %vm3820_vm2 = vcmp.eq.f32.partialorder %v3819_v14, 8.507059e+37 }
 0xa9c   :  { %v3794_v15 = vadd.f32 1.0, %v3790_v39  ;;  %v8235_v5 = vadd.f32 %v3754_v27, %v3743_v26  ;;  %v3898_v39 = vsub.f32 0.0, %v3894_v35 }
 0xa9d   :  { %v3873_v22 = vmul.f32 %v3869_v48, %v8225_v47 }
 0xa9e   :  { %4385 = vrcp.f32 %v3794_v15  ;;  %v8238_v30 = vmul.f32 0.70710677, %v8235_v5  ;;  %v3851_v51 = vand.u32 2147483648, %v3794_v15  ;;  %v3849_v20 = vand.u32 2147483647, %v3794_v15 }
 0xa9f   :  { %v4384_v56 = vpop.eup %4383  ;;  %v3877_v46 = vadd.f32 -0.28449672, %v3873_v22  ;;  %vm3845_vm4 = vweird.f32 %v3794_v15  ;;  %v3905_v38 = vmul.f32 1.442695, %v3898_v39 }
 0xaa0   :  { %v3811_v62 = vmul.f32 %v4384_v56, %v3792_v23  ;;  %v8241_v10 = vand.u32 2147483647, %v8238_v30  ;;  %vm3816_vm13 = vweird.f32 %v4384_v56  ;;  %v3852_v50 = vor.u32 1.1754944e-38, %v3851_v51 }
 0xaa1   :  { %vm3817_vm15 = vmor %vm3815_vm14, %vm3816_vm13  ;;  %v3881_v29 = vmul.f32 %v3877_v46, %v8225_v47  ;;  %vm3850_vm6 = vcmp.eq.f32.partialorder %v3849_v20, 8.507059e+37  ;;  %vm3915_vm0 = vcmp.lt.f32.partialorder %v8238_v30, 0.0  ;;  %vm9217_vm13 = vcmask 261120  }
 0xaa2   :  { %v3812_v40 = vsub.f32 1.0, %v3811_v62  ;;  %v3787_v7 = vmul.f32 0.3275911, %v8241_v10  ;;  %vm9218_vm14 = vmmov %vm9217_vm13 }
 0xaa3   :  { %v3885_v4 = vadd.f32 0.2548296, %v3881_v29 }
 0xaa4   :  { %v4386_v0 = vpop.eup %4385  ;;  %v3813_v3 = vmul.f32 %v4384_v56, %v3812_v40  ;;  %v3791_v60 = vadd.f32 1.0, %v3787_v7  ;;  %v3891_v7 = vmul.f32 %v8241_v10, %v8241_v10 }
 0xaa5   :  { %v3841_v1 = vmul.f32 %v4386_v0, %v3794_v15  ;;  %vm3846_vm3 = vweird.f32 %v4386_v0  ;;  %v3889_v15 = vmul.f32 %v3885_v4, %v8225_v47 }
 0xaa6   :  { %v3814_v54 = vadd.f32 %v4384_v56, %v3813_v3  ;;  %4387 = vrcp.f32 %v3791_v60  ;;  %vm3847_vm5 = vmor %vm3845_vm4, %vm3846_vm3  ;;  %v3806_v23 = vand.u32 2147483648, %v3791_v60  ;;  %v3804_v27 = vand.u32 2147483647, %v3791_v60 }
 0xaa7   :  { %v3842_v41 = vsub.f32 1.0, %v3841_v1  ;;  %4389 = vpow2.f32 %v3903_v2  ;;  %vm3800_vm8 = vweird.f32 %v3791_v60 }
 0xaa8   :  { %v3818_v18 = vsel %vm3817_vm15, %v4384_v56, %v3814_v54  ;;  %4391 = vpow2.f32 %v3901_v17  ;;  %v3807_v48 = vor.u32 1.1754944e-38, %v3806_v23  ;;  %vm3805_vm10 = vcmp.eq.f32.partialorder %v3804_v27, 8.507059e+37  ;;  %vm9219_vm15 = vmmov %vm9217_vm13 }
 0xaa9   :  { %v3843_v58 = vmul.f32 %v4386_v0, %v3842_v41  ;;  %v3823_v63 = vsel %vm3820_vm2, %v3822_v43, %v3818_v18  ;;  %4393 = vpow2.f32 %v3905_v38  ;;  %v3895_v41 = vsub.f32 0.0, %v3891_v7  ;;  %vm9220_vm2 = vmmov %vm9217_vm13  ;;  %v4414_v7 = vld [vmem:[%s8295_s0] sm:$0xff] }
 0xaaa   :  { %v3856_v11 = vmul.f32 1.0614054, %v3823_v63  ;;  %v3777_v17 = vmul.f32 0.5, %v8198_v31  ;;  %v3778_v23 = vmul.f32 0.5, %v8223_v57 }
 0xaab   :  { %v3844_v34 = vadd.f32 %v4386_v0, %v3843_v58  ;;  %v3899_v10 = vmul.f32 1.442695, %v3895_v41 }
 0xaac   :  { %v3860_v53 = vadd.f32 -1.4531521, %v3856_v11  ;;  %v4388_v9 = vpop.eup %4387 }
 0xaad   :  { %v3848_v49 = vsel %vm3847_vm5, %v4386_v0, %v3844_v34  ;;  %v3796_v24 = vmul.f32 %v4388_v9, %v3791_v60  ;;  %vm3801_vm7 = vweird.f32 %v4388_v9  ;;  %v4390_v40 = vpop.eup %4389  ;;  %4395 = vpow2.f32 %v3899_v10 }
 0xaae   :  { %v3853_v6 = vsel %vm3850_vm6, %v3852_v50, %v3848_v49  ;;  %v3864_v37 = vmul.f32 %v3860_v53, %v3823_v63  ;;  %vm3802_vm9 = vmor %vm3800_vm8, %vm3801_vm7  ;;  %v3909_v3 = vmul.f32 %v4390_v40, %v3889_v15  ;;  %v4392_v43 = vpop.eup %4391 }
 0xaaf   :  { %v3858_v12 = vmul.f32 1.0614054, %v3853_v6  ;;  %v3797_v25 = vsub.f32 1.0, %v3796_v24  ;;  %v4394_v36 = vpop.eup %4393 }
 0xab0   :  { %v3868_v59 = vadd.f32 1.4214138, %v3864_v37  ;;  %v3913_v44 = vsub.f32 1.0, %v3909_v3 }
 0xab1   :  { %v3862_v32 = vadd.f32 -1.4531521, %v3858_v12  ;;  %v3798_v26 = vmul.f32 %v4388_v9, %v3797_v25 }
 0xab2   :  { %v3872_v56 = vmul.f32 %v3868_v59, %v3823_v63  ;;  %v3921_v29 = vsub.f32 0.0, %v3913_v44 }
 0xab3   :  { %v3866_v28 = vmul.f32 %v3862_v32, %v3853_v6  ;;  %v3799_v19 = vadd.f32 %v4388_v9, %v3798_v26  ;;  %v4396_v39 = vpop.eup %4395  ;;  %v3776_v26 = vmul.f32 0.5, %v8214_v61 }
 0xab4   :  { %v3876_v8 = vadd.f32 -0.28449672, %v3872_v56  ;;  %v3925_v24 = vsel %vm3917_vm1, %v3921_v29, %v3913_v44 }
 0xab5   :  { %v3870_v62 = vadd.f32 1.4214138, %v3866_v28  ;;  %v3803_v22 = vsel %vm3802_vm9, %v4388_v9, %v3799_v19 }
 0xab6   :  { %v3880_v14 = vmul.f32 %v3876_v8, %v3823_v63  ;;  %v3808_v1 = vsel %vm3805_vm10, %v3807_v48, %v3803_v22 }
 0xab7   :  { %v3874_v0 = vmul.f32 %v3870_v62, %v3853_v6  ;;  %v3855_v47 = vmul.f32 1.0614054, %v3808_v1  ;;  %v3775_v62 = vmul.f32 0.5, %v8235_v5  ;;  %v3950_v5 = vpop.permute.xlu1 %3949 }
 0xab8   :  { %v3884_v54 = vadd.f32 0.2548296, %v3880_v14 }
 0xab9   :  { %v3878_v52 = vadd.f32 -0.28449672, %v3874_v0  ;;  %v3859_v60 = vadd.f32 -1.4531521, %v3855_v47  ;;  %v3955_v0 = vpop.permute.xlu2 %3954 }
 0xaba   :  { %v3888_v51 = vmul.f32 %v3884_v54, %v3823_v63 }
 0xabb   :  { %v3882_v46 = vmul.f32 %v3878_v52, %v3853_v6  ;;  %v3863_v18 = vmul.f32 %v3859_v60, %v3808_v1  ;;  %v3960_v52 = vpop.permute.xlu0 %3959 }
 0xabc   :  { %v3908_v20 = vmul.f32 %v4392_v43, %v3888_v51  ;;  %v4416_v43 = vld [vmem:[%s8295_s0 + $0x10] sm:$0xff] }
 0xabd   :  { %v3886_v58 = vadd.f32 0.2548296, %v3882_v46  ;;  %v3867_v11 = vadd.f32 1.4214138, %v3863_v18  ;;  %v4417_v18 = vld [vmem:[%s8295_s0 + $0x18] sm:$0xff] }
 0xabe   :  { %v3912_v2 = vsub.f32 1.0, %v3908_v20 }
 0xabf   :  { %v3890_v34 = vmul.f32 %v3886_v58, %v3853_v6  ;;  %v3871_v50 = vmul.f32 %v3867_v11, %v3808_v1  ;;  %v3929_v6 = vadd.f32 1.0, %v3925_v24  ;;  %v3965_v46 = vpop.permute.xlu1 %3964 }
 0xac0   :  { %v3920_v9 = vsub.f32 0.0, %v3912_v2 }
 0xac1   :  { %v3910_v53 = vmul.f32 %v4394_v36, %v3890_v34  ;;  %v3875_v49 = vadd.f32 -0.28449672, %v3871_v50  ;;  %v3933_v21 = vmul.f32 %v3929_v6, %v3777_v17 }
 0xac2   :  { %v3924_v4 = vsel %vm3916_vm11, %v3920_v9, %v3912_v2 }
 0xac3   :  { %v3914_v35 = vsub.f32 1.0, %v3910_v53  ;;  %v3879_v63 = vmul.f32 %v3875_v49, %v3808_v1  ;;  %v3928_v55 = vadd.f32 1.0, %v3924_v4  ;;  %v3937_v19 = vadd.f32 %v3933_v21, %v9198_v42  ;;  %v3940_v42 = vld [vmem:[%s8301_s6 + $0x8] sm:$0xff] }
 0xac5   :  { %v3922_v12 = vsub.f32 0.0, %v3914_v35  ;;  %v3883_v37 = vadd.f32 0.2548296, %v3879_v63  ;;  %v3932_v56 = vmul.f32 %v3928_v55, %v3776_v26 }
 0xac7   :  { %v3926_v25 = vsel %vm3918_vm12, %v3922_v12, %v3914_v35  ;;  %v3887_v59 = vmul.f32 %v3883_v37, %v3808_v1  ;;  %v3936_v57 = vadd.f32 %v3932_v56, %v9209_v45  ;;  %v3941_v45 = vld [vmem:[%s8301_s6 + $0x10] sm:$0xff]  ;;  %v4415_v1 = vld [vmem:[%s8295_s0 + $0x8] sm:$0xff] }
 0xac8   :  { %v3930_v32 = vadd.f32 1.0, %v3926_v25 }
 0xac9   :  { %v3907_v28 = vmul.f32 %v4396_v39, %v3887_v59 }
 0xaca   :  { %v3934_v27 = vmul.f32 %v3930_v32, %v3778_v23 }
 0xacb   :  { %v3911_v33 = vsub.f32 1.0, %v3907_v28 }
 0xacc   :  { %v3938_v15 = vadd.f32 %v3934_v27, %v5709_v16  ;;  %v3939_v16 = vld [vmem:[%s8301_s6] sm:$0xff] }
 0xacd   :  { %v3919_v31 = vsub.f32 0.0, %v3911_v33 }
 0xace   :  { %3991 = vmatpush.msrb.mxu1 %v3938_v15 }
 0xacf   :  { %v3923_v48 = vsel %vm3915_vm0, %v3919_v31, %v3911_v33 }
 0xad0   :  { %3992 = vmatpush.msrb.mxu1 %v3937_v19  ;;  %v3927_v61 = vadd.f32 1.0, %v3923_v48 }
 0xad2   :  { %3993 = vmatpush.msrb.mxu1 %v3936_v57  ;;  %v3931_v8 = vmul.f32 %v3927_v61, %v3775_v62 }
 0xad4   :  { %v3935_v40 = vadd.f32 %v3931_v8, %v8823_v13  ;;  %v3942_v13 = vld [vmem:[%s8301_s6 + $0x18] sm:$0xff] }
 0xad6   :  { %3994 = vmatpush.msrb.mxu1 %v3935_v40 }
 0xad7   :  { %4074 = vmatmul.msk.f32.vlgmr.msrb.gmra.mxu1 %vm9217_vm13, %v3939_v16 }
 0xadf   :  { %4075 = vmatmul.msk.f32.gmra.mxu1 %vm9218_vm14, %v3940_v42 }
 0xae7   :  { %4076 = vmatmul.msk.f32.gmra.mxu1 %vm9219_vm15, %v3941_v45 }
 0xaef   :  { %4077 = vmatmul.msk.f32.gmra.mxu1 %vm9220_vm2, %v3942_v13 }
 0xb54   :  { %v3996_v30 = vpop.f32.mrf.mxu1 }
 0xb55   :  { %v3997_v38 = vadd.f32 %v3996_v30, %v3950_v5 }
 0xb57   :  { %v4008_v22 = vadd.f32 %v4414_v7, %v3997_v38 }
 0xb59   :  { %4012 = vst [vmem:[#allocation2] sm:$0xff] %v4008_v22 }
 0xb5c   :  { %v3999_v3 = vpop.f32.mrf.mxu1 }
 0xb5d   :  { %v4000_v14 = vadd.f32 %v3999_v3, %v3955_v0 }
 0xb5f   :  { %v4009_v47 = vadd.f32 %v4415_v1, %v4000_v14 }
 0xb61   :  { %4013 = vst [vmem:[#allocation2 + $0x8] sm:$0xff] %v4009_v47 }
 0xb64   :  { %v4002_v54 = vpop.f32.mrf.mxu1 }
 0xb65   :  { %v4003_v60 = vadd.f32 %v4002_v54, %v3960_v52 }
 0xb67   :  { %v4010_v41 = vadd.f32 %v4416_v43, %v4003_v60 }
 0xb69   :  { %4014 = vst [vmem:[#allocation2 + $0x10] sm:$0xff] %v4010_v41 }
 0xb6c   :  { %v4005_v44 = vpop.f32.mrf.mxu1 }
 0xb6d   :  { %v4006_v51 = vadd.f32 %v4005_v44, %v3965_v46 }
 0xb6f   :  { %v4011_v58 = vadd.f32 %v4417_v18, %v4006_v51 }
 0xb71   :  { %4015 = vst [vmem:[#allocation2 + $0x18] sm:$0xff] %v4011_v58 }
 0xb72   :  { %4028 = dma.vmem_to_hbm [thread:$0]  %s4021_s16, 512, %s4023_s19, [#allocation3], %s4547_s15, %s4547_s15, %s4488_s11  }
 0xb73   :  { %4442 = dma.done.wait [#allocation3], 512  }
 0xb74   :  { %4443 = vsyncadd [#allocation3], 4294966784 }
 0xb75   :  { %4037 = vsyncpa [#allocation3], 1 }

</bundles_post_ra>
